<compile_context>
chip_gen: v7x
topology: tpu7x:2x2x1
jax: 0.10.0
libtpu: 0.0.40
codegen_flags: <defaults>
</compile_context>

<pallas_src>
import functools

import jax
import jax.numpy as jnp
from jax.experimental import pallas as pl
from jax.experimental.pallas import tpu as pltpu
from jax.scipy.linalg import block_diag

H = 128    # cell_hidden_size == projection out_size (fixed by the module)
TC = 16    # GRU timesteps per grid step (unrolled in-kernel)


def _round_up(n, m):
    return (n + m - 1) // m * m


def _divisor_tile(n, cap, step=8):
    """Largest multiple of `step` <= cap that divides n (n multiple of step)."""
    cap = max(step, (cap // step) * step)
    t = min(n, cap)
    while n % t or t % step:
        t -= step
    return t


# ----------------------------------------------------------------------------
# Kernel 1: fused projection + GRU recurrence, time-major.
#   grid = (batch tiles [parallel], time chunks [arbitrary])
#   per chunk:  gi = tanh(emb @ Wp + bp) @ Wih + bih   (one big MXU pass)
#   per step :  gh = h @ Whh + bhh  + gate VPU ops     (h carried locally, f32)
# ----------------------------------------------------------------------------
def gru_kernel(emb_ref, wp_ref, bp_ref, wih_ref, bih_ref, whh_ref, bhh_ref,
               out_ref, h_ref, *, tc):
    @pl.when(pl.program_id(1) == 0)
    def _():
        h_ref[...] = jnp.zeros_like(h_ref)

    tcb, tbg, e = emb_ref.shape
    emb2 = emb_ref[...].reshape(tcb * tbg, e)
    proj = jnp.tanh(
        jnp.dot(emb2, wp_ref[...], preferred_element_type=jnp.float32)
        + bp_ref[...])
    gi = (jnp.dot(proj, wih_ref[...], preferred_element_type=jnp.float32)
          + bih_ref[...])
    gi3 = gi.reshape(tcb, tbg, 3 * H)            # row = t*tbg + b (time-major)

    whh = whh_ref[...]
    bhh = bhh_ref[...]
    h = h_ref[...]                               # single read per chunk (f32)
    for t in range(tc):                          # unrolled; tc is compile-time
        gi_t = gi3[t]                            # (TBg, 3H), tile-dense
        gh = jnp.dot(h, whh, preferred_element_type=jnp.float32) + bhh
        # torch GRU gate order: r, z, n
        r = jax.nn.sigmoid(gi_t[:, :H] + gh[:, :H])
        z = jax.nn.sigmoid(gi_t[:, H:2 * H] + gh[:, H:2 * H])
        n = jnp.tanh(gi_t[:, 2 * H:] + r * gh[:, 2 * H:])
        h = (1.0 - z) * n + z * h
        out_ref[t] = h.astype(out_ref.dtype)     # dense (TBg,128) store, bf16
    h_ref[...] = h                               # single write per chunk


def run_gru(emb_tm, Wp, bp, Wih, bih, Whh, bhh):
    Sp, Bp, E = emb_tm.shape
    assert Sp % TC == 0 and Bp % 16 == 0
    # cap 64 keeps the per-step live set small; Bp//2 guarantees >=2 batch
    # tiles so the "parallel" axis can occupy v7x's second TensorCore.
    cap = 64
    if Bp >= 32:
        cap = min(cap, Bp // 2)
    TBg = _divisor_tile(Bp, cap, step=16)        # 16-row granule (bf16 output)
    kernel = functools.partial(gru_kernel, tc=TC)
    return pl.pallas_call(
        kernel,
        out_shape=jax.ShapeDtypeStruct((Sp, Bp, H), jnp.bfloat16),
        grid=(Bp // TBg, Sp // TC),
        in_specs=[
            pl.BlockSpec((TC, TBg, E), lambda b, c: (c, b, 0)),
            pl.BlockSpec((E, H), lambda b, c: (0, 0)),
            pl.BlockSpec((1, H), lambda b, c: (0, 0)),
            pl.BlockSpec((H, 3 * H), lambda b, c: (0, 0)),
            pl.BlockSpec((1, 3 * H), lambda b, c: (0, 0)),
            pl.BlockSpec((H, 3 * H), lambda b, c: (0, 0)),
            pl.BlockSpec((1, 3 * H), lambda b, c: (0, 0)),
        ],
        out_specs=pl.BlockSpec((TC, TBg, H), lambda b, c: (c, b, 0)),
        scratch_shapes=[pltpu.VMEM((TBg, H), jnp.float32)],
        compiler_params=pltpu.CompilerParams(
            dimension_semantics=("parallel", "arbitrary")),
    )(emb_tm, Wp, bp, Wih, bih, Whh, bhh)


# ----------------------------------------------------------------------------
# Kernel 2: all four attention heads + decision MLPs fused, tiled over batch.
#   rep arrives time-major (Sp, Bp, H) in bf16; one lane-dense
#   (Sp*TB,128)@(128,512) bf16 matmul for the per-step MLPs, block-diagonal
#   f32 matmuls for the decision MLPs. Padded timesteps masked via the
#   scalar-prefetched real sequence length.
# ----------------------------------------------------------------------------
def heads_kernel(slen_ref, rep_ref, wa_ref, ba_ref, v_ref, wd1_ref, bd1_ref,
                 wd2_ref, bd2_ref, out_ref, pooled_ref):
    Sp, TB, _ = rep_ref.shape
    s_real = slen_ref[0]
    rep2 = rep_ref[...].reshape(Sp * TB, H)          # bf16, row = t*TB + b
    # one bf16 MXU matmul for all 4 per-step MLPs, f32 accumulation
    u2 = jnp.maximum(
        jnp.dot(rep2, wa_ref[...], preferred_element_type=jnp.float32)
        + ba_ref[...], 0.0)                          # (Sp*TB, 4H) f32
    u3 = u2.reshape(Sp, TB, 4 * H)

    t_idx = jax.lax.broadcasted_iota(jnp.int32, (Sp, TB), 0)
    valid = t_idx < s_real

    for j in range(4):
        uj = u3[:, :, j * H:(j + 1) * H]             # (Sp, TB, H), 128-aligned
        vj = v_ref[:, j * H:(j + 1) * H]             # (1, H)
        sc = jnp.sum(uj * vj[None], axis=-1)         # (Sp, TB) f32
        sc = jnp.where(valid, sc, -1e30)
        m = jnp.max(sc, axis=0, keepdims=True)
        e = jnp.exp(sc - m)
        alpha = e / jnp.sum(e, axis=0, keepdims=True)
        pooled_ref[:, j * H:(j + 1) * H] = jnp.sum(uj * alpha[:, :, None],
                                                   axis=0)

    pooled = pooled_ref[...]                         # (TB, 4H) f32
    d1 = jnp.maximum(
        jnp.dot(pooled, wd1_ref[...], preferred_element_type=jnp.float32)
        + bd1_ref[...], 0.0)                         # block-diag decision MLP
    out_ref[...] = (
        jnp.dot(d1, wd2_ref[...], preferred_element_type=jnp.float32)
        + bd2_ref[...])                              # (TB, 4)


def run_heads(rep_tm, wa_cat, ba_cat, v_cat, wd1_bd, bd1_cat, wd2_bd, bd2_cat,
              seq_len):
    Sp, Bp, _ = rep_tm.shape
    # VMEM budget per batch row per timestep:
    #   rep block (bf16, double-buffered) + u3 (f32) + per-head temps (~f32 H)
    rep_b = jnp.dtype(rep_tm.dtype).itemsize
    per_row = Sp * (H * rep_b * 2 + 4 * H * 4 + H * 4 + 128)
    budget = 16 * 1024 * 1024
    cap = max(16, budget // max(per_row, 1))
    TB = _divisor_tile(Bp, min(cap, 256), step=16)
    # TODO(synk): for very long sequences, additionally tile Sp with an online
    # softmax instead of holding the full (Sp, TB, 4H) activation in VMEM.
    slen = jnp.array([seq_len], dtype=jnp.int32)
    return pl.pallas_call(
        heads_kernel,
        out_shape=jax.ShapeDtypeStruct((Bp, 4), jnp.float32),
        grid_spec=pltpu.PrefetchScalarGridSpec(
            num_scalar_prefetch=1,
            grid=(Bp // TB,),
            in_specs=[
                pl.BlockSpec((Sp, TB, H), lambda b, sl: (0, b, 0)),
                pl.BlockSpec((H, 4 * H), lambda b, sl: (0, 0)),
                pl.BlockSpec((1, 4 * H), lambda b, sl: (0, 0)),
                pl.BlockSpec((1, 4 * H), lambda b, sl: (0, 0)),
                pl.BlockSpec((4 * H, 4 * H), lambda b, sl: (0, 0)),
                pl.BlockSpec((1, 4 * H), lambda b, sl: (0, 0)),
                pl.BlockSpec((4 * H, 4), lambda b, sl: (0, 0)),
                pl.BlockSpec((1, 4), lambda b, sl: (0, 0)),
            ],
            out_specs=pl.BlockSpec((TB, 4), lambda b, sl: (b, 0)),
            scratch_shapes=[pltpu.VMEM((TB, 4 * H), jnp.float32)]),
        compiler_params=pltpu.CompilerParams(
            dimension_semantics=("parallel",),
            vmem_limit_bytes=32 * 1024 * 1024),
    )(slen, rep_tm, wa_cat, ba_cat, v_cat, wd1_bd, bd1_cat, wd2_bd, bd2_cat)


# ----------------------------------------------------------------------------
# Full forward
# ----------------------------------------------------------------------------
def forward(ids, p):
    B, S = ids.shape
    Bp = _round_up(B, 16)         # 16-row granule for bf16 rep storage
    Sp = _round_up(S, TC)         # time padded to the GRU chunk size

    # Embedding lookup (glue: pure gather on the frozen table; dropout = id).
    # Gather directly in time-major layout so no large transpose is needed.
    ids_tm = jnp.zeros((Sp, Bp), jnp.int32).at[:S, :B].set(ids.T)
    emb_tm = jnp.take(p["emb"], ids_tm, axis=0)                   # (Sp, Bp, E)
    # TODO(synk): fold the embedding gather into the GRU kernel via scalar
    # prefetch + manual DMA when E is large (minor at E=64).

    # Kernel 1: fused projection + GRU recurrence -> bf16 rep, time-major.
    rep = run_gru(emb_tm, p["Wp"], p["bp"], p["Wih"], p["bih"],
                  p["Whh"], p["bhh"])                             # (Sp, Bp, H)

    # Fused head parameters (order: harassment, sexual, physical, indirect).
    wa_cat = (jnp.transpose(p["Wa"], (1, 0, 2)).reshape(H, 4 * H)
              .astype(jnp.bfloat16))
    ba_cat = p["ba"].reshape(1, 4 * H)
    v_cat = p["v"].reshape(1, 4 * H)
    wd1_bd = block_diag(*[p["Wd1"][j] for j in range(4)])         # (4H, 4H)
    bd1_cat = p["bd1"].reshape(1, 4 * H)
    wd2_bd = block_diag(*[p["Wd2"][j] for j in range(4)])         # (4H, 4)
    bd2_cat = p["bd2"].reshape(1, 4)

    out = run_heads(rep, wa_cat, ba_cat, v_cat, wd1_bd, bd1_cat,
                    wd2_bd, bd2_cat, S)                           # (Bp, 4)
    return out[:B]


# ----------------------------------------------------------------------------
# Plain-JAX reference (sanity check)
# ----------------------------------------------------------------------------
def reference(ids, p):
    B, S = ids.shape
    emb = jnp.take(p["emb"], ids, axis=0)
    proj = jnp.tanh(emb @ p["Wp"] + p["bp"][0])

    def step(h, x_t):
        gi = x_t @ p["Wih"] + p["bih"][0]
        gh = h @ p["Whh"] + p["bhh"][0]
        r = jax.nn.sigmoid(gi[:, :H] + gh[:, :H])
        z = jax.nn.sigmoid(gi[:, H:2 * H] + gh[:, H:2 * H])
        n = jnp.tanh(gi[:, 2 * H:] + r * gh[:, 2 * H:])
        h_new = (1.0 - z) * n + z * h
        return h_new, h_new

    _, outs = jax.lax.scan(step, jnp.zeros((B, H), jnp.float32),
                           jnp.transpose(proj, (1, 0, 2)))
    rep = jnp.transpose(outs, (1, 0, 2))
    cols = []
    for i in range(4):
        u = jax.nn.relu(rep @ p["Wa"][i] + p["ba"][i, 0])
        scores = jnp.sum(u * p["v"][i, 0], axis=-1)
        alpha = jax.nn.softmax(scores, axis=-1)
        pooled = jnp.sum(u * alpha[..., None], axis=1)
        d1 = jax.nn.relu(pooled @ p["Wd1"][i] + p["bd1"][i, 0])
        cols.append(d1 @ p["Wd2"][i] + p["bd2"][i, 0])
    return jnp.concatenate(cols, axis=1)


def init_params(key, vocab, emb_dim):
    ks = jax.random.split(key, 16)
    s = 0.1
    return {
        "emb": jax.random.normal(ks[0], (vocab, emb_dim), jnp.float32) * s,
        "Wp": jax.random.normal(ks[1], (emb_dim, H), jnp.float32) * s,
        "bp": jax.random.normal(ks[2], (1, H), jnp.float32) * s,
        "Wih": jax.random.normal(ks[3], (H, 3 * H), jnp.float32) * s,
        "Whh": jax.random.normal(ks[4], (H, 3 * H), jnp.float32) * s,
        "bih": jax.random.normal(ks[5], (1, 3 * H), jnp.float32) * s,
        "bhh": jax.random.normal(ks[6], (1, 3 * H), jnp.float32) * s,
        # per-head params, stacked [harassment, sexual, physical, indirect]
        "Wa": jax.random.normal(ks[7], (4, H, H), jnp.float32) * s,
        "ba": jax.random.normal(ks[8], (4, 1, H), jnp.float32) * s,
        "v": jax.random.normal(ks[9], (4, 1, H), jnp.float32) * s,
        "Wd1": jax.random.normal(ks[10], (4, H, H), jnp.float32) * s,
        "bd1": jax.random.normal(ks[11], (4, 1, H), jnp.float32) * s,
        "Wd2": jax.random.normal(ks[12], (4, H, 1), jnp.float32) * s,
        "bd2": jax.random.normal(ks[13], (4, 1, 1), jnp.float32) * s,
    }


if __name__ == "__main__":
    B, S, vocab, emb_dim = 2, 10, 50, 64
    key = jax.random.PRNGKey(0)
    kp, kx = jax.random.split(key)
    params = init_params(kp, vocab, emb_dim)
    ids = jax.random.randint(kx, (B, S), 0, vocab, dtype=jnp.int32)

    fwd = jax.jit(forward)
    out = jax.block_until_ready(fwd(ids, params))
    ref = jax.block_until_ready(reference(ids, params))

    assert out.shape == (B, 4), out.shape
    assert bool(jnp.all(jnp.isfinite(out)))
    # tolerance covers bf16 rep/Wa operands + MXU vs XLA precision differences
    err = float(jnp.max(jnp.abs(out - ref)))
    assert err < 2e-2, err
    print("KERNEL_OK")
</pallas_src>

<mosaic_0001>
module attributes {stable_mosaic.version = 11 : i64} {
  func.func @gru_kernel(%arg0: i32, %arg1: i32, %arg2: memref<16x16x64xf32, #tpu.memory_space<vmem>>, %arg3: memref<64x128xf32, #tpu.memory_space<vmem>>, %arg4: memref<1x128xf32, #tpu.memory_space<vmem>>, %arg5: memref<128x384xf32, #tpu.memory_space<vmem>>, %arg6: memref<1x384xf32, #tpu.memory_space<vmem>>, %arg7: memref<128x384xf32, #tpu.memory_space<vmem>>, %arg8: memref<1x384xf32, #tpu.memory_space<vmem>>, %arg9: memref<16x16x128xbf16, #tpu.memory_space<vmem>>, %arg10: memref<16x128xf32, #tpu.memory_space<vmem>>) attributes {dimension_semantics = [#tpu.dimension_semantics<parallel>, #tpu.dimension_semantics<arbitrary>], iteration_bounds = array<i64: 1, 1>, scalar_prefetch = 0 : i64, scratch_operands = 1 : i64, tpu.core_type = #tpu.core_type<tc>, window_params = [{transform_indices = @transform_0, window_bounds = array<i64: 16, 16, 64>}, {pipeline_mode = #tpu.pipeline_mode<synchronous>, transform_indices = @transform_1, window_bounds = array<i64: 64, 128>}, {pipeline_mode = #tpu.pipeline_mode<synchronous>, transform_indices = @transform_2, window_bounds = array<i64: 1, 128>}, {pipeline_mode = #tpu.pipeline_mode<synchronous>, transform_indices = @transform_3, window_bounds = array<i64: 128, 384>}, {pipeline_mode = #tpu.pipeline_mode<synchronous>, transform_indices = @transform_4, window_bounds = array<i64: 1, 384>}, {pipeline_mode = #tpu.pipeline_mode<synchronous>, transform_indices = @transform_5, window_bounds = array<i64: 128, 384>}, {pipeline_mode = #tpu.pipeline_mode<synchronous>, transform_indices = @transform_6, window_bounds = array<i64: 1, 384>}, {transform_indices = @transform_7, window_bounds = array<i64: 16, 16, 128>}]} {
    %c0_i32 = arith.constant 0 : i32
    %0 = arith.cmpi eq, %arg1, %c0_i32 : i32
    %1 = arith.extui %0 : i1 to i32
    %c0_i32_0 = arith.constant 0 : i32
    %2 = arith.cmpi ne, %1, %c0_i32_0 : i32
    scf.if %2 {
      %cst_117 = arith.constant 0.000000e+00 : f32
      %581 = vector.broadcast %cst_117 : f32 to vector<16x128xf32>
      %c0_118 = arith.constant 0 : index
      %c0_119 = arith.constant 0 : index
      %582 = vector.load %arg10[%c0_118, %c0_119] : memref<16x128xf32, #tpu.memory_space<vmem>>, vector<16x128xf32>
      tpu.vector_store %arg10[%c0_118, %c0_119], %581 {strides = array<i32>} : memref<16x128xf32, #tpu.memory_space<vmem>>, vector<16x128xf32>,
    } else {
    }
    %c0 = arith.constant 0 : index
    %c0_1 = arith.constant 0 : index
    %c0_2 = arith.constant 0 : index
    %3 = vector.load %arg2[%c0, %c0_1, %c0_2] : memref<16x16x64xf32, #tpu.memory_space<vmem>>, vector<16x16x64xf32>
    %4 = vector.shape_cast %3 : vector<16x16x64xf32> to vector<256x64xf32>
    %c0_3 = arith.constant 0 : index
    %c0_4 = arith.constant 0 : index
    %5 = vector.load %arg3[%c0_3, %c0_4] : memref<64x128xf32, #tpu.memory_space<vmem>>, vector<64x128xf32>
    %cst = arith.constant dense<0.000000e+00> : vector<256x128xf32>
    %6 = tpu.matmul %4, %5, %cst {dimension_numbers = #tpu.dot_dimension_numbers<[1], [0], [0], [1], [0, 0, 1, 1], [], []>} : vector<256x64xf32>, vector<64x128xf32>, vector<256x128xf32> -> vector<256x128xf32>
    %c0_5 = arith.constant 0 : index
    %c0_6 = arith.constant 0 : index
    %7 = vector.load %arg4[%c0_5, %c0_6] : memref<1x128xf32, #tpu.memory_space<vmem>>, vector<1x128xf32>
    %8 = vector.broadcast %7 : vector<1x128xf32> to vector<256x128xf32>
    %9 = arith.addf %6, %8 : vector<256x128xf32>
    %10 = math.tanh %9 : vector<256x128xf32>
    %c0_7 = arith.constant 0 : index
    %c0_8 = arith.constant 0 : index
    %11 = vector.load %arg5[%c0_7, %c0_8] : memref<128x384xf32, #tpu.memory_space<vmem>>, vector<128x384xf32>
    %cst_9 = arith.constant dense<0.000000e+00> : vector<256x384xf32>
    %12 = tpu.matmul %10, %11, %cst_9 {dimension_numbers = #tpu.dot_dimension_numbers<[1], [0], [0], [1], [0, 0, 1, 1], [], []>} : vector<256x128xf32>, vector<128x384xf32>, vector<256x384xf32> -> vector<256x384xf32>
    %c0_10 = arith.constant 0 : index
    %c0_11 = arith.constant 0 : index
    %13 = vector.load %arg6[%c0_10, %c0_11] : memref<1x384xf32, #tpu.memory_space<vmem>>, vector<1x384xf32>
    %14 = vector.broadcast %13 : vector<1x384xf32> to vector<256x384xf32>
    %15 = arith.addf %12, %14 : vector<256x384xf32>
    %16 = vector.shape_cast %15 : vector<256x384xf32> to vector<16x16x384xf32>
    %c0_12 = arith.constant 0 : index
    %c0_13 = arith.constant 0 : index
    %17 = vector.load %arg7[%c0_12, %c0_13] : memref<128x384xf32, #tpu.memory_space<vmem>>, vector<128x384xf32>
    %c0_14 = arith.constant 0 : index
    %c0_15 = arith.constant 0 : index
    %18 = vector.load %arg8[%c0_14, %c0_15] : memref<1x384xf32, #tpu.memory_space<vmem>>, vector<1x384xf32>
    %c0_16 = arith.constant 0 : index
    %c0_17 = arith.constant 0 : index
    %19 = vector.load %arg10[%c0_16, %c0_17] : memref<16x128xf32, #tpu.memory_space<vmem>>, vector<16x128xf32>
    %20 = vector.extract_strided_slice %16 {offsets = [0, 0, 0], sizes = [1, 16, 384], strides = [1, 1, 1]} : vector<16x16x384xf32> to vector<1x16x384xf32>
    %21 = vector.shape_cast %20 : vector<1x16x384xf32> to vector<16x384xf32>
    %cst_18 = arith.constant dense<0.000000e+00> : vector<16x384xf32>
    %22 = tpu.matmul %19, %17, %cst_18 {dimension_numbers = #tpu.dot_dimension_numbers<[1], [0], [0], [1], [0, 0, 1, 1], [], []>} : vector<16x128xf32>, vector<128x384xf32>, vector<16x384xf32> -> vector<16x384xf32>
    %23 = vector.broadcast %18 : vector<1x384xf32> to vector<16x384xf32>
    %24 = arith.addf %22, %23 : vector<16x384xf32>
    %25 = vector.extract_strided_slice %21 {offsets = [0, 0], sizes = [16, 128], strides = [1, 1]} : vector<16x384xf32> to vector<16x128xf32>
    %26 = vector.extract_strided_slice %24 {offsets = [0, 0], sizes = [16, 128], strides = [1, 1]} : vector<16x384xf32> to vector<16x128xf32>
    %27 = arith.addf %25, %26 : vector<16x128xf32>
    %28 = arith.negf %27 : vector<16x128xf32>
    %29 = math.exp %28 : vector<16x128xf32>
    %cst_19 = arith.constant 1.000000e+00 : f32
    %30 = vector.broadcast %cst_19 : f32 to vector<16x128xf32>
    %31 = arith.addf %30, %29 : vector<16x128xf32>
    %32 = arith.divf %30, %31 : vector<16x128xf32>
    %33 = vector.extract_strided_slice %21 {offsets = [0, 128], sizes = [16, 128], strides = [1, 1]} : vector<16x384xf32> to vector<16x128xf32>
    %34 = vector.extract_strided_slice %24 {offsets = [0, 128], sizes = [16, 128], strides = [1, 1]} : vector<16x384xf32> to vector<16x128xf32>
    %35 = arith.addf %33, %34 : vector<16x128xf32>
    %36 = arith.negf %35 : vector<16x128xf32>
    %37 = math.exp %36 : vector<16x128xf32>
    %cst_20 = arith.constant 1.000000e+00 : f32
    %38 = vector.broadcast %cst_20 : f32 to vector<16x128xf32>
    %39 = arith.addf %38, %37 : vector<16x128xf32>
    %40 = arith.divf %38, %39 : vector<16x128xf32>
    %41 = vector.extract_strided_slice %21 {offsets = [0, 256], sizes = [16, 128], strides = [1, 1]} : vector<16x384xf32> to vector<16x128xf32>
    %42 = vector.extract_strided_slice %24 {offsets = [0, 256], sizes = [16, 128], strides = [1, 1]} : vector<16x384xf32> to vector<16x128xf32>
    %43 = arith.mulf %32, %42 : vector<16x128xf32>
    %44 = arith.addf %41, %43 : vector<16x128xf32>
    %45 = math.tanh %44 : vector<16x128xf32>
    %cst_21 = arith.constant 1.000000e+00 : f32
    %46 = vector.broadcast %cst_21 : f32 to vector<16x128xf32>
    %47 = arith.subf %46, %40 : vector<16x128xf32>
    %48 = arith.mulf %47, %45 : vector<16x128xf32>
    %49 = arith.mulf %40, %19 : vector<16x128xf32>
    %50 = arith.addf %48, %49 : vector<16x128xf32>
    %51 = arith.truncf %50 : vector<16x128xf32> to vector<16x128xbf16>
    %c0_22 = arith.constant 0 : index
    %c0_23 = arith.constant 0 : index
    %c0_24 = arith.constant 0 : index
    %52 = vector.load %arg9[%c0_22, %c0_23, %c0_24] : memref<16x16x128xbf16, #tpu.memory_space<vmem>>, vector<1x16x128xbf16>
    %53 = vector.shape_cast %52 : vector<1x16x128xbf16> to vector<16x128xbf16>
    %54 = vector.shape_cast %51 : vector<16x128xbf16> to vector<1x16x128xbf16>
    tpu.vector_store %arg9[%c0_22, %c0_23, %c0_24], %54 {strides = array<i32>} : memref<16x16x128xbf16, #tpu.memory_space<vmem>>, vector<1x16x128xbf16>,
    %55 = vector.extract_strided_slice %16 {offsets = [1, 0, 0], sizes = [1, 16, 384], strides = [1, 1, 1]} : vector<16x16x384xf32> to vector<1x16x384xf32>
    %56 = vector.shape_cast %55 : vector<1x16x384xf32> to vector<16x384xf32>
    %cst_25 = arith.constant dense<0.000000e+00> : vector<16x384xf32>
    %57 = tpu.matmul %50, %17, %cst_25 {dimension_numbers = #tpu.dot_dimension_numbers<[1], [0], [0], [1], [0, 0, 1, 1], [], []>} : vector<16x128xf32>, vector<128x384xf32>, vector<16x384xf32> -> vector<16x384xf32>
    %58 = vector.broadcast %18 : vector<1x384xf32> to vector<16x384xf32>
    %59 = arith.addf %57, %58 : vector<16x384xf32>
    %60 = vector.extract_strided_slice %56 {offsets = [0, 0], sizes = [16, 128], strides = [1, 1]} : vector<16x384xf32> to vector<16x128xf32>
    %61 = vector.extract_strided_slice %59 {offsets = [0, 0], sizes = [16, 128], strides = [1, 1]} : vector<16x384xf32> to vector<16x128xf32>
    %62 = arith.addf %60, %61 : vector<16x128xf32>
    %63 = arith.negf %62 : vector<16x128xf32>
    %64 = math.exp %63 : vector<16x128xf32>
    %cst_26 = arith.constant 1.000000e+00 : f32
    %65 = vector.broadcast %cst_26 : f32 to vector<16x128xf32>
    %66 = arith.addf %65, %64 : vector<16x128xf32>
    %67 = arith.divf %65, %66 : vector<16x128xf32>
    %68 = vector.extract_strided_slice %56 {offsets = [0, 128], sizes = [16, 128], strides = [1, 1]} : vector<16x384xf32> to vector<16x128xf32>
    %69 = vector.extract_strided_slice %59 {offsets = [0, 128], sizes = [16, 128], strides = [1, 1]} : vector<16x384xf32> to vector<16x128xf32>
    %70 = arith.addf %68, %69 : vector<16x128xf32>
    %71 = arith.negf %70 : vector<16x128xf32>
    %72 = math.exp %71 : vector<16x128xf32>
    %cst_27 = arith.constant 1.000000e+00 : f32
    %73 = vector.broadcast %cst_27 : f32 to vector<16x128xf32>
    %74 = arith.addf %73, %72 : vector<16x128xf32>
    %75 = arith.divf %73, %74 : vector<16x128xf32>
    %76 = vector.extract_strided_slice %56 {offsets = [0, 256], sizes = [16, 128], strides = [1, 1]} : vector<16x384xf32> to vector<16x128xf32>
    %77 = vector.extract_strided_slice %59 {offsets = [0, 256], sizes = [16, 128], strides = [1, 1]} : vector<16x384xf32> to vector<16x128xf32>
    %78 = arith.mulf %67, %77 : vector<16x128xf32>
    %79 = arith.addf %76, %78 : vector<16x128xf32>
    %80 = math.tanh %79 : vector<16x128xf32>
    %cst_28 = arith.constant 1.000000e+00 : f32
    %81 = vector.broadcast %cst_28 : f32 to vector<16x128xf32>
    %82 = arith.subf %81, %75 : vector<16x128xf32>
    %83 = arith.mulf %82, %80 : vector<16x128xf32>
    %84 = arith.mulf %75, %50 : vector<16x128xf32>
    %85 = arith.addf %83, %84 : vector<16x128xf32>
    %86 = arith.truncf %85 : vector<16x128xf32> to vector<16x128xbf16>
    %c1 = arith.constant 1 : index
    %c0_29 = arith.constant 0 : index
    %c0_30 = arith.constant 0 : index
    %87 = vector.load %arg9[%c1, %c0_29, %c0_30] : memref<16x16x128xbf16, #tpu.memory_space<vmem>>, vector<1x16x128xbf16>
    %88 = vector.shape_cast %87 : vector<1x16x128xbf16> to vector<16x128xbf16>
    %89 = vector.shape_cast %86 : vector<16x128xbf16> to vector<1x16x128xbf16>
    tpu.vector_store %arg9[%c1, %c0_29, %c0_30], %89 {strides = array<i32>} : memref<16x16x128xbf16, #tpu.memory_space<vmem>>, vector<1x16x128xbf16>,
    %90 = vector.extract_strided_slice %16 {offsets = [2, 0, 0], sizes = [1, 16, 384], strides = [1, 1, 1]} : vector<16x16x384xf32> to vector<1x16x384xf32>
    %91 = vector.shape_cast %90 : vector<1x16x384xf32> to vector<16x384xf32>
    %cst_31 = arith.constant dense<0.000000e+00> : vector<16x384xf32>
    %92 = tpu.matmul %85, %17, %cst_31 {dimension_numbers = #tpu.dot_dimension_numbers<[1], [0], [0], [1], [0, 0, 1, 1], [], []>} : vector<16x128xf32>, vector<128x384xf32>, vector<16x384xf32> -> vector<16x384xf32>
    %93 = vector.broadcast %18 : vector<1x384xf32> to vector<16x384xf32>
    %94 = arith.addf %92, %93 : vector<16x384xf32>
    %95 = vector.extract_strided_slice %91 {offsets = [0, 0], sizes = [16, 128], strides = [1, 1]} : vector<16x384xf32> to vector<16x128xf32>
    %96 = vector.extract_strided_slice %94 {offsets = [0, 0], sizes = [16, 128], strides = [1, 1]} : vector<16x384xf32> to vector<16x128xf32>
    %97 = arith.addf %95, %96 : vector<16x128xf32>
    %98 = arith.negf %97 : vector<16x128xf32>
    %99 = math.exp %98 : vector<16x128xf32>
    %cst_32 = arith.constant 1.000000e+00 : f32
    %100 = vector.broadcast %cst_32 : f32 to vector<16x128xf32>
    %101 = arith.addf %100, %99 : vector<16x128xf32>
    %102 = arith.divf %100, %101 : vector<16x128xf32>
    %103 = vector.extract_strided_slice %91 {offsets = [0, 128], sizes = [16, 128], strides = [1, 1]} : vector<16x384xf32> to vector<16x128xf32>
    %104 = vector.extract_strided_slice %94 {offsets = [0, 128], sizes = [16, 128], strides = [1, 1]} : vector<16x384xf32> to vector<16x128xf32>
    %105 = arith.addf %103, %104 : vector<16x128xf32>
    %106 = arith.negf %105 : vector<16x128xf32>
    %107 = math.exp %106 : vector<16x128xf32>
    %cst_33 = arith.constant 1.000000e+00 : f32
    %108 = vector.broadcast %cst_33 : f32 to vector<16x128xf32>
    %109 = arith.addf %108, %107 : vector<16x128xf32>
    %110 = arith.divf %108, %109 : vector<16x128xf32>
    %111 = vector.extract_strided_slice %91 {offsets = [0, 256], sizes = [16, 128], strides = [1, 1]} : vector<16x384xf32> to vector<16x128xf32>
    %112 = vector.extract_strided_slice %94 {offsets = [0, 256], sizes = [16, 128], strides = [1, 1]} : vector<16x384xf32> to vector<16x128xf32>
    %113 = arith.mulf %102, %112 : vector<16x128xf32>
    %114 = arith.addf %111, %113 : vector<16x128xf32>
    %115 = math.tanh %114 : vector<16x128xf32>
    %cst_34 = arith.constant 1.000000e+00 : f32
    %116 = vector.broadcast %cst_34 : f32 to vector<16x128xf32>
    %117 = arith.subf %116, %110 : vector<16x128xf32>
    %118 = arith.mulf %117, %115 : vector<16x128xf32>
    %119 = arith.mulf %110, %85 : vector<16x128xf32>
    %120 = arith.addf %118, %119 : vector<16x128xf32>
    %121 = arith.truncf %120 : vector<16x128xf32> to vector<16x128xbf16>
    %c2 = arith.constant 2 : index
    %c0_35 = arith.constant 0 : index
    %c0_36 = arith.constant 0 : index
    %122 = vector.load %arg9[%c2, %c0_35, %c0_36] : memref<16x16x128xbf16, #tpu.memory_space<vmem>>, vector<1x16x128xbf16>
    %123 = vector.shape_cast %122 : vector<1x16x128xbf16> to vector<16x128xbf16>
    %124 = vector.shape_cast %121 : vector<16x128xbf16> to vector<1x16x128xbf16>
    tpu.vector_store %arg9[%c2, %c0_35, %c0_36], %124 {strides = array<i32>} : memref<16x16x128xbf16, #tpu.memory_space<vmem>>, vector<1x16x128xbf16>,
    %125 = vector.extract_strided_slice %16 {offsets = [3, 0, 0], sizes = [1, 16, 384], strides = [1, 1, 1]} : vector<16x16x384xf32> to vector<1x16x384xf32>
    %126 = vector.shape_cast %125 : vector<1x16x384xf32> to vector<16x384xf32>
    %cst_37 = arith.constant dense<0.000000e+00> : vector<16x384xf32>
    %127 = tpu.matmul %120, %17, %cst_37 {dimension_numbers = #tpu.dot_dimension_numbers<[1], [0], [0], [1], [0, 0, 1, 1], [], []>} : vector<16x128xf32>, vector<128x384xf32>, vector<16x384xf32> -> vector<16x384xf32>
    %128 = vector.broadcast %18 : vector<1x384xf32> to vector<16x384xf32>
    %129 = arith.addf %127, %128 : vector<16x384xf32>
    %130 = vector.extract_strided_slice %126 {offsets = [0, 0], sizes = [16, 128], strides = [1, 1]} : vector<16x384xf32> to vector<16x128xf32>
    %131 = vector.extract_strided_slice %129 {offsets = [0, 0], sizes = [16, 128], strides = [1, 1]} : vector<16x384xf32> to vector<16x128xf32>
    %132 = arith.addf %130, %131 : vector<16x128xf32>
    %133 = arith.negf %132 : vector<16x128xf32>
    %134 = math.exp %133 : vector<16x128xf32>
    %cst_38 = arith.constant 1.000000e+00 : f32
    %135 = vector.broadcast %cst_38 : f32 to vector<16x128xf32>
    %136 = arith.addf %135, %134 : vector<16x128xf32>
    %137 = arith.divf %135, %136 : vector<16x128xf32>
    %138 = vector.extract_strided_slice %126 {offsets = [0, 128], sizes = [16, 128], strides = [1, 1]} : vector<16x384xf32> to vector<16x128xf32>
    %139 = vector.extract_strided_slice %129 {offsets = [0, 128], sizes = [16, 128], strides = [1, 1]} : vector<16x384xf32> to vector<16x128xf32>
    %140 = arith.addf %138, %139 : vector<16x128xf32>
    %141 = arith.negf %140 : vector<16x128xf32>
    %142 = math.exp %141 : vector<16x128xf32>
    %cst_39 = arith.constant 1.000000e+00 : f32
    %143 = vector.broadcast %cst_39 : f32 to vector<16x128xf32>
    %144 = arith.addf %143, %142 : vector<16x128xf32>
    %145 = arith.divf %143, %144 : vector<16x128xf32>
    %146 = vector.extract_strided_slice %126 {offsets = [0, 256], sizes = [16, 128], strides = [1, 1]} : vector<16x384xf32> to vector<16x128xf32>
    %147 = vector.extract_strided_slice %129 {offsets = [0, 256], sizes = [16, 128], strides = [1, 1]} : vector<16x384xf32> to vector<16x128xf32>
    %148 = arith.mulf %137, %147 : vector<16x128xf32>
    %149 = arith.addf %146, %148 : vector<16x128xf32>
    %150 = math.tanh %149 : vector<16x128xf32>
    %cst_40 = arith.constant 1.000000e+00 : f32
    %151 = vector.broadcast %cst_40 : f32 to vector<16x128xf32>
    %152 = arith.subf %151, %145 : vector<16x128xf32>
    %153 = arith.mulf %152, %150 : vector<16x128xf32>
    %154 = arith.mulf %145, %120 : vector<16x128xf32>
    %155 = arith.addf %153, %154 : vector<16x128xf32>
    %156 = arith.truncf %155 : vector<16x128xf32> to vector<16x128xbf16>
    %c3 = arith.constant 3 : index
    %c0_41 = arith.constant 0 : index
    %c0_42 = arith.constant 0 : index
    %157 = vector.load %arg9[%c3, %c0_41, %c0_42] : memref<16x16x128xbf16, #tpu.memory_space<vmem>>, vector<1x16x128xbf16>
    %158 = vector.shape_cast %157 : vector<1x16x128xbf16> to vector<16x128xbf16>
    %159 = vector.shape_cast %156 : vector<16x128xbf16> to vector<1x16x128xbf16>
    tpu.vector_store %arg9[%c3, %c0_41, %c0_42], %159 {strides = array<i32>} : memref<16x16x128xbf16, #tpu.memory_space<vmem>>, vector<1x16x128xbf16>,
    %160 = vector.extract_strided_slice %16 {offsets = [4, 0, 0], sizes = [1, 16, 384], strides = [1, 1, 1]} : vector<16x16x384xf32> to vector<1x16x384xf32>
    %161 = vector.shape_cast %160 : vector<1x16x384xf32> to vector<16x384xf32>
    %cst_43 = arith.constant dense<0.000000e+00> : vector<16x384xf32>
    %162 = tpu.matmul %155, %17, %cst_43 {dimension_numbers = #tpu.dot_dimension_numbers<[1], [0], [0], [1], [0, 0, 1, 1], [], []>} : vector<16x128xf32>, vector<128x384xf32>, vector<16x384xf32> -> vector<16x384xf32>
    %163 = vector.broadcast %18 : vector<1x384xf32> to vector<16x384xf32>
    %164 = arith.addf %162, %163 : vector<16x384xf32>
    %165 = vector.extract_strided_slice %161 {offsets = [0, 0], sizes = [16, 128], strides = [1, 1]} : vector<16x384xf32> to vector<16x128xf32>
    %166 = vector.extract_strided_slice %164 {offsets = [0, 0], sizes = [16, 128], strides = [1, 1]} : vector<16x384xf32> to vector<16x128xf32>
    %167 = arith.addf %165, %166 : vector<16x128xf32>
    %168 = arith.negf %167 : vector<16x128xf32>
    %169 = math.exp %168 : vector<16x128xf32>
    %cst_44 = arith.constant 1.000000e+00 : f32
    %170 = vector.broadcast %cst_44 : f32 to vector<16x128xf32>
    %171 = arith.addf %170, %169 : vector<16x128xf32>
    %172 = arith.divf %170, %171 : vector<16x128xf32>
    %173 = vector.extract_strided_slice %161 {offsets = [0, 128], sizes = [16, 128], strides = [1, 1]} : vector<16x384xf32> to vector<16x128xf32>
    %174 = vector.extract_strided_slice %164 {offsets = [0, 128], sizes = [16, 128], strides = [1, 1]} : vector<16x384xf32> to vector<16x128xf32>
    %175 = arith.addf %173, %174 : vector<16x128xf32>
    %176 = arith.negf %175 : vector<16x128xf32>
    %177 = math.exp %176 : vector<16x128xf32>
    %cst_45 = arith.constant 1.000000e+00 : f32
    %178 = vector.broadcast %cst_45 : f32 to vector<16x128xf32>
    %179 = arith.addf %178, %177 : vector<16x128xf32>
    %180 = arith.divf %178, %179 : vector<16x128xf32>
    %181 = vector.extract_strided_slice %161 {offsets = [0, 256], sizes = [16, 128], strides = [1, 1]} : vector<16x384xf32> to vector<16x128xf32>
    %182 = vector.extract_strided_slice %164 {offsets = [0, 256], sizes = [16, 128], strides = [1, 1]} : vector<16x384xf32> to vector<16x128xf32>
    %183 = arith.mulf %172, %182 : vector<16x128xf32>
    %184 = arith.addf %181, %183 : vector<16x128xf32>
    %185 = math.tanh %184 : vector<16x128xf32>
    %cst_46 = arith.constant 1.000000e+00 : f32
    %186 = vector.broadcast %cst_46 : f32 to vector<16x128xf32>
    %187 = arith.subf %186, %180 : vector<16x128xf32>
    %188 = arith.mulf %187, %185 : vector<16x128xf32>
    %189 = arith.mulf %180, %155 : vector<16x128xf32>
    %190 = arith.addf %188, %189 : vector<16x128xf32>
    %191 = arith.truncf %190 : vector<16x128xf32> to vector<16x128xbf16>
    %c4 = arith.constant 4 : index
    %c0_47 = arith.constant 0 : index
    %c0_48 = arith.constant 0 : index
    %192 = vector.load %arg9[%c4, %c0_47, %c0_48] : memref<16x16x128xbf16, #tpu.memory_space<vmem>>, vector<1x16x128xbf16>
    %193 = vector.shape_cast %192 : vector<1x16x128xbf16> to vector<16x128xbf16>
    %194 = vector.shape_cast %191 : vector<16x128xbf16> to vector<1x16x128xbf16>
    tpu.vector_store %arg9[%c4, %c0_47, %c0_48], %194 {strides = array<i32>} : memref<16x16x128xbf16, #tpu.memory_space<vmem>>, vector<1x16x128xbf16>,
    %195 = vector.extract_strided_slice %16 {offsets = [5, 0, 0], sizes = [1, 16, 384], strides = [1, 1, 1]} : vector<16x16x384xf32> to vector<1x16x384xf32>
    %196 = vector.shape_cast %195 : vector<1x16x384xf32> to vector<16x384xf32>
    %cst_49 = arith.constant dense<0.000000e+00> : vector<16x384xf32>
    %197 = tpu.matmul %190, %17, %cst_49 {dimension_numbers = #tpu.dot_dimension_numbers<[1], [0], [0], [1], [0, 0, 1, 1], [], []>} : vector<16x128xf32>, vector<128x384xf32>, vector<16x384xf32> -> vector<16x384xf32>
    %198 = vector.broadcast %18 : vector<1x384xf32> to vector<16x384xf32>
    %199 = arith.addf %197, %198 : vector<16x384xf32>
    %200 = vector.extract_strided_slice %196 {offsets = [0, 0], sizes = [16, 128], strides = [1, 1]} : vector<16x384xf32> to vector<16x128xf32>
    %201 = vector.extract_strided_slice %199 {offsets = [0, 0], sizes = [16, 128], strides = [1, 1]} : vector<16x384xf32> to vector<16x128xf32>
    %202 = arith.addf %200, %201 : vector<16x128xf32>
    %203 = arith.negf %202 : vector<16x128xf32>
    %204 = math.exp %203 : vector<16x128xf32>
    %cst_50 = arith.constant 1.000000e+00 : f32
    %205 = vector.broadcast %cst_50 : f32 to vector<16x128xf32>
    %206 = arith.addf %205, %204 : vector<16x128xf32>
    %207 = arith.divf %205, %206 : vector<16x128xf32>
    %208 = vector.extract_strided_slice %196 {offsets = [0, 128], sizes = [16, 128], strides = [1, 1]} : vector<16x384xf32> to vector<16x128xf32>
    %209 = vector.extract_strided_slice %199 {offsets = [0, 128], sizes = [16, 128], strides = [1, 1]} : vector<16x384xf32> to vector<16x128xf32>
    %210 = arith.addf %208, %209 : vector<16x128xf32>
    %211 = arith.negf %210 : vector<16x128xf32>
    %212 = math.exp %211 : vector<16x128xf32>
    %cst_51 = arith.constant 1.000000e+00 : f32
    %213 = vector.broadcast %cst_51 : f32 to vector<16x128xf32>
    %214 = arith.addf %213, %212 : vector<16x128xf32>
    %215 = arith.divf %213, %214 : vector<16x128xf32>
    %216 = vector.extract_strided_slice %196 {offsets = [0, 256], sizes = [16, 128], strides = [1, 1]} : vector<16x384xf32> to vector<16x128xf32>
    %217 = vector.extract_strided_slice %199 {offsets = [0, 256], sizes = [16, 128], strides = [1, 1]} : vector<16x384xf32> to vector<16x128xf32>
    %218 = arith.mulf %207, %217 : vector<16x128xf32>
    %219 = arith.addf %216, %218 : vector<16x128xf32>
    %220 = math.tanh %219 : vector<16x128xf32>
    %cst_52 = arith.constant 1.000000e+00 : f32
    %221 = vector.broadcast %cst_52 : f32 to vector<16x128xf32>
    %222 = arith.subf %221, %215 : vector<16x128xf32>
    %223 = arith.mulf %222, %220 : vector<16x128xf32>
    %224 = arith.mulf %215, %190 : vector<16x128xf32>
    %225 = arith.addf %223, %224 : vector<16x128xf32>
    %226 = arith.truncf %225 : vector<16x128xf32> to vector<16x128xbf16>
    %c5 = arith.constant 5 : index
    %c0_53 = arith.constant 0 : index
    %c0_54 = arith.constant 0 : index
    %227 = vector.load %arg9[%c5, %c0_53, %c0_54] : memref<16x16x128xbf16, #tpu.memory_space<vmem>>, vector<1x16x128xbf16>
    %228 = vector.shape_cast %227 : vector<1x16x128xbf16> to vector<16x128xbf16>
    %229 = vector.shape_cast %226 : vector<16x128xbf16> to vector<1x16x128xbf16>
    tpu.vector_store %arg9[%c5, %c0_53, %c0_54], %229 {strides = array<i32>} : memref<16x16x128xbf16, #tpu.memory_space<vmem>>, vector<1x16x128xbf16>,
    %230 = vector.extract_strided_slice %16 {offsets = [6, 0, 0], sizes = [1, 16, 384], strides = [1, 1, 1]} : vector<16x16x384xf32> to vector<1x16x384xf32>
    %231 = vector.shape_cast %230 : vector<1x16x384xf32> to vector<16x384xf32>
    %cst_55 = arith.constant dense<0.000000e+00> : vector<16x384xf32>
    %232 = tpu.matmul %225, %17, %cst_55 {dimension_numbers = #tpu.dot_dimension_numbers<[1], [0], [0], [1], [0, 0, 1, 1], [], []>} : vector<16x128xf32>, vector<128x384xf32>, vector<16x384xf32> -> vector<16x384xf32>
    %233 = vector.broadcast %18 : vector<1x384xf32> to vector<16x384xf32>
    %234 = arith.addf %232, %233 : vector<16x384xf32>
    %235 = vector.extract_strided_slice %231 {offsets = [0, 0], sizes = [16, 128], strides = [1, 1]} : vector<16x384xf32> to vector<16x128xf32>
    %236 = vector.extract_strided_slice %234 {offsets = [0, 0], sizes = [16, 128], strides = [1, 1]} : vector<16x384xf32> to vector<16x128xf32>
    %237 = arith.addf %235, %236 : vector<16x128xf32>
    %238 = arith.negf %237 : vector<16x128xf32>
    %239 = math.exp %238 : vector<16x128xf32>
    %cst_56 = arith.constant 1.000000e+00 : f32
    %240 = vector.broadcast %cst_56 : f32 to vector<16x128xf32>
    %241 = arith.addf %240, %239 : vector<16x128xf32>
    %242 = arith.divf %240, %241 : vector<16x128xf32>
    %243 = vector.extract_strided_slice %231 {offsets = [0, 128], sizes = [16, 128], strides = [1, 1]} : vector<16x384xf32> to vector<16x128xf32>
    %244 = vector.extract_strided_slice %234 {offsets = [0, 128], sizes = [16, 128], strides = [1, 1]} : vector<16x384xf32> to vector<16x128xf32>
    %245 = arith.addf %243, %244 : vector<16x128xf32>
    %246 = arith.negf %245 : vector<16x128xf32>
    %247 = math.exp %246 : vector<16x128xf32>
    %cst_57 = arith.constant 1.000000e+00 : f32
    %248 = vector.broadcast %cst_57 : f32 to vector<16x128xf32>
    %249 = arith.addf %248, %247 : vector<16x128xf32>
    %250 = arith.divf %248, %249 : vector<16x128xf32>
    %251 = vector.extract_strided_slice %231 {offsets = [0, 256], sizes = [16, 128], strides = [1, 1]} : vector<16x384xf32> to vector<16x128xf32>
    %252 = vector.extract_strided_slice %234 {offsets = [0, 256], sizes = [16, 128], strides = [1, 1]} : vector<16x384xf32> to vector<16x128xf32>
    %253 = arith.mulf %242, %252 : vector<16x128xf32>
    %254 = arith.addf %251, %253 : vector<16x128xf32>
    %255 = math.tanh %254 : vector<16x128xf32>
    %cst_58 = arith.constant 1.000000e+00 : f32
    %256 = vector.broadcast %cst_58 : f32 to vector<16x128xf32>
    %257 = arith.subf %256, %250 : vector<16x128xf32>
    %258 = arith.mulf %257, %255 : vector<16x128xf32>
    %259 = arith.mulf %250, %225 : vector<16x128xf32>
    %260 = arith.addf %258, %259 : vector<16x128xf32>
    %261 = arith.truncf %260 : vector<16x128xf32> to vector<16x128xbf16>
    %c6 = arith.constant 6 : index
    %c0_59 = arith.constant 0 : index
    %c0_60 = arith.constant 0 : index
    %262 = vector.load %arg9[%c6, %c0_59, %c0_60] : memref<16x16x128xbf16, #tpu.memory_space<vmem>>, vector<1x16x128xbf16>
    %263 = vector.shape_cast %262 : vector<1x16x128xbf16> to vector<16x128xbf16>
    %264 = vector.shape_cast %261 : vector<16x128xbf16> to vector<1x16x128xbf16>
    tpu.vector_store %arg9[%c6, %c0_59, %c0_60], %264 {strides = array<i32>} : memref<16x16x128xbf16, #tpu.memory_space<vmem>>, vector<1x16x128xbf16>,
    %265 = vector.extract_strided_slice %16 {offsets = [7, 0, 0], sizes = [1, 16, 384], strides = [1, 1, 1]} : vector<16x16x384xf32> to vector<1x16x384xf32>
    %266 = vector.shape_cast %265 : vector<1x16x384xf32> to vector<16x384xf32>
    %cst_61 = arith.constant dense<0.000000e+00> : vector<16x384xf32>
    %267 = tpu.matmul %260, %17, %cst_61 {dimension_numbers = #tpu.dot_dimension_numbers<[1], [0], [0], [1], [0, 0, 1, 1], [], []>} : vector<16x128xf32>, vector<128x384xf32>, vector<16x384xf32> -> vector<16x384xf32>
    %268 = vector.broadcast %18 : vector<1x384xf32> to vector<16x384xf32>
    %269 = arith.addf %267, %268 : vector<16x384xf32>
    %270 = vector.extract_strided_slice %266 {offsets = [0, 0], sizes = [16, 128], strides = [1, 1]} : vector<16x384xf32> to vector<16x128xf32>
    %271 = vector.extract_strided_slice %269 {offsets = [0, 0], sizes = [16, 128], strides = [1, 1]} : vector<16x384xf32> to vector<16x128xf32>
    %272 = arith.addf %270, %271 : vector<16x128xf32>
    %273 = arith.negf %272 : vector<16x128xf32>
    %274 = math.exp %273 : vector<16x128xf32>
    %cst_62 = arith.constant 1.000000e+00 : f32
    %275 = vector.broadcast %cst_62 : f32 to vector<16x128xf32>
    %276 = arith.addf %275, %274 : vector<16x128xf32>
    %277 = arith.divf %275, %276 : vector<16x128xf32>
    %278 = vector.extract_strided_slice %266 {offsets = [0, 128], sizes = [16, 128], strides = [1, 1]} : vector<16x384xf32> to vector<16x128xf32>
    %279 = vector.extract_strided_slice %269 {offsets = [0, 128], sizes = [16, 128], strides = [1, 1]} : vector<16x384xf32> to vector<16x128xf32>
    %280 = arith.addf %278, %279 : vector<16x128xf32>
    %281 = arith.negf %280 : vector<16x128xf32>
    %282 = math.exp %281 : vector<16x128xf32>
    %cst_63 = arith.constant 1.000000e+00 : f32
    %283 = vector.broadcast %cst_63 : f32 to vector<16x128xf32>
    %284 = arith.addf %283, %282 : vector<16x128xf32>
    %285 = arith.divf %283, %284 : vector<16x128xf32>
    %286 = vector.extract_strided_slice %266 {offsets = [0, 256], sizes = [16, 128], strides = [1, 1]} : vector<16x384xf32> to vector<16x128xf32>
    %287 = vector.extract_strided_slice %269 {offsets = [0, 256], sizes = [16, 128], strides = [1, 1]} : vector<16x384xf32> to vector<16x128xf32>
    %288 = arith.mulf %277, %287 : vector<16x128xf32>
    %289 = arith.addf %286, %288 : vector<16x128xf32>
    %290 = math.tanh %289 : vector<16x128xf32>
    %cst_64 = arith.constant 1.000000e+00 : f32
    %291 = vector.broadcast %cst_64 : f32 to vector<16x128xf32>
    %292 = arith.subf %291, %285 : vector<16x128xf32>
    %293 = arith.mulf %292, %290 : vector<16x128xf32>
    %294 = arith.mulf %285, %260 : vector<16x128xf32>
    %295 = arith.addf %293, %294 : vector<16x128xf32>
    %296 = arith.truncf %295 : vector<16x128xf32> to vector<16x128xbf16>
    %c7 = arith.constant 7 : index
    %c0_65 = arith.constant 0 : index
    %c0_66 = arith.constant 0 : index
    %297 = vector.load %arg9[%c7, %c0_65, %c0_66] : memref<16x16x128xbf16, #tpu.memory_space<vmem>>, vector<1x16x128xbf16>
    %298 = vector.shape_cast %297 : vector<1x16x128xbf16> to vector<16x128xbf16>
    %299 = vector.shape_cast %296 : vector<16x128xbf16> to vector<1x16x128xbf16>
    tpu.vector_store %arg9[%c7, %c0_65, %c0_66], %299 {strides = array<i32>} : memref<16x16x128xbf16, #tpu.memory_space<vmem>>, vector<1x16x128xbf16>,
    %300 = vector.extract_strided_slice %16 {offsets = [8, 0, 0], sizes = [1, 16, 384], strides = [1, 1, 1]} : vector<16x16x384xf32> to vector<1x16x384xf32>
    %301 = vector.shape_cast %300 : vector<1x16x384xf32> to vector<16x384xf32>
    %cst_67 = arith.constant dense<0.000000e+00> : vector<16x384xf32>
    %302 = tpu.matmul %295, %17, %cst_67 {dimension_numbers = #tpu.dot_dimension_numbers<[1], [0], [0], [1], [0, 0, 1, 1], [], []>} : vector<16x128xf32>, vector<128x384xf32>, vector<16x384xf32> -> vector<16x384xf32>
    %303 = vector.broadcast %18 : vector<1x384xf32> to vector<16x384xf32>
    %304 = arith.addf %302, %303 : vector<16x384xf32>
    %305 = vector.extract_strided_slice %301 {offsets = [0, 0], sizes = [16, 128], strides = [1, 1]} : vector<16x384xf32> to vector<16x128xf32>
    %306 = vector.extract_strided_slice %304 {offsets = [0, 0], sizes = [16, 128], strides = [1, 1]} : vector<16x384xf32> to vector<16x128xf32>
    %307 = arith.addf %305, %306 : vector<16x128xf32>
    %308 = arith.negf %307 : vector<16x128xf32>
    %309 = math.exp %308 : vector<16x128xf32>
    %cst_68 = arith.constant 1.000000e+00 : f32
    %310 = vector.broadcast %cst_68 : f32 to vector<16x128xf32>
    %311 = arith.addf %310, %309 : vector<16x128xf32>
    %312 = arith.divf %310, %311 : vector<16x128xf32>
    %313 = vector.extract_strided_slice %301 {offsets = [0, 128], sizes = [16, 128], strides = [1, 1]} : vector<16x384xf32> to vector<16x128xf32>
    %314 = vector.extract_strided_slice %304 {offsets = [0, 128], sizes = [16, 128], strides = [1, 1]} : vector<16x384xf32> to vector<16x128xf32>
    %315 = arith.addf %313, %314 : vector<16x128xf32>
    %316 = arith.negf %315 : vector<16x128xf32>
    %317 = math.exp %316 : vector<16x128xf32>
    %cst_69 = arith.constant 1.000000e+00 : f32
    %318 = vector.broadcast %cst_69 : f32 to vector<16x128xf32>
    %319 = arith.addf %318, %317 : vector<16x128xf32>
    %320 = arith.divf %318, %319 : vector<16x128xf32>
    %321 = vector.extract_strided_slice %301 {offsets = [0, 256], sizes = [16, 128], strides = [1, 1]} : vector<16x384xf32> to vector<16x128xf32>
    %322 = vector.extract_strided_slice %304 {offsets = [0, 256], sizes = [16, 128], strides = [1, 1]} : vector<16x384xf32> to vector<16x128xf32>
    %323 = arith.mulf %312, %322 : vector<16x128xf32>
    %324 = arith.addf %321, %323 : vector<16x128xf32>
    %325 = math.tanh %324 : vector<16x128xf32>
    %cst_70 = arith.constant 1.000000e+00 : f32
    %326 = vector.broadcast %cst_70 : f32 to vector<16x128xf32>
    %327 = arith.subf %326, %320 : vector<16x128xf32>
    %328 = arith.mulf %327, %325 : vector<16x128xf32>
    %329 = arith.mulf %320, %295 : vector<16x128xf32>
    %330 = arith.addf %328, %329 : vector<16x128xf32>
    %331 = arith.truncf %330 : vector<16x128xf32> to vector<16x128xbf16>
    %c8 = arith.constant 8 : index
    %c0_71 = arith.constant 0 : index
    %c0_72 = arith.constant 0 : index
    %332 = vector.load %arg9[%c8, %c0_71, %c0_72] : memref<16x16x128xbf16, #tpu.memory_space<vmem>>, vector<1x16x128xbf16>
    %333 = vector.shape_cast %332 : vector<1x16x128xbf16> to vector<16x128xbf16>
    %334 = vector.shape_cast %331 : vector<16x128xbf16> to vector<1x16x128xbf16>
    tpu.vector_store %arg9[%c8, %c0_71, %c0_72], %334 {strides = array<i32>} : memref<16x16x128xbf16, #tpu.memory_space<vmem>>, vector<1x16x128xbf16>,
    %335 = vector.extract_strided_slice %16 {offsets = [9, 0, 0], sizes = [1, 16, 384], strides = [1, 1, 1]} : vector<16x16x384xf32> to vector<1x16x384xf32>
    %336 = vector.shape_cast %335 : vector<1x16x384xf32> to vector<16x384xf32>
    %cst_73 = arith.constant dense<0.000000e+00> : vector<16x384xf32>
    %337 = tpu.matmul %330, %17, %cst_73 {dimension_numbers = #tpu.dot_dimension_numbers<[1], [0], [0], [1], [0, 0, 1, 1], [], []>} : vector<16x128xf32>, vector<128x384xf32>, vector<16x384xf32> -> vector<16x384xf32>
    %338 = vector.broadcast %18 : vector<1x384xf32> to vector<16x384xf32>
    %339 = arith.addf %337, %338 : vector<16x384xf32>
    %340 = vector.extract_strided_slice %336 {offsets = [0, 0], sizes = [16, 128], strides = [1, 1]} : vector<16x384xf32> to vector<16x128xf32>
    %341 = vector.extract_strided_slice %339 {offsets = [0, 0], sizes = [16, 128], strides = [1, 1]} : vector<16x384xf32> to vector<16x128xf32>
    %342 = arith.addf %340, %341 : vector<16x128xf32>
    %343 = arith.negf %342 : vector<16x128xf32>
    %344 = math.exp %343 : vector<16x128xf32>
    %cst_74 = arith.constant 1.000000e+00 : f32
    %345 = vector.broadcast %cst_74 : f32 to vector<16x128xf32>
    %346 = arith.addf %345, %344 : vector<16x128xf32>
    %347 = arith.divf %345, %346 : vector<16x128xf32>
    %348 = vector.extract_strided_slice %336 {offsets = [0, 128], sizes = [16, 128], strides = [1, 1]} : vector<16x384xf32> to vector<16x128xf32>
    %349 = vector.extract_strided_slice %339 {offsets = [0, 128], sizes = [16, 128], strides = [1, 1]} : vector<16x384xf32> to vector<16x128xf32>
    %350 = arith.addf %348, %349 : vector<16x128xf32>
    %351 = arith.negf %350 : vector<16x128xf32>
    %352 = math.exp %351 : vector<16x128xf32>
    %cst_75 = arith.constant 1.000000e+00 : f32
    %353 = vector.broadcast %cst_75 : f32 to vector<16x128xf32>
    %354 = arith.addf %353, %352 : vector<16x128xf32>
    %355 = arith.divf %353, %354 : vector<16x128xf32>
    %356 = vector.extract_strided_slice %336 {offsets = [0, 256], sizes = [16, 128], strides = [1, 1]} : vector<16x384xf32> to vector<16x128xf32>
    %357 = vector.extract_strided_slice %339 {offsets = [0, 256], sizes = [16, 128], strides = [1, 1]} : vector<16x384xf32> to vector<16x128xf32>
    %358 = arith.mulf %347, %357 : vector<16x128xf32>
    %359 = arith.addf %356, %358 : vector<16x128xf32>
    %360 = math.tanh %359 : vector<16x128xf32>
    %cst_76 = arith.constant 1.000000e+00 : f32
    %361 = vector.broadcast %cst_76 : f32 to vector<16x128xf32>
    %362 = arith.subf %361, %355 : vector<16x128xf32>
    %363 = arith.mulf %362, %360 : vector<16x128xf32>
    %364 = arith.mulf %355, %330 : vector<16x128xf32>
    %365 = arith.addf %363, %364 : vector<16x128xf32>
    %366 = arith.truncf %365 : vector<16x128xf32> to vector<16x128xbf16>
    %c9 = arith.constant 9 : index
    %c0_77 = arith.constant 0 : index
    %c0_78 = arith.constant 0 : index
    %367 = vector.load %arg9[%c9, %c0_77, %c0_78] : memref<16x16x128xbf16, #tpu.memory_space<vmem>>, vector<1x16x128xbf16>
    %368 = vector.shape_cast %367 : vector<1x16x128xbf16> to vector<16x128xbf16>
    %369 = vector.shape_cast %366 : vector<16x128xbf16> to vector<1x16x128xbf16>
    tpu.vector_store %arg9[%c9, %c0_77, %c0_78], %369 {strides = array<i32>} : memref<16x16x128xbf16, #tpu.memory_space<vmem>>, vector<1x16x128xbf16>,
    %370 = vector.extract_strided_slice %16 {offsets = [10, 0, 0], sizes = [1, 16, 384], strides = [1, 1, 1]} : vector<16x16x384xf32> to vector<1x16x384xf32>
    %371 = vector.shape_cast %370 : vector<1x16x384xf32> to vector<16x384xf32>
    %cst_79 = arith.constant dense<0.000000e+00> : vector<16x384xf32>
    %372 = tpu.matmul %365, %17, %cst_79 {dimension_numbers = #tpu.dot_dimension_numbers<[1], [0], [0], [1], [0, 0, 1, 1], [], []>} : vector<16x128xf32>, vector<128x384xf32>, vector<16x384xf32> -> vector<16x384xf32>
    %373 = vector.broadcast %18 : vector<1x384xf32> to vector<16x384xf32>
    %374 = arith.addf %372, %373 : vector<16x384xf32>
    %375 = vector.extract_strided_slice %371 {offsets = [0, 0], sizes = [16, 128], strides = [1, 1]} : vector<16x384xf32> to vector<16x128xf32>
    %376 = vector.extract_strided_slice %374 {offsets = [0, 0], sizes = [16, 128], strides = [1, 1]} : vector<16x384xf32> to vector<16x128xf32>
    %377 = arith.addf %375, %376 : vector<16x128xf32>
    %378 = arith.negf %377 : vector<16x128xf32>
    %379 = math.exp %378 : vector<16x128xf32>
    %cst_80 = arith.constant 1.000000e+00 : f32
    %380 = vector.broadcast %cst_80 : f32 to vector<16x128xf32>
    %381 = arith.addf %380, %379 : vector<16x128xf32>
    %382 = arith.divf %380, %381 : vector<16x128xf32>
    %383 = vector.extract_strided_slice %371 {offsets = [0, 128], sizes = [16, 128], strides = [1, 1]} : vector<16x384xf32> to vector<16x128xf32>
    %384 = vector.extract_strided_slice %374 {offsets = [0, 128], sizes = [16, 128], strides = [1, 1]} : vector<16x384xf32> to vector<16x128xf32>
    %385 = arith.addf %383, %384 : vector<16x128xf32>
    %386 = arith.negf %385 : vector<16x128xf32>
    %387 = math.exp %386 : vector<16x128xf32>
    %cst_81 = arith.constant 1.000000e+00 : f32
    %388 = vector.broadcast %cst_81 : f32 to vector<16x128xf32>
    %389 = arith.addf %388, %387 : vector<16x128xf32>
    %390 = arith.divf %388, %389 : vector<16x128xf32>
    %391 = vector.extract_strided_slice %371 {offsets = [0, 256], sizes = [16, 128], strides = [1, 1]} : vector<16x384xf32> to vector<16x128xf32>
    %392 = vector.extract_strided_slice %374 {offsets = [0, 256], sizes = [16, 128], strides = [1, 1]} : vector<16x384xf32> to vector<16x128xf32>
    %393 = arith.mulf %382, %392 : vector<16x128xf32>
    %394 = arith.addf %391, %393 : vector<16x128xf32>
    %395 = math.tanh %394 : vector<16x128xf32>
    %cst_82 = arith.constant 1.000000e+00 : f32
    %396 = vector.broadcast %cst_82 : f32 to vector<16x128xf32>
    %397 = arith.subf %396, %390 : vector<16x128xf32>
    %398 = arith.mulf %397, %395 : vector<16x128xf32>
    %399 = arith.mulf %390, %365 : vector<16x128xf32>
    %400 = arith.addf %398, %399 : vector<16x128xf32>
    %401 = arith.truncf %400 : vector<16x128xf32> to vector<16x128xbf16>
    %c10 = arith.constant 10 : index
    %c0_83 = arith.constant 0 : index
    %c0_84 = arith.constant 0 : index
    %402 = vector.load %arg9[%c10, %c0_83, %c0_84] : memref<16x16x128xbf16, #tpu.memory_space<vmem>>, vector<1x16x128xbf16>
    %403 = vector.shape_cast %402 : vector<1x16x128xbf16> to vector<16x128xbf16>
    %404 = vector.shape_cast %401 : vector<16x128xbf16> to vector<1x16x128xbf16>
    tpu.vector_store %arg9[%c10, %c0_83, %c0_84], %404 {strides = array<i32>} : memref<16x16x128xbf16, #tpu.memory_space<vmem>>, vector<1x16x128xbf16>,
    %405 = vector.extract_strided_slice %16 {offsets = [11, 0, 0], sizes = [1, 16, 384], strides = [1, 1, 1]} : vector<16x16x384xf32> to vector<1x16x384xf32>
    %406 = vector.shape_cast %405 : vector<1x16x384xf32> to vector<16x384xf32>
    %cst_85 = arith.constant dense<0.000000e+00> : vector<16x384xf32>
    %407 = tpu.matmul %400, %17, %cst_85 {dimension_numbers = #tpu.dot_dimension_numbers<[1], [0], [0], [1], [0, 0, 1, 1], [], []>} : vector<16x128xf32>, vector<128x384xf32>, vector<16x384xf32> -> vector<16x384xf32>
    %408 = vector.broadcast %18 : vector<1x384xf32> to vector<16x384xf32>
    %409 = arith.addf %407, %408 : vector<16x384xf32>
    %410 = vector.extract_strided_slice %406 {offsets = [0, 0], sizes = [16, 128], strides = [1, 1]} : vector<16x384xf32> to vector<16x128xf32>
    %411 = vector.extract_strided_slice %409 {offsets = [0, 0], sizes = [16, 128], strides = [1, 1]} : vector<16x384xf32> to vector<16x128xf32>
    %412 = arith.addf %410, %411 : vector<16x128xf32>
    %413 = arith.negf %412 : vector<16x128xf32>
    %414 = math.exp %413 : vector<16x128xf32>
    %cst_86 = arith.constant 1.000000e+00 : f32
    %415 = vector.broadcast %cst_86 : f32 to vector<16x128xf32>
    %416 = arith.addf %415, %414 : vector<16x128xf32>
    %417 = arith.divf %415, %416 : vector<16x128xf32>
    %418 = vector.extract_strided_slice %406 {offsets = [0, 128], sizes = [16, 128], strides = [1, 1]} : vector<16x384xf32> to vector<16x128xf32>
    %419 = vector.extract_strided_slice %409 {offsets = [0, 128], sizes = [16, 128], strides = [1, 1]} : vector<16x384xf32> to vector<16x128xf32>
    %420 = arith.addf %418, %419 : vector<16x128xf32>
    %421 = arith.negf %420 : vector<16x128xf32>
    %422 = math.exp %421 : vector<16x128xf32>
    %cst_87 = arith.constant 1.000000e+00 : f32
    %423 = vector.broadcast %cst_87 : f32 to vector<16x128xf32>
    %424 = arith.addf %423, %422 : vector<16x128xf32>
    %425 = arith.divf %423, %424 : vector<16x128xf32>
    %426 = vector.extract_strided_slice %406 {offsets = [0, 256], sizes = [16, 128], strides = [1, 1]} : vector<16x384xf32> to vector<16x128xf32>
    %427 = vector.extract_strided_slice %409 {offsets = [0, 256], sizes = [16, 128], strides = [1, 1]} : vector<16x384xf32> to vector<16x128xf32>
    %428 = arith.mulf %417, %427 : vector<16x128xf32>
    %429 = arith.addf %426, %428 : vector<16x128xf32>
    %430 = math.tanh %429 : vector<16x128xf32>
    %cst_88 = arith.constant 1.000000e+00 : f32
    %431 = vector.broadcast %cst_88 : f32 to vector<16x128xf32>
    %432 = arith.subf %431, %425 : vector<16x128xf32>
    %433 = arith.mulf %432, %430 : vector<16x128xf32>
    %434 = arith.mulf %425, %400 : vector<16x128xf32>
    %435 = arith.addf %433, %434 : vector<16x128xf32>
    %436 = arith.truncf %435 : vector<16x128xf32> to vector<16x128xbf16>
    %c11 = arith.constant 11 : index
    %c0_89 = arith.constant 0 : index
    %c0_90 = arith.constant 0 : index
    %437 = vector.load %arg9[%c11, %c0_89, %c0_90] : memref<16x16x128xbf16, #tpu.memory_space<vmem>>, vector<1x16x128xbf16>
    %438 = vector.shape_cast %437 : vector<1x16x128xbf16> to vector<16x128xbf16>
    %439 = vector.shape_cast %436 : vector<16x128xbf16> to vector<1x16x128xbf16>
    tpu.vector_store %arg9[%c11, %c0_89, %c0_90], %439 {strides = array<i32>} : memref<16x16x128xbf16, #tpu.memory_space<vmem>>, vector<1x16x128xbf16>,
    %440 = vector.extract_strided_slice %16 {offsets = [12, 0, 0], sizes = [1, 16, 384], strides = [1, 1, 1]} : vector<16x16x384xf32> to vector<1x16x384xf32>
    %441 = vector.shape_cast %440 : vector<1x16x384xf32> to vector<16x384xf32>
    %cst_91 = arith.constant dense<0.000000e+00> : vector<16x384xf32>
    %442 = tpu.matmul %435, %17, %cst_91 {dimension_numbers = #tpu.dot_dimension_numbers<[1], [0], [0], [1], [0, 0, 1, 1], [], []>} : vector<16x128xf32>, vector<128x384xf32>, vector<16x384xf32> -> vector<16x384xf32>
    %443 = vector.broadcast %18 : vector<1x384xf32> to vector<16x384xf32>
    %444 = arith.addf %442, %443 : vector<16x384xf32>
    %445 = vector.extract_strided_slice %441 {offsets = [0, 0], sizes = [16, 128], strides = [1, 1]} : vector<16x384xf32> to vector<16x128xf32>
    %446 = vector.extract_strided_slice %444 {offsets = [0, 0], sizes = [16, 128], strides = [1, 1]} : vector<16x384xf32> to vector<16x128xf32>
    %447 = arith.addf %445, %446 : vector<16x128xf32>
    %448 = arith.negf %447 : vector<16x128xf32>
    %449 = math.exp %448 : vector<16x128xf32>
    %cst_92 = arith.constant 1.000000e+00 : f32
    %450 = vector.broadcast %cst_92 : f32 to vector<16x128xf32>
    %451 = arith.addf %450, %449 : vector<16x128xf32>
    %452 = arith.divf %450, %451 : vector<16x128xf32>
    %453 = vector.extract_strided_slice %441 {offsets = [0, 128], sizes = [16, 128], strides = [1, 1]} : vector<16x384xf32> to vector<16x128xf32>
    %454 = vector.extract_strided_slice %444 {offsets = [0, 128], sizes = [16, 128], strides = [1, 1]} : vector<16x384xf32> to vector<16x128xf32>
    %455 = arith.addf %453, %454 : vector<16x128xf32>
    %456 = arith.negf %455 : vector<16x128xf32>
    %457 = math.exp %456 : vector<16x128xf32>
    %cst_93 = arith.constant 1.000000e+00 : f32
    %458 = vector.broadcast %cst_93 : f32 to vector<16x128xf32>
    %459 = arith.addf %458, %457 : vector<16x128xf32>
    %460 = arith.divf %458, %459 : vector<16x128xf32>
    %461 = vector.extract_strided_slice %441 {offsets = [0, 256], sizes = [16, 128], strides = [1, 1]} : vector<16x384xf32> to vector<16x128xf32>
    %462 = vector.extract_strided_slice %444 {offsets = [0, 256], sizes = [16, 128], strides = [1, 1]} : vector<16x384xf32> to vector<16x128xf32>
    %463 = arith.mulf %452, %462 : vector<16x128xf32>
    %464 = arith.addf %461, %463 : vector<16x128xf32>
    %465 = math.tanh %464 : vector<16x128xf32>
    %cst_94 = arith.constant 1.000000e+00 : f32
    %466 = vector.broadcast %cst_94 : f32 to vector<16x128xf32>
    %467 = arith.subf %466, %460 : vector<16x128xf32>
    %468 = arith.mulf %467, %465 : vector<16x128xf32>
    %469 = arith.mulf %460, %435 : vector<16x128xf32>
    %470 = arith.addf %468, %469 : vector<16x128xf32>
    %471 = arith.truncf %470 : vector<16x128xf32> to vector<16x128xbf16>
    %c12 = arith.constant 12 : index
    %c0_95 = arith.constant 0 : index
    %c0_96 = arith.constant 0 : index
    %472 = vector.load %arg9[%c12, %c0_95, %c0_96] : memref<16x16x128xbf16, #tpu.memory_space<vmem>>, vector<1x16x128xbf16>
    %473 = vector.shape_cast %472 : vector<1x16x128xbf16> to vector<16x128xbf16>
    %474 = vector.shape_cast %471 : vector<16x128xbf16> to vector<1x16x128xbf16>
    tpu.vector_store %arg9[%c12, %c0_95, %c0_96], %474 {strides = array<i32>} : memref<16x16x128xbf16, #tpu.memory_space<vmem>>, vector<1x16x128xbf16>,
    %475 = vector.extract_strided_slice %16 {offsets = [13, 0, 0], sizes = [1, 16, 384], strides = [1, 1, 1]} : vector<16x16x384xf32> to vector<1x16x384xf32>
    %476 = vector.shape_cast %475 : vector<1x16x384xf32> to vector<16x384xf32>
    %cst_97 = arith.constant dense<0.000000e+00> : vector<16x384xf32>
    %477 = tpu.matmul %470, %17, %cst_97 {dimension_numbers = #tpu.dot_dimension_numbers<[1], [0], [0], [1], [0, 0, 1, 1], [], []>} : vector<16x128xf32>, vector<128x384xf32>, vector<16x384xf32> -> vector<16x384xf32>
    %478 = vector.broadcast %18 : vector<1x384xf32> to vector<16x384xf32>
    %479 = arith.addf %477, %478 : vector<16x384xf32>
    %480 = vector.extract_strided_slice %476 {offsets = [0, 0], sizes = [16, 128], strides = [1, 1]} : vector<16x384xf32> to vector<16x128xf32>
    %481 = vector.extract_strided_slice %479 {offsets = [0, 0], sizes = [16, 128], strides = [1, 1]} : vector<16x384xf32> to vector<16x128xf32>
    %482 = arith.addf %480, %481 : vector<16x128xf32>
    %483 = arith.negf %482 : vector<16x128xf32>
    %484 = math.exp %483 : vector<16x128xf32>
    %cst_98 = arith.constant 1.000000e+00 : f32
    %485 = vector.broadcast %cst_98 : f32 to vector<16x128xf32>
    %486 = arith.addf %485, %484 : vector<16x128xf32>
    %487 = arith.divf %485, %486 : vector<16x128xf32>
    %488 = vector.extract_strided_slice %476 {offsets = [0, 128], sizes = [16, 128], strides = [1, 1]} : vector<16x384xf32> to vector<16x128xf32>
    %489 = vector.extract_strided_slice %479 {offsets = [0, 128], sizes = [16, 128], strides = [1, 1]} : vector<16x384xf32> to vector<16x128xf32>
    %490 = arith.addf %488, %489 : vector<16x128xf32>
    %491 = arith.negf %490 : vector<16x128xf32>
    %492 = math.exp %491 : vector<16x128xf32>
    %cst_99 = arith.constant 1.000000e+00 : f32
    %493 = vector.broadcast %cst_99 : f32 to vector<16x128xf32>
    %494 = arith.addf %493, %492 : vector<16x128xf32>
    %495 = arith.divf %493, %494 : vector<16x128xf32>
    %496 = vector.extract_strided_slice %476 {offsets = [0, 256], sizes = [16, 128], strides = [1, 1]} : vector<16x384xf32> to vector<16x128xf32>
    %497 = vector.extract_strided_slice %479 {offsets = [0, 256], sizes = [16, 128], strides = [1, 1]} : vector<16x384xf32> to vector<16x128xf32>
    %498 = arith.mulf %487, %497 : vector<16x128xf32>
    %499 = arith.addf %496, %498 : vector<16x128xf32>
    %500 = math.tanh %499 : vector<16x128xf32>
    %cst_100 = arith.constant 1.000000e+00 : f32
    %501 = vector.broadcast %cst_100 : f32 to vector<16x128xf32>
    %502 = arith.subf %501, %495 : vector<16x128xf32>
    %503 = arith.mulf %502, %500 : vector<16x128xf32>
    %504 = arith.mulf %495, %470 : vector<16x128xf32>
    %505 = arith.addf %503, %504 : vector<16x128xf32>
    %506 = arith.truncf %505 : vector<16x128xf32> to vector<16x128xbf16>
    %c13 = arith.constant 13 : index
    %c0_101 = arith.constant 0 : index
    %c0_102 = arith.constant 0 : index
    %507 = vector.load %arg9[%c13, %c0_101, %c0_102] : memref<16x16x128xbf16, #tpu.memory_space<vmem>>, vector<1x16x128xbf16>
    %508 = vector.shape_cast %507 : vector<1x16x128xbf16> to vector<16x128xbf16>
    %509 = vector.shape_cast %506 : vector<16x128xbf16> to vector<1x16x128xbf16>
    tpu.vector_store %arg9[%c13, %c0_101, %c0_102], %509 {strides = array<i32>} : memref<16x16x128xbf16, #tpu.memory_space<vmem>>, vector<1x16x128xbf16>,
    %510 = vector.extract_strided_slice %16 {offsets = [14, 0, 0], sizes = [1, 16, 384], strides = [1, 1, 1]} : vector<16x16x384xf32> to vector<1x16x384xf32>
    %511 = vector.shape_cast %510 : vector<1x16x384xf32> to vector<16x384xf32>
    %cst_103 = arith.constant dense<0.000000e+00> : vector<16x384xf32>
    %512 = tpu.matmul %505, %17, %cst_103 {dimension_numbers = #tpu.dot_dimension_numbers<[1], [0], [0], [1], [0, 0, 1, 1], [], []>} : vector<16x128xf32>, vector<128x384xf32>, vector<16x384xf32> -> vector<16x384xf32>
    %513 = vector.broadcast %18 : vector<1x384xf32> to vector<16x384xf32>
    %514 = arith.addf %512, %513 : vector<16x384xf32>
    %515 = vector.extract_strided_slice %511 {offsets = [0, 0], sizes = [16, 128], strides = [1, 1]} : vector<16x384xf32> to vector<16x128xf32>
    %516 = vector.extract_strided_slice %514 {offsets = [0, 0], sizes = [16, 128], strides = [1, 1]} : vector<16x384xf32> to vector<16x128xf32>
    %517 = arith.addf %515, %516 : vector<16x128xf32>
    %518 = arith.negf %517 : vector<16x128xf32>
    %519 = math.exp %518 : vector<16x128xf32>
    %cst_104 = arith.constant 1.000000e+00 : f32
    %520 = vector.broadcast %cst_104 : f32 to vector<16x128xf32>
    %521 = arith.addf %520, %519 : vector<16x128xf32>
    %522 = arith.divf %520, %521 : vector<16x128xf32>
    %523 = vector.extract_strided_slice %511 {offsets = [0, 128], sizes = [16, 128], strides = [1, 1]} : vector<16x384xf32> to vector<16x128xf32>
    %524 = vector.extract_strided_slice %514 {offsets = [0, 128], sizes = [16, 128], strides = [1, 1]} : vector<16x384xf32> to vector<16x128xf32>
    %525 = arith.addf %523, %524 : vector<16x128xf32>
    %526 = arith.negf %525 : vector<16x128xf32>
    %527 = math.exp %526 : vector<16x128xf32>
    %cst_105 = arith.constant 1.000000e+00 : f32
    %528 = vector.broadcast %cst_105 : f32 to vector<16x128xf32>
    %529 = arith.addf %528, %527 : vector<16x128xf32>
    %530 = arith.divf %528, %529 : vector<16x128xf32>
    %531 = vector.extract_strided_slice %511 {offsets = [0, 256], sizes = [16, 128], strides = [1, 1]} : vector<16x384xf32> to vector<16x128xf32>
    %532 = vector.extract_strided_slice %514 {offsets = [0, 256], sizes = [16, 128], strides = [1, 1]} : vector<16x384xf32> to vector<16x128xf32>
    %533 = arith.mulf %522, %532 : vector<16x128xf32>
    %534 = arith.addf %531, %533 : vector<16x128xf32>
    %535 = math.tanh %534 : vector<16x128xf32>
    %cst_106 = arith.constant 1.000000e+00 : f32
    %536 = vector.broadcast %cst_106 : f32 to vector<16x128xf32>
    %537 = arith.subf %536, %530 : vector<16x128xf32>
    %538 = arith.mulf %537, %535 : vector<16x128xf32>
    %539 = arith.mulf %530, %505 : vector<16x128xf32>
    %540 = arith.addf %538, %539 : vector<16x128xf32>
    %541 = arith.truncf %540 : vector<16x128xf32> to vector<16x128xbf16>
    %c14 = arith.constant 14 : index
    %c0_107 = arith.constant 0 : index
    %c0_108 = arith.constant 0 : index
    %542 = vector.load %arg9[%c14, %c0_107, %c0_108] : memref<16x16x128xbf16, #tpu.memory_space<vmem>>, vector<1x16x128xbf16>
    %543 = vector.shape_cast %542 : vector<1x16x128xbf16> to vector<16x128xbf16>
    %544 = vector.shape_cast %541 : vector<16x128xbf16> to vector<1x16x128xbf16>
    tpu.vector_store %arg9[%c14, %c0_107, %c0_108], %544 {strides = array<i32>} : memref<16x16x128xbf16, #tpu.memory_space<vmem>>, vector<1x16x128xbf16>,
    %545 = vector.extract_strided_slice %16 {offsets = [15, 0, 0], sizes = [1, 16, 384], strides = [1, 1, 1]} : vector<16x16x384xf32> to vector<1x16x384xf32>
    %546 = vector.shape_cast %545 : vector<1x16x384xf32> to vector<16x384xf32>
    %cst_109 = arith.constant dense<0.000000e+00> : vector<16x384xf32>
    %547 = tpu.matmul %540, %17, %cst_109 {dimension_numbers = #tpu.dot_dimension_numbers<[1], [0], [0], [1], [0, 0, 1, 1], [], []>} : vector<16x128xf32>, vector<128x384xf32>, vector<16x384xf32> -> vector<16x384xf32>
    %548 = vector.broadcast %18 : vector<1x384xf32> to vector<16x384xf32>
    %549 = arith.addf %547, %548 : vector<16x384xf32>
    %550 = vector.extract_strided_slice %546 {offsets = [0, 0], sizes = [16, 128], strides = [1, 1]} : vector<16x384xf32> to vector<16x128xf32>
    %551 = vector.extract_strided_slice %549 {offsets = [0, 0], sizes = [16, 128], strides = [1, 1]} : vector<16x384xf32> to vector<16x128xf32>
    %552 = arith.addf %550, %551 : vector<16x128xf32>
    %553 = arith.negf %552 : vector<16x128xf32>
    %554 = math.exp %553 : vector<16x128xf32>
    %cst_110 = arith.constant 1.000000e+00 : f32
    %555 = vector.broadcast %cst_110 : f32 to vector<16x128xf32>
    %556 = arith.addf %555, %554 : vector<16x128xf32>
    %557 = arith.divf %555, %556 : vector<16x128xf32>
    %558 = vector.extract_strided_slice %546 {offsets = [0, 128], sizes = [16, 128], strides = [1, 1]} : vector<16x384xf32> to vector<16x128xf32>
    %559 = vector.extract_strided_slice %549 {offsets = [0, 128], sizes = [16, 128], strides = [1, 1]} : vector<16x384xf32> to vector<16x128xf32>
    %560 = arith.addf %558, %559 : vector<16x128xf32>
    %561 = arith.negf %560 : vector<16x128xf32>
    %562 = math.exp %561 : vector<16x128xf32>
    %cst_111 = arith.constant 1.000000e+00 : f32
    %563 = vector.broadcast %cst_111 : f32 to vector<16x128xf32>
    %564 = arith.addf %563, %562 : vector<16x128xf32>
    %565 = arith.divf %563, %564 : vector<16x128xf32>
    %566 = vector.extract_strided_slice %546 {offsets = [0, 256], sizes = [16, 128], strides = [1, 1]} : vector<16x384xf32> to vector<16x128xf32>
    %567 = vector.extract_strided_slice %549 {offsets = [0, 256], sizes = [16, 128], strides = [1, 1]} : vector<16x384xf32> to vector<16x128xf32>
    %568 = arith.mulf %557, %567 : vector<16x128xf32>
    %569 = arith.addf %566, %568 : vector<16x128xf32>
    %570 = math.tanh %569 : vector<16x128xf32>
    %cst_112 = arith.constant 1.000000e+00 : f32
    %571 = vector.broadcast %cst_112 : f32 to vector<16x128xf32>
    %572 = arith.subf %571, %565 : vector<16x128xf32>
    %573 = arith.mulf %572, %570 : vector<16x128xf32>
    %574 = arith.mulf %565, %540 : vector<16x128xf32>
    %575 = arith.addf %573, %574 : vector<16x128xf32>
    %576 = arith.truncf %575 : vector<16x128xf32> to vector<16x128xbf16>
    %c15 = arith.constant 15 : index
    %c0_113 = arith.constant 0 : index
    %c0_114 = arith.constant 0 : index
    %577 = vector.load %arg9[%c15, %c0_113, %c0_114] : memref<16x16x128xbf16, #tpu.memory_space<vmem>>, vector<1x16x128xbf16>
    %578 = vector.shape_cast %577 : vector<1x16x128xbf16> to vector<16x128xbf16>
    %579 = vector.shape_cast %576 : vector<16x128xbf16> to vector<1x16x128xbf16>
    tpu.vector_store %arg9[%c15, %c0_113, %c0_114], %579 {strides = array<i32>} : memref<16x16x128xbf16, #tpu.memory_space<vmem>>, vector<1x16x128xbf16>,
    %c0_115 = arith.constant 0 : index
    %c0_116 = arith.constant 0 : index
    %580 = vector.load %arg10[%c0_115, %c0_116] : memref<16x128xf32, #tpu.memory_space<vmem>>, vector<16x128xf32>
    tpu.vector_store %arg10[%c0_115, %c0_116], %575 {strides = array<i32>} : memref<16x128xf32, #tpu.memory_space<vmem>>, vector<16x128xf32>,
    return
  }
  func.func @transform_0(%arg0: i32, %arg1: i32) -> (i32, i32, i32) {
    %c0_i32 = arith.constant 0 : i32
    %c0_i32_0 = arith.constant 0 : i32
    return %arg1, %arg0, %c0_i32 : i32, i32, i32
  }
  func.func @transform_1(%arg0: i32, %arg1: i32) -> (i32, i32) {
    %c0_i32 = arith.constant 0 : i32
    %c0_i32_0 = arith.constant 0 : i32
    %c0_i32_1 = arith.constant 0 : i32
    return %c0_i32, %c0_i32_0 : i32, i32
  }
  func.func @transform_2(%arg0: i32, %arg1: i32) -> (i32, i32) {
    %c0_i32 = arith.constant 0 : i32
    %c0_i32_0 = arith.constant 0 : i32
    %c0_i32_1 = arith.constant 0 : i32
    return %c0_i32, %c0_i32_0 : i32, i32
  }
  func.func @transform_3(%arg0: i32, %arg1: i32) -> (i32, i32) {
    %c0_i32 = arith.constant 0 : i32
    %c0_i32_0 = arith.constant 0 : i32
    %c0_i32_1 = arith.constant 0 : i32
    return %c0_i32, %c0_i32_0 : i32, i32
  }
  func.func @transform_4(%arg0: i32, %arg1: i32) -> (i32, i32) {
    %c0_i32 = arith.constant 0 : i32
    %c0_i32_0 = arith.constant 0 : i32
    %c0_i32_1 = arith.constant 0 : i32
    return %c0_i32, %c0_i32_0 : i32, i32
  }
  func.func @transform_5(%arg0: i32, %arg1: i32) -> (i32, i32) {
    %c0_i32 = arith.constant 0 : i32
    %c0_i32_0 = arith.constant 0 : i32
    %c0_i32_1 = arith.constant 0 : i32
    return %c0_i32, %c0_i32_0 : i32, i32
  }
  func.func @transform_6(%arg0: i32, %arg1: i32) -> (i32, i32) {
    %c0_i32 = arith.constant 0 : i32
    %c0_i32_0 = arith.constant 0 : i32
    %c0_i32_1 = arith.constant 0 : i32
    return %c0_i32, %c0_i32_0 : i32, i32
  }
  func.func @transform_7(%arg0: i32, %arg1: i32) -> (i32, i32, i32) {
    %c0_i32 = arith.constant 0 : i32
    %c0_i32_0 = arith.constant 0 : i32
    return %arg1, %arg0, %c0_i32 : i32, i32, i32
  }
}

module attributes {stable_mosaic.version = 11 : i64} {
  func.func @heads_kernel(%arg0: i32, %arg1: memref<1xi32, #tpu.memory_space<smem>>, %arg2: memref<16x16x128xbf16, #tpu.memory_space<vmem>>, %arg3: memref<128x512xbf16, #tpu.memory_space<vmem>>, %arg4: memref<1x512xf32, #tpu.memory_space<vmem>>, %arg5: memref<1x512xf32, #tpu.memory_space<vmem>>, %arg6: memref<512x512xf32, #tpu.memory_space<vmem>>, %arg7: memref<1x512xf32, #tpu.memory_space<vmem>>, %arg8: memref<512x4xf32, #tpu.memory_space<vmem>>, %arg9: memref<1x4xf32, #tpu.memory_space<vmem>>, %arg10: memref<16x4xf32, #tpu.memory_space<vmem>>, %arg11: memref<16x512xf32, #tpu.memory_space<vmem>>) attributes {dimension_semantics = [#tpu.dimension_semantics<parallel>], iteration_bounds = array<i64: 1>, scalar_prefetch = 1 : i64, scratch_operands = 1 : i64, tpu.core_type = #tpu.core_type<tc>, window_params = [{transform_indices = @transform_0, window_bounds = array<i64: 16, 16, 128>}, {pipeline_mode = #tpu.pipeline_mode<synchronous>, transform_indices = @transform_1, window_bounds = array<i64: 128, 512>}, {pipeline_mode = #tpu.pipeline_mode<synchronous>, transform_indices = @transform_2, window_bounds = array<i64: 1, 512>}, {pipeline_mode = #tpu.pipeline_mode<synchronous>, transform_indices = @transform_3, window_bounds = array<i64: 1, 512>}, {pipeline_mode = #tpu.pipeline_mode<synchronous>, transform_indices = @transform_4, window_bounds = array<i64: 512, 512>}, {pipeline_mode = #tpu.pipeline_mode<synchronous>, transform_indices = @transform_5, window_bounds = array<i64: 1, 512>}, {pipeline_mode = #tpu.pipeline_mode<synchronous>, transform_indices = @transform_6, window_bounds = array<i64: 512, 4>}, {pipeline_mode = #tpu.pipeline_mode<synchronous>, transform_indices = @transform_7, window_bounds = array<i64: 1, 4>}, {transform_indices = @transform_8, window_bounds = array<i64: 16, 4>}]} {
    %c0 = arith.constant 0 : index
    %0 = memref.load %arg1[%c0] : memref<1xi32, #tpu.memory_space<smem>>
    %c0_0 = arith.constant 0 : index
    %c0_1 = arith.constant 0 : index
    %c0_2 = arith.constant 0 : index
    %1 = vector.load %arg2[%c0_0, %c0_1, %c0_2] : memref<16x16x128xbf16, #tpu.memory_space<vmem>>, vector<16x16x128xbf16>
    %2 = vector.shape_cast %1 : vector<16x16x128xbf16> to vector<256x128xbf16>
    %c0_3 = arith.constant 0 : index
    %c0_4 = arith.constant 0 : index
    %3 = vector.load %arg3[%c0_3, %c0_4] : memref<128x512xbf16, #tpu.memory_space<vmem>>, vector<128x512xbf16>
    %cst = arith.constant dense<0.000000e+00> : vector<256x512xf32>
    %4 = tpu.matmul %2, %3, %cst {dimension_numbers = #tpu.dot_dimension_numbers<[1], [0], [0], [1], [0, 0, 1, 1], [], []>} : vector<256x128xbf16>, vector<128x512xbf16>, vector<256x512xf32> -> vector<256x512xf32>
    %c0_5 = arith.constant 0 : index
    %c0_6 = arith.constant 0 : index
    %5 = vector.load %arg4[%c0_5, %c0_6] : memref<1x512xf32, #tpu.memory_space<vmem>>, vector<1x512xf32>
    %6 = vector.broadcast %5 : vector<1x512xf32> to vector<256x512xf32>
    %7 = arith.addf %4, %6 : vector<256x512xf32>
    %cst_7 = arith.constant 0.000000e+00 : f32
    %8 = vector.broadcast %cst_7 : f32 to vector<256x512xf32>
    %9 = arith.maximumf %7, %8 : vector<256x512xf32>
    %10 = vector.shape_cast %9 : vector<256x512xf32> to vector<16x16x512xf32>
    %11 = tpu.iota {dimensions = array<i32: 0>} : vector<16x16xi32>
    %12 = vector.broadcast %0 : i32 to vector<16x16xi32>
    %13 = arith.cmpi slt, %11, %12 : vector<16x16xi32>
    %14 = vector.extract_strided_slice %10 {offsets = [0, 0, 0], sizes = [16, 16, 128], strides = [1, 1, 1]} : vector<16x16x512xf32> to vector<16x16x128xf32>
    %c0_8 = arith.constant 0 : index
    %c0_9 = arith.constant 0 : index
    %15 = vector.load %arg5[%c0_8, %c0_9] : memref<1x512xf32, #tpu.memory_space<vmem>>, vector<1x128xf32>
    %16 = vector.shape_cast %15 : vector<1x128xf32> to vector<1x1x128xf32>
    %17 = vector.broadcast %16 : vector<1x1x128xf32> to vector<16x16x128xf32>
    %18 = arith.mulf %14, %17 : vector<16x16x128xf32>
    %cst_10 = arith.constant dense<0.000000e+00> : vector<16x16xf32>
    %19 = vector.multi_reduction <add>, %18, %cst_10 [2] : vector<16x16x128xf32> to vector<16x16xf32>
    %cst_11 = arith.constant -1.000000e+30 : f32
    %20 = vector.broadcast %cst_11 : f32 to vector<16x16xf32>
    %21 = arith.select %13, %19, %20 : vector<16x16xi1>, vector<16x16xf32>
    %cst_12 = arith.constant dense<0xFF800000> : vector<16xf32>
    %22 = vector.multi_reduction <maximumf>, %21, %cst_12 [0] : vector<16x16xf32> to vector<16xf32>
    %23 = vector.shape_cast %22 : vector<16xf32> to vector<1x16xf32>
    %24 = vector.broadcast %23 : vector<1x16xf32> to vector<16x16xf32>
    %25 = arith.subf %21, %24 : vector<16x16xf32>
    %26 = math.exp %25 : vector<16x16xf32>
    %cst_13 = arith.constant dense<0.000000e+00> : vector<16xf32>
    %27 = vector.multi_reduction <add>, %26, %cst_13 [0] : vector<16x16xf32> to vector<16xf32>
    %28 = vector.shape_cast %27 : vector<16xf32> to vector<1x16xf32>
    %29 = vector.broadcast %28 : vector<1x16xf32> to vector<16x16xf32>
    %30 = arith.divf %26, %29 : vector<16x16xf32>
    %31 = vector.shape_cast %30 : vector<16x16xf32> to vector<16x16x1xf32>
    %32 = vector.broadcast %31 : vector<16x16x1xf32> to vector<16x16x128xf32>
    %33 = arith.mulf %14, %32 : vector<16x16x128xf32>
    %cst_14 = arith.constant dense<0.000000e+00> : vector<16x128xf32>
    %34 = vector.multi_reduction <add>, %33, %cst_14 [0] : vector<16x16x128xf32> to vector<16x128xf32>
    %c0_15 = arith.constant 0 : index
    %c0_16 = arith.constant 0 : index
    %35 = vector.load %arg11[%c0_15, %c0_16] : memref<16x512xf32, #tpu.memory_space<vmem>>, vector<16x128xf32>
    tpu.vector_store %arg11[%c0_15, %c0_16], %34 {strides = array<i32>} : memref<16x512xf32, #tpu.memory_space<vmem>>, vector<16x128xf32>,
    %36 = vector.extract_strided_slice %10 {offsets = [0, 0, 128], sizes = [16, 16, 128], strides = [1, 1, 1]} : vector<16x16x512xf32> to vector<16x16x128xf32>
    %c0_17 = arith.constant 0 : index
    %c128 = arith.constant 128 : index
    %37 = vector.load %arg5[%c0_17, %c128] : memref<1x512xf32, #tpu.memory_space<vmem>>, vector<1x128xf32>
    %38 = vector.shape_cast %37 : vector<1x128xf32> to vector<1x1x128xf32>
    %39 = vector.broadcast %38 : vector<1x1x128xf32> to vector<16x16x128xf32>
    %40 = arith.mulf %36, %39 : vector<16x16x128xf32>
    %cst_18 = arith.constant dense<0.000000e+00> : vector<16x16xf32>
    %41 = vector.multi_reduction <add>, %40, %cst_18 [2] : vector<16x16x128xf32> to vector<16x16xf32>
    %cst_19 = arith.constant -1.000000e+30 : f32
    %42 = vector.broadcast %cst_19 : f32 to vector<16x16xf32>
    %43 = arith.select %13, %41, %42 : vector<16x16xi1>, vector<16x16xf32>
    %cst_20 = arith.constant dense<0xFF800000> : vector<16xf32>
    %44 = vector.multi_reduction <maximumf>, %43, %cst_20 [0] : vector<16x16xf32> to vector<16xf32>
    %45 = vector.shape_cast %44 : vector<16xf32> to vector<1x16xf32>
    %46 = vector.broadcast %45 : vector<1x16xf32> to vector<16x16xf32>
    %47 = arith.subf %43, %46 : vector<16x16xf32>
    %48 = math.exp %47 : vector<16x16xf32>
    %cst_21 = arith.constant dense<0.000000e+00> : vector<16xf32>
    %49 = vector.multi_reduction <add>, %48, %cst_21 [0] : vector<16x16xf32> to vector<16xf32>
    %50 = vector.shape_cast %49 : vector<16xf32> to vector<1x16xf32>
    %51 = vector.broadcast %50 : vector<1x16xf32> to vector<16x16xf32>
    %52 = arith.divf %48, %51 : vector<16x16xf32>
    %53 = vector.shape_cast %52 : vector<16x16xf32> to vector<16x16x1xf32>
    %54 = vector.broadcast %53 : vector<16x16x1xf32> to vector<16x16x128xf32>
    %55 = arith.mulf %36, %54 : vector<16x16x128xf32>
    %cst_22 = arith.constant dense<0.000000e+00> : vector<16x128xf32>
    %56 = vector.multi_reduction <add>, %55, %cst_22 [0] : vector<16x16x128xf32> to vector<16x128xf32>
    %c0_23 = arith.constant 0 : index
    %c128_24 = arith.constant 128 : index
    %57 = vector.load %arg11[%c0_23, %c128_24] : memref<16x512xf32, #tpu.memory_space<vmem>>, vector<16x128xf32>
    tpu.vector_store %arg11[%c0_23, %c128_24], %56 {strides = array<i32>} : memref<16x512xf32, #tpu.memory_space<vmem>>, vector<16x128xf32>,
    %58 = vector.extract_strided_slice %10 {offsets = [0, 0, 256], sizes = [16, 16, 128], strides = [1, 1, 1]} : vector<16x16x512xf32> to vector<16x16x128xf32>
    %c0_25 = arith.constant 0 : index
    %c256 = arith.constant 256 : index
    %59 = vector.load %arg5[%c0_25, %c256] : memref<1x512xf32, #tpu.memory_space<vmem>>, vector<1x128xf32>
    %60 = vector.shape_cast %59 : vector<1x128xf32> to vector<1x1x128xf32>
    %61 = vector.broadcast %60 : vector<1x1x128xf32> to vector<16x16x128xf32>
    %62 = arith.mulf %58, %61 : vector<16x16x128xf32>
    %cst_26 = arith.constant dense<0.000000e+00> : vector<16x16xf32>
    %63 = vector.multi_reduction <add>, %62, %cst_26 [2] : vector<16x16x128xf32> to vector<16x16xf32>
    %cst_27 = arith.constant -1.000000e+30 : f32
    %64 = vector.broadcast %cst_27 : f32 to vector<16x16xf32>
    %65 = arith.select %13, %63, %64 : vector<16x16xi1>, vector<16x16xf32>
    %cst_28 = arith.constant dense<0xFF800000> : vector<16xf32>
    %66 = vector.multi_reduction <maximumf>, %65, %cst_28 [0] : vector<16x16xf32> to vector<16xf32>
    %67 = vector.shape_cast %66 : vector<16xf32> to vector<1x16xf32>
    %68 = vector.broadcast %67 : vector<1x16xf32> to vector<16x16xf32>
    %69 = arith.subf %65, %68 : vector<16x16xf32>
    %70 = math.exp %69 : vector<16x16xf32>
    %cst_29 = arith.constant dense<0.000000e+00> : vector<16xf32>
    %71 = vector.multi_reduction <add>, %70, %cst_29 [0] : vector<16x16xf32> to vector<16xf32>
    %72 = vector.shape_cast %71 : vector<16xf32> to vector<1x16xf32>
    %73 = vector.broadcast %72 : vector<1x16xf32> to vector<16x16xf32>
    %74 = arith.divf %70, %73 : vector<16x16xf32>
    %75 = vector.shape_cast %74 : vector<16x16xf32> to vector<16x16x1xf32>
    %76 = vector.broadcast %75 : vector<16x16x1xf32> to vector<16x16x128xf32>
    %77 = arith.mulf %58, %76 : vector<16x16x128xf32>
    %cst_30 = arith.constant dense<0.000000e+00> : vector<16x128xf32>
    %78 = vector.multi_reduction <add>, %77, %cst_30 [0] : vector<16x16x128xf32> to vector<16x128xf32>
    %c0_31 = arith.constant 0 : index
    %c256_32 = arith.constant 256 : index
    %79 = vector.load %arg11[%c0_31, %c256_32] : memref<16x512xf32, #tpu.memory_space<vmem>>, vector<16x128xf32>
    tpu.vector_store %arg11[%c0_31, %c256_32], %78 {strides = array<i32>} : memref<16x512xf32, #tpu.memory_space<vmem>>, vector<16x128xf32>,
    %80 = vector.extract_strided_slice %10 {offsets = [0, 0, 384], sizes = [16, 16, 128], strides = [1, 1, 1]} : vector<16x16x512xf32> to vector<16x16x128xf32>
    %c0_33 = arith.constant 0 : index
    %c384 = arith.constant 384 : index
    %81 = vector.load %arg5[%c0_33, %c384] : memref<1x512xf32, #tpu.memory_space<vmem>>, vector<1x128xf32>
    %82 = vector.shape_cast %81 : vector<1x128xf32> to vector<1x1x128xf32>
    %83 = vector.broadcast %82 : vector<1x1x128xf32> to vector<16x16x128xf32>
    %84 = arith.mulf %80, %83 : vector<16x16x128xf32>
    %cst_34 = arith.constant dense<0.000000e+00> : vector<16x16xf32>
    %85 = vector.multi_reduction <add>, %84, %cst_34 [2] : vector<16x16x128xf32> to vector<16x16xf32>
    %cst_35 = arith.constant -1.000000e+30 : f32
    %86 = vector.broadcast %cst_35 : f32 to vector<16x16xf32>
    %87 = arith.select %13, %85, %86 : vector<16x16xi1>, vector<16x16xf32>
    %cst_36 = arith.constant dense<0xFF800000> : vector<16xf32>
    %88 = vector.multi_reduction <maximumf>, %87, %cst_36 [0] : vector<16x16xf32> to vector<16xf32>
    %89 = vector.shape_cast %88 : vector<16xf32> to vector<1x16xf32>
    %90 = vector.broadcast %89 : vector<1x16xf32> to vector<16x16xf32>
    %91 = arith.subf %87, %90 : vector<16x16xf32>
    %92 = math.exp %91 : vector<16x16xf32>
    %cst_37 = arith.constant dense<0.000000e+00> : vector<16xf32>
    %93 = vector.multi_reduction <add>, %92, %cst_37 [0] : vector<16x16xf32> to vector<16xf32>
    %94 = vector.shape_cast %93 : vector<16xf32> to vector<1x16xf32>
    %95 = vector.broadcast %94 : vector<1x16xf32> to vector<16x16xf32>
    %96 = arith.divf %92, %95 : vector<16x16xf32>
    %97 = vector.shape_cast %96 : vector<16x16xf32> to vector<16x16x1xf32>
    %98 = vector.broadcast %97 : vector<16x16x1xf32> to vector<16x16x128xf32>
    %99 = arith.mulf %80, %98 : vector<16x16x128xf32>
    %cst_38 = arith.constant dense<0.000000e+00> : vector<16x128xf32>
    %100 = vector.multi_reduction <add>, %99, %cst_38 [0] : vector<16x16x128xf32> to vector<16x128xf32>
    %c0_39 = arith.constant 0 : index
    %c384_40 = arith.constant 384 : index
    %101 = vector.load %arg11[%c0_39, %c384_40] : memref<16x512xf32, #tpu.memory_space<vmem>>, vector<16x128xf32>
    tpu.vector_store %arg11[%c0_39, %c384_40], %100 {strides = array<i32>} : memref<16x512xf32, #tpu.memory_space<vmem>>, vector<16x128xf32>,
    %c0_41 = arith.constant 0 : index
    %c0_42 = arith.constant 0 : index
    %102 = vector.load %arg11[%c0_41, %c0_42] : memref<16x512xf32, #tpu.memory_space<vmem>>, vector<16x512xf32>
    %c0_43 = arith.constant 0 : index
    %c0_44 = arith.constant 0 : index
    %103 = vector.load %arg6[%c0_43, %c0_44] : memref<512x512xf32, #tpu.memory_space<vmem>>, vector<512x512xf32>
    %cst_45 = arith.constant dense<0.000000e+00> : vector<16x512xf32>
    %104 = tpu.matmul %102, %103, %cst_45 {dimension_numbers = #tpu.dot_dimension_numbers<[1], [0], [0], [1], [0, 0, 1, 1], [], []>} : vector<16x512xf32>, vector<512x512xf32>, vector<16x512xf32> -> vector<16x512xf32>
    %c0_46 = arith.constant 0 : index
    %c0_47 = arith.constant 0 : index
    %105 = vector.load %arg7[%c0_46, %c0_47] : memref<1x512xf32, #tpu.memory_space<vmem>>, vector<1x512xf32>
    %106 = vector.broadcast %105 : vector<1x512xf32> to vector<16x512xf32>
    %107 = arith.addf %104, %106 : vector<16x512xf32>
    %cst_48 = arith.constant 0.000000e+00 : f32
    %108 = vector.broadcast %cst_48 : f32 to vector<16x512xf32>
    %109 = arith.maximumf %107, %108 : vector<16x512xf32>
    %c0_49 = arith.constant 0 : index
    %c0_50 = arith.constant 0 : index
    %110 = vector.load %arg8[%c0_49, %c0_50] : memref<512x4xf32, #tpu.memory_space<vmem>>, vector<512x4xf32>
    %cst_51 = arith.constant dense<0.000000e+00> : vector<16x4xf32>
    %111 = tpu.matmul %109, %110, %cst_51 {dimension_numbers = #tpu.dot_dimension_numbers<[1], [0], [0], [1], [0, 0, 1, 1], [], []>} : vector<16x512xf32>, vector<512x4xf32>, vector<16x4xf32> -> vector<16x4xf32>
    %c0_52 = arith.constant 0 : index
    %c0_53 = arith.constant 0 : index
    %112 = vector.load %arg9[%c0_52, %c0_53] : memref<1x4xf32, #tpu.memory_space<vmem>>, vector<1x4xf32>
    %113 = vector.broadcast %112 : vector<1x4xf32> to vector<16x4xf32>
    %114 = arith.addf %111, %113 : vector<16x4xf32>
    %c0_54 = arith.constant 0 : index
    %c0_55 = arith.constant 0 : index
    %115 = vector.load %arg10[%c0_54, %c0_55] : memref<16x4xf32, #tpu.memory_space<vmem>>, vector<16x4xf32>
    tpu.vector_store %arg10[%c0_54, %c0_55], %114 {strides = array<i32>} : memref<16x4xf32, #tpu.memory_space<vmem>>, vector<16x4xf32>,
    return
  }
  func.func @transform_0(%arg0: i32, %arg1: memref<1xi32, #tpu.memory_space<smem>>) -> (i32, i32, i32) {
    %c0_i32 = arith.constant 0 : i32
    %c0_i32_0 = arith.constant 0 : i32
    %c0_i32_1 = arith.constant 0 : i32
    return %c0_i32, %arg0, %c0_i32_0 : i32, i32, i32
  }
  func.func @transform_1(%arg0: i32, %arg1: memref<1xi32, #tpu.memory_space<smem>>) -> (i32, i32) {
    %c0_i32 = arith.constant 0 : i32
    %c0_i32_0 = arith.constant 0 : i32
    %c0_i32_1 = arith.constant 0 : i32
    return %c0_i32, %c0_i32_0 : i32, i32
  }
  func.func @transform_2(%arg0: i32, %arg1: memref<1xi32, #tpu.memory_space<smem>>) -> (i32, i32) {
    %c0_i32 = arith.constant 0 : i32
    %c0_i32_0 = arith.constant 0 : i32
    %c0_i32_1 = arith.constant 0 : i32
    return %c0_i32, %c0_i32_0 : i32, i32
  }
  func.func @transform_3(%arg0: i32, %arg1: memref<1xi32, #tpu.memory_space<smem>>) -> (i32, i32) {
    %c0_i32 = arith.constant 0 : i32
    %c0_i32_0 = arith.constant 0 : i32
    %c0_i32_1 = arith.constant 0 : i32
    return %c0_i32, %c0_i32_0 : i32, i32
  }
  func.func @transform_4(%arg0: i32, %arg1: memref<1xi32, #tpu.memory_space<smem>>) -> (i32, i32) {
    %c0_i32 = arith.constant 0 : i32
    %c0_i32_0 = arith.constant 0 : i32
    %c0_i32_1 = arith.constant 0 : i32
    return %c0_i32, %c0_i32_0 : i32, i32
  }
  func.func @transform_5(%arg0: i32, %arg1: memref<1xi32, #tpu.memory_space<smem>>) -> (i32, i32) {
    %c0_i32 = arith.constant 0 : i32
    %c0_i32_0 = arith.constant 0 : i32
    %c0_i32_1 = arith.constant 0 : i32
    return %c0_i32, %c0_i32_0 : i32, i32
  }
  func.func @transform_6(%arg0: i32, %arg1: memref<1xi32, #tpu.memory_space<smem>>) -> (i32, i32) {
    %c0_i32 = arith.constant 0 : i32
    %c0_i32_0 = arith.constant 0 : i32
    %c0_i32_1 = arith.constant 0 : i32
    return %c0_i32, %c0_i32_0 : i32, i32
  }
  func.func @transform_7(%arg0: i32, %arg1: memref<1xi32, #tpu.memory_space<smem>>) -> (i32, i32) {
    %c0_i32 = arith.constant 0 : i32
    %c0_i32_0 = arith.constant 0 : i32
    %c0_i32_1 = arith.constant 0 : i32
    return %c0_i32, %c0_i32_0 : i32, i32
  }
  func.func @transform_8(%arg0: i32, %arg1: memref<1xi32, #tpu.memory_space<smem>>) -> (i32, i32) {
    %c0_i32 = arith.constant 0 : i32
    %c0_i32_0 = arith.constant 0 : i32
    return %arg0, %c0_i32 : i32, i32
  }
}

</mosaic_0001>

<bundles_post_ra>
// kernel: forward.2
= control target key start
LH: loop header
LB: loop body
LE: loop exit
PB: predicated region body
PF: predicated region fallthrough
CT: control target
= control target key end

     0   :  { %vm79_vm0 = vcmask 523264   ;;  %s9077_s1 = inlined_call_operand.vmem [shape: f32[64,128], index: 1, kind: input, shape index: {}]   ;;  %s9078_s0 = inlined_call_operand.vmem [shape: f32[16,16,64], index: 0, kind: input, shape index: {}]   ;;  %s9079_s3 = inlined_call_operand.vmem [shape: f32[128,384], index: 3, kind: input, shape index: {}]   ;;  %s9080_s5 = inlined_call_operand.vmem [shape: f32[128,384], index: 5, kind: input, shape index: {}]   ;;  %s9081_s2 = inlined_call_operand.vmem [shape: f32[1,128], index: 2, kind: input, shape index: {}]   ;;  %s9082_s4 = inlined_call_operand.vmem [shape: f32[1,384], index: 4, kind: input, shape index: {}]   ;;  %s9083_s6 = inlined_call_operand.vmem [shape: f32[1,384], index: 6, kind: input, shape index: {}]   ;;  %s9084_s7 = inlined_call_operand.vmem [shape: bf16[16,16,128], index: 7, kind: output, shape index: {}]  }
   0x1   :  { %v64_v0 = vld [vmem:[%s9077_s1] sm:$0xff]  ;;  %v65_v1 = vld [vmem:[%s9077_s1 + $0x8] sm:$0xff]  ;;  %v66_v2 = vld [vmem:[%s9077_s1 + $0x10] sm:$0xff] }
   0x2   :  { %v5698_v3 = vpack.c.bf16 %v65_v1, %v64_v0  ;;  %v67_v4 = vld [vmem:[%s9077_s1 + $0x18] sm:$0xff]  ;;  %v68_v6 = vld [vmem:[%s9077_s1 + $0x20] sm:$0xff]  ;;  %v69_v7 = vld [vmem:[%s9077_s1 + $0x28] sm:$0xff] }
   0x3   :  { %v5702_v5 = vpack.c.bf16 %v67_v4, %v66_v2  ;;  %v32_v8 = vld [vmem:[%s9078_s0] sm:$0xff]  ;;  %v5706_v9 = vpack.c.bf16 %v69_v7, %v68_v6  ;;  %v70_v10 = vld [vmem:[%s9077_s1 + $0x30] sm:$0xff]  ;;  %v71_v11 = vld [vmem:[%s9077_s1 + $0x38] sm:$0xff] }
   0x4   :  { %5699 = vmatprep.subr.bf16.mxu0 %v5698_v3  ;;  %5010 = vmatprep.mubr.msk.f32.mxu0 %vm79_vm0, %v32_v8  ;;  %v5710_v12 = vpack.c.bf16 %v71_v11, %v70_v10  ;;  %v434_v13 = vld [vmem:[%s9079_s3 + $0x8] sm:$0xff]  ;;  %v437_v14 = vld [vmem:[%s9079_s3 + $0x20] sm:$0xff]  ;;  %v436_v18 = vld [vmem:[%s9079_s3 + $0x18] sm:$0xff] }
   0x5   :  { %5701 = vmatpush3.bf16.msra.mxu0 %v5698_v3  ;;  %v33_v15 = vld [vmem:[%s9078_s0 + $0x8] sm:$0xff]  ;;  %v5714_v16 = vpack.c.bf16 %v437_v14, %v434_v13  ;;  %v433_v17 = vld [vmem:[%s9079_s3] sm:$0xff]  ;;  %v435_v19 = vld [vmem:[%s9079_s3 + $0x10] sm:$0xff] }
   0x6   :  { %5703 = vmatprep.subr.bf16.mxu0 %v5702_v5  ;;  %v34_v20 = vld [vmem:[%s9078_s0 + $0x10] sm:$0xff]  ;;  %v5716_v21 = vpack.c.bf16 %v436_v18, %v433_v17  ;;  %v438_v22 = vld [vmem:[%s9079_s3 + $0x28] sm:$0xff]  ;;  %v440_v23 = vld [vmem:[%s9079_s3 + $0x38] sm:$0xff] }
   0x7   :  { %v443_v24 = vld [vmem:[%s9079_s3 + $0x50] sm:$0xff]  ;;  %5715 = vmatprep.subr.bf16.mxu1 %v5714_v16  ;;  %v5746_v25 = vpack.c.bf16 %v438_v22, %v435_v19  ;;  %v442_v28 = vld [vmem:[%s9079_s3 + $0x48] sm:$0xff]  ;;  %v441_v29 = vld [vmem:[%s9079_s3 + $0x40] sm:$0xff] }
   0x8   :  { %v5718_v26 = vpack.c.bf16 %v443_v24, %v440_v23  ;;  %v439_v27 = vld [vmem:[%s9079_s3 + $0x30] sm:$0xff]  ;;  %5717 = vmatpush1.bf16.msra.mxu1 %v5716_v21  ;;  %v444_v31 = vld [vmem:[%s9079_s3 + $0x58] sm:$0xff]  ;;  %v446_v32 = vld [vmem:[%s9079_s3 + $0x68] sm:$0xff] }
   0x9   :  { %5705 = vmatpush3.bf16.msra.mxu0 %v5702_v5  ;;  %v5720_v30 = vpack.c.bf16 %v442_v28, %v439_v27  ;;  %v449_v33 = vld [vmem:[%s9079_s3 + $0x80] sm:$0xff]  ;;  %v5750_v34 = vpack.c.bf16 %v444_v31, %v441_v29  ;;  %v448_v37 = vld [vmem:[%s9079_s3 + $0x78] sm:$0xff]  ;;  %v447_v38 = vld [vmem:[%s9079_s3 + $0x70] sm:$0xff] }
   0xa   :  { %5707 = vmatprep.subr.bf16.mxu0 %v5706_v9  ;;  %5719 = vmatprep.subr.bf16.mxu1 %v5718_v26  ;;  %v5722_v35 = vpack.c.bf16 %v449_v33, %v446_v32  ;;  %v445_v36 = vld [vmem:[%s9079_s3 + $0x60] sm:$0xff]  ;;  %v450_v39 = vld [vmem:[%s9079_s3 + $0x88] sm:$0xff]  ;;  %v452_v40 = vld [vmem:[%s9079_s3 + $0x98] sm:$0xff] }
   0xb   :  { %v455_v41 = vld [vmem:[%s9079_s3 + $0xb0] sm:$0xff]  ;;  %v35_v42 = vld [vmem:[%s9078_s0 + $0x18] sm:$0xff]  ;;  %v36_v43 = vld [vmem:[%s9078_s0 + $0x20] sm:$0xff]  ;;  %v5724_v44 = vpack.c.bf16 %v448_v37, %v445_v36  ;;  %v5754_v45 = vpack.c.bf16 %v450_v39, %v447_v38 }
   0xc   :  { %5721 = vmatpush1.bf16.msra.mxu1 %v5720_v30  ;;  %v451_v46 = vld [vmem:[%s9079_s3 + $0x90] sm:$0xff]  ;;  %v5726_v47 = vpack.c.bf16 %v455_v41, %v452_v40  ;;  %v454_v48 = vld [vmem:[%s9079_s3 + $0xa8] sm:$0xff]  ;;  %v453_v49 = vld [vmem:[%s9079_s3 + $0xa0] sm:$0xff] }
   0xd   :  { %5709 = vmatpush3.bf16.msra.mxu0 %v5706_v9  ;;  %5723 = vmatprep.subr.bf16.mxu1 %v5722_v35  ;;  %v456_v50 = vld [vmem:[%s9079_s3 + $0xb8] sm:$0xff]  ;;  %v458_v51 = vld [vmem:[%s9079_s3 + $0xc8] sm:$0xff]  ;;  %v461_v52 = vld [vmem:[%s9079_s3 + $0xe0] sm:$0xff]  ;;  %v5728_v55 = vpack.c.bf16 %v454_v48, %v451_v46 }
   0xe   :  { %5711 = vmatprep.subr.bf16.mxu0 %v5710_v12  ;;  %v37_v53 = vld [vmem:[%s9078_s0 + $0x28] sm:$0xff]  ;;  %v38_v54 = vld [vmem:[%s9078_s0 + $0x30] sm:$0xff]  ;;  %v5758_v56 = vpack.c.bf16 %v456_v50, %v453_v49  ;;  %v5730_v57 = vpack.c.bf16 %v461_v52, %v458_v51  ;;  %v457_v58 = vld [vmem:[%s9079_s3 + $0xc0] sm:$0xff]  ;;  %v9085_v52 = vmov 0.0  }
   0xf   :  { %v460_v59 = vld [vmem:[%s9079_s3 + $0xd8] sm:$0xff]  ;;  %v40_v61 = vld [vmem:[%s9078_s0 + $0x40] sm:$0xff]  ;;  %v41_v63 = vld [vmem:[%s9078_s0 + $0x48] sm:$0xff]  ;;  %562 = vmatprep.mubr.f32.mxu1 %v9085_v52 }
  0x10   :  { %5725 = vmatpush1.bf16.msra.mxu1 %v5724_v44  ;;  %v39_v60 = vld [vmem:[%s9078_s0 + $0x38] sm:$0xff]  ;;  %v5732_v62 = vpack.c.bf16 %v460_v59, %v457_v58  ;;  %v42_v0 = vld [vmem:[%s9078_s0 + $0x50] sm:$0xff]  ;;  %v44_v2 = vld [vmem:[%s9078_s0 + $0x60] sm:$0xff] }
  0x11   :  { %5713 = vmatpush3.bf16.msra.mxu0 %v5710_v12  ;;  %5727 = vmatprep.subr.bf16.mxu1 %v5726_v47  ;;  %v43_v1 = vld [vmem:[%s9078_s0 + $0x58] sm:$0xff]  ;;  %v45_v3 = vld [vmem:[%s9078_s0 + $0x68] sm:$0xff]  ;;  %v46_v4 = vld [vmem:[%s9078_s0 + $0x70] sm:$0xff] }
  0x12   :  { %5747 = vmatprep.subr.bf16.mxu0 %v5746_v25  ;;  %v47_v5 = vld [vmem:[%s9078_s0 + $0x78] sm:$0xff]  ;;  %v48_v6 = vld [vmem:[%s9078_s0 + $0x80] sm:$0xff]  ;;  %v49_v7 = vld [vmem:[%s9078_s0 + $0x88] sm:$0xff] }
  0x13   :  { %v50_v8 = vld [vmem:[%s9078_s0 + $0x90] sm:$0xff]  ;;  %v51_v9 = vld [vmem:[%s9078_s0 + $0x98] sm:$0xff]  ;;  %v52_v10 = vld [vmem:[%s9078_s0 + $0xa0] sm:$0xff] }
  0x14   :  { %5011 = vmatmul.mubr.msk.f32.vlgmr.msra.gmra.mrb[0].mxu0 %vm79_vm0, %v33_v15  ;;  %5729 = vmatpush1.bf16.msra.mxu1 %v5728_v55  ;;  %v53_v11 = vld [vmem:[%s9078_s0 + $0xa8] sm:$0xff]  ;;  %v54_v12 = vld [vmem:[%s9078_s0 + $0xb0] sm:$0xff]  ;;  %v55_v13 = vld [vmem:[%s9078_s0 + $0xb8] sm:$0xff] }
  0x15   :  { %5013 = vmatprep.mubr.msk.f32.mxu0 %vm79_vm0, %v34_v20  ;;  %5749 = vmatpush3.bf16.msra.mxu0 %v5746_v25  ;;  %v56_v14 = vld [vmem:[%s9078_s0 + $0xc0] sm:$0xff]  ;;  %v57_v15 = vld [vmem:[%s9078_s0 + $0xc8] sm:$0xff]  ;;  %v58_v16 = vld [vmem:[%s9078_s0 + $0xd0] sm:$0xff] }
  0x16   :  { %5751 = vmatprep.subr.bf16.mxu0 %v5750_v34  ;;  %5731 = vmatprep.subr.bf16.mxu1 %v5730_v57  ;;  %v59_v17 = vld [vmem:[%s9078_s0 + $0xd8] sm:$0xff]  ;;  %v60_v18 = vld [vmem:[%s9078_s0 + $0xe0] sm:$0xff]  ;;  %v61_v19 = vld [vmem:[%s9078_s0 + $0xe8] sm:$0xff] }
  0x17   :  { %v62_v20 = vld [vmem:[%s9078_s0 + $0xf0] sm:$0xff]  ;;  %v63_v21 = vld [vmem:[%s9078_s0 + $0xf8] sm:$0xff]  ;;  %v462_v23 = vld [vmem:[%s9079_s3 + $0xe8] sm:$0xff] }
  0x18   :  { %5014 = vmatmul.mubr.msk.f32.gmra.mrb[2].mxu0 %vm79_vm0, %v35_v42  ;;  %5733 = vmatpush1.bf16.msra.mxu1 %v5732_v62  ;;  %v459_v22 = vld [vmem:[%s9079_s3 + $0xd0] sm:$0xff]  ;;  %v464_v25 = vld [vmem:[%s9079_s3 + $0xf8] sm:$0xff]  ;;  %v466_v29 = vld [vmem:[%s9079_s3 + $0x108] sm:$0xff] }
  0x19   :  { %5016 = vmatprep.mubr.msk.f32.mxu0 %vm79_vm0, %v36_v43  ;;  %5753 = vmatpush3.bf16.msra.mxu0 %v5750_v34  ;;  %v5762_v24 = vpack.c.bf16 %v462_v23, %v459_v22  ;;  %v467_v26 = vld [vmem:[%s9079_s3 + $0x110] sm:$0xff]  ;;  %v465_v30 = vld [vmem:[%s9079_s3 + $0x100] sm:$0xff]  ;;  %v468_v32 = vld [vmem:[%s9079_s3 + $0x118] sm:$0xff] }
  0x1a   :  { %5755 = vmatprep.subr.bf16.mxu0 %v5754_v45  ;;  %v5734_v27 = vpack.c.bf16 %v467_v26, %v464_v25  ;;  %v463_v28 = vld [vmem:[%s9079_s3 + $0xf0] sm:$0xff]  ;;  %v5766_v33 = vpack.c.bf16 %v468_v32, %v465_v30  ;;  %v470_v34 = vld [vmem:[%s9079_s3 + $0x128] sm:$0xff]  ;;  %v473_v35 = vld [vmem:[%s9079_s3 + $0x140] sm:$0xff] }
  0x1b   :  { %v5736_v31 = vpack.c.bf16 %v466_v29, %v463_v28  ;;  %v5738_v36 = vpack.c.bf16 %v473_v35, %v470_v34  ;;  %v469_v37 = vld [vmem:[%s9079_s3 + $0x120] sm:$0xff]  ;;  %v472_v38 = vld [vmem:[%s9079_s3 + $0x138] sm:$0xff]  ;;  %v471_v39 = vld [vmem:[%s9079_s3 + $0x130] sm:$0xff] }
  0x1c   :  { %5017 = vmatmul.mubr.msk.f32.gmra.mrb[4].mxu0 %vm79_vm0, %v37_v53  ;;  %5735 = vmatprep.subr.bf16.mxu1 %v5734_v27  ;;  %v5740_v40 = vpack.c.bf16 %v472_v38, %v469_v37  ;;  %v474_v41 = vld [vmem:[%s9079_s3 + $0x148] sm:$0xff]  ;;  %v476_v43 = vld [vmem:[%s9079_s3 + $0x158] sm:$0xff]  ;;  %v479_v44 = vld [vmem:[%s9079_s3 + $0x170] sm:$0xff] }
  0x1d   :  { %5019 = vmatprep.mubr.msk.f32.mxu0 %vm79_vm0, %v38_v54  ;;  %5757 = vmatpush3.bf16.msra.mxu0 %v5754_v45  ;;  %v5770_v42 = vpack.c.bf16 %v474_v41, %v471_v39  ;;  %v475_v45 = vld [vmem:[%s9079_s3 + $0x150] sm:$0xff]  ;;  %v5742_v46 = vpack.c.bf16 %v479_v44, %v476_v43  ;;  %v478_v47 = vld [vmem:[%s9079_s3 + $0x168] sm:$0xff]  ;;  %v477_v48 = vld [vmem:[%s9079_s3 + $0x160] sm:$0xff] }
  0x1e   :  { %5759 = vmatprep.subr.bf16.mxu0 %v5758_v56  ;;  %5737 = vmatpush1.bf16.msra.mxu1 %v5736_v31  ;;  %v480_v49 = vld [vmem:[%s9079_s3 + $0x178] sm:$0xff]  ;;  %v5744_v50 = vpack.c.bf16 %v478_v47, %v475_v45  ;;  %v981_v53 = vld [vmem:[%s9080_s5 + $0x8] sm:$0xff]  ;;  %v984_v54 = vld [vmem:[%s9080_s5 + $0x20] sm:$0xff] }
  0x1f   :  { %5739 = vmatprep.subr.bf16.mxu1 %v5738_v36  ;;  %v5774_v51 = vpack.c.bf16 %v480_v49, %v477_v48  ;;  %v7723_v55 = vpack.c.bf16 %v984_v54, %v981_v53  ;;  %v985_v57 = vld [vmem:[%s9080_s5 + $0x28] sm:$0xff]  ;;  %v7738_v59 = vld [vmem:[%s9081_s2] ss:$0 sm:$0xff]  ;;  %v991_v22 = vld [vmem:[%s9080_s5 + $0x58] sm:$0xff] }
  0x20   :  { %5020 = vmatmul.mubr.msk.f32.gmra.mrb[6].mxu0 %vm79_vm0, %v39_v60  ;;  %v996_v25 = vld [vmem:[%s9080_s5 + $0x80] sm:$0xff]  ;;  %v995_v36 = vld [vmem:[%s9080_s5 + $0x78] sm:$0xff]  ;;  %v994_v37 = vld [vmem:[%s9080_s5 + $0x70] sm:$0xff] }
  0x21   :  { %5022 = vmatprep.mubr.msk.f32.mxu0 %vm79_vm0, %v40_v61  ;;  %5761 = vmatpush3.bf16.msra.mxu0 %v5758_v56  ;;  %v982_v56 = vld [vmem:[%s9080_s5 + $0x10] sm:$0xff]  ;;  %v992_v31 = vld [vmem:[%s9080_s5 + $0x60] sm:$0xff]  ;;  %v997_v38 = vld [vmem:[%s9080_s5 + $0x88] sm:$0xff] }
  0x22   :  { %5763 = vmatprep.subr.bf16.mxu0 %v5762_v24  ;;  %5741 = vmatpush1.bf16.msra.mxu1 %v5740_v40  ;;  %v7732_v58 = vpack.c.bf16 %v985_v57, %v982_v56  ;;  %v999_v39 = vld [vmem:[%s9080_s5 + $0x98] sm:$0xff]  ;;  %v1002_v40 = vld [vmem:[%s9080_s5 + $0xb0] sm:$0xff]  ;;  %v7820_v45 = vpack.c.bf16 %v995_v36, %v992_v31  ;;  %v7826_v47 = vpack.c.bf16 %v997_v38, %v994_v37  ;;  %v1000_v53 = vld [vmem:[%s9080_s5 + $0xa0] sm:$0xff] }
  0x23   :  { %5743 = vmatprep.subr.bf16.mxu1 %v5742_v46  ;;  %v998_v46 = vld [vmem:[%s9080_s5 + $0x90] sm:$0xff]  ;;  %v1003_v54 = vld [vmem:[%s9080_s5 + $0xb8] sm:$0xff]  ;;  %v1005_v56 = vld [vmem:[%s9080_s5 + $0xc8] sm:$0xff] }
  0x24   :  { %5023 = vmatmul.mubr.msk.f32.gmra.mrb[8].mxu0 %vm79_vm0, %v41_v63  ;;  %v1008_v57 = vld [vmem:[%s9080_s5 + $0xe0] sm:$0xff] }
  0x25   :  { %5025 = vmatprep.mubr.msk.f32.mxu0 %vm79_vm0, %v42_v0  ;;  %5765 = vmatpush3.bf16.msra.mxu0 %v5762_v24  ;;  %v993_v24 = vld [vmem:[%s9080_s5 + $0x68] sm:$0xff]  ;;  %v1016_v36 = vld [vmem:[%s9080_s5 + $0x120] sm:$0xff] }
  0x26   :  { %5767 = vmatprep.subr.bf16.mxu0 %v5766_v33  ;;  %5745 = vmatpush1.bf16.msra.mxu1 %v5744_v50  ;;  %v7796_v35 = vpack.c.bf16 %v996_v25, %v993_v24  ;;  %v7830_v50 = vpack.c.bf16 %v1002_v40, %v999_v39  ;;  %v1012_v24 = vld [vmem:[%s9080_s5 + $0x100] sm:$0xff]  ;;  %v1015_v25 = vld [vmem:[%s9080_s5 + $0x118] sm:$0xff] }
  0x27   :  { %5779 = vmatprep.subr.bf16.mxu1 %v7723_v55  ;;  %v7935_v37 = vpack.c.bf16 %v1015_v25, %v1012_v24 }
  0x28   :  { %5026 = vmatmul.mubr.msk.f32.gmra.mrb[10].mxu0 %vm79_vm0, %v43_v1 }
  0x29   :  { %5028 = vmatprep.mubr.msk.f32.mxu0 %vm79_vm0, %v44_v2  ;;  %5769 = vmatpush3.bf16.msra.mxu0 %v5766_v33 }
  0x2a   :  { %5771 = vmatprep.subr.bf16.mxu0 %v5770_v42 }
  0x2c   :  { %5029 = vmatmul.mubr.msk.f32.gmra.mrb[12].mxu0 %vm79_vm0, %v45_v3 }
  0x2d   :  { %5031 = vmatprep.mubr.msk.f32.mxu0 %vm79_vm0, %v46_v4  ;;  %5773 = vmatpush3.bf16.msra.mxu0 %v5770_v42 }
  0x2e   :  { %5775 = vmatprep.subr.bf16.mxu0 %v5774_v51 }
  0x30   :  { %5032 = vmatmul.mubr.msk.f32.gmra.mrb[14].mxu0 %vm79_vm0, %v47_v5 }
  0x31   :  { %5034 = vmatprep.mubr.msk.f32.mxu0 %vm79_vm0, %v48_v6  ;;  %5777 = vmatpush3.bf16.msra.mxu0 %v5774_v51  ;;  %v1001_v51 = vld [vmem:[%s9080_s5 + $0xa8] sm:$0xff] }
  0x32   :  { %5811 = vmatprep.subr.bf16.mxu0 %v7732_v58 }
  0x34   :  { %5035 = vmatmul.mubr.msk.f32.gmra.mrb[16].mxu0 %vm79_vm0, %v49_v7  ;;  %v980_v7 = vld [vmem:[%s9080_s5] sm:$0xff] }
  0x35   :  { %5037 = vmatprep.mubr.msk.f32.mxu0 %vm79_vm0, %v50_v8  ;;  %v983_v8 = vld [vmem:[%s9080_s5 + $0x18] sm:$0xff] }
  0x38   :  { %5038 = vmatmul.mubr.msk.f32.gmra.mrb[18].mxu0 %vm79_vm0, %v51_v9 }
  0x39   :  { %5040 = vmatprep.mubr.msk.f32.mxu0 %vm79_vm0, %v52_v10  ;;  %v987_v10 = vld [vmem:[%s9080_s5 + $0x38] sm:$0xff] }
  0x3c   :  { %5041 = vmatmul.mubr.msk.f32.gmra.mrb[20].mxu0 %vm79_vm0, %v53_v11  ;;  %v990_v11 = vld [vmem:[%s9080_s5 + $0x50] sm:$0xff] }
  0x3d   :  { %5043 = vmatprep.mubr.msk.f32.mxu0 %vm79_vm0, %v54_v12  ;;  %v7758_v12 = vpack.c.bf16 %v983_v8, %v980_v7  ;;  %v1006_v7 = vld [vmem:[%s9080_s5 + $0xd0] sm:$0xff]  ;;  %v1009_v8 = vld [vmem:[%s9080_s5 + $0xe8] sm:$0xff] }
  0x40   :  { %5044 = vmatmul.mubr.msk.f32.gmra.mrb[22].mxu0 %vm79_vm0, %v55_v13 }
  0x41   :  { %5046 = vmatprep.mubr.msk.f32.mxu0 %vm79_vm0, %v56_v14 }
  0x44   :  { %5047 = vmatmul.mubr.msk.f32.gmra.mrb[24].mxu0 %vm79_vm0, %v57_v15 }
  0x45   :  { %5049 = vmatprep.mubr.msk.f32.mxu0 %vm79_vm0, %v58_v16  ;;  %v7761_v16 = vpack.c.bf16 %v990_v11, %v987_v10  ;;  %v1014_v10 = vld [vmem:[%s9080_s5 + $0x110] sm:$0xff] }
  0x48   :  { %5050 = vmatmul.mubr.msk.f32.gmra.mrb[26].mxu0 %vm79_vm0, %v59_v17  ;;  %v986_v17 = vld [vmem:[%s9080_s5 + $0x30] sm:$0xff] }
  0x49   :  { %5052 = vmatprep.mubr.msk.f32.mxu0 %vm79_vm0, %v60_v18 }
  0x4c   :  { %5053 = vmatmul.mubr.msk.f32.gmra.mrb[28].mxu0 %vm79_vm0, %v61_v19 }
  0x4d   :  { %5055 = vmatprep.mubr.msk.f32.mxu0 %vm79_vm0, %v62_v20  ;;  %v989_v20 = vld [vmem:[%s9080_s5 + $0x48] sm:$0xff] }
  0x4e   :  { %v7788_v30 = vpack.c.bf16 %v989_v20, %v986_v17 }
  0x50   :  { %5056 = vmatmul.mubr.msk.f32.gmra.mrb[30].mxu0 %vm79_vm0, %v63_v21  ;;  %v988_v21 = vld [vmem:[%s9080_s5 + $0x40] sm:$0xff] }
  0x51   :  { %v7793_v32 = vpack.c.bf16 %v991_v22, %v988_v21 }
  0xe7   :  { %v5012_v60 = vpop.f32.mrb[0].mxu0 }
  0xe8   :  { %v248_v61 = vadd.f32 %v5012_v60, %v7738_v59  ;;  %v242_v62 = vpop.f32.mrb[1].mxu0 }
  0xe9   :  { %v243_v63 = vadd.f32 %v7738_v59, %v242_v62 }
  0xeb   :  { %6995 = vtanh.f32 %v243_v63  ;;  %v5015_v0 = vpop.f32.mrb[2].mxu0 }
  0xec   :  { %6997 = vtanh.f32 %v248_v61  ;;  %v258_v1 = vadd.f32 %v5015_v0, %v7738_v59  ;;  %v252_v2 = vpop.f32.mrb[3].mxu0  ;;  %v7854_v0 = vpack.c.bf16 %v1001_v51, %v998_v46  ;;  %v1023_v46 = vld [vmem:[%s9080_s5 + $0x158] sm:$0xff] }
  0xed   :  { %v253_v3 = vadd.f32 %v7738_v59, %v252_v2  ;;  %v7860_v2 = vpack.c.bf16 %v1003_v54, %v1000_v53 }
  0xee   :  { %6999 = vtanh.f32 %v258_v1  ;;  %v1004_v1 = vld [vmem:[%s9080_s5 + $0xc0] sm:$0xff] }
  0xef   :  { %7001 = vtanh.f32 %v253_v3  ;;  %v5018_v4 = vpop.f32.mrb[4].mxu0 }
  0xf0   :  { %v268_v5 = vadd.f32 %v5018_v4, %v7738_v59  ;;  %v262_v6 = vpop.f32.mrb[5].mxu0 }
  0xf1   :  { %v263_v9 = vadd.f32 %v7738_v59, %v262_v6  ;;  %v1007_v6 = vld [vmem:[%s9080_s5 + $0xd8] sm:$0xff] }
  0xf2   :  { %7003 = vtanh.f32 %v268_v5  ;;  %v7866_v5 = vpack.c.bf16 %v1008_v57, %v1005_v56  ;;  %v7892_v17 = vpack.c.bf16 %v1007_v6, %v1004_v1  ;;  %v1022_v56 = vld [vmem:[%s9080_s5 + $0x150] sm:$0xff]  ;;  %v1025_v1 = vld [vmem:[%s9080_s5 + $0x168] sm:$0xff]  ;;  %v1027_v6 = vld [vmem:[%s9080_s5 + $0x178] sm:$0xff] }
  0xf3   :  { %7005 = vtanh.f32 %v263_v9  ;;  %v5021_v13 = vpop.f32.mrb[6].mxu0  ;;  %v1011_v9 = vld [vmem:[%s9080_s5 + $0xf8] sm:$0xff] }
  0xf4   :  { %v278_v14 = vadd.f32 %v5021_v13, %v7738_v59  ;;  %v272_v15 = vpop.f32.mrb[7].mxu0  ;;  %v7904_v22 = vpack.c.bf16 %v1014_v10, %v1011_v9 }
  0xf5   :  { %v6996_v18 = vpop.eup %6995  ;;  %v273_v19 = vadd.f32 %v7738_v59, %v272_v15 }
  0xf6   :  { %v6998_v23 = vpop.eup %6997  ;;  %563 = vmatmul.mubr.f32.vlgmr.msra.gmra.mrb[0].mxu1 %v6996_v18  ;;  %5090 = vmatprep.mubr.f32.mxu0 %v6996_v18  ;;  %7007 = vtanh.f32 %v278_v14  ;;  %v1010_v18 = vld [vmem:[%s9080_s5 + $0xf0] sm:$0xff] }
  0xf7   :  { %5781 = vmatpush1.bf16.msra.mxu1 %v7758_v12  ;;  %5091 = vmatmul.mubr.f32.vlgmr.msra.gmra.mrb[32].mxu0 %v6998_v23  ;;  %7009 = vtanh.f32 %v273_v19  ;;  %v5024_v26 = vpop.f32.mrb[8].mxu0  ;;  %v7898_v19 = vpack.c.bf16 %v1009_v8, %v1006_v7 }
  0xf8   :  { %v7783_v27 = vpop.eup %6999  ;;  %568 = vmatprep.mubr.f32.mxu1 %v9085_v52  ;;  %v288_v28 = vadd.f32 %v5024_v26, %v7738_v59  ;;  %v282_v29 = vpop.f32.mrb[9].mxu0  ;;  %5783 = vmatprep.subr.bf16.mxu1 %v7761_v16  ;;  %v1017_v26 = vld [vmem:[%s9080_s5 + $0x128] sm:$0xff] }
  0xf9   :  { %v7002_v33 = vpop.eup %7001  ;;  %v283_v34 = vadd.f32 %v7738_v59, %v282_v29  ;;  %5813 = vmatpush3.bf16.msra.mxu0 %v7732_v58 }
  0xfa   :  { %569 = vmatmul.mubr.f32.gmra.mrb[2].mxu1 %v6998_v23  ;;  %5093 = vmatprep.mubr.f32.mxu0 %v7002_v33  ;;  %7011 = vtanh.f32 %v288_v28  ;;  %v1013_v23 = vld [vmem:[%s9080_s5 + $0x108] sm:$0xff] }
  0xfb   :  { %5094 = vmatmul.mubr.f32.gmra.mrb[34].mxu0 %v7783_v27  ;;  %574 = vmatprep.mubr.f32.mxu1 %v9085_v52  ;;  %7013 = vtanh.f32 %v283_v34  ;;  %v5027_v41 = vpop.f32.mrb[10].mxu0  ;;  %v7929_v34 = vpack.c.bf16 %v1013_v23, %v1010_v18 }
  0xfc   :  { %v7816_v42 = vpop.eup %7003  ;;  %5785 = vmatpush1.bf16.msra.mxu1 %v7788_v30  ;;  %v298_v43 = vadd.f32 %v5027_v41, %v7738_v59  ;;  %v292_v44 = vpop.f32.mrb[11].mxu0  ;;  %5815 = vmatprep.subr.bf16.mxu0 %v7793_v32  ;;  %v1019_v41 = vld [vmem:[%s9080_s5 + $0x138] sm:$0xff] }
  0xfd   :  { %v7006_v48 = vpop.eup %7005  ;;  %v293_v49 = vadd.f32 %v7738_v59, %v292_v44  ;;  %5787 = vmatprep.subr.bf16.mxu1 %v7796_v35  ;;  %5817 = vmatpush3.bf16.msra.mxu0 %v7793_v32  ;;  %v1021_v44 = vld [vmem:[%s9080_s5 + $0x148] sm:$0xff]  ;;  %v7967_v54 = vpack.c.bf16 %v1019_v41, %v1016_v36 }
  0xfe   :  { %575 = vmatmul.mubr.f32.gmra.mrb[4].mxu1 %v7002_v33  ;;  %5096 = vmatprep.mubr.f32.mxu0 %v7006_v48  ;;  %7015 = vtanh.f32 %v298_v43  ;;  %v1018_v43 = vld [vmem:[%s9080_s5 + $0x130] sm:$0xff] }
  0xff   :  { %580 = vmatprep.mubr.f32.mxu1 %v9085_v52  ;;  %5097 = vmatmul.mubr.f32.gmra.mrb[36].mxu0 %v7816_v42  ;;  %7017 = vtanh.f32 %v293_v49  ;;  %v5030_v60 = vpop.f32.mrb[12].mxu0  ;;  %v7973_v57 = vpack.c.bf16 %v1021_v44, %v1018_v43 }
 0x100   :  { %v7850_v61 = vpop.eup %7007  ;;  %v308_v62 = vadd.f32 %v5030_v60, %v7738_v59  ;;  %v302_v63 = vpop.f32.mrb[13].mxu0  ;;  %5789 = vmatpush1.bf16.msra.mxu1 %v7820_v45  ;;  %5819 = vmatprep.subr.bf16.mxu0 %v7826_v47 }
 0x101   :  { %v7862_v3 = vpop.eup %7009  ;;  %v303_v4 = vadd.f32 %v7738_v59, %v302_v63  ;;  %5791 = vmatprep.subr.bf16.mxu1 %v7830_v50  ;;  %5821 = vmatpush3.bf16.msra.mxu0 %v7826_v47 }
 0x102   :  { %581 = vmatmul.mubr.f32.gmra.mrb[6].mxu1 %v7783_v27  ;;  %5099 = vmatprep.mubr.f32.mxu0 %v7862_v3  ;;  %7019 = vtanh.f32 %v308_v62  ;;  %v1020_v27 = vld [vmem:[%s9080_s5 + $0x140] sm:$0xff] }
 0x103   :  { %586 = vmatprep.mubr.f32.mxu1 %v9085_v52  ;;  %5100 = vmatmul.mubr.f32.gmra.mrb[38].mxu0 %v7850_v61  ;;  %7021 = vtanh.f32 %v303_v4  ;;  %v5033_v11 = vpop.f32.mrb[14].mxu0  ;;  %v7941_v40 = vpack.c.bf16 %v1020_v27, %v1017_v26  ;;  %v1024_v4 = vld [vmem:[%s9080_s5 + $0x160] sm:$0xff] }
 0x104   :  { %v7888_v13 = vpop.eup %7011  ;;  %v318_v14 = vadd.f32 %v5033_v11, %v7738_v59  ;;  %v312_v15 = vpop.f32.mrb[15].mxu0  ;;  %5793 = vmatpush1.bf16.msra.mxu1 %v7854_v0  ;;  %5823 = vmatprep.subr.bf16.mxu0 %v7860_v2  ;;  %v7999_v11 = vpack.c.bf16 %v1025_v1, %v1022_v56 }
 0x105   :  { %v7900_v20 = vpop.eup %7013  ;;  %v313_v21 = vadd.f32 %v7738_v59, %v312_v15  ;;  %5795 = vmatprep.subr.bf16.mxu1 %v7866_v5  ;;  %5825 = vmatpush3.bf16.msra.mxu0 %v7860_v2 }
 0x106   :  { %587 = vmatmul.mubr.f32.gmra.mrb[8].mxu1 %v7006_v48  ;;  %5102 = vmatprep.mubr.f32.mxu0 %v7900_v20  ;;  %7023 = vtanh.f32 %v318_v14  ;;  %v1026_v48 = vld [vmem:[%s9080_s5 + $0x170] sm:$0xff] }
 0x107   :  { %592 = vmatprep.mubr.f32.mxu1 %v9085_v52  ;;  %5103 = vmatmul.mubr.f32.gmra.mrb[40].mxu0 %v7888_v13  ;;  %7025 = vtanh.f32 %v313_v21  ;;  %v5036_v28 = vpop.f32.mrb[16].mxu0  ;;  %v7979_v63 = vpack.c.bf16 %v1026_v48, %v1023_v46 }
 0x108   :  { %v7925_v29 = vpop.eup %7015  ;;  %v328_v31 = vadd.f32 %v5036_v28, %v7738_v59  ;;  %v322_v33 = vpop.f32.mrb[17].mxu0  ;;  %5797 = vmatpush1.bf16.msra.mxu1 %v7892_v17  ;;  %5827 = vmatprep.subr.bf16.mxu0 %v7898_v19 }
 0x109   :  { %v7937_v38 = vpop.eup %7017  ;;  %v323_v39 = vadd.f32 %v7738_v59, %v322_v33  ;;  %5799 = vmatprep.subr.bf16.mxu1 %v7904_v22  ;;  %5829 = vmatpush3.bf16.msra.mxu0 %v7898_v19 }
 0x10a   :  { %593 = vmatmul.mubr.f32.gmra.mrb[10].mxu1 %v7816_v42  ;;  %5105 = vmatprep.mubr.f32.mxu0 %v7937_v38  ;;  %7027 = vtanh.f32 %v328_v31 }
 0x10b   :  { %598 = vmatprep.mubr.f32.mxu1 %v9085_v52  ;;  %5106 = vmatmul.mubr.f32.gmra.mrb[42].mxu0 %v7925_v29  ;;  %7029 = vtanh.f32 %v323_v39  ;;  %v5039_v49 = vpop.f32.mrb[18].mxu0 }
 0x10c   :  { %v7963_v51 = vpop.eup %7019  ;;  %v338_v42 = vadd.f32 %v5039_v49, %v7738_v59  ;;  %v332_v53 = vpop.f32.mrb[19].mxu0  ;;  %5801 = vmatpush1.bf16.msra.mxu1 %v7929_v34  ;;  %5831 = vmatprep.subr.bf16.mxu0 %v7935_v37 }
 0x10d   :  { %v7975_v60 = vpop.eup %7021  ;;  %v333_v62 = vadd.f32 %v7738_v59, %v332_v53  ;;  %5803 = vmatprep.subr.bf16.mxu1 %v7941_v40  ;;  %5833 = vmatpush3.bf16.msra.mxu0 %v7935_v37 }
 0x10e   :  { %599 = vmatmul.mubr.f32.gmra.mrb[12].mxu1 %v7862_v3  ;;  %5108 = vmatprep.mubr.f32.mxu0 %v7975_v60  ;;  %7031 = vtanh.f32 %v338_v42  ;;  %v8002_v3 = vpack.c.bf16 %v1027_v6, %v1024_v4 }
 0x10f   :  { %604 = vmatprep.mubr.f32.mxu1 %v9085_v52  ;;  %5109 = vmatmul.mubr.f32.gmra.mrb[44].mxu0 %v7963_v51  ;;  %7033 = vtanh.f32 %v333_v62  ;;  %v5042_v7 = vpop.f32.mrb[20].mxu0 }
 0x110   :  { %v7995_v8 = vpop.eup %7023  ;;  %v348_v9 = vadd.f32 %v5042_v7, %v7738_v59  ;;  %v342_v10 = vpop.f32.mrb[21].mxu0  ;;  %5805 = vmatpush1.bf16.msra.mxu1 %v7967_v54  ;;  %5835 = vmatprep.subr.bf16.mxu0 %v7973_v57 }
 0x111   :  { %v8004_v14 = vpop.eup %7025  ;;  %v343_v15 = vadd.f32 %v7738_v59, %v342_v10  ;;  %5807 = vmatprep.subr.bf16.mxu1 %v7979_v63  ;;  %5837 = vmatpush3.bf16.msra.mxu0 %v7973_v57 }
 0x112   :  { %605 = vmatmul.mubr.f32.gmra.mrb[14].mxu1 %v7850_v61  ;;  %5111 = vmatprep.mubr.f32.mxu0 %v8004_v14  ;;  %7035 = vtanh.f32 %v348_v9 }
 0x113   :  { %610 = vmatprep.mubr.f32.mxu1 %v9085_v52  ;;  %5112 = vmatmul.mubr.f32.gmra.mrb[46].mxu0 %v7995_v8  ;;  %7037 = vtanh.f32 %v343_v15  ;;  %v5045_v18 = vpop.f32.mrb[22].mxu0 }
 0x114   :  { %v8013_v21 = vpop.eup %7027  ;;  %v358_v23 = vadd.f32 %v5045_v18, %v7738_v59  ;;  %v352_v24 = vpop.f32.mrb[23].mxu0  ;;  %5809 = vmatpush1.bf16.msra.mxu1 %v7999_v11  ;;  %5839 = vmatprep.subr.bf16.mxu0 %v8002_v3  ;;  %v8140_v18 = vld [vmem:[%s9082_s4] sm:$0x7] }
 0x115   :  { %v8018_v25 = vpop.eup %7029  ;;  %v353_v61 = vadd.f32 %v7738_v59, %v352_v24  ;;  %5841 = vmatpush3.bf16.msra.mxu0 %v8002_v3  ;;  %5843 = vmatprep.subr.bf16.mxu1 %v7723_v55 }
 0x116   :  { %611 = vmatmul.mubr.f32.gmra.mrb[16].mxu1 %v7900_v20  ;;  %5114 = vmatprep.mubr.f32.mxu0 %v8018_v25  ;;  %7039 = vtanh.f32 %v358_v23 }
 0x117   :  { %616 = vmatprep.mubr.f32.mxu1 %v9085_v52  ;;  %5115 = vmatmul.mubr.f32.gmra.mrb[48].mxu0 %v8013_v21  ;;  %7041 = vtanh.f32 %v353_v61  ;;  %v5048_v26 = vpop.f32.mrb[24].mxu0 }
 0x118   :  { %v8027_v27 = vpop.eup %7031  ;;  %v368_v28 = vadd.f32 %v5048_v26, %v7738_v59  ;;  %v362_v31 = vpop.f32.mrb[25].mxu0  ;;  %5875 = vmatprep.subr.bf16.mxu0 %v7732_v58 }
 0x119   :  { %v8031_v33 = vpop.eup %7033  ;;  %v363_v20 = vadd.f32 %v7738_v59, %v362_v31 }
 0x11a   :  { %617 = vmatmul.mubr.f32.gmra.mrb[18].mxu1 %v7888_v13  ;;  %5117 = vmatprep.mubr.f32.mxu0 %v8031_v33  ;;  %7043 = vtanh.f32 %v368_v28 }
 0x11b   :  { %622 = vmatprep.mubr.f32.mxu1 %v9085_v52  ;;  %5118 = vmatmul.mubr.f32.gmra.mrb[50].mxu0 %v8027_v27  ;;  %7045 = vtanh.f32 %v363_v20  ;;  %v5051_v36 = vpop.f32.mrb[26].mxu0 }
 0x11c   :  { %v8038_v39 = vpop.eup %7035  ;;  %v378_v41 = vadd.f32 %v5051_v36, %v7738_v59  ;;  %v372_v43 = vpop.f32.mrb[27].mxu0 }
 0x11d   :  { %v8041_v44 = vpop.eup %7037  ;;  %v373_v46 = vadd.f32 %v7738_v59, %v372_v43 }
 0x11e   :  { %623 = vmatmul.mubr.f32.gmra.mrb[20].mxu1 %v7937_v38  ;;  %5120 = vmatprep.mubr.f32.mxu0 %v8041_v44  ;;  %7047 = vtanh.f32 %v378_v41 }
 0x11f   :  { %628 = vmatprep.mubr.f32.mxu1 %v9085_v52  ;;  %5121 = vmatmul.mubr.f32.gmra.mrb[52].mxu0 %v8038_v39  ;;  %7049 = vtanh.f32 %v373_v46  ;;  %v5054_v13 = vpop.f32.mrb[28].mxu0 }
 0x120   :  { %v8048_v48 = vpop.eup %7039  ;;  %v388_v49 = vadd.f32 %v5054_v13, %v7738_v59  ;;  %v382_v42 = vpop.f32.mrb[29].mxu0 }
 0x121   :  { %v8051_v53 = vpop.eup %7041  ;;  %v383_v56 = vadd.f32 %v7738_v59, %v382_v42 }
 0x122   :  { %629 = vmatmul.mubr.f32.gmra.mrb[22].mxu1 %v7925_v29  ;;  %5123 = vmatprep.mubr.f32.mxu0 %v8051_v53  ;;  %7051 = vtanh.f32 %v388_v49 }
 0x123   :  { %634 = vmatprep.mubr.f32.mxu1 %v9085_v52  ;;  %5124 = vmatmul.mubr.f32.gmra.mrb[54].mxu0 %v8048_v48  ;;  %7053 = vtanh.f32 %v383_v56  ;;  %v5057_v38 = vpop.f32.mrb[30].mxu0 }
 0x124   :  { %v8058_v62 = vpop.eup %7043  ;;  %v398_v1 = vadd.f32 %v5057_v38, %v7738_v59  ;;  %v392_v4 = vpop.f32.mrb[31].mxu0 }
 0x125   :  { %v7046_v6 = vpop.eup %7045  ;;  %v393_v7 = vadd.f32 %v7738_v59, %v392_v4 }
 0x126   :  { %635 = vmatmul.mubr.f32.gmra.mrb[24].mxu1 %v7975_v60  ;;  %5126 = vmatprep.mubr.f32.mxu0 %v7046_v6  ;;  %7055 = vtanh.f32 %v398_v1 }
 0x127   :  { %640 = vmatprep.mubr.f32.mxu1 %v9085_v52  ;;  %5127 = vmatmul.mubr.f32.gmra.mrb[56].mxu0 %v8058_v62  ;;  %7057 = vtanh.f32 %v393_v7 }
 0x128   :  { %v7048_v29 = vpop.eup %7047 }
 0x129   :  { %v7050_v9 = vpop.eup %7049 }
 0x12a   :  { %641 = vmatmul.mubr.f32.gmra.mrb[26].mxu1 %v7963_v51  ;;  %5129 = vmatprep.mubr.f32.mxu0 %v7050_v9  ;;  %v483_v51 = vlaneseq }
 0x12b   :  { %646 = vmatprep.mubr.f32.mxu1 %v9085_v52  ;;  %5130 = vmatmul.mubr.f32.gmra.mrb[58].mxu0 %v7048_v29 }
 0x12c   :  { %v7052_v10 = vpop.eup %7051 }
 0x12d   :  { %v7054_v15 = vpop.eup %7053 }
 0x12e   :  { %647 = vmatmul.mubr.f32.gmra.mrb[28].mxu1 %v8004_v14  ;;  %5132 = vmatprep.mubr.f32.mxu0 %v7054_v15 }
 0x12f   :  { %652 = vmatprep.mubr.f32.mxu1 %v9085_v52  ;;  %5133 = vmatmul.mubr.f32.gmra.mrb[60].mxu0 %v7052_v10 }
 0x130   :  { %v7056_v59 = vpop.eup %7055 }
 0x131   :  { %v7058_v60 = vpop.eup %7057 }
 0x132   :  { %653 = vmatmul.mubr.f32.gmra.mrb[30].mxu1 %v7995_v8  ;;  %5135 = vmatprep.mubr.f32.mxu0 %v7058_v60  ;;  %v8134_v8 = vshrl.u32 %v483_v51, 7 }
 0x133   :  { %658 = vmatprep.mubr.f32.mxu1 %v9085_v52  ;;  %5136 = vmatmul.mubr.f32.gmra.mrb[62].mxu0 %v7056_v59 }
 0x134   :  { %5170 = vmatprep.mubr.f32.mxu0 %v9085_v52  ;;  %v9087_v14 = vsub.s32 2, %v8134_v8 }
 0x136   :  { %659 = vmatmul.mubr.f32.gmra.mrb[32].mxu1 %v8018_v25  ;;  %v8149_v24 = vrot.slane %v8140_v18, %v9087_v14 }
 0x137   :  { %664 = vmatprep.mubr.f32.mxu1 %v9085_v52  ;;  %5171 = vmatmul.mubr.f32.vlgmr.msra.gmra.mrb[64].mxu0 %v9085_v52 }
 0x138   :  { %5877 = vmatpush3.bf16.msra.mxu0 %v7732_v58 }
 0x139   :  { %5879 = vmatprep.subr.bf16.mxu0 %v7793_v32 }
 0x13a   :  { %665 = vmatmul.mubr.f32.gmra.mrb[34].mxu1 %v8013_v21 }
 0x13b   :  { %670 = vmatprep.mubr.f32.mxu1 %v9085_v52 }
 0x13c   :  { %5881 = vmatpush3.bf16.msra.mxu0 %v7793_v32 }
 0x13d   :  { %5883 = vmatprep.subr.bf16.mxu0 %v7826_v47 }
 0x13e   :  { %671 = vmatmul.mubr.f32.gmra.mrb[36].mxu1 %v8031_v33 }
 0x13f   :  { %676 = vmatprep.mubr.f32.mxu1 %v9085_v52 }
 0x140   :  { %5885 = vmatpush3.bf16.msra.mxu0 %v7826_v47 }
 0x141   :  { %5887 = vmatprep.subr.bf16.mxu0 %v7860_v2 }
 0x142   :  { %677 = vmatmul.mubr.f32.gmra.mrb[38].mxu1 %v8027_v27 }
 0x143   :  { %682 = vmatprep.mubr.f32.mxu1 %v9085_v52 }
 0x144   :  { %5889 = vmatpush3.bf16.msra.mxu0 %v7860_v2 }
 0x145   :  { %5891 = vmatprep.subr.bf16.mxu0 %v7898_v19 }
 0x146   :  { %683 = vmatmul.mubr.f32.gmra.mrb[40].mxu1 %v8041_v44 }
 0x147   :  { %688 = vmatprep.mubr.f32.mxu1 %v9085_v52 }
 0x148   :  { %5893 = vmatpush3.bf16.msra.mxu0 %v7898_v19 }
 0x149   :  { %5895 = vmatprep.subr.bf16.mxu0 %v7935_v37 }
 0x14a   :  { %689 = vmatmul.mubr.f32.gmra.mrb[42].mxu1 %v8038_v39 }
 0x14b   :  { %694 = vmatprep.mubr.f32.mxu1 %v9085_v52 }
 0x14c   :  { %5897 = vmatpush3.bf16.msra.mxu0 %v7935_v37 }
 0x14d   :  { %5899 = vmatprep.subr.bf16.mxu0 %v7973_v57 }
 0x14e   :  { %695 = vmatmul.mubr.f32.gmra.mrb[44].mxu1 %v8051_v53 }
 0x14f   :  { %700 = vmatprep.mubr.f32.mxu1 %v9085_v52 }
 0x150   :  { %5901 = vmatpush3.bf16.msra.mxu0 %v7973_v57 }
 0x151   :  { %5903 = vmatprep.subr.bf16.mxu0 %v8002_v3 }
 0x152   :  { %701 = vmatmul.mubr.f32.gmra.mrb[46].mxu1 %v8048_v48 }
 0x153   :  { %706 = vmatprep.mubr.f32.mxu1 %v9085_v52 }
 0x154   :  { %5905 = vmatpush3.bf16.msra.mxu0 %v8002_v3 }
 0x155   :  { %5939 = vmatprep.subr.bf16.mxu0 %v7732_v58 }
 0x156   :  { %707 = vmatmul.mubr.f32.gmra.mrb[48].mxu1 %v7046_v6 }
 0x157   :  { %712 = vmatprep.mubr.f32.mxu1 %v9085_v52 }
 0x15a   :  { %713 = vmatmul.mubr.f32.gmra.mrb[50].mxu1 %v8058_v62 }
 0x15b   :  { %718 = vmatprep.mubr.f32.mxu1 %v9085_v52 }
 0x15e   :  { %719 = vmatmul.mubr.f32.gmra.mrb[52].mxu1 %v7050_v9 }
 0x15f   :  { %724 = vmatprep.mubr.f32.mxu1 %v9085_v52 }
 0x162   :  { %725 = vmatmul.mubr.f32.gmra.mrb[54].mxu1 %v7048_v29 }
 0x163   :  { %730 = vmatprep.mubr.f32.mxu1 %v9085_v52 }
 0x166   :  { %731 = vmatmul.mubr.f32.gmra.mrb[56].mxu1 %v7054_v15 }
 0x167   :  { %736 = vmatprep.mubr.f32.mxu1 %v9085_v52 }
 0x16a   :  { %737 = vmatmul.mubr.f32.gmra.mrb[58].mxu1 %v7052_v10 }
 0x16b   :  { %742 = vmatprep.mubr.f32.mxu1 %v9085_v52 }
 0x16e   :  { %743 = vmatmul.mubr.f32.gmra.mrb[60].mxu1 %v7058_v60 }
 0x16f   :  { %748 = vmatprep.mubr.f32.mxu1 %v9085_v52 }
 0x172   :  { %749 = vmatmul.mubr.f32.gmra.mrb[62].mxu1 %v7056_v59 }
 0x173   :  { %1111 = vmatprep.mubr.f32.mxu1 %v9085_v52 }
 0x176   :  { %1112 = vmatmul.mubr.f32.vlgmr.msra.gmra.mrb[0].mxu1 %v9085_v52 }
 0x177   :  { %1117 = vmatprep.mubr.f32.mxu1 %v9085_v52  ;;  %5845 = vmatpush1.bf16.msra.mxu1 %v7758_v12 }
 0x178   :  { %5847 = vmatprep.subr.bf16.mxu1 %v7761_v16 }
 0x17a   :  { %1118 = vmatmul.mubr.f32.gmra.mrb[2].mxu1 %v9085_v52 }
 0x17b   :  { %5849 = vmatpush1.bf16.msra.mxu1 %v7788_v30  ;;  %1315 = vmatprep.mubr.f32.mxu1 %v9085_v52 }
 0x17c   :  { %5851 = vmatprep.subr.bf16.mxu1 %v7796_v35 }
 0x17f   :  { %5853 = vmatpush1.bf16.msra.mxu1 %v7820_v45 }
 0x180   :  { %5855 = vmatprep.subr.bf16.mxu1 %v7830_v50 }
 0x183   :  { %5857 = vmatpush1.bf16.msra.mxu1 %v7854_v0 }
 0x184   :  { %5859 = vmatprep.subr.bf16.mxu1 %v7866_v5 }
 0x187   :  { %5861 = vmatpush1.bf16.msra.mxu1 %v7892_v17 }
 0x188   :  { %5863 = vmatprep.subr.bf16.mxu1 %v7904_v22 }
 0x18b   :  { %5865 = vmatpush1.bf16.msra.mxu1 %v7929_v34 }
 0x18c   :  { %5867 = vmatprep.subr.bf16.mxu1 %v7941_v40 }
 0x18f   :  { %5869 = vmatpush1.bf16.msra.mxu1 %v7967_v54 }
 0x190   :  { %5871 = vmatprep.subr.bf16.mxu1 %v7979_v63 }
 0x193   :  { %5873 = vmatpush1.bf16.msra.mxu1 %v7999_v11 }
 0x194   :  { %5907 = vmatprep.subr.bf16.mxu1 %v7723_v55 }
 0x1ca   :  { %v8142_v21 = vpop.f32.mrb[32].mxu0 }
 0x1cb   :  { %v8144_v23 = vpop.f32.mrb[33].mxu0 }
 0x1ce   :  { %v5095_v25 = vpop.f32.mrb[34].mxu0 }
 0x1cf   :  { %v8152_v61 = vadd.f32 %v5095_v25, %v8149_v24  ;;  %v831_v26 = vpop.f32.mrb[35].mxu0 }
 0x1d0   :  { %v8155_v27 = vadd.f32 %v831_v26, %v8149_v24 }
 0x1d2   :  { %v5098_v28 = vpop.f32.mrb[36].mxu0 }
 0x1d3   :  { %v8158_v31 = vadd.f32 %v5098_v28, %v8149_v24  ;;  %v841_v33 = vpop.f32.mrb[37].mxu0 }
 0x1d4   :  { %v8161_v20 = vadd.f32 %v841_v33, %v8149_v24 }
 0x1d6   :  { %v5101_v36 = vpop.f32.mrb[38].mxu0 }
 0x1d7   :  { %v8164_v39 = vadd.f32 %v5101_v36, %v8149_v24  ;;  %v851_v41 = vpop.f32.mrb[39].mxu0 }
 0x1d8   :  { %v8167_v43 = vadd.f32 %v851_v41, %v8149_v24 }
 0x1da   :  { %v5104_v44 = vpop.f32.mrb[40].mxu0 }
 0x1db   :  { %v8170_v46 = vadd.f32 %v5104_v44, %v8149_v24  ;;  %v861_v13 = vpop.f32.mrb[41].mxu0 }
 0x1dc   :  { %v8173_v48 = vadd.f32 %v861_v13, %v8149_v24 }
 0x1de   :  { %v5107_v49 = vpop.f32.mrb[42].mxu0 }
 0x1df   :  { %v8176_v42 = vadd.f32 %v5107_v49, %v8149_v24  ;;  %v871_v53 = vpop.f32.mrb[43].mxu0 }
 0x1e0   :  { %v8179_v56 = vadd.f32 %v871_v53, %v8149_v24 }
 0x1e2   :  { %v5110_v38 = vpop.f32.mrb[44].mxu0 }
 0x1e3   :  { %v8182_v62 = vadd.f32 %v5110_v38, %v8149_v24  ;;  %v881_v1 = vpop.f32.mrb[45].mxu0 }
 0x1e4   :  { %v8185_v4 = vadd.f32 %v881_v1, %v8149_v24 }
 0x1e6   :  { %v5113_v6 = vpop.f32.mrb[46].mxu0 }
 0x1e7   :  { %v8188_v7 = vadd.f32 %v5113_v6, %v8149_v24  ;;  %v891_v29 = vpop.f32.mrb[47].mxu0 }
 0x1e8   :  { %v8191_v9 = vadd.f32 %v891_v29, %v8149_v24 }
 0x1ea   :  { %v5116_v10 = vpop.f32.mrb[48].mxu0 }
 0x1eb   :  { %v8194_v15 = vadd.f32 %v5116_v10, %v8149_v24  ;;  %v901_v59 = vpop.f32.mrb[49].mxu0 }
 0x1ec   :  { %v8197_v60 = vadd.f32 %v901_v59, %v8149_v24 }
 0x1ee   :  { %v5119_v51 = vpop.f32.mrb[50].mxu0 }
 0x1ef   :  { %v8200_v25 = vadd.f32 %v5119_v51, %v8149_v24  ;;  %v911_v26 = vpop.f32.mrb[51].mxu0 }
 0x1f0   :  { %v8203_v28 = vadd.f32 %v911_v26, %v8149_v24 }
 0x1f1   :  { %9088 = vst [vmem:[#allocation3_spill] sm:$0xff] %v8200_v25 }
 0x1f2   :  { %9089 = vst [vmem:[#allocation4_spill] sm:$0xff] %v8203_v28  ;;  %v5122_v33 = vpop.f32.mrb[52].mxu0 }
 0x1f3   :  { %v8206_v36 = vadd.f32 %v5122_v33, %v8149_v24  ;;  %v921_v41 = vpop.f32.mrb[53].mxu0 }
 0x1f4   :  { %v8209_v44 = vadd.f32 %v921_v41, %v8149_v24 }
 0x1f5   :  { %9090 = vst [vmem:[#allocation5_spill] sm:$0xff] %v8206_v36 }
 0x1f6   :  { %9091 = vst [vmem:[#allocation6_spill] sm:$0xff] %v8209_v44  ;;  %v5125_v13 = vpop.f32.mrb[54].mxu0 }
 0x1f7   :  { %v8212_v49 = vadd.f32 %v5125_v13, %v8149_v24  ;;  %v931_v53 = vpop.f32.mrb[55].mxu0 }
 0x1f8   :  { %v8215_v38 = vadd.f32 %v931_v53, %v8149_v24 }
 0x1f9   :  { %9092 = vst [vmem:[#allocation7_spill] sm:$0xff] %v8212_v49 }
 0x1fa   :  { %9093 = vst [vmem:[#allocation8_spill] sm:$0xff] %v8215_v38  ;;  %v5128_v1 = vpop.f32.mrb[56].mxu0 }
 0x1fb   :  { %v8218_v6 = vadd.f32 %v5128_v1, %v8149_v24  ;;  %v941_v29 = vpop.f32.mrb[57].mxu0 }
 0x1fc   :  { %v8221_v10 = vadd.f32 %v941_v29, %v8149_v24 }
 0x1fd   :  { %9094 = vst [vmem:[#allocation9_spill] sm:$0xff] %v8218_v6 }
 0x1fe   :  { %9095 = vst [vmem:[#allocation10_spill] sm:$0xff] %v8221_v10  ;;  %v5131_v59 = vpop.f32.mrb[58].mxu0 }
 0x1ff   :  { %v8224_v51 = vadd.f32 %v5131_v59, %v8149_v24  ;;  %v951_v26 = vpop.f32.mrb[59].mxu0 }
 0x200   :  { %v8227_v33 = vadd.f32 %v951_v26, %v8149_v24  ;;  %v485_v26 = vsub.s32 0, %v8134_v8 }
 0x201   :  { %9096 = vst [vmem:[#allocation11_spill] sm:$0xff] %v8224_v51 }
 0x202   :  { %9097 = vst [vmem:[#allocation12_spill] sm:$0xff] %v8227_v33  ;;  %v5134_v41 = vpop.f32.mrb[60].mxu0 }
 0x203   :  { %v8230_v13 = vadd.f32 %v5134_v41, %v8149_v24  ;;  %v961_v53 = vpop.f32.mrb[61].mxu0  ;;  %v1028_v41 = vld [vmem:[%s9083_s6] sm:$0x7] }
 0x204   :  { %v8233_v1 = vadd.f32 %v961_v53, %v8149_v24  ;;  %v486_v53 = vrot.slane %v8140_v18, %v485_v26 }
 0x205   :  { %9098 = vst [vmem:[#allocation13_spill] sm:$0xff] %v8230_v13  ;;  %v489_v13 = vsub.s32 1, %v8134_v8 }
 0x206   :  { %9099 = vst [vmem:[#allocation14_spill] sm:$0xff] %v8233_v1  ;;  %v5137_v52 = vpop.f32.mrb[62].mxu0  ;;  %v1035_v1 = vrot.slane %v1028_v41, %v485_v26 }
 0x207   :  { %v8236_v29 = vadd.f32 %v5137_v52, %v8149_v24  ;;  %v971_v14 = vpop.f32.mrb[63].mxu0  ;;  %v490_v52 = vrot.slane %v8140_v18, %v489_v13 }
 0x208   :  { %v8239_v59 = vadd.f32 %v971_v14, %v8149_v24  ;;  %v8248_v33 = vadd.f32 %v1035_v1, %v486_v53 }
 0x209   :  { %9100 = vst [vmem:[#allocation15_spill] sm:$0xff] %v8236_v29  ;;  %v1039_v29 = vrot.slane %v1028_v41, %v489_v13 }
 0x20a   :  { %9101 = vst [vmem:[#allocation16_spill] sm:$0xff] %v8239_v59  ;;  %v5172_v51 = vpop.f32.mrb[64].mxu0 }
 0x20b   :  { %v1190_v6 = vpop.f32.mrb[65].mxu0  ;;  %v8250_v59 = vadd.f32 %v1039_v29, %v490_v52 }
 0x249   :  { %v1113_v14 = vpop.f32.mrb[0].mxu1 }
 0x24a   :  { %v6803_v10 = vadd.f32 %v8248_v33, %v1113_v14  ;;  %v1115_v49 = vpop.f32.mrb[1].mxu1 }
 0x24b   :  { %v6805_v36 = vadd.f32 %v8250_v59, %v1115_v49  ;;  %v9102_v49 = vsub.s32 2, %v8134_v8  ;;  %v827_v8 = vadd.f32 %v8142_v21, %v8149_v24 }
 0x24c   :  { %v4365_v38 = vmul.f32 -1.442695, %v6803_v10 }
 0x24d   :  { %v1119_v44 = vpop.f32.mrb[2].mxu1  ;;  %v4367_v13 = vmul.f32 -1.442695, %v6805_v36  ;;  %v8258_v14 = vrot.slane %v1028_v41, %v9102_v49 }
 0x24e   :  { %7059 = vpow2.f32 %v4365_v38  ;;  %v6807_v25 = vadd.f32 %v8248_v33, %v1119_v44  ;;  %v1121_v28 = vpop.f32.mrb[3].mxu1 }
 0x24f   :  { %v6809_v18 = vadd.f32 %v8250_v59, %v1121_v28  ;;  %v1191_v28 = vadd.f32 %v1190_v6, %v8258_v14 }
 0x250   :  { %v4366_v26 = vmul.f32 -1.442695, %v6807_v25 }
 0x251   :  { %v4368_v1 = vmul.f32 -1.442695, %v6809_v18  ;;  %v822_v18 = vadd.f32 %v8144_v23, %v8149_v24  ;;  %v9103_v24 = vmov 0.0  }
 0x252   :  { %7061 = vpow2.f32 %v4366_v26 }
 0x253   :  { %7063 = vpow2.f32 %v4367_v13 }
 0x254   :  { %7065 = vpow2.f32 %v4368_v1  ;;  %v1196_v1 = vadd.f32 %v5172_v51, %v8258_v14 }
 0x258   :  { %v7060_v29 = vpop.eup %7059 }
 0x259   :  { %v1207_v53 = vadd.f32 1.0, %v7060_v29 }
 0x25b   :  { %7067 = vrcp.f32 %v1207_v53 }
 0x25c   :  { %v7062_v52 = vpop.eup %7061 }
 0x25d   :  { %v1208_v10 = vadd.f32 1.0, %v7062_v52  ;;  %v7064_v38 = vpop.eup %7063 }
 0x25e   :  { %v7066_v44 = vpop.eup %7065  ;;  %v1221_v25 = vadd.f32 1.0, %v7064_v38 }
 0x25f   :  { %7069 = vrcp.f32 %v1208_v10  ;;  %v1222_v26 = vadd.f32 1.0, %v7066_v44 }
 0x260   :  { %7071 = vrcp.f32 %v1221_v25 }
 0x261   :  { %7073 = vrcp.f32 %v1222_v26 }
 0x265   :  { %v7068_v36 = vpop.eup %7067 }
 0x266   :  { %v1227_v13 = vmul.f32 %v7068_v36, %v1191_v28 }
 0x268   :  { %v1229_v29 = vadd.f32 %v1227_v13, %v822_v18 }
 0x269   :  { %v7070_v53 = vpop.eup %7069 }
 0x26a   :  { %v1228_v41 = vmul.f32 %v7070_v53, %v1196_v1  ;;  %7075 = vtanh.f32 %v1229_v29  ;;  %v7072_v6 = vpop.eup %7071 }
 0x26b   :  { %v7074_v10 = vpop.eup %7073  ;;  %v1233_v49 = vsub.f32 1.0, %v7072_v6  ;;  %v1237_v23 = vmul.f32 0.0, %v7072_v6 }
 0x26c   :  { %v1230_v52 = vadd.f32 %v1228_v41, %v827_v8  ;;  %v1234_v28 = vsub.f32 1.0, %v7074_v10  ;;  %v1238_v21 = vmul.f32 0.0, %v7074_v10 }
 0x26e   :  { %7077 = vtanh.f32 %v1230_v52 }
 0x274   :  { %v7076_v38 = vpop.eup %7075 }
 0x275   :  { %v1235_v44 = vmul.f32 %v7076_v38, %v1233_v49 }
 0x277   :  { %v8266_v25 = vadd.f32 %v1237_v23, %v1235_v44 }
 0x278   :  { %v7078_v51 = vpop.eup %7077 }
 0x279   :  { %1316 = vmatmul.mubr.f32.vlgmr.msra.gmra.mrb[4].mxu1 %v8266_v25  ;;  %5205 = vmatprep.mubr.f32.mxu0 %v8266_v25  ;;  %v1236_v36 = vmul.f32 %v7078_v51, %v1234_v28 }
 0x27a   :  { %1321 = vmatprep.mubr.f32.mxu1 %v9103_v24  ;;  %5909 = vmatpush1.bf16.msra.mxu1 %v7758_v12 }
 0x27b   :  { %v8272_v26 = vadd.f32 %v1238_v21, %v1236_v36  ;;  %5911 = vmatprep.subr.bf16.mxu1 %v7761_v16 }
 0x27d   :  { %v4526_v18 = vpack.c.bf16 %v8272_v26, %v8266_v25  ;;  %1322 = vmatmul.mubr.f32.gmra.mrb[6].mxu1 %v8272_v26  ;;  %5206 = vmatmul.mubr.f32.vlgmr.msra.gmra.mrb[66].mxu0 %v8272_v26 }
 0x27e   :  { %5913 = vmatpush1.bf16.msra.mxu1 %v7788_v30  ;;  %5941 = vmatpush3.bf16.msra.mxu0 %v7732_v58 }
 0x27f   :  { %4527 = vst [vmem:[%s9084_s7] sm:$0xff] %v4526_v18   ;;  %5915 = vmatprep.subr.bf16.mxu1 %v7796_v35  ;;  %5943 = vmatprep.subr.bf16.mxu0 %v7793_v32 }
 0x280   :  { %1520 = vmatprep.mubr.f32.mxu1 %v9103_v24 }
 0x282   :  { %5917 = vmatpush1.bf16.msra.mxu1 %v7820_v45  ;;  %5945 = vmatpush3.bf16.msra.mxu0 %v7793_v32 }
 0x283   :  { %5919 = vmatprep.subr.bf16.mxu1 %v7830_v50  ;;  %5947 = vmatprep.subr.bf16.mxu0 %v7826_v47 }
 0x286   :  { %5921 = vmatpush1.bf16.msra.mxu1 %v7854_v0  ;;  %5949 = vmatpush3.bf16.msra.mxu0 %v7826_v47 }
 0x287   :  { %5923 = vmatprep.subr.bf16.mxu1 %v7866_v5  ;;  %5951 = vmatprep.subr.bf16.mxu0 %v7860_v2 }
 0x28a   :  { %5925 = vmatpush1.bf16.msra.mxu1 %v7892_v17  ;;  %5953 = vmatpush3.bf16.msra.mxu0 %v7860_v2 }
 0x28b   :  { %5927 = vmatprep.subr.bf16.mxu1 %v7904_v22  ;;  %5955 = vmatprep.subr.bf16.mxu0 %v7898_v19 }
 0x28e   :  { %5929 = vmatpush1.bf16.msra.mxu1 %v7929_v34  ;;  %5957 = vmatpush3.bf16.msra.mxu0 %v7898_v19 }
 0x28f   :  { %5931 = vmatprep.subr.bf16.mxu1 %v7941_v40  ;;  %5959 = vmatprep.subr.bf16.mxu0 %v7935_v37 }
 0x292   :  { %5933 = vmatpush1.bf16.msra.mxu1 %v7967_v54  ;;  %5961 = vmatpush3.bf16.msra.mxu0 %v7935_v37 }
 0x293   :  { %5935 = vmatprep.subr.bf16.mxu1 %v7979_v63  ;;  %5963 = vmatprep.subr.bf16.mxu0 %v7973_v57 }
 0x296   :  { %5937 = vmatpush1.bf16.msra.mxu1 %v7999_v11  ;;  %5965 = vmatpush3.bf16.msra.mxu0 %v7973_v57 }
 0x297   :  { %5967 = vmatprep.subr.bf16.mxu0 %v8002_v3  ;;  %5971 = vmatprep.subr.bf16.mxu1 %v7723_v55 }
 0x29a   :  { %5969 = vmatpush3.bf16.msra.mxu0 %v8002_v3 }
 0x29b   :  { %6003 = vmatprep.subr.bf16.mxu0 %v7732_v58 }
 0x34c   :  { %v1317_v13 = vpop.f32.mrb[4].mxu1 }
 0x34d   :  { %v6811_v1 = vadd.f32 %v8248_v33, %v1317_v13  ;;  %v1319_v29 = vpop.f32.mrb[5].mxu1 }
 0x34e   :  { %v6813_v8 = vadd.f32 %v8250_v59, %v1319_v29 }
 0x34f   :  { %v4371_v53 = vmul.f32 -1.442695, %v6811_v1 }
 0x350   :  { %v1323_v41 = vpop.f32.mrb[6].mxu1  ;;  %v5207_v52 = vpop.f32.mrb[66].mxu0  ;;  %v4373_v23 = vmul.f32 -1.442695, %v6813_v8 }
 0x351   :  { %7079 = vpow2.f32 %v4371_v53  ;;  %v6815_v6 = vadd.f32 %v8248_v33, %v1323_v41  ;;  %v1325_v10 = vpop.f32.mrb[7].mxu1  ;;  %v1394_v49 = vpop.f32.mrb[67].mxu0  ;;  %v1400_v8 = vadd.f32 %v5207_v52, %v8258_v14 }
 0x352   :  { %v6817_v44 = vadd.f32 %v8250_v59, %v1325_v10  ;;  %v1395_v53 = vadd.f32 %v1394_v49, %v8258_v14 }
 0x353   :  { %v4372_v38 = vmul.f32 -1.442695, %v6815_v6 }
 0x354   :  { %v4374_v28 = vmul.f32 -1.442695, %v6817_v44 }
 0x355   :  { %7081 = vpow2.f32 %v4372_v38 }
 0x356   :  { %7083 = vpow2.f32 %v4373_v23 }
 0x357   :  { %7085 = vpow2.f32 %v4374_v28 }
 0x35b   :  { %v7080_v51 = vpop.eup %7079 }
 0x35c   :  { %v1411_v36 = vadd.f32 1.0, %v7080_v51 }
 0x35e   :  { %7087 = vrcp.f32 %v1411_v36 }
 0x35f   :  { %v7082_v21 = vpop.eup %7081 }
 0x360   :  { %v1412_v18 = vadd.f32 1.0, %v7082_v21  ;;  %v7084_v13 = vpop.eup %7083 }
 0x361   :  { %v7086_v1 = vpop.eup %7085  ;;  %v1425_v29 = vadd.f32 1.0, %v7084_v13 }
 0x362   :  { %7089 = vrcp.f32 %v1412_v18  ;;  %v1426_v6 = vadd.f32 1.0, %v7086_v1 }
 0x363   :  { %7091 = vrcp.f32 %v1425_v29 }
 0x364   :  { %7093 = vrcp.f32 %v1426_v6 }
 0x368   :  { %v7088_v41 = vpop.eup %7087 }
 0x369   :  { %v1431_v10 = vmul.f32 %v7088_v41, %v1395_v53 }
 0x36b   :  { %v1433_v38 = vadd.f32 %v1431_v10, %v8155_v27 }
 0x36c   :  { %v7090_v44 = vpop.eup %7089 }
 0x36d   :  { %v1432_v23 = vmul.f32 %v7090_v44, %v1400_v8  ;;  %7095 = vtanh.f32 %v1433_v38  ;;  %v7092_v51 = vpop.eup %7091 }
 0x36e   :  { %v7094_v36 = vpop.eup %7093  ;;  %v1437_v21 = vsub.f32 1.0, %v7092_v51  ;;  %v1441_v13 = vmul.f32 %v7092_v51, %v8266_v25 }
 0x36f   :  { %v1434_v28 = vadd.f32 %v1432_v23, %v8152_v61  ;;  %v1438_v29 = vsub.f32 1.0, %v7094_v36  ;;  %v1442_v53 = vmul.f32 %v7094_v36, %v8272_v26 }
 0x371   :  { %7097 = vtanh.f32 %v1434_v28 }
 0x377   :  { %v7096_v18 = vpop.eup %7095 }
 0x378   :  { %v1439_v49 = vmul.f32 %v7096_v18, %v1437_v21 }
 0x37a   :  { %v8322_v1 = vadd.f32 %v1441_v13, %v1439_v49 }
 0x37b   :  { %v7098_v52 = vpop.eup %7097 }
 0x37c   :  { %1521 = vmatmul.mubr.f32.vlgmr.msra.gmra.mrb[8].mxu1 %v8322_v1  ;;  %5240 = vmatprep.mubr.f32.mxu0 %v8322_v1  ;;  %v1440_v27 = vmul.f32 %v7098_v52, %v1438_v29 }
 0x37d   :  { %1526 = vmatprep.mubr.f32.mxu1 %v9103_v24  ;;  %5973 = vmatpush1.bf16.msra.mxu1 %v7758_v12 }
 0x37e   :  { %v8329_v61 = vadd.f32 %v1442_v53, %v1440_v27  ;;  %5975 = vmatprep.subr.bf16.mxu1 %v7761_v16 }
 0x380   :  { %v4531_v25 = vpack.c.bf16 %v8329_v61, %v8322_v1  ;;  %1527 = vmatmul.mubr.f32.gmra.mrb[10].mxu1 %v8329_v61  ;;  %5241 = vmatmul.mubr.f32.vlgmr.msra.gmra.mrb[68].mxu0 %v8329_v61 }
 0x381   :  { %5977 = vmatpush1.bf16.msra.mxu1 %v7788_v30  ;;  %6005 = vmatpush3.bf16.msra.mxu0 %v7732_v58 }
 0x382   :  { %4603 = vst [vmem:[%s9084_s7 + $0x8] sm:$0xff] %v4531_v25   ;;  %5979 = vmatprep.subr.bf16.mxu1 %v7796_v35  ;;  %6007 = vmatprep.subr.bf16.mxu0 %v7793_v32 }
 0x383   :  { %1725 = vmatprep.mubr.f32.mxu1 %v9103_v24 }
 0x385   :  { %5981 = vmatpush1.bf16.msra.mxu1 %v7820_v45  ;;  %6009 = vmatpush3.bf16.msra.mxu0 %v7793_v32 }
 0x386   :  { %5983 = vmatprep.subr.bf16.mxu1 %v7830_v50  ;;  %6011 = vmatprep.subr.bf16.mxu0 %v7826_v47 }
 0x389   :  { %5985 = vmatpush1.bf16.msra.mxu1 %v7854_v0  ;;  %6013 = vmatpush3.bf16.msra.mxu0 %v7826_v47 }
 0x38a   :  { %5987 = vmatprep.subr.bf16.mxu1 %v7866_v5  ;;  %6015 = vmatprep.subr.bf16.mxu0 %v7860_v2 }
 0x38d   :  { %5989 = vmatpush1.bf16.msra.mxu1 %v7892_v17  ;;  %6017 = vmatpush3.bf16.msra.mxu0 %v7860_v2 }
 0x38e   :  { %5991 = vmatprep.subr.bf16.mxu1 %v7904_v22  ;;  %6019 = vmatprep.subr.bf16.mxu0 %v7898_v19 }
 0x391   :  { %5993 = vmatpush1.bf16.msra.mxu1 %v7929_v34  ;;  %6021 = vmatpush3.bf16.msra.mxu0 %v7898_v19 }
 0x392   :  { %5995 = vmatprep.subr.bf16.mxu1 %v7941_v40  ;;  %6023 = vmatprep.subr.bf16.mxu0 %v7935_v37 }
 0x395   :  { %5997 = vmatpush1.bf16.msra.mxu1 %v7967_v54  ;;  %6025 = vmatpush3.bf16.msra.mxu0 %v7935_v37 }
 0x396   :  { %5999 = vmatprep.subr.bf16.mxu1 %v7979_v63  ;;  %6027 = vmatprep.subr.bf16.mxu0 %v7973_v57 }
 0x399   :  { %6001 = vmatpush1.bf16.msra.mxu1 %v7999_v11  ;;  %6029 = vmatpush3.bf16.msra.mxu0 %v7973_v57 }
 0x39a   :  { %6031 = vmatprep.subr.bf16.mxu0 %v8002_v3  ;;  %6035 = vmatprep.subr.bf16.mxu1 %v7723_v55 }
 0x39d   :  { %6033 = vmatpush3.bf16.msra.mxu0 %v8002_v3 }
 0x39e   :  { %6067 = vmatprep.subr.bf16.mxu0 %v7732_v58 }
 0x44f   :  { %v1522_v26 = vpop.f32.mrb[8].mxu1 }
 0x450   :  { %v6819_v41 = vadd.f32 %v8248_v33, %v1522_v26  ;;  %v1524_v6 = vpop.f32.mrb[9].mxu1 }
 0x451   :  { %v6821_v8 = vadd.f32 %v8250_v59, %v1524_v6 }
 0x452   :  { %v4379_v10 = vmul.f32 -1.442695, %v6819_v41 }
 0x453   :  { %v1528_v38 = vpop.f32.mrb[10].mxu1  ;;  %v5242_v44 = vpop.f32.mrb[68].mxu0  ;;  %v4381_v18 = vmul.f32 -1.442695, %v6821_v8 }
 0x454   :  { %7099 = vpow2.f32 %v4379_v10  ;;  %v6823_v23 = vadd.f32 %v8248_v33, %v1528_v38  ;;  %v1530_v28 = vpop.f32.mrb[11].mxu1  ;;  %v1599_v51 = vpop.f32.mrb[69].mxu0  ;;  %v1605_v8 = vadd.f32 %v5242_v44, %v8258_v14 }
 0x455   :  { %v6825_v21 = vadd.f32 %v8250_v59, %v1530_v28  ;;  %v1600_v41 = vadd.f32 %v1599_v51, %v8258_v14 }
 0x456   :  { %v4380_v36 = vmul.f32 -1.442695, %v6823_v23 }
 0x457   :  { %v4382_v49 = vmul.f32 -1.442695, %v6825_v21 }
 0x458   :  { %7101 = vpow2.f32 %v4380_v36 }
 0x459   :  { %7103 = vpow2.f32 %v4381_v18 }
 0x45a   :  { %7105 = vpow2.f32 %v4382_v49 }
 0x45e   :  { %v7100_v13 = vpop.eup %7099 }
 0x45f   :  { %v1616_v29 = vadd.f32 1.0, %v7100_v13 }
 0x461   :  { %7107 = vrcp.f32 %v1616_v29 }
 0x462   :  { %v7102_v52 = vpop.eup %7101 }
 0x463   :  { %v1617_v27 = vadd.f32 1.0, %v7102_v52  ;;  %v7104_v53 = vpop.eup %7103 }
 0x464   :  { %v7106_v25 = vpop.eup %7105  ;;  %v1630_v26 = vadd.f32 1.0, %v7104_v53 }
 0x465   :  { %7109 = vrcp.f32 %v1617_v27  ;;  %v1631_v10 = vadd.f32 1.0, %v7106_v25 }
 0x466   :  { %7111 = vrcp.f32 %v1630_v26 }
 0x467   :  { %7113 = vrcp.f32 %v1631_v10 }
 0x46b   :  { %v7108_v6 = vpop.eup %7107 }
 0x46c   :  { %v1636_v38 = vmul.f32 %v7108_v6, %v1600_v41 }
 0x46e   :  { %v1638_v23 = vadd.f32 %v1636_v38, %v8161_v20 }
 0x46f   :  { %v7110_v28 = vpop.eup %7109 }
 0x470   :  { %v1637_v36 = vmul.f32 %v7110_v28, %v1605_v8  ;;  %7115 = vtanh.f32 %v1638_v23  ;;  %v7112_v18 = vpop.eup %7111 }
 0x471   :  { %v7114_v49 = vpop.eup %7113  ;;  %v1642_v13 = vsub.f32 1.0, %v7112_v18  ;;  %v1646_v52 = vmul.f32 %v7112_v18, %v8322_v1 }
 0x472   :  { %v1639_v21 = vadd.f32 %v1637_v36, %v8158_v31  ;;  %v1643_v53 = vsub.f32 1.0, %v7114_v49  ;;  %v1647_v25 = vmul.f32 %v7114_v49, %v8329_v61 }
 0x474   :  { %7117 = vtanh.f32 %v1639_v21 }
 0x47a   :  { %v7116_v29 = vpop.eup %7115 }
 0x47b   :  { %v1644_v51 = vmul.f32 %v7116_v29, %v1642_v13 }
 0x47d   :  { %v8379_v27 = vadd.f32 %v1646_v52, %v1644_v51 }
 0x47e   :  { %v7118_v44 = vpop.eup %7117 }
 0x47f   :  { %1726 = vmatmul.mubr.f32.vlgmr.msra.gmra.mrb[12].mxu1 %v8379_v27  ;;  %5275 = vmatprep.mubr.f32.mxu0 %v8379_v27  ;;  %v1645_v20 = vmul.f32 %v7118_v44, %v1643_v53 }
 0x480   :  { %1731 = vmatprep.mubr.f32.mxu1 %v9103_v24  ;;  %6037 = vmatpush1.bf16.msra.mxu1 %v7758_v12 }
 0x481   :  { %v8386_v31 = vadd.f32 %v1647_v25, %v1645_v20  ;;  %6039 = vmatprep.subr.bf16.mxu1 %v7761_v16 }
 0x483   :  { %v4536_v1 = vpack.c.bf16 %v8386_v31, %v8379_v27  ;;  %1732 = vmatmul.mubr.f32.gmra.mrb[14].mxu1 %v8386_v31  ;;  %5276 = vmatmul.mubr.f32.vlgmr.msra.gmra.mrb[70].mxu0 %v8386_v31 }
 0x484   :  { %6041 = vmatpush1.bf16.msra.mxu1 %v7788_v30  ;;  %6069 = vmatpush3.bf16.msra.mxu0 %v7732_v58 }
 0x485   :  { %4604 = vst [vmem:[%s9084_s7 + $0x10] sm:$0xff] %v4536_v1   ;;  %6043 = vmatprep.subr.bf16.mxu1 %v7796_v35  ;;  %6071 = vmatprep.subr.bf16.mxu0 %v7793_v32 }
 0x486   :  { %1930 = vmatprep.mubr.f32.mxu1 %v9103_v24 }
 0x488   :  { %6045 = vmatpush1.bf16.msra.mxu1 %v7820_v45  ;;  %6073 = vmatpush3.bf16.msra.mxu0 %v7793_v32 }
 0x489   :  { %6047 = vmatprep.subr.bf16.mxu1 %v7830_v50  ;;  %6075 = vmatprep.subr.bf16.mxu0 %v7826_v47 }
 0x48c   :  { %6049 = vmatpush1.bf16.msra.mxu1 %v7854_v0  ;;  %6077 = vmatpush3.bf16.msra.mxu0 %v7826_v47 }
 0x48d   :  { %6051 = vmatprep.subr.bf16.mxu1 %v7866_v5  ;;  %6079 = vmatprep.subr.bf16.mxu0 %v7860_v2 }
 0x490   :  { %6053 = vmatpush1.bf16.msra.mxu1 %v7892_v17  ;;  %6081 = vmatpush3.bf16.msra.mxu0 %v7860_v2 }
 0x491   :  { %6055 = vmatprep.subr.bf16.mxu1 %v7904_v22  ;;  %6083 = vmatprep.subr.bf16.mxu0 %v7898_v19 }
 0x494   :  { %6057 = vmatpush1.bf16.msra.mxu1 %v7929_v34  ;;  %6085 = vmatpush3.bf16.msra.mxu0 %v7898_v19 }
 0x495   :  { %6059 = vmatprep.subr.bf16.mxu1 %v7941_v40  ;;  %6087 = vmatprep.subr.bf16.mxu0 %v7935_v37 }
 0x498   :  { %6061 = vmatpush1.bf16.msra.mxu1 %v7967_v54  ;;  %6089 = vmatpush3.bf16.msra.mxu0 %v7935_v37 }
 0x499   :  { %6063 = vmatprep.subr.bf16.mxu1 %v7979_v63  ;;  %6091 = vmatprep.subr.bf16.mxu0 %v7973_v57 }
 0x49c   :  { %6065 = vmatpush1.bf16.msra.mxu1 %v7999_v11  ;;  %6093 = vmatpush3.bf16.msra.mxu0 %v7973_v57 }
 0x49d   :  { %6095 = vmatprep.subr.bf16.mxu0 %v8002_v3  ;;  %6099 = vmatprep.subr.bf16.mxu1 %v7723_v55 }
 0x4a0   :  { %6097 = vmatpush3.bf16.msra.mxu0 %v8002_v3 }
 0x4a1   :  { %6131 = vmatprep.subr.bf16.mxu0 %v7732_v58 }
 0x552   :  { %v1727_v61 = vpop.f32.mrb[12].mxu1 }
 0x553   :  { %v6827_v26 = vadd.f32 %v8248_v33, %v1727_v61  ;;  %v1729_v41 = vpop.f32.mrb[13].mxu1 }
 0x554   :  { %v6829_v10 = vadd.f32 %v8250_v59, %v1729_v41 }
 0x555   :  { %v4387_v6 = vmul.f32 -1.442695, %v6827_v26 }
 0x556   :  { %v1733_v38 = vpop.f32.mrb[14].mxu1  ;;  %v5277_v8 = vpop.f32.mrb[70].mxu0  ;;  %v4389_v49 = vmul.f32 -1.442695, %v6829_v10 }
 0x557   :  { %7119 = vpow2.f32 %v4387_v6  ;;  %v6831_v23 = vadd.f32 %v8248_v33, %v1733_v38  ;;  %v1735_v28 = vpop.f32.mrb[15].mxu1  ;;  %v1804_v36 = vpop.f32.mrb[71].mxu0  ;;  %v1810_v6 = vadd.f32 %v5277_v8, %v8258_v14 }
 0x558   :  { %v6833_v18 = vadd.f32 %v8250_v59, %v1735_v28  ;;  %v1805_v1 = vadd.f32 %v1804_v36, %v8258_v14 }
 0x559   :  { %v4388_v21 = vmul.f32 -1.442695, %v6831_v23 }
 0x55a   :  { %v4390_v13 = vmul.f32 -1.442695, %v6833_v18 }
 0x55b   :  { %7121 = vpow2.f32 %v4388_v21 }
 0x55c   :  { %7123 = vpow2.f32 %v4389_v49 }
 0x55d   :  { %7125 = vpow2.f32 %v4390_v13 }
 0x561   :  { %v7120_v29 = vpop.eup %7119 }
 0x562   :  { %v1821_v51 = vadd.f32 1.0, %v7120_v29 }
 0x564   :  { %7127 = vrcp.f32 %v1821_v51 }
 0x565   :  { %v7122_v52 = vpop.eup %7121 }
 0x566   :  { %v1822_v53 = vadd.f32 1.0, %v7122_v52  ;;  %v7124_v44 = vpop.eup %7123 }
 0x567   :  { %v7126_v20 = vpop.eup %7125  ;;  %v1835_v25 = vadd.f32 1.0, %v7124_v44 }
 0x568   :  { %7129 = vrcp.f32 %v1822_v53  ;;  %v1836_v26 = vadd.f32 1.0, %v7126_v20 }
 0x569   :  { %7131 = vrcp.f32 %v1835_v25 }
 0x56a   :  { %7133 = vrcp.f32 %v1836_v26 }
 0x56e   :  { %v7128_v61 = vpop.eup %7127 }
 0x56f   :  { %v1841_v41 = vmul.f32 %v7128_v61, %v1805_v1 }
 0x571   :  { %v1843_v10 = vadd.f32 %v1841_v41, %v8167_v43 }
 0x572   :  { %v7130_v38 = vpop.eup %7129 }
 0x573   :  { %v1842_v23 = vmul.f32 %v7130_v38, %v1810_v6  ;;  %7135 = vtanh.f32 %v1843_v10  ;;  %v7132_v21 = vpop.eup %7131 }
 0x574   :  { %v7134_v18 = vpop.eup %7133  ;;  %v1847_v49 = vsub.f32 1.0, %v7132_v21  ;;  %v1851_v29 = vmul.f32 %v7132_v21, %v8379_v27 }
 0x575   :  { %v1844_v28 = vadd.f32 %v1842_v23, %v8164_v39  ;;  %v1848_v52 = vsub.f32 1.0, %v7134_v18  ;;  %v1852_v53 = vmul.f32 %v7134_v18, %v8386_v31 }
 0x577   :  { %7137 = vtanh.f32 %v1844_v28 }
 0x57d   :  { %v7136_v13 = vpop.eup %7135 }
 0x57e   :  { %v1849_v36 = vmul.f32 %v7136_v13, %v1847_v49 }
 0x580   :  { %v8436_v51 = vadd.f32 %v1851_v29, %v1849_v36 }
 0x581   :  { %v7138_v8 = vpop.eup %7137 }
 0x582   :  { %1931 = vmatmul.mubr.f32.vlgmr.msra.gmra.mrb[16].mxu1 %v8436_v51  ;;  %5310 = vmatprep.mubr.f32.mxu0 %v8436_v51  ;;  %v1850_v43 = vmul.f32 %v7138_v8, %v1848_v52 }
 0x583   :  { %1936 = vmatprep.mubr.f32.mxu1 %v9103_v24  ;;  %6101 = vmatpush1.bf16.msra.mxu1 %v7758_v12 }
 0x584   :  { %v8443_v39 = vadd.f32 %v1852_v53, %v1850_v43  ;;  %6103 = vmatprep.subr.bf16.mxu1 %v7761_v16 }
 0x586   :  { %v4541_v27 = vpack.c.bf16 %v8443_v39, %v8436_v51  ;;  %1937 = vmatmul.mubr.f32.gmra.mrb[18].mxu1 %v8443_v39  ;;  %5311 = vmatmul.mubr.f32.vlgmr.msra.gmra.mrb[72].mxu0 %v8443_v39 }
 0x587   :  { %6105 = vmatpush1.bf16.msra.mxu1 %v7788_v30  ;;  %6133 = vmatpush3.bf16.msra.mxu0 %v7732_v58 }
 0x588   :  { %4605 = vst [vmem:[%s9084_s7 + $0x18] sm:$0xff] %v4541_v27   ;;  %6107 = vmatprep.subr.bf16.mxu1 %v7796_v35  ;;  %6135 = vmatprep.subr.bf16.mxu0 %v7793_v32 }
 0x589   :  { %2135 = vmatprep.mubr.f32.mxu1 %v9103_v24 }
 0x58b   :  { %6109 = vmatpush1.bf16.msra.mxu1 %v7820_v45  ;;  %6137 = vmatpush3.bf16.msra.mxu0 %v7793_v32 }
 0x58c   :  { %6111 = vmatprep.subr.bf16.mxu1 %v7830_v50  ;;  %6139 = vmatprep.subr.bf16.mxu0 %v7826_v47 }
 0x58f   :  { %6113 = vmatpush1.bf16.msra.mxu1 %v7854_v0  ;;  %6141 = vmatpush3.bf16.msra.mxu0 %v7826_v47 }
 0x590   :  { %6115 = vmatprep.subr.bf16.mxu1 %v7866_v5  ;;  %6143 = vmatprep.subr.bf16.mxu0 %v7860_v2 }
 0x593   :  { %6117 = vmatpush1.bf16.msra.mxu1 %v7892_v17  ;;  %6145 = vmatpush3.bf16.msra.mxu0 %v7860_v2 }
 0x594   :  { %6119 = vmatprep.subr.bf16.mxu1 %v7904_v22  ;;  %6147 = vmatprep.subr.bf16.mxu0 %v7898_v19 }
 0x597   :  { %6121 = vmatpush1.bf16.msra.mxu1 %v7929_v34  ;;  %6149 = vmatpush3.bf16.msra.mxu0 %v7898_v19 }
 0x598   :  { %6123 = vmatprep.subr.bf16.mxu1 %v7941_v40  ;;  %6151 = vmatprep.subr.bf16.mxu0 %v7935_v37 }
 0x59b   :  { %6125 = vmatpush1.bf16.msra.mxu1 %v7967_v54  ;;  %6153 = vmatpush3.bf16.msra.mxu0 %v7935_v37 }
 0x59c   :  { %6127 = vmatprep.subr.bf16.mxu1 %v7979_v63  ;;  %6155 = vmatprep.subr.bf16.mxu0 %v7973_v57 }
 0x59f   :  { %6129 = vmatpush1.bf16.msra.mxu1 %v7999_v11  ;;  %6157 = vmatpush3.bf16.msra.mxu0 %v7973_v57 }
 0x5a0   :  { %6159 = vmatprep.subr.bf16.mxu0 %v8002_v3  ;;  %6163 = vmatprep.subr.bf16.mxu1 %v7723_v55 }
 0x5a3   :  { %6161 = vmatpush3.bf16.msra.mxu0 %v8002_v3 }
 0x5a4   :  { %6195 = vmatprep.subr.bf16.mxu0 %v7732_v58 }
 0x655   :  { %v1932_v31 = vpop.f32.mrb[16].mxu1 }
 0x656   :  { %v6835_v44 = vadd.f32 %v8248_v33, %v1932_v31  ;;  %v1934_v20 = vpop.f32.mrb[17].mxu1 }
 0x657   :  { %v6837_v1 = vadd.f32 %v8250_v59, %v1934_v20 }
 0x658   :  { %v4395_v25 = vmul.f32 -1.442695, %v6835_v44 }
 0x659   :  { %v1938_v61 = vpop.f32.mrb[18].mxu1  ;;  %v5312_v26 = vpop.f32.mrb[72].mxu0  ;;  %v4397_v28 = vmul.f32 -1.442695, %v6837_v1 }
 0x65a   :  { %7139 = vpow2.f32 %v4395_v25  ;;  %v6839_v41 = vadd.f32 %v8248_v33, %v1938_v61  ;;  %v1940_v6 = vpop.f32.mrb[19].mxu1  ;;  %v2009_v10 = vpop.f32.mrb[73].mxu0  ;;  %v2015_v44 = vadd.f32 %v5312_v26, %v8258_v14 }
 0x65b   :  { %v6841_v23 = vadd.f32 %v8250_v59, %v1940_v6  ;;  %v2010_v43 = vadd.f32 %v2009_v10, %v8258_v14 }
 0x65c   :  { %v4396_v38 = vmul.f32 -1.442695, %v6839_v41 }
 0x65d   :  { %v4398_v21 = vmul.f32 -1.442695, %v6841_v23 }
 0x65e   :  { %7141 = vpow2.f32 %v4396_v38 }
 0x65f   :  { %7143 = vpow2.f32 %v4397_v28 }
 0x660   :  { %7145 = vpow2.f32 %v4398_v21 }
 0x664   :  { %v7140_v18 = vpop.eup %7139 }
 0x665   :  { %v2026_v49 = vadd.f32 1.0, %v7140_v18 }
 0x667   :  { %7147 = vrcp.f32 %v2026_v49 }
 0x668   :  { %v7142_v13 = vpop.eup %7141 }
 0x669   :  { %v2027_v36 = vadd.f32 1.0, %v7142_v13  ;;  %v7144_v29 = vpop.eup %7143 }
 0x66a   :  { %v7146_v52 = vpop.eup %7145  ;;  %v2040_v8 = vadd.f32 1.0, %v7144_v29 }
 0x66b   :  { %7149 = vrcp.f32 %v2027_v36  ;;  %v2041_v27 = vadd.f32 1.0, %v7146_v52 }
 0x66c   :  { %7151 = vrcp.f32 %v2040_v8 }
 0x66d   :  { %7153 = vrcp.f32 %v2041_v27 }
 0x671   :  { %v7148_v53 = vpop.eup %7147 }
 0x672   :  { %v2046_v31 = vmul.f32 %v7148_v53, %v2010_v43 }
 0x674   :  { %v2048_v20 = vadd.f32 %v2046_v31, %v8173_v48 }
 0x675   :  { %v7150_v25 = vpop.eup %7149 }
 0x676   :  { %v2047_v1 = vmul.f32 %v7150_v25, %v2015_v44  ;;  %7155 = vtanh.f32 %v2048_v20  ;;  %v7152_v41 = vpop.eup %7151 }
 0x677   :  { %v7154_v6 = vpop.eup %7153  ;;  %v2052_v38 = vsub.f32 1.0, %v7152_v41  ;;  %v2056_v28 = vmul.f32 %v7152_v41, %v8436_v51 }
 0x678   :  { %v2049_v61 = vadd.f32 %v2047_v1, %v8170_v46  ;;  %v2053_v18 = vsub.f32 1.0, %v7154_v6  ;;  %v2057_v49 = vmul.f32 %v7154_v6, %v8443_v39 }
 0x67a   :  { %7157 = vtanh.f32 %v2049_v61 }
 0x680   :  { %v7156_v23 = vpop.eup %7155 }
 0x681   :  { %v2054_v10 = vmul.f32 %v7156_v23, %v2052_v38 }
 0x683   :  { %v8493_v21 = vadd.f32 %v2056_v28, %v2054_v10 }
 0x684   :  { %v7158_v26 = vpop.eup %7157 }
 0x685   :  { %2136 = vmatmul.mubr.f32.vlgmr.msra.gmra.mrb[20].mxu1 %v8493_v21  ;;  %5345 = vmatprep.mubr.f32.mxu0 %v8493_v21  ;;  %v2055_v48 = vmul.f32 %v7158_v26, %v2053_v18 }
 0x686   :  { %2141 = vmatprep.mubr.f32.mxu1 %v9103_v24  ;;  %6165 = vmatpush1.bf16.msra.mxu1 %v7758_v12 }
 0x687   :  { %v8500_v46 = vadd.f32 %v2057_v49, %v2055_v48  ;;  %6167 = vmatprep.subr.bf16.mxu1 %v7761_v16 }
 0x689   :  { %v4546_v51 = vpack.c.bf16 %v8500_v46, %v8493_v21  ;;  %2142 = vmatmul.mubr.f32.gmra.mrb[22].mxu1 %v8500_v46  ;;  %5346 = vmatmul.mubr.f32.vlgmr.msra.gmra.mrb[74].mxu0 %v8500_v46 }
 0x68a   :  { %6169 = vmatpush1.bf16.msra.mxu1 %v7788_v30  ;;  %6197 = vmatpush3.bf16.msra.mxu0 %v7732_v58 }
 0x68b   :  { %4606 = vst [vmem:[%s9084_s7 + $0x20] sm:$0xff] %v4546_v51   ;;  %6171 = vmatprep.subr.bf16.mxu1 %v7796_v35  ;;  %6199 = vmatprep.subr.bf16.mxu0 %v7793_v32 }
 0x68c   :  { %2340 = vmatprep.mubr.f32.mxu1 %v9103_v24 }
 0x68e   :  { %6173 = vmatpush1.bf16.msra.mxu1 %v7820_v45  ;;  %6201 = vmatpush3.bf16.msra.mxu0 %v7793_v32 }
 0x68f   :  { %6175 = vmatprep.subr.bf16.mxu1 %v7830_v50  ;;  %6203 = vmatprep.subr.bf16.mxu0 %v7826_v47 }
 0x692   :  { %6177 = vmatpush1.bf16.msra.mxu1 %v7854_v0  ;;  %6205 = vmatpush3.bf16.msra.mxu0 %v7826_v47 }
 0x693   :  { %6179 = vmatprep.subr.bf16.mxu1 %v7866_v5  ;;  %6207 = vmatprep.subr.bf16.mxu0 %v7860_v2 }
 0x696   :  { %6181 = vmatpush1.bf16.msra.mxu1 %v7892_v17  ;;  %6209 = vmatpush3.bf16.msra.mxu0 %v7860_v2 }
 0x697   :  { %6183 = vmatprep.subr.bf16.mxu1 %v7904_v22  ;;  %6211 = vmatprep.subr.bf16.mxu0 %v7898_v19 }
 0x69a   :  { %6185 = vmatpush1.bf16.msra.mxu1 %v7929_v34  ;;  %6213 = vmatpush3.bf16.msra.mxu0 %v7898_v19 }
 0x69b   :  { %6187 = vmatprep.subr.bf16.mxu1 %v7941_v40  ;;  %6215 = vmatprep.subr.bf16.mxu0 %v7935_v37 }
 0x69e   :  { %6189 = vmatpush1.bf16.msra.mxu1 %v7967_v54  ;;  %6217 = vmatpush3.bf16.msra.mxu0 %v7935_v37 }
 0x69f   :  { %6191 = vmatprep.subr.bf16.mxu1 %v7979_v63  ;;  %6219 = vmatprep.subr.bf16.mxu0 %v7973_v57 }
 0x6a2   :  { %6193 = vmatpush1.bf16.msra.mxu1 %v7999_v11  ;;  %6221 = vmatpush3.bf16.msra.mxu0 %v7973_v57 }
 0x6a3   :  { %6223 = vmatprep.subr.bf16.mxu0 %v8002_v3  ;;  %6227 = vmatprep.subr.bf16.mxu1 %v7723_v55 }
 0x6a6   :  { %6225 = vmatpush3.bf16.msra.mxu0 %v8002_v3 }
 0x6a7   :  { %6259 = vmatprep.subr.bf16.mxu0 %v7732_v58 }
 0x758   :  { %v2137_v39 = vpop.f32.mrb[20].mxu1 }
 0x759   :  { %v6843_v13 = vadd.f32 %v8248_v33, %v2137_v39  ;;  %v2139_v36 = vpop.f32.mrb[21].mxu1 }
 0x75a   :  { %v6845_v52 = vadd.f32 %v8250_v59, %v2139_v36 }
 0x75b   :  { %v4403_v29 = vmul.f32 -1.442695, %v6843_v13 }
 0x75c   :  { %v2143_v8 = vpop.f32.mrb[22].mxu1  ;;  %v5347_v43 = vpop.f32.mrb[74].mxu0  ;;  %v4405_v25 = vmul.f32 -1.442695, %v6845_v52 }
 0x75d   :  { %7159 = vpow2.f32 %v4403_v29  ;;  %v6847_v53 = vadd.f32 %v8248_v33, %v2143_v8  ;;  %v2145_v27 = vpop.f32.mrb[23].mxu1  ;;  %v2214_v31 = vpop.f32.mrb[75].mxu0  ;;  %v2220_v51 = vadd.f32 %v5347_v43, %v8258_v14 }
 0x75e   :  { %v6849_v20 = vadd.f32 %v8250_v59, %v2145_v27  ;;  %v2215_v18 = vadd.f32 %v2214_v31, %v8258_v14 }
 0x75f   :  { %v4404_v44 = vmul.f32 -1.442695, %v6847_v53 }
 0x760   :  { %v4406_v1 = vmul.f32 -1.442695, %v6849_v20 }
 0x761   :  { %7161 = vpow2.f32 %v4404_v44 }
 0x762   :  { %7163 = vpow2.f32 %v4405_v25 }
 0x763   :  { %7165 = vpow2.f32 %v4406_v1 }
 0x767   :  { %v7160_v61 = vpop.eup %7159 }
 0x768   :  { %v2231_v41 = vadd.f32 1.0, %v7160_v61 }
 0x76a   :  { %7167 = vrcp.f32 %v2231_v41 }
 0x76b   :  { %v7162_v6 = vpop.eup %7161 }
 0x76c   :  { %v2232_v38 = vadd.f32 1.0, %v7162_v6  ;;  %v7164_v23 = vpop.eup %7163 }
 0x76d   :  { %v7166_v10 = vpop.eup %7165  ;;  %v2245_v28 = vadd.f32 1.0, %v7164_v23 }
 0x76e   :  { %7169 = vrcp.f32 %v2232_v38  ;;  %v2246_v48 = vadd.f32 1.0, %v7166_v10 }
 0x76f   :  { %7171 = vrcp.f32 %v2245_v28 }
 0x770   :  { %7173 = vrcp.f32 %v2246_v48 }
 0x774   :  { %v7168_v26 = vpop.eup %7167 }
 0x775   :  { %v2251_v49 = vmul.f32 %v7168_v26, %v2215_v18 }
 0x777   :  { %v2253_v39 = vadd.f32 %v2251_v49, %v8179_v56 }
 0x778   :  { %v7170_v13 = vpop.eup %7169 }
 0x779   :  { %v2252_v36 = vmul.f32 %v7170_v13, %v2220_v51  ;;  %7175 = vtanh.f32 %v2253_v39  ;;  %v7172_v52 = vpop.eup %7171 }
 0x77a   :  { %v7174_v8 = vpop.eup %7173  ;;  %v2257_v53 = vsub.f32 1.0, %v7172_v52  ;;  %v2261_v44 = vmul.f32 %v7172_v52, %v8493_v21 }
 0x77b   :  { %v2254_v29 = vadd.f32 %v2252_v36, %v8176_v42  ;;  %v2258_v25 = vsub.f32 1.0, %v7174_v8  ;;  %v2262_v1 = vmul.f32 %v7174_v8, %v8500_v46 }
 0x77d   :  { %7177 = vtanh.f32 %v2254_v29 }
 0x783   :  { %v7176_v27 = vpop.eup %7175 }
 0x784   :  { %v2259_v31 = vmul.f32 %v7176_v27, %v2257_v53 }
 0x786   :  { %v8550_v20 = vadd.f32 %v2261_v44, %v2259_v31 }
 0x787   :  { %v7178_v43 = vpop.eup %7177 }
 0x788   :  { %2341 = vmatmul.mubr.f32.vlgmr.msra.gmra.mrb[24].mxu1 %v8550_v20  ;;  %5380 = vmatprep.mubr.f32.mxu0 %v8550_v20  ;;  %v2260_v56 = vmul.f32 %v7178_v43, %v2258_v25 }
 0x789   :  { %2346 = vmatprep.mubr.f32.mxu1 %v9103_v24  ;;  %6229 = vmatpush1.bf16.msra.mxu1 %v7758_v12 }
 0x78a   :  { %v8557_v42 = vadd.f32 %v2262_v1, %v2260_v56  ;;  %6231 = vmatprep.subr.bf16.mxu1 %v7761_v16 }
 0x78c   :  { %v4551_v21 = vpack.c.bf16 %v8557_v42, %v8550_v20  ;;  %2347 = vmatmul.mubr.f32.gmra.mrb[26].mxu1 %v8557_v42  ;;  %5381 = vmatmul.mubr.f32.vlgmr.msra.gmra.mrb[76].mxu0 %v8557_v42 }
 0x78d   :  { %6233 = vmatpush1.bf16.msra.mxu1 %v7788_v30  ;;  %6261 = vmatpush3.bf16.msra.mxu0 %v7732_v58 }
 0x78e   :  { %4607 = vst [vmem:[%s9084_s7 + $0x28] sm:$0xff] %v4551_v21   ;;  %6235 = vmatprep.subr.bf16.mxu1 %v7796_v35  ;;  %6263 = vmatprep.subr.bf16.mxu0 %v7793_v32 }
 0x78f   :  { %2545 = vmatprep.mubr.f32.mxu1 %v9103_v24 }
 0x791   :  { %6237 = vmatpush1.bf16.msra.mxu1 %v7820_v45  ;;  %6265 = vmatpush3.bf16.msra.mxu0 %v7793_v32 }
 0x792   :  { %6239 = vmatprep.subr.bf16.mxu1 %v7830_v50  ;;  %6267 = vmatprep.subr.bf16.mxu0 %v7826_v47 }
 0x795   :  { %6241 = vmatpush1.bf16.msra.mxu1 %v7854_v0  ;;  %6269 = vmatpush3.bf16.msra.mxu0 %v7826_v47 }
 0x796   :  { %6243 = vmatprep.subr.bf16.mxu1 %v7866_v5  ;;  %6271 = vmatprep.subr.bf16.mxu0 %v7860_v2 }
 0x799   :  { %6245 = vmatpush1.bf16.msra.mxu1 %v7892_v17  ;;  %6273 = vmatpush3.bf16.msra.mxu0 %v7860_v2 }
 0x79a   :  { %6247 = vmatprep.subr.bf16.mxu1 %v7904_v22  ;;  %6275 = vmatprep.subr.bf16.mxu0 %v7898_v19 }
 0x79d   :  { %6249 = vmatpush1.bf16.msra.mxu1 %v7929_v34  ;;  %6277 = vmatpush3.bf16.msra.mxu0 %v7898_v19 }
 0x79e   :  { %6251 = vmatprep.subr.bf16.mxu1 %v7941_v40  ;;  %6279 = vmatprep.subr.bf16.mxu0 %v7935_v37 }
 0x7a1   :  { %6253 = vmatpush1.bf16.msra.mxu1 %v7967_v54  ;;  %6281 = vmatpush3.bf16.msra.mxu0 %v7935_v37 }
 0x7a2   :  { %6255 = vmatprep.subr.bf16.mxu1 %v7979_v63  ;;  %6283 = vmatprep.subr.bf16.mxu0 %v7973_v57 }
 0x7a5   :  { %6257 = vmatpush1.bf16.msra.mxu1 %v7999_v11  ;;  %6285 = vmatpush3.bf16.msra.mxu0 %v7973_v57 }
 0x7a6   :  { %6287 = vmatprep.subr.bf16.mxu0 %v8002_v3  ;;  %6291 = vmatprep.subr.bf16.mxu1 %v7723_v55 }
 0x7a9   :  { %6289 = vmatpush3.bf16.msra.mxu0 %v8002_v3 }
 0x7aa   :  { %6323 = vmatprep.subr.bf16.mxu0 %v7732_v58 }
 0x85b   :  { %v2342_v46 = vpop.f32.mrb[24].mxu1 }
 0x85c   :  { %v6851_v61 = vadd.f32 %v8248_v33, %v2342_v46  ;;  %v2344_v41 = vpop.f32.mrb[25].mxu1 }
 0x85d   :  { %v6853_v38 = vadd.f32 %v8250_v59, %v2344_v41 }
 0x85e   :  { %v4411_v6 = vmul.f32 -1.442695, %v6851_v61 }
 0x85f   :  { %v2348_v23 = vpop.f32.mrb[26].mxu1  ;;  %v5382_v10 = vpop.f32.mrb[76].mxu0  ;;  %v4413_v51 = vmul.f32 -1.442695, %v6853_v38 }
 0x860   :  { %7179 = vpow2.f32 %v4411_v6  ;;  %v6855_v28 = vadd.f32 %v8248_v33, %v2348_v23  ;;  %v2350_v18 = vpop.f32.mrb[27].mxu1  ;;  %v2419_v26 = vpop.f32.mrb[77].mxu0  ;;  %v2425_v56 = vadd.f32 %v5382_v10, %v8258_v14 }
 0x861   :  { %v6857_v49 = vadd.f32 %v8250_v59, %v2350_v18  ;;  %v2420_v31 = vadd.f32 %v2419_v26, %v8258_v14 }
 0x862   :  { %v4412_v48 = vmul.f32 -1.442695, %v6855_v28 }
 0x863   :  { %v4414_v39 = vmul.f32 -1.442695, %v6857_v49 }
 0x864   :  { %7181 = vpow2.f32 %v4412_v48 }
 0x865   :  { %7183 = vpow2.f32 %v4413_v51 }
 0x866   :  { %7185 = vpow2.f32 %v4414_v39 }
 0x86a   :  { %v7180_v13 = vpop.eup %7179 }
 0x86b   :  { %v2436_v36 = vadd.f32 1.0, %v7180_v13 }
 0x86d   :  { %7187 = vrcp.f32 %v2436_v36 }
 0x86e   :  { %v7182_v29 = vpop.eup %7181 }
 0x86f   :  { %v2437_v52 = vadd.f32 1.0, %v7182_v29  ;;  %v7184_v8 = vpop.eup %7183 }
 0x870   :  { %v7186_v53 = vpop.eup %7185  ;;  %v2450_v27 = vadd.f32 1.0, %v7184_v8 }
 0x871   :  { %7189 = vrcp.f32 %v2437_v52  ;;  %v2451_v25 = vadd.f32 1.0, %v7186_v53 }
 0x872   :  { %7191 = vrcp.f32 %v2450_v27 }
 0x873   :  { %7193 = vrcp.f32 %v2451_v25 }
 0x877   :  { %v7188_v44 = vpop.eup %7187 }
 0x878   :  { %v2456_v43 = vmul.f32 %v7188_v44, %v2420_v31 }
 0x87a   :  { %v2458_v1 = vadd.f32 %v2456_v43, %v8185_v4 }
 0x87b   :  { %v7190_v21 = vpop.eup %7189 }
 0x87c   :  { %v2457_v46 = vmul.f32 %v7190_v21, %v2425_v56  ;;  %7195 = vtanh.f32 %v2458_v1  ;;  %v7192_v41 = vpop.eup %7191 }
 0x87d   :  { %v7194_v6 = vpop.eup %7193  ;;  %v2462_v38 = vsub.f32 1.0, %v7192_v41  ;;  %v2466_v18 = vmul.f32 %v7192_v41, %v8550_v20 }
 0x87e   :  { %v2459_v61 = vadd.f32 %v2457_v46, %v8182_v62  ;;  %v2463_v48 = vsub.f32 1.0, %v7194_v6  ;;  %v2467_v49 = vmul.f32 %v7194_v6, %v8557_v42 }
 0x880   :  { %7197 = vtanh.f32 %v2459_v61 }
 0x886   :  { %v7196_v23 = vpop.eup %7195 }
 0x887   :  { %v2464_v28 = vmul.f32 %v7196_v23, %v2462_v38 }
 0x889   :  { %v8607_v26 = vadd.f32 %v2466_v18, %v2464_v28 }
 0x88a   :  { %v7198_v10 = vpop.eup %7197 }
 0x88b   :  { %2546 = vmatmul.mubr.f32.vlgmr.msra.gmra.mrb[28].mxu1 %v8607_v26  ;;  %5415 = vmatprep.mubr.f32.mxu0 %v8607_v26  ;;  %v2465_v4 = vmul.f32 %v7198_v10, %v2463_v48 }
 0x88c   :  { %2551 = vmatprep.mubr.f32.mxu1 %v9103_v24  ;;  %6293 = vmatpush1.bf16.msra.mxu1 %v7758_v12 }
 0x88d   :  { %v8614_v62 = vadd.f32 %v2467_v49, %v2465_v4  ;;  %6295 = vmatprep.subr.bf16.mxu1 %v7761_v16 }
 0x88f   :  { %v4556_v20 = vpack.c.bf16 %v8614_v62, %v8607_v26  ;;  %2552 = vmatmul.mubr.f32.gmra.mrb[30].mxu1 %v8614_v62  ;;  %5416 = vmatmul.mubr.f32.vlgmr.msra.gmra.mrb[78].mxu0 %v8614_v62 }
 0x890   :  { %6297 = vmatpush1.bf16.msra.mxu1 %v7788_v30  ;;  %6325 = vmatpush3.bf16.msra.mxu0 %v7732_v58 }
 0x891   :  { %4608 = vst [vmem:[%s9084_s7 + $0x30] sm:$0xff] %v4556_v20   ;;  %6299 = vmatprep.subr.bf16.mxu1 %v7796_v35  ;;  %6327 = vmatprep.subr.bf16.mxu0 %v7793_v32 }
 0x892   :  { %2750 = vmatprep.mubr.f32.mxu1 %v9103_v24 }
 0x894   :  { %6301 = vmatpush1.bf16.msra.mxu1 %v7820_v45  ;;  %6329 = vmatpush3.bf16.msra.mxu0 %v7793_v32 }
 0x895   :  { %6303 = vmatprep.subr.bf16.mxu1 %v7830_v50  ;;  %6331 = vmatprep.subr.bf16.mxu0 %v7826_v47 }
 0x898   :  { %6305 = vmatpush1.bf16.msra.mxu1 %v7854_v0  ;;  %6333 = vmatpush3.bf16.msra.mxu0 %v7826_v47 }
 0x899   :  { %6307 = vmatprep.subr.bf16.mxu1 %v7866_v5  ;;  %6335 = vmatprep.subr.bf16.mxu0 %v7860_v2 }
 0x89c   :  { %6309 = vmatpush1.bf16.msra.mxu1 %v7892_v17  ;;  %6337 = vmatpush3.bf16.msra.mxu0 %v7860_v2 }
 0x89d   :  { %6311 = vmatprep.subr.bf16.mxu1 %v7904_v22  ;;  %6339 = vmatprep.subr.bf16.mxu0 %v7898_v19 }
 0x8a0   :  { %6313 = vmatpush1.bf16.msra.mxu1 %v7929_v34  ;;  %6341 = vmatpush3.bf16.msra.mxu0 %v7898_v19 }
 0x8a1   :  { %6315 = vmatprep.subr.bf16.mxu1 %v7941_v40  ;;  %6343 = vmatprep.subr.bf16.mxu0 %v7935_v37 }
 0x8a4   :  { %6317 = vmatpush1.bf16.msra.mxu1 %v7967_v54  ;;  %6345 = vmatpush3.bf16.msra.mxu0 %v7935_v37 }
 0x8a5   :  { %6319 = vmatprep.subr.bf16.mxu1 %v7979_v63  ;;  %6347 = vmatprep.subr.bf16.mxu0 %v7973_v57 }
 0x8a8   :  { %6321 = vmatpush1.bf16.msra.mxu1 %v7999_v11  ;;  %6349 = vmatpush3.bf16.msra.mxu0 %v7973_v57 }
 0x8a9   :  { %6351 = vmatprep.subr.bf16.mxu0 %v8002_v3  ;;  %6355 = vmatprep.subr.bf16.mxu1 %v7723_v55 }
 0x8ac   :  { %6353 = vmatpush3.bf16.msra.mxu0 %v8002_v3 }
 0x8ad   :  { %6387 = vmatprep.subr.bf16.mxu0 %v7732_v58 }
 0x95e   :  { %v2547_v42 = vpop.f32.mrb[28].mxu1 }
 0x95f   :  { %v6859_v51 = vadd.f32 %v8248_v33, %v2547_v42  ;;  %v2549_v39 = vpop.f32.mrb[29].mxu1 }
 0x960   :  { %v6861_v36 = vadd.f32 %v8250_v59, %v2549_v39 }
 0x961   :  { %v4419_v13 = vmul.f32 -1.442695, %v6859_v51 }
 0x962   :  { %v2553_v29 = vpop.f32.mrb[30].mxu1  ;;  %v5417_v52 = vpop.f32.mrb[78].mxu0  ;;  %v4421_v25 = vmul.f32 -1.442695, %v6861_v36 }
 0x963   :  { %7199 = vpow2.f32 %v4419_v13  ;;  %v6863_v8 = vadd.f32 %v8248_v33, %v2553_v29  ;;  %v2555_v53 = vpop.f32.mrb[31].mxu1  ;;  %v2624_v27 = vpop.f32.mrb[79].mxu0  ;;  %v2630_v48 = vadd.f32 %v5417_v52, %v8258_v14 }
 0x964   :  { %v6865_v44 = vadd.f32 %v8250_v59, %v2555_v53  ;;  %v2625_v38 = vadd.f32 %v2624_v27, %v8258_v14 }
 0x965   :  { %v4420_v31 = vmul.f32 -1.442695, %v6863_v8 }
 0x966   :  { %v4422_v43 = vmul.f32 -1.442695, %v6865_v44 }
 0x967   :  { %7201 = vpow2.f32 %v4420_v31 }
 0x968   :  { %7203 = vpow2.f32 %v4421_v25 }
 0x969   :  { %7205 = vpow2.f32 %v4422_v43 }
 0x96d   :  { %v7200_v56 = vpop.eup %7199 }
 0x96e   :  { %v2641_v1 = vadd.f32 1.0, %v7200_v56 }
 0x970   :  { %7207 = vrcp.f32 %v2641_v1 }
 0x971   :  { %v7202_v21 = vpop.eup %7201 }
 0x972   :  { %v2642_v46 = vadd.f32 1.0, %v7202_v21  ;;  %v7204_v61 = vpop.eup %7203 }
 0x973   :  { %v7206_v41 = vpop.eup %7205  ;;  %v2655_v6 = vadd.f32 1.0, %v7204_v61 }
 0x974   :  { %7209 = vrcp.f32 %v2642_v46  ;;  %v2656_v28 = vadd.f32 1.0, %v7206_v41 }
 0x975   :  { %7211 = vrcp.f32 %v2655_v6 }
 0x976   :  { %7213 = vrcp.f32 %v2656_v28 }
 0x97a   :  { %v7208_v23 = vpop.eup %7207 }
 0x97b   :  { %v2661_v18 = vmul.f32 %v7208_v23, %v2625_v38 }
 0x97d   :  { %v2663_v10 = vadd.f32 %v2661_v18, %v8191_v9 }
 0x97e   :  { %v7210_v4 = vpop.eup %7209 }
 0x97f   :  { %v2662_v49 = vmul.f32 %v7210_v4, %v2630_v48  ;;  %7215 = vtanh.f32 %v2663_v10  ;;  %v7212_v42 = vpop.eup %7211 }
 0x980   :  { %v7214_v51 = vpop.eup %7213  ;;  %v2667_v39 = vsub.f32 1.0, %v7212_v42  ;;  %v2671_v29 = vmul.f32 %v7212_v42, %v8607_v26 }
 0x981   :  { %v2664_v20 = vadd.f32 %v2662_v49, %v8188_v7  ;;  %v2668_v53 = vsub.f32 1.0, %v7214_v51  ;;  %v2672_v27 = vmul.f32 %v7214_v51, %v8614_v62 }
 0x983   :  { %7217 = vtanh.f32 %v2664_v20 }
 0x989   :  { %v7216_v13 = vpop.eup %7215 }
 0x98a   :  { %v2669_v36 = vmul.f32 %v7216_v13, %v2667_v39 }
 0x98c   :  { %v8664_v8 = vadd.f32 %v2671_v29, %v2669_v36 }
 0x98d   :  { %v7218_v52 = vpop.eup %7217 }
 0x98e   :  { %2751 = vmatmul.mubr.f32.vlgmr.msra.gmra.mrb[32].mxu1 %v8664_v8  ;;  %5450 = vmatprep.mubr.f32.mxu0 %v8664_v8  ;;  %v2670_v9 = vmul.f32 %v7218_v52, %v2668_v53 }
 0x98f   :  { %2756 = vmatprep.mubr.f32.mxu1 %v9103_v24  ;;  %6357 = vmatpush1.bf16.msra.mxu1 %v7758_v12 }
 0x990   :  { %v8671_v7 = vadd.f32 %v2672_v27, %v2670_v9  ;;  %6359 = vmatprep.subr.bf16.mxu1 %v7761_v16 }
 0x992   :  { %v4561_v26 = vpack.c.bf16 %v8671_v7, %v8664_v8  ;;  %2757 = vmatmul.mubr.f32.gmra.mrb[34].mxu1 %v8671_v7  ;;  %5451 = vmatmul.mubr.f32.vlgmr.msra.gmra.mrb[80].mxu0 %v8671_v7 }
 0x993   :  { %6361 = vmatpush1.bf16.msra.mxu1 %v7788_v30  ;;  %6389 = vmatpush3.bf16.msra.mxu0 %v7732_v58 }
 0x994   :  { %4609 = vst [vmem:[%s9084_s7 + $0x38] sm:$0xff] %v4561_v26   ;;  %6363 = vmatprep.subr.bf16.mxu1 %v7796_v35  ;;  %6391 = vmatprep.subr.bf16.mxu0 %v7793_v32 }
 0x995   :  { %2955 = vmatprep.mubr.f32.mxu1 %v9103_v24 }
 0x997   :  { %6365 = vmatpush1.bf16.msra.mxu1 %v7820_v45  ;;  %6393 = vmatpush3.bf16.msra.mxu0 %v7793_v32 }
 0x998   :  { %6367 = vmatprep.subr.bf16.mxu1 %v7830_v50  ;;  %6395 = vmatprep.subr.bf16.mxu0 %v7826_v47 }
 0x99b   :  { %6369 = vmatpush1.bf16.msra.mxu1 %v7854_v0  ;;  %6397 = vmatpush3.bf16.msra.mxu0 %v7826_v47 }
 0x99c   :  { %6371 = vmatprep.subr.bf16.mxu1 %v7866_v5  ;;  %6399 = vmatprep.subr.bf16.mxu0 %v7860_v2 }
 0x99f   :  { %6373 = vmatpush1.bf16.msra.mxu1 %v7892_v17  ;;  %6401 = vmatpush3.bf16.msra.mxu0 %v7860_v2 }
 0x9a0   :  { %6375 = vmatprep.subr.bf16.mxu1 %v7904_v22  ;;  %6403 = vmatprep.subr.bf16.mxu0 %v7898_v19 }
 0x9a3   :  { %6377 = vmatpush1.bf16.msra.mxu1 %v7929_v34  ;;  %6405 = vmatpush3.bf16.msra.mxu0 %v7898_v19 }
 0x9a4   :  { %6379 = vmatprep.subr.bf16.mxu1 %v7941_v40  ;;  %6407 = vmatprep.subr.bf16.mxu0 %v7935_v37 }
 0x9a7   :  { %6381 = vmatpush1.bf16.msra.mxu1 %v7967_v54  ;;  %6409 = vmatpush3.bf16.msra.mxu0 %v7935_v37 }
 0x9a8   :  { %6383 = vmatprep.subr.bf16.mxu1 %v7979_v63  ;;  %6411 = vmatprep.subr.bf16.mxu0 %v7973_v57 }
 0x9ab   :  { %6385 = vmatpush1.bf16.msra.mxu1 %v7999_v11  ;;  %6413 = vmatpush3.bf16.msra.mxu0 %v7973_v57 }
 0x9ac   :  { %6415 = vmatprep.subr.bf16.mxu0 %v8002_v3  ;;  %6419 = vmatprep.subr.bf16.mxu1 %v7723_v55 }
 0x9af   :  { %6417 = vmatpush3.bf16.msra.mxu0 %v8002_v3 }
 0x9b0   :  { %6451 = vmatprep.subr.bf16.mxu0 %v7732_v58 }
 0xa61   :  { %v2752_v62 = vpop.f32.mrb[32].mxu1 }
 0xa62   :  { %v6867_v31 = vadd.f32 %v8248_v33, %v2752_v62  ;;  %v2754_v44 = vpop.f32.mrb[33].mxu1 }
 0xa63   :  { %v6869_v43 = vadd.f32 %v8250_v59, %v2754_v44 }
 0xa64   :  { %v4427_v25 = vmul.f32 -1.442695, %v6867_v31 }
 0xa65   :  { %v2758_v56 = vpop.f32.mrb[34].mxu1  ;;  %v5452_v1 = vpop.f32.mrb[80].mxu0  ;;  %v4429_v38 = vmul.f32 -1.442695, %v6869_v43 }
 0xa66   :  { %7219 = vpow2.f32 %v4427_v25  ;;  %v6871_v21 = vadd.f32 %v8248_v33, %v2758_v56  ;;  %v2760_v46 = vpop.f32.mrb[35].mxu1  ;;  %v2829_v61 = vpop.f32.mrb[81].mxu0  ;;  %v2835_v36 = vadd.f32 %v5452_v1, %v8258_v14 }
 0xa67   :  { %v6873_v6 = vadd.f32 %v8250_v59, %v2760_v46  ;;  %v2830_v42 = vadd.f32 %v2829_v61, %v8258_v14 }
 0xa68   :  { %v4428_v41 = vmul.f32 -1.442695, %v6871_v21 }
 0xa69   :  { %v4430_v23 = vmul.f32 -1.442695, %v6873_v6 }
 0xa6a   :  { %7221 = vpow2.f32 %v4428_v41 }
 0xa6b   :  { %7223 = vpow2.f32 %v4429_v38 }
 0xa6c   :  { %7225 = vpow2.f32 %v4430_v23 }
 0xa70   :  { %v7220_v28 = vpop.eup %7219 }
 0xa71   :  { %v2846_v18 = vadd.f32 1.0, %v7220_v28 }
 0xa73   :  { %7227 = vrcp.f32 %v2846_v18 }
 0xa74   :  { %v7222_v48 = vpop.eup %7221 }
 0xa75   :  { %v2847_v10 = vadd.f32 1.0, %v7222_v48  ;;  %v7224_v4 = vpop.eup %7223 }
 0xa76   :  { %v7226_v49 = vpop.eup %7225  ;;  %v2860_v20 = vadd.f32 1.0, %v7224_v4 }
 0xa77   :  { %7229 = vrcp.f32 %v2847_v10  ;;  %v2861_v39 = vadd.f32 1.0, %v7226_v49 }
 0xa78   :  { %7231 = vrcp.f32 %v2860_v20 }
 0xa79   :  { %7233 = vrcp.f32 %v2861_v39 }
 0xa7d   :  { %v7228_v51 = vpop.eup %7227 }
 0xa7e   :  { %v2866_v13 = vmul.f32 %v7228_v51, %v2830_v42 }
 0xa80   :  { %v2868_v29 = vadd.f32 %v2866_v13, %v8197_v60 }
 0xa81   :  { %v7230_v53 = vpop.eup %7229 }
 0xa82   :  { %v2867_v52 = vmul.f32 %v7230_v53, %v2835_v36  ;;  %7235 = vtanh.f32 %v2868_v29  ;;  %v7232_v27 = vpop.eup %7231 }
 0xa83   :  { %v7234_v26 = vpop.eup %7233  ;;  %v2872_v62 = vsub.f32 1.0, %v7232_v27  ;;  %v2876_v25 = vmul.f32 %v7232_v27, %v8664_v8 }
 0xa84   :  { %v2869_v9 = vadd.f32 %v2867_v52, %v8194_v15  ;;  %v2873_v56 = vsub.f32 1.0, %v7234_v26  ;;  %v2877_v21 = vmul.f32 %v7234_v26, %v8671_v7 }
 0xa86   :  { %7237 = vtanh.f32 %v2869_v9 }
 0xa8c   :  { %v7236_v31 = vpop.eup %7235 }
 0xa8d   :  { %v2874_v44 = vmul.f32 %v7236_v31, %v2872_v62  ;;  %v9104_v31 = vld [vmem:[#allocation4_spill] sm:$0xff] }
 0xa8f   :  { %v8721_v43 = vadd.f32 %v2876_v25, %v2874_v44 }
 0xa90   :  { %v7238_v1 = vpop.eup %7237 }
 0xa91   :  { %2956 = vmatmul.mubr.f32.vlgmr.msra.gmra.mrb[36].mxu1 %v8721_v43  ;;  %5485 = vmatprep.mubr.f32.mxu0 %v8721_v43  ;;  %v2875_v60 = vmul.f32 %v7238_v1, %v2873_v56  ;;  %v9105_v1 = vld [vmem:[#allocation3_spill] sm:$0xff] }
 0xa92   :  { %2961 = vmatprep.mubr.f32.mxu1 %v9103_v24  ;;  %6421 = vmatpush1.bf16.msra.mxu1 %v7758_v12 }
 0xa93   :  { %v8728_v15 = vadd.f32 %v2877_v21, %v2875_v60  ;;  %6423 = vmatprep.subr.bf16.mxu1 %v7761_v16 }
 0xa95   :  { %v4566_v8 = vpack.c.bf16 %v8728_v15, %v8721_v43  ;;  %2962 = vmatmul.mubr.f32.gmra.mrb[38].mxu1 %v8728_v15  ;;  %5486 = vmatmul.mubr.f32.vlgmr.msra.gmra.mrb[82].mxu0 %v8728_v15 }
 0xa96   :  { %6425 = vmatpush1.bf16.msra.mxu1 %v7788_v30  ;;  %6453 = vmatpush3.bf16.msra.mxu0 %v7732_v58 }
 0xa97   :  { %4610 = vst [vmem:[%s9084_s7 + $0x40] sm:$0xff] %v4566_v8   ;;  %6427 = vmatprep.subr.bf16.mxu1 %v7796_v35  ;;  %6455 = vmatprep.subr.bf16.mxu0 %v7793_v32 }
 0xa98   :  { %3160 = vmatprep.mubr.f32.mxu1 %v9103_v24 }
 0xa9a   :  { %6429 = vmatpush1.bf16.msra.mxu1 %v7820_v45  ;;  %6457 = vmatpush3.bf16.msra.mxu0 %v7793_v32 }
 0xa9b   :  { %6431 = vmatprep.subr.bf16.mxu1 %v7830_v50  ;;  %6459 = vmatprep.subr.bf16.mxu0 %v7826_v47 }
 0xa9e   :  { %6433 = vmatpush1.bf16.msra.mxu1 %v7854_v0  ;;  %6461 = vmatpush3.bf16.msra.mxu0 %v7826_v47 }
 0xa9f   :  { %6435 = vmatprep.subr.bf16.mxu1 %v7866_v5  ;;  %6463 = vmatprep.subr.bf16.mxu0 %v7860_v2 }
 0xaa2   :  { %6437 = vmatpush1.bf16.msra.mxu1 %v7892_v17  ;;  %6465 = vmatpush3.bf16.msra.mxu0 %v7860_v2 }
 0xaa3   :  { %6439 = vmatprep.subr.bf16.mxu1 %v7904_v22  ;;  %6467 = vmatprep.subr.bf16.mxu0 %v7898_v19 }
 0xaa6   :  { %6441 = vmatpush1.bf16.msra.mxu1 %v7929_v34  ;;  %6469 = vmatpush3.bf16.msra.mxu0 %v7898_v19 }
 0xaa7   :  { %6443 = vmatprep.subr.bf16.mxu1 %v7941_v40  ;;  %6471 = vmatprep.subr.bf16.mxu0 %v7935_v37 }
 0xaaa   :  { %6445 = vmatpush1.bf16.msra.mxu1 %v7967_v54  ;;  %6473 = vmatpush3.bf16.msra.mxu0 %v7935_v37 }
 0xaab   :  { %6447 = vmatprep.subr.bf16.mxu1 %v7979_v63  ;;  %6475 = vmatprep.subr.bf16.mxu0 %v7973_v57 }
 0xaae   :  { %6449 = vmatpush1.bf16.msra.mxu1 %v7999_v11  ;;  %6477 = vmatpush3.bf16.msra.mxu0 %v7973_v57 }
 0xaaf   :  { %6479 = vmatprep.subr.bf16.mxu0 %v8002_v3  ;;  %6483 = vmatprep.subr.bf16.mxu1 %v7723_v55 }
 0xab2   :  { %6481 = vmatpush3.bf16.msra.mxu0 %v8002_v3 }
 0xab3   :  { %6515 = vmatprep.subr.bf16.mxu0 %v7732_v58 }
 0xb64   :  { %v2957_v7 = vpop.f32.mrb[36].mxu1 }
 0xb65   :  { %v6875_v46 = vadd.f32 %v8248_v33, %v2957_v7  ;;  %v2959_v61 = vpop.f32.mrb[37].mxu1 }
 0xb66   :  { %v6877_v6 = vadd.f32 %v8250_v59, %v2959_v61 }
 0xb67   :  { %v4435_v41 = vmul.f32 -1.442695, %v6875_v46 }
 0xb68   :  { %v2963_v38 = vpop.f32.mrb[38].mxu1  ;;  %v5487_v23 = vpop.f32.mrb[82].mxu0  ;;  %v4437_v49 = vmul.f32 -1.442695, %v6877_v6 }
 0xb69   :  { %7239 = vpow2.f32 %v4435_v41  ;;  %v6879_v28 = vadd.f32 %v8248_v33, %v2963_v38  ;;  %v2965_v18 = vpop.f32.mrb[39].mxu1  ;;  %v3034_v48 = vpop.f32.mrb[83].mxu0  ;;  %v3040_v62 = vadd.f32 %v5487_v23, %v8258_v14 }
 0xb6a   :  { %v6881_v4 = vadd.f32 %v8250_v59, %v2965_v18  ;;  %v3035_v52 = vadd.f32 %v3034_v48, %v8258_v14 }
 0xb6b   :  { %v4436_v10 = vmul.f32 -1.442695, %v6879_v28 }
 0xb6c   :  { %v4438_v20 = vmul.f32 -1.442695, %v6881_v4 }
 0xb6d   :  { %7241 = vpow2.f32 %v4436_v10 }
 0xb6e   :  { %7243 = vpow2.f32 %v4437_v49 }
 0xb6f   :  { %7245 = vpow2.f32 %v4438_v20 }
 0xb73   :  { %v7240_v42 = vpop.eup %7239 }
 0xb74   :  { %v3051_v51 = vadd.f32 1.0, %v7240_v42 }
 0xb76   :  { %7247 = vrcp.f32 %v3051_v51 }
 0xb77   :  { %v7242_v39 = vpop.eup %7241 }
 0xb78   :  { %v3052_v13 = vadd.f32 1.0, %v7242_v39  ;;  %v7244_v36 = vpop.eup %7243 }
 0xb79   :  { %v7246_v29 = vpop.eup %7245  ;;  %v3065_v53 = vadd.f32 1.0, %v7244_v36 }
 0xb7a   :  { %7249 = vrcp.f32 %v3052_v13  ;;  %v3066_v27 = vadd.f32 1.0, %v7246_v29 }
 0xb7b   :  { %7251 = vrcp.f32 %v3065_v53 }
 0xb7c   :  { %7253 = vrcp.f32 %v3066_v27 }
 0xb80   :  { %v7248_v9 = vpop.eup %7247 }
 0xb81   :  { %v3071_v26 = vmul.f32 %v7248_v9, %v3035_v52 }
 0xb83   :  { %v3073_v44 = vadd.f32 %v3071_v26, %v9104_v31 }
 0xb84   :  { %v7250_v25 = vpop.eup %7249 }
 0xb85   :  { %v3072_v56 = vmul.f32 %v7250_v25, %v3040_v62  ;;  %7255 = vtanh.f32 %v3073_v44  ;;  %v7252_v21 = vpop.eup %7251 }
 0xb86   :  { %v7254_v8 = vpop.eup %7253  ;;  %v3077_v7 = vsub.f32 1.0, %v7252_v21  ;;  %v3081_v41 = vmul.f32 %v7252_v21, %v8721_v43 }
 0xb87   :  { %v3074_v60 = vadd.f32 %v3072_v56, %v9105_v1  ;;  %v3078_v38 = vsub.f32 1.0, %v7254_v8  ;;  %v3082_v18 = vmul.f32 %v7254_v8, %v8728_v15 }
 0xb89   :  { %7257 = vtanh.f32 %v3074_v60 }
 0xb8f   :  { %v7256_v46 = vpop.eup %7255 }
 0xb90   :  { %v3079_v61 = vmul.f32 %v7256_v46, %v3077_v7  ;;  %v9106_v46 = vld [vmem:[#allocation6_spill] sm:$0xff] }
 0xb92   :  { %v8778_v6 = vadd.f32 %v3081_v41, %v3079_v61 }
 0xb93   :  { %v7258_v23 = vpop.eup %7257 }
 0xb94   :  { %3161 = vmatmul.mubr.f32.vlgmr.msra.gmra.mrb[40].mxu1 %v8778_v6  ;;  %5520 = vmatprep.mubr.f32.mxu0 %v8778_v6  ;;  %v3080_v28 = vmul.f32 %v7258_v23, %v3078_v38  ;;  %v9107_v23 = vld [vmem:[#allocation5_spill] sm:$0xff] }
 0xb95   :  { %3166 = vmatprep.mubr.f32.mxu1 %v9103_v24  ;;  %6485 = vmatpush1.bf16.msra.mxu1 %v7758_v12 }
 0xb96   :  { %v8785_v48 = vadd.f32 %v3082_v18, %v3080_v28  ;;  %6487 = vmatprep.subr.bf16.mxu1 %v7761_v16 }
 0xb98   :  { %v4571_v43 = vpack.c.bf16 %v8785_v48, %v8778_v6  ;;  %3167 = vmatmul.mubr.f32.gmra.mrb[42].mxu1 %v8785_v48  ;;  %5521 = vmatmul.mubr.f32.vlgmr.msra.gmra.mrb[84].mxu0 %v8785_v48 }
 0xb99   :  { %6489 = vmatpush1.bf16.msra.mxu1 %v7788_v30  ;;  %6517 = vmatpush3.bf16.msra.mxu0 %v7732_v58 }
 0xb9a   :  { %4611 = vst [vmem:[%s9084_s7 + $0x48] sm:$0xff] %v4571_v43   ;;  %6491 = vmatprep.subr.bf16.mxu1 %v7796_v35  ;;  %6519 = vmatprep.subr.bf16.mxu0 %v7793_v32 }
 0xb9b   :  { %3365 = vmatprep.mubr.f32.mxu1 %v9103_v24 }
 0xb9d   :  { %6493 = vmatpush1.bf16.msra.mxu1 %v7820_v45  ;;  %6521 = vmatpush3.bf16.msra.mxu0 %v7793_v32 }
 0xb9e   :  { %6495 = vmatprep.subr.bf16.mxu1 %v7830_v50  ;;  %6523 = vmatprep.subr.bf16.mxu0 %v7826_v47 }
 0xba1   :  { %6497 = vmatpush1.bf16.msra.mxu1 %v7854_v0  ;;  %6525 = vmatpush3.bf16.msra.mxu0 %v7826_v47 }
 0xba2   :  { %6499 = vmatprep.subr.bf16.mxu1 %v7866_v5  ;;  %6527 = vmatprep.subr.bf16.mxu0 %v7860_v2 }
 0xba5   :  { %6501 = vmatpush1.bf16.msra.mxu1 %v7892_v17  ;;  %6529 = vmatpush3.bf16.msra.mxu0 %v7860_v2 }
 0xba6   :  { %6503 = vmatprep.subr.bf16.mxu1 %v7904_v22  ;;  %6531 = vmatprep.subr.bf16.mxu0 %v7898_v19 }
 0xba9   :  { %6505 = vmatpush1.bf16.msra.mxu1 %v7929_v34  ;;  %6533 = vmatpush3.bf16.msra.mxu0 %v7898_v19 }
 0xbaa   :  { %6507 = vmatprep.subr.bf16.mxu1 %v7941_v40  ;;  %6535 = vmatprep.subr.bf16.mxu0 %v7935_v37 }
 0xbad   :  { %6509 = vmatpush1.bf16.msra.mxu1 %v7967_v54  ;;  %6537 = vmatpush3.bf16.msra.mxu0 %v7935_v37 }
 0xbae   :  { %6511 = vmatprep.subr.bf16.mxu1 %v7979_v63  ;;  %6539 = vmatprep.subr.bf16.mxu0 %v7973_v57 }
 0xbb1   :  { %6513 = vmatpush1.bf16.msra.mxu1 %v7999_v11  ;;  %6541 = vmatpush3.bf16.msra.mxu0 %v7973_v57 }
 0xbb2   :  { %6543 = vmatprep.subr.bf16.mxu0 %v8002_v3  ;;  %6547 = vmatprep.subr.bf16.mxu1 %v7723_v55 }
 0xbb5   :  { %6545 = vmatpush3.bf16.msra.mxu0 %v8002_v3 }
 0xbb6   :  { %6579 = vmatprep.subr.bf16.mxu0 %v7732_v58 }
 0xc67   :  { %v3162_v15 = vpop.f32.mrb[40].mxu1 }
 0xc68   :  { %v6883_v10 = vadd.f32 %v8248_v33, %v3162_v15  ;;  %v3164_v4 = vpop.f32.mrb[41].mxu1 }
 0xc69   :  { %v6885_v20 = vadd.f32 %v8250_v59, %v3164_v4 }
 0xc6a   :  { %v4443_v49 = vmul.f32 -1.442695, %v6883_v10 }
 0xc6b   :  { %v3168_v42 = vpop.f32.mrb[42].mxu1  ;;  %v5522_v51 = vpop.f32.mrb[84].mxu0  ;;  %v4445_v52 = vmul.f32 -1.442695, %v6885_v20 }
 0xc6c   :  { %7259 = vpow2.f32 %v4443_v49  ;;  %v6887_v39 = vadd.f32 %v8248_v33, %v3168_v42  ;;  %v3170_v13 = vpop.f32.mrb[43].mxu1  ;;  %v3239_v36 = vpop.f32.mrb[85].mxu0  ;;  %v3245_v7 = vadd.f32 %v5522_v51, %v8258_v14 }
 0xc6d   :  { %v6889_v53 = vadd.f32 %v8250_v59, %v3170_v13  ;;  %v3240_v1 = vadd.f32 %v3239_v36, %v8258_v14 }
 0xc6e   :  { %v4444_v29 = vmul.f32 -1.442695, %v6887_v39 }
 0xc6f   :  { %v4446_v9 = vmul.f32 -1.442695, %v6889_v53 }
 0xc70   :  { %7261 = vpow2.f32 %v4444_v29 }
 0xc71   :  { %7263 = vpow2.f32 %v4445_v52 }
 0xc72   :  { %7265 = vpow2.f32 %v4446_v9 }
 0xc76   :  { %v7260_v27 = vpop.eup %7259 }
 0xc77   :  { %v3256_v26 = vadd.f32 1.0, %v7260_v27 }
 0xc79   :  { %7267 = vrcp.f32 %v3256_v26 }
 0xc7a   :  { %v7262_v62 = vpop.eup %7261 }
 0xc7b   :  { %v3257_v31 = vadd.f32 1.0, %v7262_v62  ;;  %v7264_v44 = vpop.eup %7263 }
 0xc7c   :  { %v7266_v25 = vpop.eup %7265  ;;  %v3270_v56 = vadd.f32 1.0, %v7264_v44 }
 0xc7d   :  { %7269 = vrcp.f32 %v3257_v31  ;;  %v3271_v21 = vadd.f32 1.0, %v7266_v25 }
 0xc7e   :  { %7271 = vrcp.f32 %v3270_v56 }
 0xc7f   :  { %7273 = vrcp.f32 %v3271_v21 }
 0xc83   :  { %v7268_v60 = vpop.eup %7267 }
 0xc84   :  { %v3276_v8 = vmul.f32 %v7268_v60, %v3240_v1 }
 0xc86   :  { %v3278_v61 = vadd.f32 %v3276_v8, %v9106_v46 }
 0xc87   :  { %v7270_v41 = vpop.eup %7269 }
 0xc88   :  { %v3277_v38 = vmul.f32 %v7270_v41, %v3245_v7  ;;  %7275 = vtanh.f32 %v3278_v61  ;;  %v7272_v18 = vpop.eup %7271 }
 0xc89   :  { %v7274_v43 = vpop.eup %7273  ;;  %v3282_v15 = vsub.f32 1.0, %v7272_v18  ;;  %v3286_v49 = vmul.f32 %v7272_v18, %v8778_v6 }
 0xc8a   :  { %v3279_v28 = vadd.f32 %v3277_v38, %v9107_v23  ;;  %v3283_v42 = vsub.f32 1.0, %v7274_v43  ;;  %v3287_v13 = vmul.f32 %v7274_v43, %v8785_v48 }
 0xc8c   :  { %7277 = vtanh.f32 %v3279_v28 }
 0xc92   :  { %v7276_v10 = vpop.eup %7275 }
 0xc93   :  { %v3284_v4 = vmul.f32 %v7276_v10, %v3282_v15  ;;  %v9108_v10 = vld [vmem:[#allocation8_spill] sm:$0xff] }
 0xc95   :  { %v8835_v20 = vadd.f32 %v3286_v49, %v3284_v4 }
 0xc96   :  { %v7278_v51 = vpop.eup %7277 }
 0xc97   :  { %3366 = vmatmul.mubr.f32.vlgmr.msra.gmra.mrb[44].mxu1 %v8835_v20  ;;  %5555 = vmatprep.mubr.f32.mxu0 %v8835_v20  ;;  %v3285_v39 = vmul.f32 %v7278_v51, %v3283_v42  ;;  %v9109_v51 = vld [vmem:[#allocation7_spill] sm:$0xff] }
 0xc98   :  { %3371 = vmatprep.mubr.f32.mxu1 %v9103_v24  ;;  %6549 = vmatpush1.bf16.msra.mxu1 %v7758_v12 }
 0xc99   :  { %v8842_v36 = vadd.f32 %v3287_v13, %v3285_v39  ;;  %6551 = vmatprep.subr.bf16.mxu1 %v7761_v16 }
 0xc9b   :  { %v4576_v6 = vpack.c.bf16 %v8842_v36, %v8835_v20  ;;  %3372 = vmatmul.mubr.f32.gmra.mrb[46].mxu1 %v8842_v36  ;;  %5556 = vmatmul.mubr.f32.vlgmr.msra.gmra.mrb[86].mxu0 %v8842_v36 }
 0xc9c   :  { %6553 = vmatpush1.bf16.msra.mxu1 %v7788_v30  ;;  %6581 = vmatpush3.bf16.msra.mxu0 %v7732_v58 }
 0xc9d   :  { %4612 = vst [vmem:[%s9084_s7 + $0x50] sm:$0xff] %v4576_v6   ;;  %6555 = vmatprep.subr.bf16.mxu1 %v7796_v35  ;;  %6583 = vmatprep.subr.bf16.mxu0 %v7793_v32 }
 0xc9e   :  { %3570 = vmatprep.mubr.f32.mxu1 %v9103_v24 }
 0xca0   :  { %6557 = vmatpush1.bf16.msra.mxu1 %v7820_v45  ;;  %6585 = vmatpush3.bf16.msra.mxu0 %v7793_v32 }
 0xca1   :  { %6559 = vmatprep.subr.bf16.mxu1 %v7830_v50  ;;  %6587 = vmatprep.subr.bf16.mxu0 %v7826_v47 }
 0xca4   :  { %6561 = vmatpush1.bf16.msra.mxu1 %v7854_v0  ;;  %6589 = vmatpush3.bf16.msra.mxu0 %v7826_v47 }
 0xca5   :  { %6563 = vmatprep.subr.bf16.mxu1 %v7866_v5  ;;  %6591 = vmatprep.subr.bf16.mxu0 %v7860_v2 }
 0xca8   :  { %6565 = vmatpush1.bf16.msra.mxu1 %v7892_v17  ;;  %6593 = vmatpush3.bf16.msra.mxu0 %v7860_v2 }
 0xca9   :  { %6567 = vmatprep.subr.bf16.mxu1 %v7904_v22  ;;  %6595 = vmatprep.subr.bf16.mxu0 %v7898_v19 }
 0xcac   :  { %6569 = vmatpush1.bf16.msra.mxu1 %v7929_v34  ;;  %6597 = vmatpush3.bf16.msra.mxu0 %v7898_v19 }
 0xcad   :  { %6571 = vmatprep.subr.bf16.mxu1 %v7941_v40  ;;  %6599 = vmatprep.subr.bf16.mxu0 %v7935_v37 }
 0xcb0   :  { %6573 = vmatpush1.bf16.msra.mxu1 %v7967_v54  ;;  %6601 = vmatpush3.bf16.msra.mxu0 %v7935_v37 }
 0xcb1   :  { %6575 = vmatprep.subr.bf16.mxu1 %v7979_v63  ;;  %6603 = vmatprep.subr.bf16.mxu0 %v7973_v57 }
 0xcb4   :  { %6577 = vmatpush1.bf16.msra.mxu1 %v7999_v11  ;;  %6605 = vmatpush3.bf16.msra.mxu0 %v7973_v57 }
 0xcb5   :  { %6607 = vmatprep.subr.bf16.mxu0 %v8002_v3  ;;  %6611 = vmatprep.subr.bf16.mxu1 %v7723_v55 }
 0xcb8   :  { %6609 = vmatpush3.bf16.msra.mxu0 %v8002_v3 }
 0xcb9   :  { %6643 = vmatprep.subr.bf16.mxu0 %v7732_v58 }
 0xd6a   :  { %v3367_v48 = vpop.f32.mrb[44].mxu1 }
 0xd6b   :  { %v6891_v29 = vadd.f32 %v8248_v33, %v3367_v48  ;;  %v3369_v53 = vpop.f32.mrb[45].mxu1 }
 0xd6c   :  { %v6893_v9 = vadd.f32 %v8250_v59, %v3369_v53 }
 0xd6d   :  { %v4451_v52 = vmul.f32 -1.442695, %v6891_v29 }
 0xd6e   :  { %v3373_v27 = vpop.f32.mrb[46].mxu1  ;;  %v5557_v26 = vpop.f32.mrb[86].mxu0  ;;  %v4453_v1 = vmul.f32 -1.442695, %v6893_v9 }
 0xd6f   :  { %7279 = vpow2.f32 %v4451_v52  ;;  %v6895_v62 = vadd.f32 %v8248_v33, %v3373_v27  ;;  %v3375_v31 = vpop.f32.mrb[47].mxu1  ;;  %v3444_v44 = vpop.f32.mrb[87].mxu0  ;;  %v3450_v15 = vadd.f32 %v5557_v26, %v8258_v14 }
 0xd70   :  { %v6897_v56 = vadd.f32 %v8250_v59, %v3375_v31  ;;  %v3445_v23 = vadd.f32 %v3444_v44, %v8258_v14 }
 0xd71   :  { %v4452_v25 = vmul.f32 -1.442695, %v6895_v62 }
 0xd72   :  { %v4454_v60 = vmul.f32 -1.442695, %v6897_v56 }
 0xd73   :  { %7281 = vpow2.f32 %v4452_v25 }
 0xd74   :  { %7283 = vpow2.f32 %v4453_v1 }
 0xd75   :  { %7285 = vpow2.f32 %v4454_v60 }
 0xd79   :  { %v7280_v21 = vpop.eup %7279 }
 0xd7a   :  { %v3461_v8 = vadd.f32 1.0, %v7280_v21 }
 0xd7c   :  { %7287 = vrcp.f32 %v3461_v8 }
 0xd7d   :  { %v7282_v7 = vpop.eup %7281 }
 0xd7e   :  { %v3462_v46 = vadd.f32 1.0, %v7282_v7  ;;  %v7284_v61 = vpop.eup %7283 }
 0xd7f   :  { %v7286_v41 = vpop.eup %7285  ;;  %v3475_v38 = vadd.f32 1.0, %v7284_v61 }
 0xd80   :  { %7289 = vrcp.f32 %v3462_v46  ;;  %v3476_v18 = vadd.f32 1.0, %v7286_v41 }
 0xd81   :  { %7291 = vrcp.f32 %v3475_v38 }
 0xd82   :  { %7293 = vrcp.f32 %v3476_v18 }
 0xd86   :  { %v7288_v28 = vpop.eup %7287 }
 0xd87   :  { %v3481_v43 = vmul.f32 %v7288_v28, %v3445_v23 }
 0xd89   :  { %v3483_v4 = vadd.f32 %v3481_v43, %v9108_v10 }
 0xd8a   :  { %v7290_v49 = vpop.eup %7289 }
 0xd8b   :  { %v3482_v42 = vmul.f32 %v7290_v49, %v3450_v15  ;;  %7295 = vtanh.f32 %v3483_v4  ;;  %v7292_v13 = vpop.eup %7291 }
 0xd8c   :  { %v7294_v6 = vpop.eup %7293  ;;  %v3487_v48 = vsub.f32 1.0, %v7292_v13  ;;  %v3491_v52 = vmul.f32 %v7292_v13, %v8835_v20 }
 0xd8d   :  { %v3484_v39 = vadd.f32 %v3482_v42, %v9109_v51  ;;  %v3488_v27 = vsub.f32 1.0, %v7294_v6  ;;  %v3492_v31 = vmul.f32 %v7294_v6, %v8842_v36 }
 0xd8f   :  { %7297 = vtanh.f32 %v3484_v39 }
 0xd95   :  { %v7296_v29 = vpop.eup %7295 }
 0xd96   :  { %v3489_v53 = vmul.f32 %v7296_v29, %v3487_v48  ;;  %v9110_v29 = vld [vmem:[#allocation10_spill] sm:$0xff] }
 0xd98   :  { %v8892_v9 = vadd.f32 %v3491_v52, %v3489_v53 }
 0xd99   :  { %v7298_v26 = vpop.eup %7297 }
 0xd9a   :  { %3571 = vmatmul.mubr.f32.vlgmr.msra.gmra.mrb[48].mxu1 %v8892_v9  ;;  %5590 = vmatprep.mubr.f32.mxu0 %v8892_v9  ;;  %v3490_v62 = vmul.f32 %v7298_v26, %v3488_v27  ;;  %v9111_v26 = vld [vmem:[#allocation9_spill] sm:$0xff] }
 0xd9b   :  { %3576 = vmatprep.mubr.f32.mxu1 %v9103_v24  ;;  %6613 = vmatpush1.bf16.msra.mxu1 %v7758_v12 }
 0xd9c   :  { %v8899_v44 = vadd.f32 %v3492_v31, %v3490_v62  ;;  %6615 = vmatprep.subr.bf16.mxu1 %v7761_v16 }
 0xd9e   :  { %v4581_v20 = vpack.c.bf16 %v8899_v44, %v8892_v9  ;;  %3577 = vmatmul.mubr.f32.gmra.mrb[50].mxu1 %v8899_v44  ;;  %5591 = vmatmul.mubr.f32.vlgmr.msra.gmra.mrb[88].mxu0 %v8899_v44 }
 0xd9f   :  { %6617 = vmatpush1.bf16.msra.mxu1 %v7788_v30  ;;  %6645 = vmatpush3.bf16.msra.mxu0 %v7732_v58 }
 0xda0   :  { %4613 = vst [vmem:[%s9084_s7 + $0x58] sm:$0xff] %v4581_v20   ;;  %6619 = vmatprep.subr.bf16.mxu1 %v7796_v35  ;;  %6647 = vmatprep.subr.bf16.mxu0 %v7793_v32 }
 0xda1   :  { %3775 = vmatprep.mubr.f32.mxu1 %v9103_v24 }
 0xda3   :  { %6621 = vmatpush1.bf16.msra.mxu1 %v7820_v45  ;;  %6649 = vmatpush3.bf16.msra.mxu0 %v7793_v32 }
 0xda4   :  { %6623 = vmatprep.subr.bf16.mxu1 %v7830_v50  ;;  %6651 = vmatprep.subr.bf16.mxu0 %v7826_v47 }
 0xda7   :  { %6625 = vmatpush1.bf16.msra.mxu1 %v7854_v0  ;;  %6653 = vmatpush3.bf16.msra.mxu0 %v7826_v47 }
 0xda8   :  { %6627 = vmatprep.subr.bf16.mxu1 %v7866_v5  ;;  %6655 = vmatprep.subr.bf16.mxu0 %v7860_v2 }
 0xdab   :  { %6629 = vmatpush1.bf16.msra.mxu1 %v7892_v17  ;;  %6657 = vmatpush3.bf16.msra.mxu0 %v7860_v2 }
 0xdac   :  { %6631 = vmatprep.subr.bf16.mxu1 %v7904_v22  ;;  %6659 = vmatprep.subr.bf16.mxu0 %v7898_v19 }
 0xdaf   :  { %6633 = vmatpush1.bf16.msra.mxu1 %v7929_v34  ;;  %6661 = vmatpush3.bf16.msra.mxu0 %v7898_v19 }
 0xdb0   :  { %6635 = vmatprep.subr.bf16.mxu1 %v7941_v40  ;;  %6663 = vmatprep.subr.bf16.mxu0 %v7935_v37 }
 0xdb3   :  { %6637 = vmatpush1.bf16.msra.mxu1 %v7967_v54  ;;  %6665 = vmatpush3.bf16.msra.mxu0 %v7935_v37 }
 0xdb4   :  { %6639 = vmatprep.subr.bf16.mxu1 %v7979_v63  ;;  %6667 = vmatprep.subr.bf16.mxu0 %v7973_v57 }
 0xdb7   :  { %6641 = vmatpush1.bf16.msra.mxu1 %v7999_v11  ;;  %6669 = vmatpush3.bf16.msra.mxu0 %v7973_v57 }
 0xdb8   :  { %6671 = vmatprep.subr.bf16.mxu0 %v8002_v3  ;;  %6675 = vmatprep.subr.bf16.mxu1 %v7723_v55 }
 0xdbb   :  { %6673 = vmatpush3.bf16.msra.mxu0 %v8002_v3 }
 0xdbc   :  { %6707 = vmatprep.subr.bf16.mxu0 %v7732_v58 }
 0xe6d   :  { %v3572_v36 = vpop.f32.mrb[48].mxu1 }
 0xe6e   :  { %v6899_v25 = vadd.f32 %v8248_v33, %v3572_v36  ;;  %v3574_v56 = vpop.f32.mrb[49].mxu1 }
 0xe6f   :  { %v6901_v60 = vadd.f32 %v8250_v59, %v3574_v56 }
 0xe70   :  { %v4459_v1 = vmul.f32 -1.442695, %v6899_v25 }
 0xe71   :  { %v3578_v21 = vpop.f32.mrb[50].mxu1  ;;  %v5592_v8 = vpop.f32.mrb[88].mxu0  ;;  %v4461_v23 = vmul.f32 -1.442695, %v6901_v60 }
 0xe72   :  { %7299 = vpow2.f32 %v4459_v1  ;;  %v6903_v7 = vadd.f32 %v8248_v33, %v3578_v21  ;;  %v3580_v46 = vpop.f32.mrb[51].mxu1  ;;  %v3649_v61 = vpop.f32.mrb[89].mxu0  ;;  %v3655_v48 = vadd.f32 %v5592_v8, %v8258_v14 }
 0xe73   :  { %v6905_v38 = vadd.f32 %v8250_v59, %v3580_v46  ;;  %v3650_v51 = vadd.f32 %v3649_v61, %v8258_v14 }
 0xe74   :  { %v4460_v41 = vmul.f32 -1.442695, %v6903_v7 }
 0xe75   :  { %v4462_v28 = vmul.f32 -1.442695, %v6905_v38 }
 0xe76   :  { %7301 = vpow2.f32 %v4460_v41 }
 0xe77   :  { %7303 = vpow2.f32 %v4461_v23 }
 0xe78   :  { %7305 = vpow2.f32 %v4462_v28 }
 0xe7c   :  { %v7300_v18 = vpop.eup %7299 }
 0xe7d   :  { %v3666_v43 = vadd.f32 1.0, %v7300_v18 }
 0xe7f   :  { %7307 = vrcp.f32 %v3666_v43 }
 0xe80   :  { %v7302_v15 = vpop.eup %7301 }
 0xe81   :  { %v3667_v10 = vadd.f32 1.0, %v7302_v15  ;;  %v7304_v4 = vpop.eup %7303 }
 0xe82   :  { %v7306_v49 = vpop.eup %7305  ;;  %v3680_v42 = vadd.f32 1.0, %v7304_v4 }
 0xe83   :  { %7309 = vrcp.f32 %v3667_v10  ;;  %v3681_v13 = vadd.f32 1.0, %v7306_v49 }
 0xe84   :  { %7311 = vrcp.f32 %v3680_v42 }
 0xe85   :  { %7313 = vrcp.f32 %v3681_v13 }
 0xe89   :  { %v7308_v39 = vpop.eup %7307 }
 0xe8a   :  { %v3686_v6 = vmul.f32 %v7308_v39, %v3650_v51 }
 0xe8c   :  { %v3688_v53 = vadd.f32 %v3686_v6, %v9110_v29 }
 0xe8d   :  { %v7310_v52 = vpop.eup %7309 }
 0xe8e   :  { %v3687_v27 = vmul.f32 %v7310_v52, %v3655_v48  ;;  %7315 = vtanh.f32 %v3688_v53  ;;  %v7312_v31 = vpop.eup %7311 }
 0xe8f   :  { %v7314_v20 = vpop.eup %7313  ;;  %v3692_v36 = vsub.f32 1.0, %v7312_v31  ;;  %v3696_v1 = vmul.f32 %v7312_v31, %v8892_v9 }
 0xe90   :  { %v3689_v62 = vadd.f32 %v3687_v27, %v9111_v26  ;;  %v3693_v21 = vsub.f32 1.0, %v7314_v20  ;;  %v3697_v46 = vmul.f32 %v7314_v20, %v8899_v44 }
 0xe92   :  { %7317 = vtanh.f32 %v3689_v62 }
 0xe98   :  { %v7316_v25 = vpop.eup %7315 }
 0xe99   :  { %v3694_v56 = vmul.f32 %v7316_v25, %v3692_v36  ;;  %v9112_v36 = vld [vmem:[#allocation12_spill] sm:$0xff] }
 0xe9b   :  { %v8949_v60 = vadd.f32 %v3696_v1, %v3694_v56 }
 0xe9c   :  { %v7318_v8 = vpop.eup %7317 }
 0xe9d   :  { %3776 = vmatmul.mubr.f32.vlgmr.msra.gmra.mrb[52].mxu1 %v8949_v60  ;;  %5625 = vmatprep.mubr.f32.mxu0 %v8949_v60  ;;  %v3695_v7 = vmul.f32 %v7318_v8, %v3693_v21  ;;  %v9113_v21 = vld [vmem:[#allocation11_spill] sm:$0xff] }
 0xe9e   :  { %3781 = vmatprep.mubr.f32.mxu1 %v9103_v24  ;;  %6677 = vmatpush1.bf16.msra.mxu1 %v7758_v12 }
 0xe9f   :  { %v8956_v61 = vadd.f32 %v3697_v46, %v3695_v7  ;;  %6679 = vmatprep.subr.bf16.mxu1 %v7761_v16 }
 0xea1   :  { %v4586_v9 = vpack.c.bf16 %v8956_v61, %v8949_v60  ;;  %3782 = vmatmul.mubr.f32.gmra.mrb[54].mxu1 %v8956_v61  ;;  %5626 = vmatmul.mubr.f32.vlgmr.msra.gmra.mrb[90].mxu0 %v8956_v61 }
 0xea2   :  { %6681 = vmatpush1.bf16.msra.mxu1 %v7788_v30  ;;  %6709 = vmatpush3.bf16.msra.mxu0 %v7732_v58 }
 0xea3   :  { %4614 = vst [vmem:[%s9084_s7 + $0x60] sm:$0xff] %v4586_v9   ;;  %6683 = vmatprep.subr.bf16.mxu1 %v7796_v35  ;;  %6711 = vmatprep.subr.bf16.mxu0 %v7793_v32 }
 0xea4   :  { %3980 = vmatprep.mubr.f32.mxu1 %v9103_v24 }
 0xea6   :  { %6685 = vmatpush1.bf16.msra.mxu1 %v7820_v45  ;;  %6713 = vmatpush3.bf16.msra.mxu0 %v7793_v32 }
 0xea7   :  { %6687 = vmatprep.subr.bf16.mxu1 %v7830_v50  ;;  %6715 = vmatprep.subr.bf16.mxu0 %v7826_v47 }
 0xeaa   :  { %6689 = vmatpush1.bf16.msra.mxu1 %v7854_v0  ;;  %6717 = vmatpush3.bf16.msra.mxu0 %v7826_v47 }
 0xeab   :  { %6691 = vmatprep.subr.bf16.mxu1 %v7866_v5  ;;  %6719 = vmatprep.subr.bf16.mxu0 %v7860_v2 }
 0xeae   :  { %6693 = vmatpush1.bf16.msra.mxu1 %v7892_v17  ;;  %6721 = vmatpush3.bf16.msra.mxu0 %v7860_v2 }
 0xeaf   :  { %6695 = vmatprep.subr.bf16.mxu1 %v7904_v22  ;;  %6723 = vmatprep.subr.bf16.mxu0 %v7898_v19 }
 0xeb2   :  { %6697 = vmatpush1.bf16.msra.mxu1 %v7929_v34  ;;  %6725 = vmatpush3.bf16.msra.mxu0 %v7898_v19 }
 0xeb3   :  { %6699 = vmatprep.subr.bf16.mxu1 %v7941_v40  ;;  %6727 = vmatprep.subr.bf16.mxu0 %v7935_v37 }
 0xeb6   :  { %6701 = vmatpush1.bf16.msra.mxu1 %v7967_v54  ;;  %6729 = vmatpush3.bf16.msra.mxu0 %v7935_v37 }
 0xeb7   :  { %6703 = vmatprep.subr.bf16.mxu1 %v7979_v63  ;;  %6731 = vmatprep.subr.bf16.mxu0 %v7973_v57 }
 0xeba   :  { %6705 = vmatpush1.bf16.msra.mxu1 %v7999_v11  ;;  %6733 = vmatpush3.bf16.msra.mxu0 %v7973_v57 }
 0xebb   :  { %6735 = vmatprep.subr.bf16.mxu0 %v8002_v3  ;;  %6739 = vmatprep.subr.bf16.mxu1 %v7723_v55 }
 0xebe   :  { %6737 = vmatpush3.bf16.msra.mxu0 %v8002_v3 }
 0xebf   :  { %6771 = vmatprep.subr.bf16.mxu0 %v7732_v58 }
 0xf70   :  { %v3777_v44 = vpop.f32.mrb[52].mxu1 }
 0xf71   :  { %v6907_v41 = vadd.f32 %v8248_v33, %v3777_v44  ;;  %v3779_v38 = vpop.f32.mrb[53].mxu1 }
 0xf72   :  { %v6909_v28 = vadd.f32 %v8250_v59, %v3779_v38 }
 0xf73   :  { %v4467_v23 = vmul.f32 -1.442695, %v6907_v41 }
 0xf74   :  { %v3783_v18 = vpop.f32.mrb[54].mxu1  ;;  %v5627_v43 = vpop.f32.mrb[90].mxu0  ;;  %v4469_v42 = vmul.f32 -1.442695, %v6909_v28 }
 0xf75   :  { %7319 = vpow2.f32 %v4467_v23  ;;  %v6911_v15 = vadd.f32 %v8248_v33, %v3783_v18  ;;  %v3785_v10 = vpop.f32.mrb[55].mxu1  ;;  %v3854_v4 = vpop.f32.mrb[91].mxu0  ;;  %v3860_v20 = vadd.f32 %v5627_v43, %v8258_v14 }
 0xf76   :  { %v6913_v55 = vadd.f32 %v8250_v59, %v3785_v10  ;;  %v3855_v27 = vadd.f32 %v3854_v4, %v8258_v14 }
 0xf77   :  { %v4468_v49 = vmul.f32 -1.442695, %v6911_v15 }
 0xf78   :  { %v4470_v51 = vmul.f32 -1.442695, %v6913_v55  ;;  %v9114_v55 = vld [vmem:[#allocation14_spill] sm:$0xff] }
 0xf79   :  { %7321 = vpow2.f32 %v4468_v49 }
 0xf7a   :  { %7323 = vpow2.f32 %v4469_v42 }
 0xf7b   :  { %7325 = vpow2.f32 %v4470_v51 }
 0xf7f   :  { %v7320_v39 = vpop.eup %7319 }
 0xf80   :  { %v3871_v13 = vadd.f32 1.0, %v7320_v39 }
 0xf82   :  { %7327 = vrcp.f32 %v3871_v13  ;;  %v9115_v13 = vld [vmem:[#allocation13_spill] sm:$0xff] }
 0xf83   :  { %v7322_v6 = vpop.eup %7321 }
 0xf84   :  { %v3872_v48 = vadd.f32 1.0, %v7322_v6  ;;  %v7324_v29 = vpop.eup %7323 }
 0xf85   :  { %v7326_v53 = vpop.eup %7325  ;;  %v3885_v52 = vadd.f32 1.0, %v7324_v29 }
 0xf86   :  { %7329 = vrcp.f32 %v3872_v48  ;;  %v3886_v62 = vadd.f32 1.0, %v7326_v53 }
 0xf87   :  { %7331 = vrcp.f32 %v3885_v52 }
 0xf88   :  { %7333 = vrcp.f32 %v3886_v62 }
 0xf8c   :  { %v7328_v26 = vpop.eup %7327 }
 0xf8d   :  { %v3891_v31 = vmul.f32 %v7328_v26, %v3855_v27 }
 0xf8f   :  { %v3893_v25 = vadd.f32 %v3891_v31, %v9112_v36 }
 0xf90   :  { %v7330_v56 = vpop.eup %7329 }
 0xf91   :  { %v3892_v1 = vmul.f32 %v7330_v56, %v3860_v20  ;;  %7335 = vtanh.f32 %v3893_v25  ;;  %v7332_v7 = vpop.eup %7331 }
 0xf92   :  { %v7334_v46 = vpop.eup %7333  ;;  %v3897_v9 = vsub.f32 1.0, %v7332_v7  ;;  %v3901_v38 = vmul.f32 %v7332_v7, %v8949_v60 }
 0xf93   :  { %v3894_v8 = vadd.f32 %v3892_v1, %v9113_v21  ;;  %v3898_v28 = vsub.f32 1.0, %v7334_v46  ;;  %v3902_v15 = vmul.f32 %v7334_v46, %v8956_v61 }
 0xf95   :  { %7337 = vtanh.f32 %v3894_v8 }
 0xf9b   :  { %v7336_v44 = vpop.eup %7335 }
 0xf9c   :  { %v3899_v41 = vmul.f32 %v7336_v44, %v3897_v9 }
 0xf9e   :  { %v9006_v23 = vadd.f32 %v3901_v38, %v3899_v41 }
 0xf9f   :  { %v7338_v18 = vpop.eup %7337 }
 0xfa0   :  { %3981 = vmatmul.mubr.f32.vlgmr.msra.gmra.mrb[56].mxu1 %v9006_v23  ;;  %5660 = vmatprep.mubr.f32.mxu0 %v9006_v23  ;;  %v3900_v43 = vmul.f32 %v7338_v18, %v3898_v28 }
 0xfa1   :  { %3986 = vmatprep.mubr.f32.mxu1 %v9103_v24  ;;  %6741 = vmatpush1.bf16.msra.mxu1 %v7758_v12 }
 0xfa2   :  { %v9013_v10 = vadd.f32 %v3902_v15, %v3900_v43  ;;  %6743 = vmatprep.subr.bf16.mxu1 %v7761_v16 }
 0xfa4   :  { %v4591_v60 = vpack.c.bf16 %v9013_v10, %v9006_v23  ;;  %3987 = vmatmul.mubr.f32.gmra.mrb[58].mxu1 %v9013_v10  ;;  %5661 = vmatmul.mubr.f32.vlgmr.msra.gmra.mrb[92].mxu0 %v9013_v10 }
 0xfa5   :  { %6745 = vmatpush1.bf16.msra.mxu1 %v7788_v30  ;;  %6773 = vmatpush3.bf16.msra.mxu0 %v7732_v58 }
 0xfa6   :  { %4615 = vst [vmem:[%s9084_s7 + $0x68] sm:$0xff] %v4591_v60   ;;  %6747 = vmatprep.subr.bf16.mxu1 %v7796_v35  ;;  %6775 = vmatprep.subr.bf16.mxu0 %v7793_v32 }
 0xfa7   :  { %4185 = vmatprep.mubr.f32.mxu1 %v9103_v24 }
 0xfa9   :  { %6749 = vmatpush1.bf16.msra.mxu1 %v7820_v45  ;;  %6777 = vmatpush3.bf16.msra.mxu0 %v7793_v32 }
 0xfaa   :  { %6751 = vmatprep.subr.bf16.mxu1 %v7830_v50  ;;  %6779 = vmatprep.subr.bf16.mxu0 %v7826_v47 }
 0xfad   :  { %6753 = vmatpush1.bf16.msra.mxu1 %v7854_v0  ;;  %6781 = vmatpush3.bf16.msra.mxu0 %v7826_v47 }
 0xfae   :  { %6755 = vmatprep.subr.bf16.mxu1 %v7866_v5  ;;  %6783 = vmatprep.subr.bf16.mxu0 %v7860_v2 }
 0xfb1   :  { %6757 = vmatpush1.bf16.msra.mxu1 %v7892_v17  ;;  %6785 = vmatpush3.bf16.msra.mxu0 %v7860_v2 }
 0xfb2   :  { %6759 = vmatprep.subr.bf16.mxu1 %v7904_v22  ;;  %6787 = vmatprep.subr.bf16.mxu0 %v7898_v19 }
 0xfb5   :  { %6761 = vmatpush1.bf16.msra.mxu1 %v7929_v34  ;;  %6789 = vmatpush3.bf16.msra.mxu0 %v7898_v19 }
 0xfb6   :  { %6763 = vmatprep.subr.bf16.mxu1 %v7941_v40  ;;  %6791 = vmatprep.subr.bf16.mxu0 %v7935_v37 }
 0xfb9   :  { %6765 = vmatpush1.bf16.msra.mxu1 %v7967_v54  ;;  %6793 = vmatpush3.bf16.msra.mxu0 %v7935_v37 }
 0xfba   :  { %6767 = vmatprep.subr.bf16.mxu1 %v7979_v63  ;;  %6795 = vmatprep.subr.bf16.mxu0 %v7973_v57 }
 0xfbd   :  { %6769 = vmatpush1.bf16.msra.mxu1 %v7999_v11  ;;  %6797 = vmatpush3.bf16.msra.mxu0 %v7973_v57 }
 0xfbe   :  { %6799 = vmatprep.subr.bf16.mxu0 %v8002_v3 }
 0xfc1   :  { %6801 = vmatpush3.bf16.msra.mxu0 %v8002_v3 }
0x1073   :  { %v3982_v58 = vpop.f32.mrb[56].mxu1 }
0x1074   :  { %v6915_v12 = vadd.f32 %v8248_v33, %v3982_v58  ;;  %v3984_v16 = vpop.f32.mrb[57].mxu1 }
0x1075   :  { %v6917_v32 = vadd.f32 %v8250_v59, %v3984_v16 }
0x1076   :  { %v4475_v30 = vmul.f32 -1.442695, %v6915_v12 }
0x1077   :  { %v3988_v35 = vpop.f32.mrb[58].mxu1  ;;  %v5662_v45 = vpop.f32.mrb[92].mxu0  ;;  %v4477_v17 = vmul.f32 -1.442695, %v6917_v32 }
0x1078   :  { %7339 = vpow2.f32 %v4475_v30  ;;  %v6919_v47 = vadd.f32 %v8248_v33, %v3988_v35  ;;  %v3990_v50 = vpop.f32.mrb[59].mxu1  ;;  %v4059_v0 = vpop.f32.mrb[93].mxu0  ;;  %v4065_v49 = vadd.f32 %v5662_v45, %v8258_v14 }
0x1079   :  { %v6921_v5 = vadd.f32 %v8250_v59, %v3990_v50  ;;  %v4060_v11 = vadd.f32 %v4059_v0, %v8258_v14  ;;  %v9116_v50 = vld [vmem:[#allocation16_spill] sm:$0xff] }
0x107a   :  { %v4476_v2 = vmul.f32 -1.442695, %v6919_v47 }
0x107b   :  { %v4478_v19 = vmul.f32 -1.442695, %v6921_v5 }
0x107c   :  { %7341 = vpow2.f32 %v4476_v2 }
0x107d   :  { %7343 = vpow2.f32 %v4477_v17  ;;  %v9117_v17 = vld [vmem:[#allocation15_spill] sm:$0xff] }
0x107e   :  { %7345 = vpow2.f32 %v4478_v19 }
0x1082   :  { %v7340_v22 = vpop.eup %7339 }
0x1083   :  { %v4076_v34 = vadd.f32 1.0, %v7340_v22 }
0x1085   :  { %7347 = vrcp.f32 %v4076_v34 }
0x1086   :  { %v7342_v37 = vpop.eup %7341 }
0x1087   :  { %v4077_v40 = vadd.f32 1.0, %v7342_v37  ;;  %v7344_v54 = vpop.eup %7343 }
0x1088   :  { %v7346_v57 = vpop.eup %7345  ;;  %v4090_v63 = vadd.f32 1.0, %v7344_v54 }
0x1089   :  { %7349 = vrcp.f32 %v4077_v40  ;;  %v4091_v61 = vadd.f32 1.0, %v7346_v57 }
0x108a   :  { %7351 = vrcp.f32 %v4090_v63 }
0x108b   :  { %7353 = vrcp.f32 %v4091_v61 }
0x108f   :  { %v7348_v3 = vpop.eup %7347 }
0x1090   :  { %v4096_v4 = vmul.f32 %v7348_v3, %v4060_v11 }
0x1092   :  { %v4098_v42 = vadd.f32 %v4096_v4, %v9114_v55 }
0x1093   :  { %v7350_v51 = vpop.eup %7349 }
0x1094   :  { %v4097_v39 = vmul.f32 %v7350_v51, %v4065_v49  ;;  %7355 = vtanh.f32 %v4098_v42  ;;  %v7352_v48 = vpop.eup %7351 }
0x1095   :  { %v7354_v29 = vpop.eup %7353  ;;  %v4102_v53 = vsub.f32 1.0, %v7352_v48  ;;  %v4106_v26 = vmul.f32 %v7352_v48, %v9006_v23 }
0x1096   :  { %v4099_v6 = vadd.f32 %v4097_v39, %v9115_v13  ;;  %v4103_v31 = vsub.f32 1.0, %v7354_v29  ;;  %v4107_v25 = vmul.f32 %v7354_v29, %v9013_v10 }
0x1098   :  { %7357 = vtanh.f32 %v4099_v6 }
0x109e   :  { %v7356_v52 = vpop.eup %7355 }
0x109f   :  { %v4104_v27 = vmul.f32 %v7356_v52, %v4102_v53 }
0x10a1   :  { %v4108_v62 = vadd.f32 %v4106_v26, %v4104_v27 }
0x10a2   :  { %v7358_v20 = vpop.eup %7357 }
0x10a3   :  { %4186 = vmatmul.mubr.f32.vlgmr.msra.gmra.mrb[60].mxu1 %v4108_v62  ;;  %5695 = vmatprep.mubr.f32.mxu0 %v4108_v62  ;;  %v4105_v36 = vmul.f32 %v7358_v20, %v4103_v31 }
0x10a4   :  { %4191 = vmatprep.mubr.f32.mxu1 %v9103_v24 }
0x10a5   :  { %v4109_v56 = vadd.f32 %v4107_v25, %v4105_v36 }
0x10a7   :  { %v4596_v1 = vpack.c.bf16 %v4109_v56, %v4108_v62  ;;  %4192 = vmatmul.mubr.f32.gmra.mrb[62].mxu1 %v4109_v56  ;;  %5696 = vmatmul.mubr.f32.vlgmr.msra.gmra.mrb[94].mxu0 %v4109_v56 }
0x10a9   :  { %4616 = vst [vmem:[%s9084_s7 + $0x70] sm:$0xff] %v4596_v1  }
0x1176   :  { %v4187_v21 = vpop.f32.mrb[60].mxu1 }
0x1177   :  { %v6923_v8 = vadd.f32 %v8248_v33, %v4187_v21  ;;  %v4189_v7 = vpop.f32.mrb[61].mxu1 }
0x1178   :  { %v6925_v9 = vadd.f32 %v8250_v59, %v4189_v7 }
0x1179   :  { %v4483_v46 = vmul.f32 -1.442695, %v6923_v8 }
0x117a   :  { %v4193_v44 = vpop.f32.mrb[62].mxu1  ;;  %v5697_v41 = vpop.f32.mrb[94].mxu0  ;;  %v4485_v43 = vmul.f32 -1.442695, %v6925_v9 }
0x117b   :  { %7359 = vpow2.f32 %v4483_v46  ;;  %v6927_v24 = vadd.f32 %v8248_v33, %v4193_v44  ;;  %v4195_v38 = vpop.f32.mrb[63].mxu1  ;;  %v4264_v23 = vpop.f32.mrb[95].mxu0  ;;  %v4270_v47 = vadd.f32 %v5697_v41, %v8258_v14 }
0x117c   :  { %v6929_v18 = vadd.f32 %v8250_v59, %v4195_v38  ;;  %v4265_v33 = vadd.f32 %v4264_v23, %v8258_v14 }
0x117d   :  { %v4484_v28 = vmul.f32 -1.442695, %v6927_v24 }
0x117e   :  { %v4486_v15 = vmul.f32 -1.442695, %v6929_v18 }
0x117f   :  { %7361 = vpow2.f32 %v4484_v28 }
0x1180   :  { %7363 = vpow2.f32 %v4485_v43 }
0x1181   :  { %7365 = vpow2.f32 %v4486_v15 }
0x1185   :  { %v7360_v10 = vpop.eup %7359 }
0x1186   :  { %v4281_v60 = vadd.f32 1.0, %v7360_v10 }
0x1188   :  { %7367 = vrcp.f32 %v4281_v60 }
0x1189   :  { %v7362_v58 = vpop.eup %7361 }
0x118a   :  { %v4282_v12 = vadd.f32 1.0, %v7362_v58  ;;  %v7364_v16 = vpop.eup %7363 }
0x118b   :  { %v7366_v30 = vpop.eup %7365  ;;  %v4295_v32 = vadd.f32 1.0, %v7364_v16 }
0x118c   :  { %7369 = vrcp.f32 %v4282_v12  ;;  %v4296_v45 = vadd.f32 1.0, %v7366_v30 }
0x118d   :  { %7371 = vrcp.f32 %v4295_v32 }
0x118e   :  { %7373 = vrcp.f32 %v4296_v45 }
0x1192   :  { %v7368_v35 = vpop.eup %7367 }
0x1193   :  { %v4301_v59 = vmul.f32 %v7368_v35, %v4265_v33 }
0x1195   :  { %v4303_v0 = vadd.f32 %v4301_v59, %v9116_v50 }
0x1196   :  { %v7370_v2 = vpop.eup %7369 }
0x1197   :  { %v4302_v5 = vmul.f32 %v7370_v2, %v4270_v47  ;;  %7375 = vtanh.f32 %v4303_v0  ;;  %v7372_v22 = vpop.eup %7371 }
0x1198   :  { %v7374_v34 = vpop.eup %7373  ;;  %v4307_v37 = vsub.f32 1.0, %v7372_v22  ;;  %v4311_v54 = vmul.f32 %v7372_v22, %v4108_v62 }
0x1199   :  { %v4304_v19 = vadd.f32 %v4302_v5, %v9117_v17  ;;  %v4308_v63 = vsub.f32 1.0, %v7374_v34  ;;  %v4312_v14 = vmul.f32 %v7374_v34, %v4109_v56 }
0x119b   :  { %7377 = vtanh.f32 %v4304_v19 }
0x11a1   :  { %v7376_v40 = vpop.eup %7375 }
0x11a2   :  { %v4309_v57 = vmul.f32 %v7376_v40, %v4307_v37 }
0x11a4   :  { %v4313_v11 = vadd.f32 %v4311_v54, %v4309_v57 }
0x11a5   :  { %v7378_v3 = vpop.eup %7377 }
0x11a6   :  { %v4310_v61 = vmul.f32 %v7378_v3, %v4308_v63 }
0x11a8   :  { %v4314_v4 = vadd.f32 %v4312_v14, %v4310_v61 }
0x11aa   :  { %v4601_v49 = vpack.c.bf16 %v4314_v4, %v4313_v11 }
0x11ac   :  { %4617 = vst [vmem:[%s9084_s7 + $0x78] sm:$0xff] %v4601_v49  }

// kernel: forward.3
= control target key start
LH: loop header
LB: loop body
LE: loop exit
PB: predicated region body
PF: predicated region fallthrough
CT: control target
= control target key end

     0   :  { %v4551_v1 = vmov 0   ;;  %v8537_v49 = vlaneseq  ;;  %vm1041_vm0 = vcmask 130112   ;;  %vm1178_vm1 = vcmask 1041409   ;;  %s8510_s2 = inlined_call_operand.vmem [shape: bf16[128,512], index: 2, kind: input, shape index: {}]   ;;  %s8511_s1 = inlined_call_operand.vmem [shape: bf16[16,16,128], index: 1, kind: input, shape index: {}]   ;;  %s8512_s3 = inlined_call_operand.vmem [shape: f32[1,512], index: 3, kind: input, shape index: {}]   ;;  %s8513_s4 = inlined_call_operand.vmem [shape: f32[1,512], index: 4, kind: input, shape index: {}]   ;;  %s8514_s0 = inlined_call_operand.<no memory space> [shape: s32[1], index: 0, kind: input, shape index: {}]   ;;  %s8515_s5 = inlined_call_operand.vmem [shape: f32[512,512], index: 5, kind: input, shape index: {}]   ;;  %s8516_s7 = inlined_call_operand.vmem [shape: f32[512,4], index: 7, kind: input, shape index: {}]   ;;  %s8517_s6 = inlined_call_operand.vmem [shape: f32[1,512], index: 6, kind: input, shape index: {}]   ;;  %s8518_s8 = inlined_call_operand.vmem [shape: f32[1,4], index: 8, kind: input, shape index: {}]   ;;  %s8519_s9 = inlined_call_operand.vmem [shape: f32[16,4], index: 9, kind: output, shape index: {}]  }
   0x1   :  { %v4459_v0 = vld [vmem:[%s8510_s2 + $0x4] ss:$16 sps:$4 sm:$0xff]   ;;  %407 = vmatprep.mubr.bf16.mxu0 %v4551_v1  ;;  %600 = vmatprep.mubr.bf16.mxu1 %v4551_v1  ;;  %v4461_v2 = vld [vmem:[%s8510_s2] ss:$16 sps:$4 sm:$0xff]   ;;  %v4462_v3 = vld [vmem:[%s8510_s2 + $0xc] ss:$16 sps:$4 sm:$0xff]  }
   0x2   :  { %375 = vmatprep.subr.bf16.mxu0 %v4459_v0  ;;  %v4464_v4 = vld [vmem:[%s8510_s2 + $0x8] ss:$16 sps:$4 sm:$0xff]   ;;  %v4465_v5 = vld [vmem:[%s8510_s2 + $0x24] ss:$16 sps:$4 sm:$0xff]   ;;  %v4467_v6 = vld [vmem:[%s8510_s2 + $0x20] ss:$16 sps:$4 sm:$0xff]   ;;  %568 = vmatprep.subr.bf16.mxu1 %v4462_v3 }
   0x3   :  { %376 = vmatpush1.bf16.msra.mxu0 %v4461_v2  ;;  %v4468_v7 = vld [vmem:[%s8510_s2 + $0x2c] ss:$16 sps:$4 sm:$0xff]   ;;  %569 = vmatpush1.bf16.msra.mxu1 %v4464_v4  ;;  %v4470_v8 = vld [vmem:[%s8510_s2 + $0x28] ss:$16 sps:$4 sm:$0xff]   ;;  %v4471_v9 = vld [vmem:[%s8510_s2 + $0x44] ss:$16 sps:$4 sm:$0xff]  }
   0x4   :  { %377 = vmatprep.subr.bf16.mxu0 %v4465_v5  ;;  %570 = vmatprep.subr.bf16.mxu1 %v4468_v7  ;;  %v4473_v10 = vld [vmem:[%s8510_s2 + $0x40] ss:$16 sps:$4 sm:$0xff]   ;;  %v4474_v11 = vld [vmem:[%s8510_s2 + $0x4c] ss:$16 sps:$4 sm:$0xff]   ;;  %v4477_v12 = vld [vmem:[%s8510_s2 + $0x64] ss:$16 sps:$4 sm:$0xff]  }
   0x5   :  { %v4476_v13 = vld [vmem:[%s8510_s2 + $0x48] ss:$16 sps:$4 sm:$0xff]   ;;  %v4480_v14 = vld [vmem:[%s8510_s2 + $0x6c] ss:$16 sps:$4 sm:$0xff]   ;;  %v4479_v15 = vld [vmem:[%s8510_s2 + $0x60] ss:$16 sps:$4 sm:$0xff]  }
   0x6   :  { %v4483_v16 = vld [vmem:[%s8510_s2 + $0x84] ss:$16 sps:$4 sm:$0xff]   ;;  %v4482_v17 = vld [vmem:[%s8510_s2 + $0x68] ss:$16 sps:$4 sm:$0xff]   ;;  %v4486_v18 = vld [vmem:[%s8510_s2 + $0x8c] ss:$16 sps:$4 sm:$0xff]  }
   0x7   :  { %378 = vmatpush1.bf16.msra.mxu0 %v4467_v6  ;;  %571 = vmatpush1.bf16.msra.mxu1 %v4470_v8  ;;  %v4485_v19 = vld [vmem:[%s8510_s2 + $0x80] ss:$16 sps:$4 sm:$0xff]   ;;  %v4489_v20 = vld [vmem:[%s8510_s2 + $0xa4] ss:$16 sps:$4 sm:$0xff]   ;;  %v4488_v21 = vld [vmem:[%s8510_s2 + $0x88] ss:$16 sps:$4 sm:$0xff]  }
   0x8   :  { %379 = vmatprep.subr.bf16.mxu0 %v4471_v9  ;;  %572 = vmatprep.subr.bf16.mxu1 %v4474_v11  ;;  %v4492_v22 = vld [vmem:[%s8510_s2 + $0xac] ss:$16 sps:$4 sm:$0xff]   ;;  %v4491_v23 = vld [vmem:[%s8510_s2 + $0xa0] ss:$16 sps:$4 sm:$0xff]   ;;  %v4495_v24 = vld [vmem:[%s8510_s2 + $0xc4] ss:$16 sps:$4 sm:$0xff]  }
   0x9   :  { %v4494_v25 = vld [vmem:[%s8510_s2 + $0xa8] ss:$16 sps:$4 sm:$0xff]   ;;  %v4498_v26 = vld [vmem:[%s8510_s2 + $0xcc] ss:$16 sps:$4 sm:$0xff]   ;;  %v4497_v27 = vld [vmem:[%s8510_s2 + $0xc0] ss:$16 sps:$4 sm:$0xff]  }
   0xa   :  { %v4501_v28 = vld [vmem:[%s8510_s2 + $0xe4] ss:$16 sps:$4 sm:$0xff]   ;;  %v4500_v29 = vld [vmem:[%s8510_s2 + $0xc8] ss:$16 sps:$4 sm:$0xff]   ;;  %v4504_v30 = vld [vmem:[%s8510_s2 + $0xec] ss:$16 sps:$4 sm:$0xff]  }
   0xb   :  { %380 = vmatpush1.bf16.msra.mxu0 %v4473_v10  ;;  %573 = vmatpush1.bf16.msra.mxu1 %v4476_v13  ;;  %v4503_v31 = vld [vmem:[%s8510_s2 + $0xe0] ss:$16 sps:$4 sm:$0xff]   ;;  %v4506_v32 = vld [vmem:[%s8510_s2 + $0xe8] ss:$16 sps:$4 sm:$0xff]   ;;  %v4779_v50 = vshrl.u32 %v8537_v49, 7  ;;  %vm1180_vm2 = vcmask 1042434  }
   0xc   :  { %381 = vmatprep.subr.bf16.mxu0 %v4477_v12  ;;  %574 = vmatprep.subr.bf16.mxu1 %v4480_v14  ;;  %v4507_v33 = vld [vmem:[%s8511_s1] sm:$0xff]   ;;  %v4508_v34 = vld [vmem:[%s8511_s1 + $0x8] sm:$0xff]   ;;  %v4509_v35 = vld [vmem:[%s8511_s1 + $0x10] sm:$0xff]   ;;  %vm1182_vm3 = vcmask 1043459   ;;  %vm1184_vm4 = vcmask 1044484   ;;  %vm1186_vm5 = vcmask 1045509  }
   0xd   :  { %v4510_v36 = vld [vmem:[%s8511_s1 + $0x18] sm:$0xff]   ;;  %v4511_v37 = vld [vmem:[%s8511_s1 + $0x20] sm:$0xff]   ;;  %v4512_v38 = vld [vmem:[%s8511_s1 + $0x28] sm:$0xff]   ;;  %v4782_v51 = vsub.s32 0, %v4779_v50  ;;  %v4788_v53 = vsub.s32 2, %v4779_v50  ;;  %v4791_v54 = vsub.s32 1, %v4779_v50 }
   0xe   :  { %v4513_v39 = vld [vmem:[%s8511_s1 + $0x30] sm:$0xff]   ;;  %v4514_v40 = vld [vmem:[%s8511_s1 + $0x38] sm:$0xff]   ;;  %v4515_v41 = vld [vmem:[%s8511_s1 + $0x40] sm:$0xff]   ;;  %v4800_v57 = vsub.s32 3, %v4779_v50  ;;  %vm1188_vm6 = vcmask 1046534   ;;  %vm1190_vm7 = vcmask 1047559  }
   0xf   :  { %382 = vmatpush1.bf16.msra.mxu0 %v4479_v15  ;;  %575 = vmatpush1.bf16.msra.mxu1 %v4482_v17  ;;  %v4516_v42 = vld [vmem:[%s8511_s1 + $0x48] sm:$0xff]   ;;  %v4517_v43 = vld [vmem:[%s8511_s1 + $0x50] sm:$0xff]   ;;  %v4518_v44 = vld [vmem:[%s8511_s1 + $0x58] sm:$0xff]   ;;  %8705 = vst [vmem:[#allocation5_spill] sm:$0xff] %v4782_v51  ;;  %vm1203_vm9 = vcmask 130048   ;;  %vm3986_vm11 = vcmask 31744  }
  0x10   :  { %383 = vmatprep.subr.bf16.mxu0 %v4483_v16  ;;  %576 = vmatprep.subr.bf16.mxu1 %v4486_v18  ;;  %v4519_v45 = vld [vmem:[%s8511_s1 + $0x60] sm:$0xff]   ;;  %v4520_v46 = vld [vmem:[%s8511_s1 + $0x68] sm:$0xff]   ;;  %v4521_v47 = vld [vmem:[%s8511_s1 + $0x70] sm:$0xff]   ;;  %8706 = vst [vmem:[#allocation6_spill] sm:$0xff] %v4788_v53 }
  0x11   :  { %v4522_v48 = vld [vmem:[%s8511_s1 + $0x78] sm:$0xff]   ;;  %v97_v52 = vld [vmem:[%s8512_s3] sm:$0xf]  ;;  %8707 = vst [vmem:[#allocation7_spill] sm:$0xff] %v4791_v54  ;;  %8708 = vst [vmem:[#allocation8_spill] sm:$0xff] %v4800_v57 }
  0x12   :  { %v4794_v55 = vrot.slane %v97_v52, %v4782_v51  ;;  %v4797_v56 = vrot.slane %v97_v52, %v4788_v53  ;;  %v4803_v59 = vrot.slane %v97_v52, %v4791_v54  ;;  %v4811_v0 = vld [vmem:[%s8513_s4] ss:$0 sm:$0xff]  ;;  %v4821_v4 = vrot.slane %v97_v52, %v4800_v57  ;;  %v4829_v9 = vld [vmem:[%s8513_s4 + $0x2] ss:$0 sm:$0xff] }
  0x13   :  { %384 = vmatpush1.bf16.msra.mxu0 %v4485_v19  ;;  %577 = vmatpush1.bf16.msra.mxu1 %v4488_v21 }
  0x14   :  { %385 = vmatprep.subr.bf16.mxu0 %v4489_v20  ;;  %578 = vmatprep.subr.bf16.mxu1 %v4492_v22 }
  0x17   :  { %386 = vmatpush1.bf16.msra.mxu0 %v4491_v23  ;;  %579 = vmatpush1.bf16.msra.mxu1 %v4494_v25  ;;  %v4859_v25 = vld [vmem:[%s8513_s4 + $0x1] ss:$0 sm:$0xff] }
  0x18   :  { %387 = vmatprep.subr.bf16.mxu0 %v4495_v24  ;;  %580 = vmatprep.subr.bf16.mxu1 %v4498_v26 }
  0x1b   :  { %388 = vmatpush1.bf16.msra.mxu0 %v4497_v27  ;;  %581 = vmatpush1.bf16.msra.mxu1 %v4500_v29 }
  0x1c   :  { %389 = vmatprep.subr.bf16.mxu0 %v4501_v28  ;;  %582 = vmatprep.subr.bf16.mxu1 %v4504_v30 }
  0x1f   :  { %390 = vmatpush1.bf16.msra.mxu0 %v4503_v31  ;;  %583 = vmatpush1.bf16.msra.mxu1 %v4506_v32  ;;  %v4868_v31 = vld [vmem:[%s8513_s4 + $0x3] ss:$0 sm:$0xff] }
  0x22   :  { %408 = vmatmul.mubr.bf16.vlgmr.msra.gmra.mrb[0].mxu0 %v4507_v33  ;;  %601 = vmatmul.mubr.bf16.vlgmr.msra.gmra.mrb[0].mxu1 %v4507_v33 }
  0x23   :  { %417 = vmatprep.mubr.bf16.mxu0 %v4551_v1  ;;  %610 = vmatprep.mubr.bf16.mxu1 %v4551_v1 }
  0x2a   :  { %418 = vmatmul.mubr.bf16.gmra.mrb[4].mxu0 %v4508_v34  ;;  %611 = vmatmul.mubr.bf16.gmra.mrb[4].mxu1 %v4508_v34 }
  0x2b   :  { %427 = vmatprep.mubr.bf16.mxu0 %v4551_v1  ;;  %620 = vmatprep.mubr.bf16.mxu1 %v4551_v1 }
  0x32   :  { %428 = vmatmul.mubr.bf16.gmra.mrb[8].mxu0 %v4509_v35  ;;  %621 = vmatmul.mubr.bf16.gmra.mrb[8].mxu1 %v4509_v35 }
  0x33   :  { %437 = vmatprep.mubr.bf16.mxu0 %v4551_v1  ;;  %630 = vmatprep.mubr.bf16.mxu1 %v4551_v1 }
  0x3a   :  { %438 = vmatmul.mubr.bf16.gmra.mrb[12].mxu0 %v4510_v36  ;;  %631 = vmatmul.mubr.bf16.gmra.mrb[12].mxu1 %v4510_v36 }
  0x3b   :  { %447 = vmatprep.mubr.bf16.mxu0 %v4551_v1  ;;  %640 = vmatprep.mubr.bf16.mxu1 %v4551_v1 }
  0x42   :  { %448 = vmatmul.mubr.bf16.gmra.mrb[16].mxu0 %v4511_v37  ;;  %641 = vmatmul.mubr.bf16.gmra.mrb[16].mxu1 %v4511_v37 }
  0x43   :  { %457 = vmatprep.mubr.bf16.mxu0 %v4551_v1  ;;  %650 = vmatprep.mubr.bf16.mxu1 %v4551_v1 }
  0x4a   :  { %458 = vmatmul.mubr.bf16.gmra.mrb[20].mxu0 %v4512_v38  ;;  %651 = vmatmul.mubr.bf16.gmra.mrb[20].mxu1 %v4512_v38 }
  0x4b   :  { %467 = vmatprep.mubr.bf16.mxu0 %v4551_v1  ;;  %660 = vmatprep.mubr.bf16.mxu1 %v4551_v1 }
  0x52   :  { %468 = vmatmul.mubr.bf16.gmra.mrb[24].mxu0 %v4513_v39  ;;  %661 = vmatmul.mubr.bf16.gmra.mrb[24].mxu1 %v4513_v39 }
  0x53   :  { %477 = vmatprep.mubr.bf16.mxu0 %v4551_v1  ;;  %670 = vmatprep.mubr.bf16.mxu1 %v4551_v1 }
  0x5a   :  { %478 = vmatmul.mubr.bf16.gmra.mrb[28].mxu0 %v4514_v40  ;;  %671 = vmatmul.mubr.bf16.gmra.mrb[28].mxu1 %v4514_v40 }
  0x5b   :  { %487 = vmatprep.mubr.bf16.mxu0 %v4551_v1  ;;  %680 = vmatprep.mubr.bf16.mxu1 %v4551_v1 }
  0x62   :  { %488 = vmatmul.mubr.bf16.gmra.mrb[32].mxu0 %v4515_v41  ;;  %681 = vmatmul.mubr.bf16.gmra.mrb[32].mxu1 %v4515_v41 }
  0x63   :  { %497 = vmatprep.mubr.bf16.mxu0 %v4551_v1  ;;  %690 = vmatprep.mubr.bf16.mxu1 %v4551_v1 }
  0x6a   :  { %498 = vmatmul.mubr.bf16.gmra.mrb[36].mxu0 %v4516_v42  ;;  %691 = vmatmul.mubr.bf16.gmra.mrb[36].mxu1 %v4516_v42 }
  0x6b   :  { %507 = vmatprep.mubr.bf16.mxu0 %v4551_v1  ;;  %700 = vmatprep.mubr.bf16.mxu1 %v4551_v1 }
  0x72   :  { %508 = vmatmul.mubr.bf16.gmra.mrb[40].mxu0 %v4517_v43  ;;  %701 = vmatmul.mubr.bf16.gmra.mrb[40].mxu1 %v4517_v43 }
  0x73   :  { %517 = vmatprep.mubr.bf16.mxu0 %v4551_v1  ;;  %710 = vmatprep.mubr.bf16.mxu1 %v4551_v1 }
  0x7a   :  { %518 = vmatmul.mubr.bf16.gmra.mrb[44].mxu0 %v4518_v44  ;;  %711 = vmatmul.mubr.bf16.gmra.mrb[44].mxu1 %v4518_v44 }
  0x7b   :  { %527 = vmatprep.mubr.bf16.mxu0 %v4551_v1  ;;  %720 = vmatprep.mubr.bf16.mxu1 %v4551_v1 }
  0x82   :  { %528 = vmatmul.mubr.bf16.gmra.mrb[48].mxu0 %v4519_v45  ;;  %721 = vmatmul.mubr.bf16.gmra.mrb[48].mxu1 %v4519_v45 }
  0x83   :  { %537 = vmatprep.mubr.bf16.mxu0 %v4551_v1  ;;  %730 = vmatprep.mubr.bf16.mxu1 %v4551_v1 }
  0x8a   :  { %538 = vmatmul.mubr.bf16.gmra.mrb[52].mxu0 %v4520_v46  ;;  %731 = vmatmul.mubr.bf16.gmra.mrb[52].mxu1 %v4520_v46 }
  0x8b   :  { %547 = vmatprep.mubr.bf16.mxu0 %v4551_v1  ;;  %740 = vmatprep.mubr.bf16.mxu1 %v4551_v1 }
  0x92   :  { %548 = vmatmul.mubr.bf16.gmra.mrb[56].mxu0 %v4521_v47  ;;  %741 = vmatmul.mubr.bf16.gmra.mrb[56].mxu1 %v4521_v47 }
  0x93   :  { %557 = vmatprep.mubr.bf16.mxu0 %v4551_v1  ;;  %750 = vmatprep.mubr.bf16.mxu1 %v4551_v1 }
  0x9a   :  { %558 = vmatmul.mubr.bf16.gmra.mrb[60].mxu0 %v4522_v48  ;;  %751 = vmatmul.mubr.bf16.gmra.mrb[60].mxu1 %v4522_v48 }
  0xf5   :  { %v409_v58 = vpop.f32.mrb[0].mxu0  ;;  %v602_v62 = vpop.f32.mrb[0].mxu1 }
  0xf6   :  { %v4806_v60 = vadd.f32 %v409_v58, %v4794_v55  ;;  %v411_v61 = vpop.f32.mrb[1].mxu0  ;;  %v4815_v2 = vadd.f32 %v602_v62, %v4797_v56  ;;  %v604_v5 = vpop.f32.mrb[1].mxu1 }
  0xf7   :  { %v413_v63 = vpop.f32.mrb[2].mxu0  ;;  %v4824_v7 = vadd.f32 %v411_v61, %v4803_v59  ;;  %v606_v8 = vpop.f32.mrb[2].mxu1  ;;  %v4851_v21 = vadd.f32 %v604_v5, %v4821_v4 }
  0xf8   :  { %8709 = vst [vmem:[#allocation9_spill] sm:$0xff] %v4806_v60  ;;  %v8523_v1 = vmax.f32 %v4806_v60, 0.0  ;;  %8710 = vst [vmem:[#allocation10_spill] sm:$0xff] %v4815_v2  ;;  %v4818_v3 = vadd.f32 %v413_v63, %v4794_v55  ;;  %v415_v6 = vpop.f32.mrb[3].mxu0  ;;  %v8532_v10 = vmax.f32 %v4815_v2, 0.0  ;;  %v4834_v12 = vadd.f32 %v606_v8, %v4797_v56  ;;  %v608_v13 = vpop.f32.mrb[3].mxu1 }
  0xf9   :  { %8712 = vst [vmem:[#allocation12_spill] sm:$0xff] %v4824_v7  ;;  %v4841_v16 = vadd.f32 %v608_v13, %v4821_v4  ;;  %v8525_v20 = vmax.f32 %v4824_v7, 0.0  ;;  %8715 = vst [vmem:[#allocation15_spill] sm:$0xff] %v4851_v21  ;;  %v8521_v33 = vmax.f32 %v4851_v21, 0.0  ;;  %v4872_v34 = vadd.f32 %v415_v6, %v4803_v59 }
  0xfa   :  { %8711 = vst [vmem:[#allocation11_spill] sm:$0xff] %v4818_v3  ;;  %v8535_v11 = vmax.f32 %v4818_v3, 0.0  ;;  %8713 = vst [vmem:[#allocation13_spill] sm:$0xff] %v4834_v12  ;;  %v902_v14 = vmul.f32 %v4811_v0, %v8523_v1  ;;  %v8529_v15 = vmax.f32 %v4834_v12, 0.0  ;;  %v2042_v18 = vmul.f32 %v4829_v9, %v8532_v10 }
  0xfb   :  { %8714 = vst [vmem:[#allocation14_spill] sm:$0xff] %v4841_v16  ;;  %v8520_v27 = vmax.f32 %v4841_v16, 0.0  ;;  %8717 = vst [vmem:[#allocation17_spill] sm:$0xff] %v4872_v34  ;;  %v1478_v36 = vmul.f32 %v4859_v25, %v8525_v20  ;;  %v8522_v41 = vmax.f32 %v4872_v34, 0.0  ;;  %v2606_v43 = vmul.f32 %v4868_v31, %v8521_v33 }
  0xfc   :  { %934 = vadd.xlane.f32.xlu0 %v902_v14  ;;  %v903_v17 = vmul.f32 %v4811_v0, %v8535_v11  ;;  %v2043_v29 = vmul.f32 %v4829_v9, %v8529_v15 }
  0xfd   :  { %v419_v19 = vpop.f32.mrb[4].mxu0  ;;  %v612_v26 = vpop.f32.mrb[4].mxu1  ;;  %v2607_v39 = vmul.f32 %v4868_v31, %v8520_v27  ;;  %v1479_v6 = vmul.f32 %v4859_v25, %v8522_v41 }
  0xfe   :  { %936 = vadd.xlane.f32.xlu1 %v903_v17  ;;  %v421_v22 = vpop.f32.mrb[5].mxu0  ;;  %v614_v30 = vpop.f32.mrb[5].mxu1  ;;  %v4886_v42 = vadd.f32 %v419_v19, %v4794_v55  ;;  %v4900_v5 = vadd.f32 %v612_v26, %v4797_v56 }
  0xff   :  { %v4854_v23 = vadd.f32 %v421_v22, %v4803_v59  ;;  %v423_v24 = vpop.f32.mrb[6].mxu0  ;;  %v616_v32 = vpop.f32.mrb[6].mxu1  ;;  %v4914_v22 = vadd.f32 %v614_v30, %v4821_v4 }
 0x100   :  { %2074 = vadd.xlane.f32.xlu0 %v2042_v18  ;;  %v425_v28 = vpop.f32.mrb[7].mxu0  ;;  %v618_v37 = vpop.f32.mrb[7].mxu1  ;;  %v4879_v38 = vadd.f32 %v423_v24, %v4794_v55  ;;  %8719 = vst [vmem:[#allocation19_spill] sm:$0xff] %v4886_v42  ;;  %v4896_v52 = vadd.f32 %v616_v32, %v4797_v56  ;;  %v8526_v63 = vmax.f32 %v4886_v42, 0.0  ;;  %8721 = vst [vmem:[#allocation21_spill] sm:$0xff] %v4900_v5  ;;  %v8533_v19 = vmax.f32 %v4900_v5, 0.0 }
 0x101   :  { %8716 = vst [vmem:[#allocation16_spill] sm:$0xff] %v4854_v23  ;;  %v8524_v35 = vmax.f32 %v4854_v23, 0.0  ;;  %v4906_v13 = vadd.f32 %v425_v28, %v4803_v59  ;;  %8723 = vst [vmem:[#allocation23_spill] sm:$0xff] %v4914_v22  ;;  %v4922_v28 = vadd.f32 %v618_v37, %v4821_v4 }
 0x102   :  { %2076 = vadd.xlane.f32.xlu1 %v2043_v29  ;;  %8718 = vst [vmem:[#allocation18_spill] sm:$0xff] %v4879_v38  ;;  %v8536_v48 = vmax.f32 %v4879_v38, 0.0  ;;  %8720 = vst [vmem:[#allocation20_spill] sm:$0xff] %v4896_v52  ;;  %v8530_v14 = vmax.f32 %v4896_v52, 0.0  ;;  %v904_v24 = vmul.f32 %v4811_v0, %v8526_v63 }
 0x103   :  { %v1480_v44 = vmul.f32 %v4859_v25, %v8524_v35  ;;  %8722 = vst [vmem:[#allocation22_spill] sm:$0xff] %v4906_v13  ;;  %8724 = vst [vmem:[#allocation24_spill] sm:$0xff] %v4922_v28 }
 0x104   :  { %1510 = vadd.xlane.f32.xlu0 %v1478_v36  ;;  %v905_v17 = vmul.f32 %v4811_v0, %v8536_v48  ;;  %v8527_v36 = vmax.f32 %v4906_v13, 0.0 }
 0x105   :  { %v429_v40 = vpop.f32.mrb[8].mxu0  ;;  %v622_v47 = vpop.f32.mrb[8].mxu1 }
 0x106   :  { %2640 = vadd.xlane.f32.xlu1 %v2607_v39  ;;  %v431_v45 = vpop.f32.mrb[9].mxu0  ;;  %v624_v61 = vpop.f32.mrb[9].mxu1  ;;  %v4930_v30 = vadd.f32 %v429_v40, %v4794_v55  ;;  %v2045_v39 = vmul.f32 %v4829_v9, %v8530_v14  ;;  %v8531_v40 = vmax.f32 %v4922_v28, 0.0  ;;  %v4953_v41 = vadd.f32 %v622_v47, %v4797_v56 }
 0x107   :  { %v433_v46 = vpop.f32.mrb[10].mxu0  ;;  %v626_v62 = vpop.f32.mrb[10].mxu1  ;;  %v4987_v10 = vadd.f32 %v431_v45, %v4803_v59 }
 0x108   :  { %2638 = vadd.xlane.f32.xlu0 %v2606_v43  ;;  %v435_v58 = vpop.f32.mrb[11].mxu0  ;;  %v628_v8 = vpop.f32.mrb[11].mxu1  ;;  %8725 = vst [vmem:[#allocation25_spill] sm:$0xff] %v4930_v30  ;;  %v8534_v27 = vmax.f32 %v4930_v30, 0.0  ;;  %v4950_v33 = vadd.f32 %v433_v46, %v4794_v55  ;;  %8727 = vst [vmem:[#allocation27_spill] sm:$0xff] %v4953_v41  ;;  %v2609_v46 = vmul.f32 %v4868_v31, %v8531_v40 }
 0x109   :  { %8729 = vst [vmem:[#allocation29_spill] sm:$0xff] %v4987_v10 }
 0x10a   :  { %1514 = vadd.xlane.f32.xlu1 %v1480_v44  ;;  %8726 = vst [vmem:[#allocation26_spill] sm:$0xff] %v4950_v33  ;;  %v8538_v63 = vmax.f32 %v4950_v33, 0.0 }
 0x10c   :  { %1512 = vadd.xlane.f32.xlu0 %v1479_v6  ;;  %v8528_v6 = vmax.f32 %v4914_v22, 0.0  ;;  %v8735_v22 = vmax.f32 %v4987_v10, 0.0 }
 0x10d   :  { %v439_v18 = vpop.f32.mrb[12].mxu0  ;;  %v4926_v32 = vpop.f32.mrb[12].mxu1 }
 0x10e   :  { %940 = vadd.xlane.f32.xlu1 %v905_v17  ;;  %v4919_v26 = vpop.f32.mrb[13].mxu0  ;;  %v4937_v44 = vpop.f32.mrb[13].mxu1  ;;  %v2044_v17 = vmul.f32 %v4829_v9, %v8533_v19  ;;  %v2608_v35 = vmul.f32 %v4868_v31, %v8528_v6  ;;  %v906_v6 = vmul.f32 %v4811_v0, %v8534_v27  ;;  %v907_v27 = vmul.f32 %v4811_v0, %v8538_v63 }
 0x10f   :  { %v4924_v29 = vpop.f32.mrb[14].mxu0  ;;  %v4939_v37 = vpop.f32.mrb[14].mxu1  ;;  %v5043_v13 = vadd.f32 %v4926_v32, %v4797_v56  ;;  %v5099_v7 = vadd.f32 %v4937_v44, %v4821_v4 }
 0x110   :  { %938 = vadd.xlane.f32.xlu0 %v904_v24  ;;  %v4935_v43 = vpop.f32.mrb[15].mxu0  ;;  %v4945_v24 = vpop.f32.mrb[15].mxu1 }
 0x111   :  { %8737 = vst [vmem:[#allocation35_spill] sm:$0xff] %v5043_v13  ;;  %v8746_v60 = vmax.f32 %v5043_v13, 0.0  ;;  %8747 = vst [vmem:[#allocation39_spill] sm:$0xff] %v5099_v7 }
 0x112   :  { %2080 = vadd.xlane.f32.xlu1 %v2045_v39  ;;  %v1481_v39 = vmul.f32 %v4859_v25, %v8527_v36  ;;  %v8539_v36 = vmax.f32 %v4953_v41, 0.0 }
 0x113   :  { %v2048_v23 = vmul.f32 %v4829_v9, %v8746_v60 }
 0x114   :  { %2078 = vadd.xlane.f32.xlu0 %v2044_v17  ;;  %v2046_v11 = vmul.f32 %v4829_v9, %v8539_v36  ;;  %v5018_v36 = vadd.f32 %v439_v18, %v4794_v55 }
 0x115   :  { %v4958_v1 = vpop.f32.mrb[16].mxu0  ;;  %v4970_v47 = vpop.f32.mrb[16].mxu1 }
 0x116   :  { %1516 = vadd.xlane.f32.xlu1 %v1481_v39  ;;  %v4963_v20 = vpop.f32.mrb[17].mxu0  ;;  %v4975_v39 = vadd.f32 %v626_v62, %v4797_v56  ;;  %v4982_v14 = vpop.f32.mrb[17].mxu1  ;;  %v4992_v62 = vadd.f32 %v435_v58, %v4803_v59  ;;  %8733 = vst [vmem:[#allocation33_spill] sm:$0xff] %v5018_v36  ;;  %v5139_v52 = vadd.f32 %v4970_v47, %v4797_v56 }
 0x117   :  { %v4968_v17 = vpop.f32.mrb[18].mxu0  ;;  %v4984_v40 = vpop.f32.mrb[18].mxu1  ;;  %v5195_v33 = vadd.f32 %v4982_v14, %v4821_v4 }
 0x118   :  { %8728 = vst [vmem:[#allocation28_spill] sm:$0xff] %v4975_v39  ;;  %2642 = vadd.xlane.f32.xlu0 %v2608_v35  ;;  %v4980_v15 = vpop.f32.mrb[19].mxu0  ;;  %v4989_v19 = vpop.f32.mrb[19].mxu1  ;;  %8730 = vst [vmem:[#allocation30_spill] sm:$0xff] %v4992_v62  ;;  %v8734_v45 = vmax.f32 %v4975_v39, 0.0  ;;  %v8762_v5 = vmax.f32 %v5139_v52, 0.0 }
 0x119   :  { %8753 = vst [vmem:[#allocation43_spill] sm:$0xff] %v5139_v52  ;;  %8763 = vst [vmem:[#allocation47_spill] sm:$0xff] %v5195_v33 }
 0x11a   :  { %2644 = vadd.xlane.f32.xlu1 %v2609_v46  ;;  %v5005_v46 = vadd.f32 %v624_v61, %v4821_v4  ;;  %v2047_v61 = vmul.f32 %v4829_v9, %v8734_v45  ;;  %v5039_v45 = vadd.f32 %v4924_v29, %v4794_v55 }
 0x11c   :  { %942 = vadd.xlane.f32.xlu0 %v906_v6  ;;  %8731 = vst [vmem:[#allocation31_spill] sm:$0xff] %v5005_v46  ;;  %v5010_v6 = vadd.f32 %v628_v8, %v4821_v4  ;;  %8736 = vst [vmem:[#allocation34_spill] sm:$0xff] %v5039_v45  ;;  %v8739_v18 = vmax.f32 %v5005_v46, 0.0 }
 0x11d   :  { %v5001_v48 = vpop.f32.mrb[20].mxu0  ;;  %v5014_v63 = vpop.f32.mrb[20].mxu1 }
 0x11e   :  { %944 = vadd.xlane.f32.xlu1 %v907_v27  ;;  %v5007_v58 = vpop.f32.mrb[21].mxu0  ;;  %8732 = vst [vmem:[#allocation32_spill] sm:$0xff] %v5010_v6  ;;  %v5025_v28 = vpop.f32.mrb[21].mxu1  ;;  %v2610_v21 = vmul.f32 %v4868_v31, %v8739_v18  ;;  %v8740_v29 = vmax.f32 %v5010_v6, 0.0  ;;  %v8742_v18 = vmax.f32 %v5018_v36, 0.0  ;;  %v5235_v57 = vadd.f32 %v5014_v63, %v4797_v56 }
 0x11f   :  { %v5012_v49 = vpop.f32.mrb[22].mxu0  ;;  %v5027_v8 = vpop.f32.mrb[22].mxu1 }
 0x120   :  { %2082 = vadd.xlane.f32.xlu0 %v2046_v11  ;;  %v5023_v27 = vpop.f32.mrb[23].mxu0  ;;  %v1482_v11 = vmul.f32 %v4859_v25, %v8735_v22  ;;  %v5033_v35 = vpop.f32.mrb[23].mxu1  ;;  %v908_v46 = vmul.f32 %v4811_v0, %v8742_v18  ;;  %v8745_v18 = vmax.f32 %v5039_v45, 0.0  ;;  %v2050_v45 = vmul.f32 %v4829_v9, %v8762_v5  ;;  %8769 = vst [vmem:[#allocation51_spill] sm:$0xff] %v5235_v57 }
 0x121   :  { %v8780_v51 = vmax.f32 %v5235_v57, 0.0 }
 0x122   :  { %2084 = vadd.xlane.f32.xlu1 %v2047_v61  ;;  %v8738_v61 = vmax.f32 %v4992_v62, 0.0  ;;  %v5079_v62 = vadd.f32 %v4919_v26, %v4803_v59  ;;  %v909_v36 = vmul.f32 %v4811_v0, %v8745_v18 }
 0x124   :  { %1518 = vadd.xlane.f32.xlu0 %v1482_v11  ;;  %v1483_v16 = vmul.f32 %v4859_v25, %v8738_v61  ;;  %v2611_v11 = vmul.f32 %v4868_v31, %v8740_v29  ;;  %8743 = vst [vmem:[#allocation37_spill] sm:$0xff] %v5079_v62  ;;  %v8751_v60 = vmax.f32 %v5079_v62, 0.0 }
 0x125   :  { %v5048_v22 = vpop.f32.mrb[24].mxu0  ;;  %v5060_v32 = vpop.f32.mrb[24].mxu1 }
 0x126   :  { %1520 = vadd.xlane.f32.xlu1 %v1483_v16  ;;  %v5053_v34 = vpop.f32.mrb[25].mxu0  ;;  %v5066_v16 = vadd.f32 %v4939_v37, %v4797_v56  ;;  %v5073_v29 = vpop.f32.mrb[25].mxu1 }
 0x127   :  { %v5058_v10 = vpop.f32.mrb[26].mxu0  ;;  %v5075_v30 = vpop.f32.mrb[26].mxu1 }
 0x128   :  { %8741 = vst [vmem:[#allocation36_spill] sm:$0xff] %v5066_v16  ;;  %2646 = vadd.xlane.f32.xlu0 %v2610_v21  ;;  %v5071_v6 = vpop.f32.mrb[27].mxu0  ;;  %v5081_v61 = vpop.f32.mrb[27].mxu1  ;;  %v5085_v21 = vadd.f32 %v4935_v43, %v4803_v59  ;;  %v8750_v44 = vmax.f32 %v5066_v16, 0.0 }
 0x12a   :  { %2648 = vadd.xlane.f32.xlu1 %v2611_v11  ;;  %8744 = vst [vmem:[#allocation38_spill] sm:$0xff] %v5085_v21  ;;  %v5114_v11 = vadd.f32 %v4958_v1, %v4794_v55  ;;  %v8755_v1 = vmax.f32 %v5099_v7, 0.0 }
 0x12c   :  { %946 = vadd.xlane.f32.xlu0 %v908_v46  ;;  %v5105_v46 = vadd.f32 %v4945_v24, %v4821_v4  ;;  %8749 = vst [vmem:[#allocation41_spill] sm:$0xff] %v5114_v11  ;;  %v2612_v16 = vmul.f32 %v4868_v31, %v8755_v1  ;;  %v8758_v1 = vmax.f32 %v5114_v11, 0.0 }
 0x12d   :  { %v5094_v26 = vpop.f32.mrb[28].mxu0  ;;  %v5109_v37 = vpop.f32.mrb[28].mxu1 }
 0x12e   :  { %948 = vadd.xlane.f32.xlu1 %v909_v36  ;;  %v5101_v43 = vpop.f32.mrb[29].mxu0  ;;  %8748 = vst [vmem:[#allocation40_spill] sm:$0xff] %v5105_v46  ;;  %v2049_v36 = vmul.f32 %v4829_v9, %v8750_v44  ;;  %v5121_v13 = vpop.f32.mrb[29].mxu1  ;;  %v5135_v44 = vadd.f32 %v4968_v17, %v4794_v55  ;;  %v8756_v17 = vmax.f32 %v5105_v46, 0.0  ;;  %v910_v7 = vmul.f32 %v4811_v0, %v8758_v1 }
 0x12f   :  { %v5107_v18 = vpop.f32.mrb[30].mxu0  ;;  %v5123_v24 = vpop.f32.mrb[30].mxu1 }
 0x130   :  { %2086 = vadd.xlane.f32.xlu0 %v2048_v23  ;;  %v5119_v42 = vpop.f32.mrb[31].mxu0  ;;  %v1484_v23 = vmul.f32 %v4859_v25, %v8751_v60  ;;  %v5129_v12 = vpop.f32.mrb[31].mxu1  ;;  %8752 = vst [vmem:[#allocation42_spill] sm:$0xff] %v5135_v44  ;;  %v8761_v1 = vmax.f32 %v5135_v44, 0.0 }
 0x132   :  { %2088 = vadd.xlane.f32.xlu1 %v2049_v36  ;;  %v8754_v36 = vmax.f32 %v5085_v21, 0.0  ;;  %v5175_v21 = vadd.f32 %v4963_v20, %v4803_v59  ;;  %v911_v11 = vmul.f32 %v4811_v0, %v8761_v1 }
 0x134   :  { %1522 = vadd.xlane.f32.xlu0 %v1484_v23  ;;  %v1485_v39 = vmul.f32 %v4859_v25, %v8754_v36  ;;  %v2613_v23 = vmul.f32 %v4868_v31, %v8756_v17  ;;  %8759 = vst [vmem:[#allocation45_spill] sm:$0xff] %v5175_v21  ;;  %v8767_v5 = vmax.f32 %v5175_v21, 0.0 }
 0x135   :  { %v5144_v60 = vpop.f32.mrb[32].mxu0  ;;  %v5156_v47 = vpop.f32.mrb[32].mxu1 }
 0x136   :  { %1524 = vadd.xlane.f32.xlu1 %v1485_v39  ;;  %v5149_v62 = vpop.f32.mrb[33].mxu0  ;;  %v5162_v39 = vadd.f32 %v4984_v40, %v4797_v56  ;;  %v5169_v17 = vpop.f32.mrb[33].mxu1  ;;  %v5181_v40 = vadd.f32 %v4980_v15, %v4803_v59 }
 0x137   :  { %v5154_v41 = vpop.f32.mrb[34].mxu0  ;;  %v5171_v2 = vpop.f32.mrb[34].mxu1 }
 0x138   :  { %8757 = vst [vmem:[#allocation44_spill] sm:$0xff] %v5162_v39  ;;  %2650 = vadd.xlane.f32.xlu0 %v2612_v16  ;;  %v5167_v46 = vpop.f32.mrb[35].mxu0  ;;  %v5177_v36 = vpop.f32.mrb[35].mxu1  ;;  %8760 = vst [vmem:[#allocation46_spill] sm:$0xff] %v5181_v40  ;;  %v8766_v14 = vmax.f32 %v5162_v39, 0.0 }
 0x13a   :  { %2652 = vadd.xlane.f32.xlu1 %v2613_v23  ;;  %v5210_v23 = vadd.f32 %v5001_v48, %v4794_v55  ;;  %v8771_v48 = vmax.f32 %v5195_v33, 0.0 }
 0x13c   :  { %950 = vadd.xlane.f32.xlu0 %v910_v7  ;;  %v5201_v7 = vadd.f32 %v4989_v19, %v4821_v4  ;;  %8765 = vst [vmem:[#allocation49_spill] sm:$0xff] %v5210_v23  ;;  %v2614_v39 = vmul.f32 %v4868_v31, %v8771_v48  ;;  %v8774_v48 = vmax.f32 %v5210_v23, 0.0 }
 0x13d   :  { %v5190_v20 = vpop.f32.mrb[36].mxu0  ;;  %v5205_v16 = vpop.f32.mrb[36].mxu1 }
 0x13e   :  { %952 = vadd.xlane.f32.xlu1 %v911_v11  ;;  %v5197_v15 = vpop.f32.mrb[37].mxu0  ;;  %8764 = vst [vmem:[#allocation48_spill] sm:$0xff] %v5201_v7  ;;  %v2051_v11 = vmul.f32 %v4829_v9, %v8766_v14  ;;  %v5217_v44 = vpop.f32.mrb[37].mxu1  ;;  %v5231_v14 = vadd.f32 %v5012_v49, %v4794_v55  ;;  %v8772_v49 = vmax.f32 %v5201_v7, 0.0  ;;  %v912_v33 = vmul.f32 %v4811_v0, %v8774_v48 }
 0x13f   :  { %v5203_v1 = vpop.f32.mrb[38].mxu0  ;;  %v5219_v19 = vpop.f32.mrb[38].mxu1 }
 0x140   :  { %2090 = vadd.xlane.f32.xlu0 %v2050_v45  ;;  %v5215_v52 = vpop.f32.mrb[39].mxu0  ;;  %v1486_v45 = vmul.f32 %v4859_v25, %v8767_v5  ;;  %v5225_v38 = vpop.f32.mrb[39].mxu1  ;;  %8768 = vst [vmem:[#allocation50_spill] sm:$0xff] %v5231_v14  ;;  %v8779_v48 = vmax.f32 %v5231_v14, 0.0 }
 0x142   :  { %2092 = vadd.xlane.f32.xlu1 %v2051_v11  ;;  %v8770_v11 = vmax.f32 %v5181_v40, 0.0  ;;  %v5271_v40 = vadd.f32 %v5007_v58, %v4803_v59  ;;  %v913_v23 = vmul.f32 %v4811_v0, %v8779_v48 }
 0x144   :  { %1526 = vadd.xlane.f32.xlu0 %v1486_v45  ;;  %v1487_v3 = vmul.f32 %v4859_v25, %v8770_v11  ;;  %v2615_v45 = vmul.f32 %v4868_v31, %v8772_v49  ;;  %8776 = vst [vmem:[#allocation54_spill] sm:$0xff] %v5271_v40 }
 0x145   :  { %v5240_v5 = vpop.f32.mrb[40].mxu0  ;;  %v5252_v63 = vpop.f32.mrb[40].mxu1 }
 0x146   :  { %1528 = vadd.xlane.f32.xlu1 %v1487_v3  ;;  %v5245_v21 = vpop.f32.mrb[41].mxu0  ;;  %v5258_v3 = vadd.f32 %v5027_v8, %v4797_v56  ;;  %v5265_v49 = vpop.f32.mrb[41].mxu1  ;;  %v5277_v8 = vadd.f32 %v5023_v27, %v4803_v59 }
 0x147   :  { %v5250_v53 = vpop.f32.mrb[42].mxu0  ;;  %8775 = vst [vmem:[#allocation53_spill] sm:$0xff] %v5265_v49  ;;  %v5267_v54 = vpop.f32.mrb[42].mxu1  ;;  %v2052_v49 = vmul.f32 %v4829_v9, %v8780_v51  ;;  %v8788_v51 = vmax.f32 %v5271_v40, 0.0 }
 0x148   :  { %8773 = vst [vmem:[#allocation52_spill] sm:$0xff] %v5258_v3  ;;  %2654 = vadd.xlane.f32.xlu0 %v2614_v39  ;;  %v5263_v7 = vpop.f32.mrb[43].mxu0  ;;  %v5273_v11 = vpop.f32.mrb[43].mxu1  ;;  %8778 = vst [vmem:[#allocation56_spill] sm:$0xff] %v5277_v8 }
 0x149   :  { %8777 = vst [vmem:[#allocation55_spill] sm:$0xff] %v5273_v11  ;;  %v5291_v11 = vadd.f32 %v5025_v28, %v4821_v4  ;;  %v8786_v28 = vmax.f32 %v5258_v3, 0.0 }
 0x14a   :  { %2656 = vadd.xlane.f32.xlu1 %v2615_v45  ;;  %v5306_v45 = vadd.f32 %v5048_v22, %v4794_v55 }
 0x14b   :  { %8781 = vst [vmem:[#allocation57_spill] sm:$0xff] %v5291_v11  ;;  %v8793_v22 = vmax.f32 %v5291_v11, 0.0 }
 0x14c   :  { %954 = vadd.xlane.f32.xlu0 %v912_v33  ;;  %v5297_v33 = vadd.f32 %v5033_v35, %v4821_v4  ;;  %8785 = vst [vmem:[#allocation61_spill] sm:$0xff] %v5306_v45 }
 0x14d   :  { %v5286_v58 = vpop.f32.mrb[44].mxu0  ;;  %v5301_v39 = vpop.f32.mrb[44].mxu1  ;;  %v2616_v3 = vmul.f32 %v4868_v31, %v8793_v22  ;;  %v8797_v22 = vmax.f32 %v5306_v45, 0.0 }
 0x14e   :  { %956 = vadd.xlane.f32.xlu1 %v913_v23  ;;  %v5293_v27 = vpop.f32.mrb[45].mxu0  ;;  %8783 = vst [vmem:[#allocation59_spill] sm:$0xff] %v5297_v33  ;;  %8784 = vst [vmem:[#allocation60_spill] sm:$0xff] %v5301_v39  ;;  %v2053_v23 = vmul.f32 %v4829_v9, %v8786_v28  ;;  %v5313_v14 = vpop.f32.mrb[45].mxu1  ;;  %v5327_v28 = vadd.f32 %v5058_v10, %v4794_v55  ;;  %v8795_v10 = vmax.f32 %v5297_v33, 0.0 }
 0x14f   :  { %8782 = vst [vmem:[#allocation58_spill] sm:$0xff] %v5293_v27  ;;  %v5299_v48 = vpop.f32.mrb[46].mxu0  ;;  %8787 = vst [vmem:[#allocation62_spill] sm:$0xff] %v5313_v14  ;;  %v5315_v35 = vpop.f32.mrb[46].mxu1  ;;  %v5331_v14 = vadd.f32 %v5060_v32, %v4797_v56  ;;  %v914_v11 = vmul.f32 %v4811_v0, %v8797_v22 }
 0x150   :  { %2094 = vadd.xlane.f32.xlu0 %v2052_v49  ;;  %v5311_v57 = vpop.f32.mrb[47].mxu0  ;;  %v1488_v49 = vmul.f32 %v4859_v25, %v8788_v51  ;;  %v5321_v39 = vpop.f32.mrb[47].mxu1  ;;  %8790 = vst [vmem:[#allocation64_spill] sm:$0xff] %v5327_v28  ;;  %v8803_v22 = vmax.f32 %v5327_v28, 0.0 }
 0x151   :  { %8789 = vst [vmem:[#allocation63_spill] sm:$0xff] %v5321_v39  ;;  %8791 = vst [vmem:[#allocation65_spill] sm:$0xff] %v5331_v14 }
 0x152   :  { %2096 = vadd.xlane.f32.xlu1 %v2053_v23  ;;  %v8792_v23 = vmax.f32 %v5277_v8, 0.0  ;;  %v5367_v8 = vadd.f32 %v5053_v34, %v4803_v59  ;;  %v915_v45 = vmul.f32 %v4811_v0, %v8803_v22 }
 0x154   :  { %1530 = vadd.xlane.f32.xlu0 %v1488_v49  ;;  %v1489_v27 = vmul.f32 %v4859_v25, %v8792_v23  ;;  %v2617_v49 = vmul.f32 %v4868_v31, %v8795_v10  ;;  %8800 = vst [vmem:[#allocation70_spill] sm:$0xff] %v5367_v8 }
 0x155   :  { %v5336_v51 = vpop.f32.mrb[48].mxu0  ;;  %v5348_v32 = vpop.f32.mrb[48].mxu1 }
 0x156   :  { %1532 = vadd.xlane.f32.xlu1 %v1489_v27  ;;  %v5341_v40 = vpop.f32.mrb[49].mxu0  ;;  %v5354_v27 = vadd.f32 %v5075_v30, %v4797_v56  ;;  %v5361_v10 = vpop.f32.mrb[49].mxu1  ;;  %v5373_v30 = vadd.f32 %v5071_v6, %v4803_v59 }
 0x157   :  { %8794 = vst [vmem:[#allocation66_spill] sm:$0xff] %v5341_v40  ;;  %v5346_v39 = vpop.f32.mrb[50].mxu0  ;;  %8799 = vst [vmem:[#allocation69_spill] sm:$0xff] %v5361_v10  ;;  %v5363_v40 = vpop.f32.mrb[50].mxu1  ;;  %v8804_v10 = vmax.f32 %v5331_v14, 0.0 }
 0x158   :  { %8796 = vst [vmem:[#allocation67_spill] sm:$0xff] %v5354_v27  ;;  %2658 = vadd.xlane.f32.xlu0 %v2616_v3  ;;  %v5359_v33 = vpop.f32.mrb[51].mxu0  ;;  %v5369_v23 = vpop.f32.mrb[51].mxu1  ;;  %8802 = vst [vmem:[#allocation72_spill] sm:$0xff] %v5373_v30 }
 0x159   :  { %8798 = vst [vmem:[#allocation68_spill] sm:$0xff] %v5359_v33  ;;  %8801 = vst [vmem:[#allocation71_spill] sm:$0xff] %v5369_v23  ;;  %v2054_v33 = vmul.f32 %v4829_v9, %v8804_v10  ;;  %v5387_v23 = vadd.f32 %v5073_v29, %v4821_v4  ;;  %v8810_v29 = vmax.f32 %v5354_v27, 0.0  ;;  %v8812_v10 = vmax.f32 %v5367_v8, 0.0 }
 0x15a   :  { %2660 = vadd.xlane.f32.xlu1 %v2617_v49  ;;  %v5402_v49 = vadd.f32 %v5094_v26, %v4794_v55 }
 0x15b   :  { %8805 = vst [vmem:[#allocation73_spill] sm:$0xff] %v5387_v23  ;;  %v8817_v26 = vmax.f32 %v5387_v23, 0.0 }
 0x15c   :  { %958 = vadd.xlane.f32.xlu0 %v914_v11  ;;  %v5393_v11 = vadd.f32 %v5081_v61, %v4821_v4  ;;  %8809 = vst [vmem:[#allocation77_spill] sm:$0xff] %v5402_v49 }
 0x15d   :  { %v5382_v34 = vpop.f32.mrb[52].mxu0  ;;  %v5397_v3 = vpop.f32.mrb[52].mxu1  ;;  %v2618_v27 = vmul.f32 %v4868_v31, %v8817_v26  ;;  %v8821_v26 = vmax.f32 %v5402_v49, 0.0 }
 0x15e   :  { %960 = vadd.xlane.f32.xlu1 %v915_v45  ;;  %v5389_v6 = vpop.f32.mrb[53].mxu0  ;;  %8807 = vst [vmem:[#allocation75_spill] sm:$0xff] %v5393_v11  ;;  %8808 = vst [vmem:[#allocation76_spill] sm:$0xff] %v5397_v3  ;;  %v2055_v45 = vmul.f32 %v4829_v9, %v8810_v29  ;;  %v5409_v28 = vpop.f32.mrb[53].mxu1  ;;  %v5423_v29 = vadd.f32 %v5107_v18, %v4794_v55  ;;  %v8819_v18 = vmax.f32 %v5393_v11, 0.0 }
 0x15f   :  { %8806 = vst [vmem:[#allocation74_spill] sm:$0xff] %v5389_v6  ;;  %v5395_v22 = vpop.f32.mrb[54].mxu0  ;;  %8811 = vst [vmem:[#allocation78_spill] sm:$0xff] %v5409_v28  ;;  %v5411_v61 = vpop.f32.mrb[54].mxu1  ;;  %v5427_v28 = vadd.f32 %v5109_v37, %v4797_v56  ;;  %v916_v23 = vmul.f32 %v4811_v0, %v8821_v26 }
 0x160   :  { %2098 = vadd.xlane.f32.xlu0 %v2054_v33  ;;  %v5407_v14 = vpop.f32.mrb[55].mxu0  ;;  %v1490_v33 = vmul.f32 %v4859_v25, %v8812_v10  ;;  %v5417_v3 = vpop.f32.mrb[55].mxu1  ;;  %8814 = vst [vmem:[#allocation80_spill] sm:$0xff] %v5423_v29  ;;  %v8827_v26 = vmax.f32 %v5423_v29, 0.0 }
 0x161   :  { %8813 = vst [vmem:[#allocation79_spill] sm:$0xff] %v5417_v3  ;;  %8815 = vst [vmem:[#allocation81_spill] sm:$0xff] %v5427_v28 }
 0x162   :  { %2100 = vadd.xlane.f32.xlu1 %v2055_v45  ;;  %v8816_v45 = vmax.f32 %v5373_v30, 0.0  ;;  %v5463_v30 = vadd.f32 %v5101_v43, %v4803_v59  ;;  %v917_v49 = vmul.f32 %v4811_v0, %v8827_v26 }
 0x164   :  { %1534 = vadd.xlane.f32.xlu0 %v1490_v33  ;;  %v1491_v6 = vmul.f32 %v4859_v25, %v8816_v45  ;;  %v2619_v33 = vmul.f32 %v4868_v31, %v8819_v18  ;;  %8824 = vst [vmem:[#allocation86_spill] sm:$0xff] %v5463_v30 }
 0x165   :  { %v5432_v10 = vpop.f32.mrb[56].mxu0  ;;  %v5444_v37 = vpop.f32.mrb[56].mxu1 }
 0x166   :  { %1536 = vadd.xlane.f32.xlu1 %v1491_v6  ;;  %v5437_v8 = vpop.f32.mrb[57].mxu0  ;;  %v5450_v6 = vadd.f32 %v5123_v24, %v4797_v56  ;;  %v5457_v18 = vpop.f32.mrb[57].mxu1  ;;  %v5469_v24 = vadd.f32 %v5119_v42, %v4803_v59 }
 0x167   :  { %8818 = vst [vmem:[#allocation82_spill] sm:$0xff] %v5437_v8  ;;  %v5442_v3 = vpop.f32.mrb[58].mxu0  ;;  %8823 = vst [vmem:[#allocation85_spill] sm:$0xff] %v5457_v18  ;;  %v5459_v8 = vpop.f32.mrb[58].mxu1  ;;  %v8828_v18 = vmax.f32 %v5427_v28, 0.0 }
 0x168   :  { %8820 = vst [vmem:[#allocation83_spill] sm:$0xff] %v5450_v6  ;;  %2662 = vadd.xlane.f32.xlu0 %v2618_v27  ;;  %v5455_v11 = vpop.f32.mrb[59].mxu0  ;;  %v5465_v45 = vpop.f32.mrb[59].mxu1  ;;  %8826 = vst [vmem:[#allocation88_spill] sm:$0xff] %v5469_v24 }
 0x169   :  { %8822 = vst [vmem:[#allocation84_spill] sm:$0xff] %v5455_v11  ;;  %8825 = vst [vmem:[#allocation87_spill] sm:$0xff] %v5465_v45  ;;  %v2056_v11 = vmul.f32 %v4829_v9, %v8828_v18  ;;  %v5483_v45 = vadd.f32 %v5121_v13, %v4821_v4  ;;  %v8834_v13 = vmax.f32 %v5450_v6, 0.0  ;;  %v8836_v18 = vmax.f32 %v5463_v30, 0.0 }
 0x16a   :  { %2664 = vadd.xlane.f32.xlu1 %v2619_v33  ;;  %v5498_v33 = vadd.f32 %v5144_v60, %v4794_v55 }
 0x16b   :  { %8829 = vst [vmem:[#allocation89_spill] sm:$0xff] %v5483_v45 }
 0x16c   :  { %962 = vadd.xlane.f32.xlu0 %v916_v23  ;;  %v5489_v23 = vadd.f32 %v5129_v12, %v4821_v4  ;;  %8833 = vst [vmem:[#allocation93_spill] sm:$0xff] %v5498_v33 }
 0x16d   :  { %v5478_v43 = vpop.f32.mrb[60].mxu0  ;;  %v5493_v27 = vpop.f32.mrb[60].mxu1 }
 0x16e   :  { %964 = vadd.xlane.f32.xlu1 %v917_v49  ;;  %v5485_v42 = vpop.f32.mrb[61].mxu0  ;;  %8831 = vst [vmem:[#allocation91_spill] sm:$0xff] %v5489_v23  ;;  %8832 = vst [vmem:[#allocation92_spill] sm:$0xff] %v5493_v27  ;;  %v2057_v49 = vmul.f32 %v4829_v9, %v8834_v13  ;;  %v5505_v29 = vpop.f32.mrb[61].mxu1  ;;  %v5519_v13 = vadd.f32 %v5154_v41, %v4794_v55  ;;  %v8841_v6 = vmax.f32 %v5489_v23, 0.0 }
 0x16f   :  { %8830 = vst [vmem:[#allocation90_spill] sm:$0xff] %v5485_v42  ;;  %v5491_v26 = vpop.f32.mrb[62].mxu0  ;;  %8835 = vst [vmem:[#allocation94_spill] sm:$0xff] %v5505_v29  ;;  %v5507_v12 = vpop.f32.mrb[62].mxu1  ;;  %v5523_v29 = vadd.f32 %v5156_v47, %v4797_v56  ;;  %v5538_v47 = vadd.f32 %v5171_v2, %v4797_v56 }
 0x170   :  { %2102 = vadd.xlane.f32.xlu0 %v2056_v11  ;;  %v5503_v28 = vpop.f32.mrb[63].mxu0  ;;  %v1492_v11 = vmul.f32 %v4859_v25, %v8836_v18  ;;  %v5513_v27 = vpop.f32.mrb[63].mxu1  ;;  %8837 = vst [vmem:[#allocation95_spill] sm:$0xff] %v5519_v13  ;;  %v8840_v18 = vmax.f32 %v5483_v45, 0.0  ;;  %v2621_v30 = vmul.f32 %v4868_v31, %v8841_v6  ;;  %v8610_v41 = vmax.f32 %v5519_v13, 0.0 }
 0x171   :  { %8838 = vst [vmem:[#allocation96_spill] sm:$0xff] %v5523_v29  ;;  %8842 = vst [vmem:[#allocation97_spill] sm:$0xff] %v5538_v47  ;;  %v5549_v6 = vadd.f32 %v5167_v46, %v4803_v59  ;;  %v8848_v46 = vlaneseq }
 0x172   :  { %2104 = vadd.xlane.f32.xlu1 %v2057_v49  ;;  %v8839_v49 = vmax.f32 %v5469_v24, 0.0  ;;  %v2620_v60 = vmul.f32 %v4868_v31, %v8840_v18  ;;  %v5545_v18 = vadd.f32 %v5149_v62, %v4803_v59  ;;  %v919_v2 = vmul.f32 %v4811_v0, %v8610_v41 }
 0x173   :  { %8845 = vst [vmem:[#allocation99_spill] sm:$0xff] %v5549_v6  ;;  %v5561_v62 = vadd.f32 %v5169_v17, %v4821_v4  ;;  %v5571_v41 = vadd.f32 %v5190_v20, %v4794_v55  ;;  %v5584_v20 = vadd.f32 %v5203_v1, %v4794_v55 }
 0x174   :  { %1538 = vadd.xlane.f32.xlu0 %v1492_v11  ;;  %v1493_v42 = vmul.f32 %v4859_v25, %v8839_v49  ;;  %v8843_v49 = vmax.f32 %v5498_v33, 0.0  ;;  %8844 = vst [vmem:[#allocation98_spill] sm:$0xff] %v5545_v18  ;;  %v8612_v11 = vmax.f32 %v5549_v6, 0.0 }
 0x175   :  { %8847 = vst [vmem:[#allocation100_spill] sm:$0xff] %v5561_v62  ;;  %8850 = vst [vmem:[#allocation102_spill] sm:$0xff] %v5571_v41  ;;  %v8613_v17 = vmax.f32 %v5561_v62, 0.0 }
 0x176   :  { %1540 = vadd.xlane.f32.xlu1 %v1493_v42  ;;  %v918_v42 = vmul.f32 %v4811_v0, %v8843_v49  ;;  %8853 = vst [vmem:[#allocation103_spill] sm:$0xff] %v5584_v20 }
 0x178   :  { %2666 = vadd.xlane.f32.xlu0 %v2620_v60  ;;  %v8846_v60 = vmax.f32 %v5523_v29, 0.0 }
 0x17a   :  { %2668 = vadd.xlane.f32.xlu1 %v2621_v30  ;;  %v2058_v49 = vmul.f32 %v4829_v9, %v8846_v60  ;;  %v1031_v30 = vand.u32 127, %v8848_v46  ;;  %v8851_v60 = vmax.f32 %v5538_v47, 0.0 }
 0x17c   :  { %966 = vadd.xlane.f32.xlu0 %v918_v42  ;;  %v5566_v42 = vadd.f32 %v5177_v36, %v4821_v4  ;;  %v2059_v23 = vmul.f32 %v4829_v9, %v8851_v60  ;;  %v1036_v36 = vadd.s32 4294967288, %v1031_v30  ;;  %v5588_v60 = vadd.f32 %v5205_v16, %v4797_v56 }
 0x17e   :  { %968 = vadd.xlane.f32.xlu1 %v919_v2  ;;  %8849 = vst [vmem:[#allocation101_spill] sm:$0xff] %v5566_v42  ;;  %v8852_v2 = vmax.f32 %v5545_v18, 0.0  ;;  %8854 = vst [vmem:[#allocation104_spill] sm:$0xff] %v5588_v60  ;;  %v5600_v1 = vsub.s32 %v1036_v36, %v4779_v50  ;;  %v5616_v36 = vadd.f32 %v5197_v15, %v4803_v59  ;;  %v8861_v15 = vmax.f32 %v5588_v60, 0.0 }
 0x180   :  { %2106 = vadd.xlane.f32.xlu0 %v2058_v49  ;;  %v1494_v46 = vmul.f32 %v4859_v25, %v8852_v2  ;;  %v2622_v2 = vmul.f32 %v4868_v31, %v8613_v17  ;;  %v5597_v49 = vsub.s32 %v1031_v30, %v4779_v50  ;;  %v8857_v17 = vmax.f32 %v5571_v41, 0.0  ;;  %8858 = vst [vmem:[#allocation106_spill] sm:$0xff] %v5616_v36 }
 0x182   :  { %2108 = vadd.xlane.f32.xlu1 %v2059_v23  ;;  %v1495_v23 = vmul.f32 %v4859_v25, %v8612_v11  ;;  %v920_v30 = vmul.f32 %v4811_v0, %v8857_v17  ;;  %v8860_v17 = vmax.f32 %v5584_v20, 0.0 }
 0x184   :  { %1542 = vadd.xlane.f32.xlu0 %v1494_v46  ;;  %v5604_v46 = vadd.f32 %v5219_v19, %v4797_v56  ;;  %v5620_v19 = vadd.f32 %v5215_v52, %v4803_v59  ;;  %v5646_v52 = vadd.f32 %v5240_v5, %v4794_v55  ;;  %v5661_v5 = vadd.f32 %v5250_v53, %v4794_v55 }
 0x186   :  { %1544 = vadd.xlane.f32.xlu1 %v1495_v23  ;;  %8855 = vst [vmem:[#allocation105_spill] sm:$0xff] %v5604_v46  ;;  %v8856_v23 = vmax.f32 %v5566_v42, 0.0  ;;  %8859 = vst [vmem:[#allocation107_spill] sm:$0xff] %v5620_v19  ;;  %v921_v42 = vmul.f32 %v4811_v0, %v8860_v17 }
 0x187   :  { %8864 = vst [vmem:[#allocation110_spill] sm:$0xff] %v5646_v52  ;;  %8867 = vst [vmem:[#allocation111_spill] sm:$0xff] %v5661_v5 }
 0x188   :  { %2670 = vadd.xlane.f32.xlu0 %v2622_v2  ;;  %v2623_v11 = vmul.f32 %v4868_v31, %v8856_v23  ;;  %v5634_v2 = vadd.f32 %v5217_v44, %v4821_v4  ;;  %v8865_v44 = vmax.f32 %v5604_v46, 0.0 }
 0x189   :  { %v935_v62 = vpop.xlane.xlu0 %934 }
 0x18a   :  { %2672 = vadd.xlane.f32.xlu1 %v2623_v11  ;;  %v1035_v23 = vrot.slane %v935_v62, %v5597_v49  ;;  %v2060_v11 = vmul.f32 %v4829_v9, %v8861_v15  ;;  %8862 = vst [vmem:[#allocation108_spill] sm:$0xff] %v5634_v2  ;;  %v8870_v53 = vmax.f32 %v5634_v2, 0.0 }
 0x18b   :  { %v937_v45 = vpop.xlane.xlu1 %936 }
 0x18c   :  { %v1040_v16 = vrot.slane %v937_v45, %v5600_v1  ;;  %970 = vadd.xlane.f32.xlu0 %v920_v30  ;;  %v5640_v30 = vadd.f32 %v5225_v38, %v4821_v4 }
 0x18d   :  { %v2075_v6 = vpop.xlane.xlu0 %2074 }
 0x18e   :  { %v1042_v62 = vsel %vm1041_vm0, %v1040_v16, %v1035_v23  ;;  %972 = vadd.xlane.f32.xlu1 %v921_v42  ;;  %8863 = vst [vmem:[#allocation109_spill] sm:$0xff] %v5640_v30  ;;  %v2173_v24 = vrot.slane %v2075_v6, %v5597_v49  ;;  %v2061_v42 = vmul.f32 %v4829_v9, %v8865_v44  ;;  %v8866_v6 = vmax.f32 %v5616_v36, 0.0 }
 0x18f   :  { %v2077_v17 = vpop.xlane.xlu1 %2076  ;;  %v5666_v23 = vadd.f32 %v5252_v63, %v4797_v56  ;;  %v2624_v36 = vmul.f32 %v4868_v31, %v8870_v53  ;;  %v8871_v63 = vmax.f32 %v5640_v30, 0.0 }
 0x190   :  { %v2177_v15 = vrot.slane %v2077_v17, %v5600_v1  ;;  %2110 = vadd.xlane.f32.xlu0 %v2060_v11  ;;  %v1496_v17 = vmul.f32 %v4859_v25, %v8866_v6 }
 0x191   :  { %v1511_v16 = vpop.xlane.xlu0 %1510  ;;  %8868 = vst [vmem:[#allocation112_spill] sm:$0xff] %v5666_v23  ;;  %v2625_v41 = vmul.f32 %v4868_v31, %v8871_v63  ;;  %v5694_v63 = vadd.f32 %v5245_v21, %v4803_v59  ;;  %v8877_v21 = vmax.f32 %v5666_v23, 0.0 }
 0x192   :  { %v5653_v38 = vsel %vm1041_vm0, %v2177_v15, %v2173_v24  ;;  %2112 = vadd.xlane.f32.xlu1 %v2061_v42  ;;  %v8869_v24 = vmax.f32 %v5620_v19, 0.0 }
 0x193   :  { %v2641_v45 = vpop.xlane.xlu1 %2640  ;;  %8874 = vst [vmem:[#allocation114_spill] sm:$0xff] %v5694_v63  ;;  %v2062_v30 = vmul.f32 %v4829_v9, %v8877_v21  ;;  %v5723_v21 = vadd.f32 %v5286_v58, %v4794_v55  ;;  %v8884_v58 = vmax.f32 %v5694_v63, 0.0  ;;  %v6019_v63 = vadd.f32 %v5442_v3, %v4794_v55 }
 0x194   :  { %1546 = vadd.xlane.f32.xlu0 %v1496_v17  ;;  %v1497_v15 = vmul.f32 %v4859_v25, %v8869_v24  ;;  %v2741_v6 = vrot.slane %v2641_v45, %v5600_v1  ;;  %v5686_v45 = vadd.f32 %v5267_v54, %v4797_v56  ;;  %v1609_v17 = vrot.slane %v1511_v16, %v5597_v49 }
 0x195   :  { %v2639_v42 = vpop.xlane.xlu0 %2638  ;;  %8882 = vst [vmem:[#allocation116_spill] sm:$0xff] %v5723_v21  ;;  %v1498_v18 = vmul.f32 %v4859_v25, %v8884_v58  ;;  %8937 = vst [vmem:[#allocation129_spill] sm:$0xff] %v6019_v63 }
 0x196   :  { %v2737_v11 = vrot.slane %v2639_v42, %v5597_v49  ;;  %1548 = vadd.xlane.f32.xlu1 %v1497_v15  ;;  %8872 = vst [vmem:[#allocation113_spill] sm:$0xff] %v5686_v45  ;;  %v8873_v15 = vmax.f32 %v5646_v52, 0.0 }
 0x197   :  { %v1515_v44 = vpop.xlane.xlu1 %1514 }
 0x198   :  { %v5681_v19 = vsel %vm1041_vm0, %v2741_v6, %v2737_v11  ;;  %2674 = vadd.xlane.f32.xlu0 %v2624_v36  ;;  %v922_v42 = vmul.f32 %v4811_v0, %v8873_v15  ;;  %v5699_v6 = vadd.f32 %v5263_v7, %v4803_v59  ;;  %v8876_v15 = vmax.f32 %v5661_v5, 0.0  ;;  %v8878_v7 = vld [vmem:[#allocation53_spill] sm:$0xff] }
 0x199   :  { %v1513_v53 = vpop.xlane.xlu0 %1512  ;;  %v5712_v2 = vadd.f32 %v8878_v7, %v4821_v4  ;;  %v8883_v7 = vmax.f32 %v5686_v45, 0.0 }
 0x19a   :  { %v1613_v11 = vrot.slane %v1513_v53, %v5600_v1  ;;  %2676 = vadd.xlane.f32.xlu1 %v2625_v41  ;;  %8875 = vst [vmem:[#allocation115_spill] sm:$0xff] %v5699_v6  ;;  %v923_v16 = vmul.f32 %v4811_v0, %v8876_v15  ;;  %v8880_v0 = vld [vmem:[#allocation55_spill] sm:$0xff] }
 0x19b   :  { %v941_v54 = vpop.xlane.xlu1 %940  ;;  %8879 = vst [vmem:[#allocation53_spill] sm:$0xff] %v5712_v2 }
 0x19c   :  { %v1614_v24 = vsel %vm1041_vm0, %v1613_v11, %v1609_v17  ;;  %974 = vadd.xlane.f32.xlu0 %v922_v42  ;;  %v1050_v36 = vrot.slane %v941_v54, %v5600_v1  ;;  %v5719_v11 = vadd.f32 %v8880_v0, %v4821_v4  ;;  %v2063_v54 = vmul.f32 %v4829_v9, %v8883_v7 }
 0x19d   :  { %v939_v41 = vpop.xlane.xlu0 %938  ;;  %v8625_v42 = vmax.f32 %v5712_v2, 0.0  ;;  %v5740_v9 = vadd.f32 %v5299_v48, %v4794_v55 }
 0x19e   :  { %v1046_v17 = vrot.slane %v939_v41, %v5597_v49  ;;  %976 = vadd.xlane.f32.xlu1 %v923_v16  ;;  %8881 = vst [vmem:[#allocation55_spill] sm:$0xff] %v5719_v11 }
 0x19f   :  { %v2081_v15 = vpop.xlane.xlu1 %2080  ;;  %8885 = vst [vmem:[#allocation117_spill] sm:$0xff] %v5740_v9 }
 0x1a0   :  { %v1051_v53 = vsel %vm1041_vm0, %v1050_v36, %v1046_v17  ;;  %2114 = vadd.xlane.f32.xlu0 %v2062_v30  ;;  %v2186_v0 = vrot.slane %v2081_v15, %v5600_v1  ;;  %v1618_v15 = vrot.slane %v1515_v44, %v5597_v49  ;;  %v8626_v44 = vmax.f32 %v5740_v9, 0.0 }
 0x1a1   :  { %v1179_v16 = vsel %vm1178_vm1, %v1051_v53, %v1042_v62  ;;  %v2079_v41 = vpop.xlane.xlu0 %2078  ;;  %v8886_v62 = vmax.f32 %v5699_v6, 0.0  ;;  %v5911_v6 = vadd.f32 %v5382_v34, %v4794_v55 }
 0x1a2   :  { %v2182_v52 = vrot.slane %v2079_v41, %v5597_v49  ;;  %2116 = vadd.xlane.f32.xlu1 %v2063_v54  ;;  %v8887_v41 = vld [vmem:[#allocation60_spill] sm:$0xff] }
 0x1a3   :  { %v1517_v17 = vpop.xlane.xlu1 %1516  ;;  %v1499_v53 = vmul.f32 %v4859_v25, %v8886_v62  ;;  %v5750_v58 = vadd.f32 %v8887_v41, %v4797_v56  ;;  %v2626_v25 = vmul.f32 %v4868_v31, %v8625_v42  ;;  %8919 = vst [vmem:[#allocation124_spill] sm:$0xff] %v5911_v6 }
 0x1a4   :  { %v2187_v7 = vsel %vm1041_vm0, %v2186_v0, %v2182_v52  ;;  %v1622_v54 = vrot.slane %v1517_v17, %v5600_v1  ;;  %1550 = vadd.xlane.f32.xlu0 %v1498_v18  ;;  %v5762_v0 = vadd.f32 %v5315_v35, %v4797_v56  ;;  %v8890_v17 = vmax.f32 %v5719_v11, 0.0 }
 0x1a5   :  { %8888 = vst [vmem:[#allocation60_spill] sm:$0xff] %v5750_v58  ;;  %v2314_v36 = vsel %vm1178_vm1, %v2187_v7, %v5653_v38  ;;  %v2643_v48 = vpop.xlane.xlu0 %2642 }
 0x1a6   :  { %v1623_v30 = vsel %vm1041_vm0, %v1622_v54, %v1618_v15  ;;  %1552 = vadd.xlane.f32.xlu1 %v1499_v53  ;;  %8889 = vst [vmem:[#allocation118_spill] sm:$0xff] %v5762_v0  ;;  %v2627_v38 = vmul.f32 %v4868_v31, %v8890_v17  ;;  %v2746_v62 = vrot.slane %v2643_v48, %v5597_v49  ;;  %v8628_v53 = vmax.f32 %v5750_v58, 0.0  ;;  %v8892_v54 = vld [vmem:[#allocation58_spill] sm:$0xff] }
 0x1a7   :  { %v1750_v52 = vsel %vm1178_vm1, %v1623_v30, %v1614_v24  ;;  %v2645_v18 = vpop.xlane.xlu1 %2644  ;;  %v5773_v24 = vld [vmem:[%s8513_s4] ss:$0 sm:$0xff]  ;;  %v8891_v30 = vmax.f32 %v5723_v21, 0.0  ;;  %v5780_v31 = vadd.f32 %v8892_v54, %v4803_v59  ;;  %v5785_v48 = vadd.f32 %v5311_v57, %v4803_v59  ;;  %v5798_v57 = vld [vmem:[%s8513_s4 + $0x2] ss:$0 sm:$0xff] }
 0x1a8   :  { %v2750_v15 = vrot.slane %v2645_v18, %v5600_v1  ;;  %2678 = vadd.xlane.f32.xlu0 %v2626_v25  ;;  %v6099_v58 = vadd.f32 %v5491_v26, %v4794_v55 }
 0x1a9   :  { %v924_v35 = vmul.f32 %v5773_v24, %v8891_v30  ;;  %v943_v7 = vpop.xlane.xlu0 %942  ;;  %8893 = vst [vmem:[#allocation58_spill] sm:$0xff] %v5780_v31  ;;  %8894 = vst [vmem:[#allocation119_spill] sm:$0xff] %v5785_v48 }
 0x1aa   :  { %v2751_v41 = vsel %vm1041_vm0, %v2750_v15, %v2746_v62  ;;  %2680 = vadd.xlane.f32.xlu1 %v2627_v38  ;;  %v1055_v30 = vrot.slane %v943_v7, %v5597_v49  ;;  %v925_v38 = vmul.f32 %v5773_v24, %v8626_v44  ;;  %v8895_v7 = vld [vmem:[#allocation62_spill] sm:$0xff]  ;;  %8954 = vst [vmem:[#allocation133_spill] sm:$0xff] %v6099_v58 }
 0x1ab   :  { %v2878_v25 = vsel %vm1178_vm1, %v2751_v41, %v5681_v19  ;;  %v945_v17 = vpop.xlane.xlu1 %944  ;;  %v2064_v19 = vmul.f32 %v5798_v57, %v8628_v53  ;;  %v5806_v54 = vadd.f32 %v8895_v7, %v4821_v4  ;;  %v5819_v7 = vadd.f32 %v5336_v51, %v4794_v55 }
 0x1ac   :  { %v1059_v42 = vrot.slane %v945_v17, %v5600_v1  ;;  %978 = vadd.xlane.f32.xlu0 %v924_v35  ;;  %v8897_v17 = vld [vmem:[#allocation63_spill] sm:$0xff] }
 0x1ad   :  { %v2083_v62 = vpop.xlane.xlu0 %2082  ;;  %8896 = vst [vmem:[#allocation62_spill] sm:$0xff] %v5806_v54  ;;  %v5812_v44 = vadd.f32 %v8897_v17, %v4821_v4  ;;  %8899 = vst [vmem:[#allocation120_spill] sm:$0xff] %v5819_v7 }
 0x1ae   :  { %v1060_v35 = vsel %vm1041_vm0, %v1059_v42, %v1055_v30  ;;  %980 = vadd.xlane.f32.xlu1 %v925_v38  ;;  %v2191_v53 = vrot.slane %v2083_v62, %v5597_v49  ;;  %v8900_v42 = vmax.f32 %v5762_v0, 0.0 }
 0x1af   :  { %8898 = vst [vmem:[#allocation63_spill] sm:$0xff] %v5812_v44  ;;  %v1181_v18 = vsel %vm1180_vm2, %v1060_v35, %v1179_v16  ;;  %v2085_v11 = vpop.xlane.xlu1 %2084  ;;  %v5829_v16 = vld [vmem:[%s8513_s4 + $0x1] ss:$0 sm:$0xff]  ;;  %v8906_v2 = vmax.f32 %v5812_v44, 0.0 }
 0x1b0   :  { %v2195_v15 = vrot.slane %v2085_v11, %v5600_v1  ;;  %2118 = vadd.xlane.f32.xlu0 %v2064_v19  ;;  %v2065_v30 = vmul.f32 %v5798_v57, %v8900_v42  ;;  %v8901_v11 = vmax.f32 %v5780_v31, 0.0  ;;  %v5838_v42 = vadd.f32 %v5346_v39, %v4794_v55  ;;  %v5854_v39 = vld [vmem:[%s8513_s4 + $0x3] ss:$0 sm:$0xff] }
 0x1b1   :  { %v1519_v38 = vpop.xlane.xlu0 %1518 }
 0x1b2   :  { %v2196_v41 = vsel %vm1041_vm0, %v2195_v15, %v2191_v53  ;;  %2120 = vadd.xlane.f32.xlu1 %v2065_v30  ;;  %v1500_v51 = vmul.f32 %v5829_v16, %v8901_v11  ;;  %8902 = vst [vmem:[#allocation121_spill] sm:$0xff] %v5838_v42  ;;  %v5842_v53 = vadd.f32 %v5348_v32, %v4797_v56  ;;  %v8904_v11 = vmax.f32 %v5785_v48, 0.0 }
 0x1b3   :  { %v2315_v62 = vsel %vm1180_vm2, %v2196_v41, %v2314_v36  ;;  %v1521_v35 = vpop.xlane.xlu1 %1520  ;;  %v1627_v15 = vrot.slane %v1519_v38, %v5597_v49  ;;  %v8905_v32 = vmax.f32 %v5806_v54, 0.0  ;;  %v5869_v54 = vadd.f32 %v5363_v40, %v4797_v56 }
 0x1b4   :  { %8903 = vst [vmem:[#allocation122_spill] sm:$0xff] %v5842_v53  ;;  %v1631_v17 = vrot.slane %v1521_v35, %v5600_v1  ;;  %1554 = vadd.xlane.f32.xlu0 %v1500_v51  ;;  %v1501_v36 = vmul.f32 %v5829_v16, %v8904_v11  ;;  %v8909_v51 = vld [vmem:[#allocation66_spill] sm:$0xff]  ;;  %v8913_v40 = vmax.f32 %v5842_v53, 0.0 }
 0x1b5   :  { %v2647_v41 = vpop.xlane.xlu0 %2646  ;;  %v2628_v38 = vmul.f32 %v5854_v39, %v8905_v32  ;;  %8907 = vst [vmem:[#allocation123_spill] sm:$0xff] %v5869_v54  ;;  %v5876_v30 = vadd.f32 %v8909_v51, %v4803_v59 }
 0x1b6   :  { %v1632_v19 = vsel %vm1041_vm0, %v1631_v17, %v1627_v15  ;;  %1556 = vadd.xlane.f32.xlu1 %v1501_v36  ;;  %v2629_v17 = vmul.f32 %v5854_v39, %v8906_v2  ;;  %v2755_v15 = vrot.slane %v2647_v41, %v5597_v49  ;;  %v8911_v41 = vld [vmem:[#allocation68_spill] sm:$0xff] }
 0x1b7   :  { %v1751_v35 = vsel %vm1180_vm2, %v1632_v19, %v1750_v52  ;;  %v2649_v11 = vpop.xlane.xlu1 %2648  ;;  %v8908_v52 = vmax.f32 %v5819_v7, 0.0  ;;  %8910 = vst [vmem:[#allocation66_spill] sm:$0xff] %v5876_v30 }
 0x1b8   :  { %v2759_v36 = vrot.slane %v2649_v11, %v5600_v1  ;;  %2682 = vadd.xlane.f32.xlu0 %v2628_v38  ;;  %v5881_v11 = vadd.f32 %v8911_v41, %v4803_v59  ;;  %v2066_v38 = vmul.f32 %v5798_v57, %v8913_v40  ;;  %v8915_v40 = vld [vmem:[#allocation69_spill] sm:$0xff] }
 0x1b9   :  { %v926_v19 = vmul.f32 %v5773_v24, %v8908_v52  ;;  %v947_v32 = vpop.xlane.xlu0 %946 }
 0x1ba   :  { %v2760_v2 = vsel %vm1041_vm0, %v2759_v36, %v2755_v15  ;;  %2684 = vadd.xlane.f32.xlu1 %v2629_v17  ;;  %8912 = vst [vmem:[#allocation68_spill] sm:$0xff] %v5881_v11  ;;  %v1064_v51 = vrot.slane %v947_v32, %v5597_v49  ;;  %v8914_v17 = vmax.f32 %v5838_v42, 0.0  ;;  %v8917_v32 = vld [vmem:[#allocation71_spill] sm:$0xff]  ;;  %v8922_v34 = vmax.f32 %v5881_v11, 0.0 }
 0x1bb   :  { %v5887_v44 = vsel %vm1180_vm2, %v2760_v2, %v2878_v25  ;;  %v949_v52 = vpop.xlane.xlu1 %948  ;;  %v5898_v25 = vadd.f32 %v8915_v40, %v4821_v4  ;;  %v8920_v40 = vmax.f32 %v5869_v54, 0.0 }
 0x1bc   :  { %v1068_v15 = vrot.slane %v949_v52, %v5600_v1  ;;  %982 = vadd.xlane.f32.xlu0 %v926_v19  ;;  %v927_v36 = vmul.f32 %v5773_v24, %v8914_v17  ;;  %v5904_v52 = vadd.f32 %v8917_v32, %v4821_v4  ;;  %v8921_v32 = vmax.f32 %v5876_v30, 0.0 }
 0x1bd   :  { %v2087_v41 = vpop.xlane.xlu0 %2086  ;;  %8916 = vst [vmem:[#allocation69_spill] sm:$0xff] %v5898_v25  ;;  %v2067_v7 = vmul.f32 %v5798_v57, %v8920_v40  ;;  %v1503_v31 = vmul.f32 %v5829_v16, %v8922_v34 }
 0x1be   :  { %v1069_v2 = vsel %vm1041_vm0, %v1068_v15, %v1064_v51  ;;  %984 = vadd.xlane.f32.xlu1 %v927_v36  ;;  %8918 = vst [vmem:[#allocation71_spill] sm:$0xff] %v5904_v52  ;;  %v2200_v51 = vrot.slane %v2087_v41, %v5597_v49  ;;  %v8638_v40 = vmax.f32 %v5904_v52, 0.0  ;;  %v8930_v52 = vld [vmem:[#allocation78_spill] sm:$0xff] }
 0x1bf   :  { %v5907_v19 = vsel %vm1182_vm3, %v1069_v2, %v1181_v18  ;;  %v2089_v17 = vpop.xlane.xlu1 %2088  ;;  %v1502_v18 = vmul.f32 %v5829_v16, %v8921_v32  ;;  %v8637_v2 = vmax.f32 %v5898_v25, 0.0  ;;  %v5988_v25 = vadd.f32 %v8930_v52, %v4821_v4 }
 0x1c0   :  { %v2204_v15 = vrot.slane %v2089_v17, %v5600_v1  ;;  %2122 = vadd.xlane.f32.xlu0 %v2066_v38  ;;  %v8639_v38 = vmax.f32 %v5911_v6, 0.0 }
 0x1c1   :  { %v1523_v36 = vpop.xlane.xlu0 %1522  ;;  %8931 = vst [vmem:[#allocation78_spill] sm:$0xff] %v5988_v25  ;;  %v8652_v6 = vmax.f32 %v5988_v25, 0.0  ;;  %v6042_v25 = vadd.f32 %v5459_v8, %v4797_v56 }
 0x1c2   :  { %v2205_v48 = vsel %vm1041_vm0, %v2204_v15, %v2200_v51  ;;  %2124 = vadd.xlane.f32.xlu1 %v2067_v7  ;;  %v1636_v30 = vrot.slane %v1523_v36, %v5597_v49  ;;  %v5935_v51 = vadd.f32 %v5395_v22, %v4794_v55  ;;  %v8924_v7 = vld [vmem:[#allocation76_spill] sm:$0xff]  ;;  %v2631_v36 = vmul.f32 %v5854_v39, %v8638_v40 }
 0x1c3   :  { %v5928_v41 = vsel %vm1182_vm3, %v2205_v48, %v2315_v62  ;;  %v1525_v17 = vpop.xlane.xlu1 %1524  ;;  %v5939_v15 = vadd.f32 %v8924_v7, %v4797_v56  ;;  %v2630_v48 = vmul.f32 %v5854_v39, %v8637_v2  ;;  %8941 = vst [vmem:[#allocation131_spill] sm:$0xff] %v6042_v25  ;;  %v8661_v33 = vmax.f32 %v6042_v25, 0.0 }
 0x1c4   :  { %v1640_v32 = vrot.slane %v1525_v17, %v5600_v1  ;;  %8923 = vst [vmem:[#allocation125_spill] sm:$0xff] %v5935_v51  ;;  %1558 = vadd.xlane.f32.xlu0 %v1502_v18  ;;  %v928_v17 = vmul.f32 %v5773_v24, %v8639_v38  ;;  %v8642_v7 = vmax.f32 %v5935_v51, 0.0  ;;  %v5977_v38 = vadd.f32 %v5407_v14, %v4803_v59 }
 0x1c5   :  { %8925 = vst [vmem:[#allocation76_spill] sm:$0xff] %v5939_v15  ;;  %v5941_v34 = vpop.xlane.xlu0 %2650  ;;  %v8644_v2 = vmax.f32 %v5939_v15, 0.0 }
 0x1c6   :  { %v1641_v62 = vsel %vm1041_vm0, %v1640_v32, %v1636_v30  ;;  %1560 = vadd.xlane.f32.xlu1 %v1503_v31  ;;  %v5962_v31 = vadd.f32 %v5411_v61, %v4797_v56  ;;  %v929_v40 = vmul.f32 %v5773_v24, %v8642_v7  ;;  %8929 = vst [vmem:[#allocation127_spill] sm:$0xff] %v5977_v38  ;;  %v8932_v7 = vld [vmem:[#allocation79_spill] sm:$0xff] }
 0x1c7   :  { %v5951_v22 = vsel %vm1182_vm3, %v1641_v62, %v1751_v35  ;;  %v5953_v18 = vpop.xlane.xlu1 %2652  ;;  %v8927_v35 = vld [vmem:[#allocation74_spill] sm:$0xff]  ;;  %v2068_v61 = vmul.f32 %v5798_v57, %v8644_v2  ;;  %v5992_v14 = vadd.f32 %v8932_v7, %v4821_v4  ;;  %v2632_v2 = vmul.f32 %v5854_v39, %v8652_v6 }
 0x1c8   :  { %8926 = vst [vmem:[#allocation126_spill] sm:$0xff] %v5962_v31  ;;  %2686 = vadd.xlane.f32.xlu0 %v2630_v48  ;;  %v5968_v32 = vadd.f32 %v8927_v35, %v4803_v59  ;;  %v8647_v48 = vmax.f32 %v5962_v31, 0.0  ;;  %v8942_v6 = vld [vmem:[#allocation82_spill] sm:$0xff] }
 0x1c9   :  { %v5964_v30 = vpop.xlane.xlu0 %950  ;;  %8933 = vst [vmem:[#allocation79_spill] sm:$0xff] %v5992_v14 }
 0x1ca   :  { %8928 = vst [vmem:[#allocation74_spill] sm:$0xff] %v5968_v32  ;;  %2688 = vadd.xlane.f32.xlu1 %v2631_v36  ;;  %v6002_v36 = vadd.f32 %v5432_v10, %v4794_v55 }
 0x1cb   :  { %v5970_v62 = vpop.xlane.xlu1 %952 }
 0x1cc   :  { %986 = vadd.xlane.f32.xlu0 %v928_v17  ;;  %v2069_v17 = vmul.f32 %v5798_v57, %v8647_v48  ;;  %8934 = vst [vmem:[#allocation128_spill] sm:$0xff] %v6002_v36  ;;  %v8936_v48 = vmax.f32 %v5977_v38, 0.0  ;;  %v8940_v3 = vmax.f32 %v6002_v36, 0.0 }
 0x1cd   :  { %v5983_v35 = vpop.xlane.xlu0 %2090 }
 0x1ce   :  { %988 = vadd.xlane.f32.xlu1 %v929_v40  ;;  %v8935_v40 = vmax.f32 %v5968_v32, 0.0 }
 0x1cf   :  { %v5994_v11 = vpop.xlane.xlu1 %2092 }
 0x1d0   :  { %2126 = vadd.xlane.f32.xlu0 %v2068_v61  ;;  %v1504_v7 = vmul.f32 %v5829_v16, %v8935_v40  ;;  %v1505_v61 = vmul.f32 %v5829_v16, %v8936_v48  ;;  %v6023_v40 = vadd.f32 %v5444_v37, %v4797_v56  ;;  %v8939_v48 = vmax.f32 %v5992_v14, 0.0  ;;  %v8944_v14 = vld [vmem:[#allocation84_spill] sm:$0xff] }
 0x1d1   :  { %v6004_v52 = vpop.xlane.xlu0 %1526  ;;  %v8659_v37 = vmax.f32 %v6019_v63, 0.0  ;;  %v6052_v36 = vadd.f32 %v8944_v14, %v4803_v59  ;;  %v8947_v14 = vld [vmem:[#allocation85_spill] sm:$0xff] }
 0x1d2   :  { %2128 = vadd.xlane.f32.xlu1 %v2069_v17  ;;  %8938 = vst [vmem:[#allocation130_spill] sm:$0xff] %v6023_v40  ;;  %v2633_v10 = vmul.f32 %v5854_v39, %v8939_v48  ;;  %v6048_v48 = vadd.f32 %v8942_v6, %v4803_v59  ;;  %v8946_v8 = vmax.f32 %v6023_v40, 0.0  ;;  %v6068_v15 = vadd.f32 %v8947_v14, %v4821_v4 }
 0x1d3   :  { %v6011_v21 = vpop.xlane.xlu1 %1528  ;;  %8945 = vst [vmem:[#allocation84_spill] sm:$0xff] %v6052_v36  ;;  %v931_v32 = vmul.f32 %v5773_v24, %v8659_v37  ;;  %v8949_v37 = vld [vmem:[#allocation87_spill] sm:$0xff] }
 0x1d4   :  { %1562 = vadd.xlane.f32.xlu0 %v1504_v7  ;;  %v930_v7 = vmul.f32 %v5773_v24, %v8940_v3  ;;  %8943 = vst [vmem:[#allocation82_spill] sm:$0xff] %v6048_v48  ;;  %8948 = vst [vmem:[#allocation85_spill] sm:$0xff] %v6068_v15  ;;  %v8667_v40 = vmax.f32 %v6068_v15, 0.0 }
 0x1d5   :  { %v6025_v17 = vpop.xlane.xlu0 %2654 }
 0x1d6   :  { %1564 = vadd.xlane.f32.xlu1 %v1505_v61 }
 0x1d7   :  { %v6033_v38 = vpop.xlane.xlu1 %2656 }
 0x1d8   :  { %2690 = vadd.xlane.f32.xlu0 %v2632_v2  ;;  %v2070_v2 = vmul.f32 %v5798_v57, %v8946_v8  ;;  %v2071_v8 = vmul.f32 %v5798_v57, %v8661_v33  ;;  %v8953_v33 = vmax.f32 %v6052_v36, 0.0  ;;  %v8671_v36 = vmax.f32 %v6099_v58, 0.0 }
 0x1d9   :  { %v6044_v61 = vpop.xlane.xlu0 %954 }
 0x1da   :  { %2692 = vadd.xlane.f32.xlu1 %v2633_v10  ;;  %v6082_v10 = vadd.f32 %v5478_v43, %v4794_v55  ;;  %v1507_v25 = vmul.f32 %v5829_v16, %v8953_v33  ;;  %v2634_v33 = vmul.f32 %v5854_v39, %v8667_v40 }
 0x1db   :  { %v6054_v3 = vpop.xlane.xlu1 %956 }
 0x1dc   :  { %990 = vadd.xlane.f32.xlu0 %v930_v7  ;;  %v6078_v7 = vadd.f32 %v8949_v37, %v4821_v4  ;;  %8951 = vst [vmem:[#allocation132_spill] sm:$0xff] %v6082_v10 }
 0x1dd   :  { %v6063_v6 = vpop.xlane.xlu0 %2094 }
 0x1de   :  { %992 = vadd.xlane.f32.xlu1 %v931_v32  ;;  %8950 = vst [vmem:[#allocation87_spill] sm:$0xff] %v6078_v7  ;;  %v8952_v32 = vmax.f32 %v6048_v48, 0.0  ;;  %v8958_v55 = vmax.f32 %v6078_v7, 0.0 }
 0x1df   :  { %v6071_v63 = vpop.xlane.xlu1 %2096 }
 0x1e0   :  { %2130 = vadd.xlane.f32.xlu0 %v2070_v2  ;;  %v1506_v53 = vmul.f32 %v5829_v16, %v8952_v32  ;;  %v8955_v32 = vld [vmem:[#allocation92_spill] sm:$0xff]  ;;  %v6112_v2 = vadd.f32 %v5507_v12, %v4797_v56  ;;  %v2635_v26 = vmul.f32 %v5854_v39, %v8958_v55  ;;  %v933_v55 = vmul.f32 %v5773_v24, %v8671_v36 }
 0x1e1   :  { %v6084_v14 = vpop.xlane.xlu0 %1530  ;;  %v6103_v48 = vadd.f32 %v8955_v32, %v4797_v56 }
 0x1e2   :  { %2132 = vadd.xlane.f32.xlu1 %v2071_v8  ;;  %8957 = vst [vmem:[#allocation134_spill] sm:$0xff] %v6112_v2  ;;  %v8965_v58 = vmax.f32 %v6112_v2, 0.0 }
 0x1e3   :  { %v6093_v37 = vpop.xlane.xlu1 %1532  ;;  %8956 = vst [vmem:[#allocation92_spill] sm:$0xff] %v6103_v48  ;;  %v8672_v15 = vmax.f32 %v6103_v48, 0.0 }
 0x1e4   :  { %1566 = vadd.xlane.f32.xlu0 %v1506_v53  ;;  %v8959_v53 = vmax.f32 %v6082_v10, 0.0 }
 0x1e5   :  { %v6105_v8 = vpop.xlane.xlu0 %2658 }
 0x1e6   :  { %1568 = vadd.xlane.f32.xlu1 %v1507_v25  ;;  %v932_v32 = vmul.f32 %v5773_v24, %v8959_v53  ;;  %v8960_v25 = vld [vmem:[#allocation90_spill] sm:$0xff]  ;;  %v2072_v53 = vmul.f32 %v5798_v57, %v8672_v15  ;;  %v2073_v24 = vmul.f32 %v5798_v57, %v8965_v58 }
 0x1e7   :  { %v2661_v43 = vpop.xlane.xlu1 %2660  ;;  %v6126_v56 = vadd.f32 %v8960_v25, %v4803_v59  ;;  %v8963_v25 = vld [vmem:[#allocation94_spill] sm:$0xff] }
 0x1e8   :  { %2694 = vadd.xlane.f32.xlu0 %v2634_v33  ;;  %v6136_v33 = vadd.f32 %v5503_v28, %v4803_v59  ;;  %v6143_v10 = vadd.f32 %v8963_v25, %v4821_v4  ;;  %v6157_v25 = vadd.f32 %v5513_v27, %v4821_v4 }
 0x1e9   :  { %v6122_v40 = vpop.xlane.xlu0 %958  ;;  %8961 = vst [vmem:[#allocation90_spill] sm:$0xff] %v6126_v56  ;;  %v8673_v12 = vmax.f32 %v6126_v56, 0.0 }
 0x1ea   :  { %2696 = vadd.xlane.f32.xlu1 %v2635_v26  ;;  %8962 = vst [vmem:[#allocation135_spill] sm:$0xff] %v6136_v33  ;;  %8964 = vst [vmem:[#allocation94_spill] sm:$0xff] %v6143_v10  ;;  %v8675_v28 = vmax.f32 %v6136_v33, 0.0  ;;  %v8676_v36 = vmax.f32 %v6143_v10, 0.0  ;;  %v8677_v4 = vmax.f32 %v6157_v25, 0.0 }
 0x1eb   :  { %v6129_v7 = vpop.xlane.xlu1 %960  ;;  %8966 = vst [vmem:[#allocation136_spill] sm:$0xff] %v6157_v25  ;;  %v1508_v15 = vmul.f32 %v5829_v16, %v8673_v12 }
 0x1ec   :  { %994 = vadd.xlane.f32.xlu0 %v932_v32  ;;  %v1509_v57 = vmul.f32 %v5829_v16, %v8675_v28 }
 0x1ed   :  { %v6145_v26 = vpop.xlane.xlu0 %2098 }
 0x1ee   :  { %996 = vadd.xlane.f32.xlu1 %v933_v55  ;;  %v2636_v55 = vmul.f32 %v5854_v39, %v8676_v36 }
 0x1ef   :  { %v6151_v59 = vpop.xlane.xlu1 %2100 }
 0x1f0   :  { %2134 = vadd.xlane.f32.xlu0 %v2072_v53 }
 0x1f1   :  { %v6159_v32 = vpop.xlane.xlu0 %1534 }
 0x1f2   :  { %2136 = vadd.xlane.f32.xlu1 %v2073_v24  ;;  %v2637_v24 = vmul.f32 %v5854_v39, %v8677_v4  ;;  %v2764_v39 = vrot.slane %v5941_v34, %v5597_v49 }
 0x1f3   :  { %v6164_v58 = vpop.xlane.xlu1 %1536 }
 0x1f4   :  { %1570 = vadd.xlane.f32.xlu0 %v1508_v15  ;;  %v2768_v15 = vrot.slane %v5953_v18, %v5600_v1  ;;  %v2782_v18 = vrot.slane %v6105_v8, %v5597_v49  ;;  %v8682_v8 = vstv %s8514_s0 }
 0x1f5   :  { %v2663_v27 = vpop.xlane.xlu0 %2662  ;;  %vm6223_vm8 = vcmp.lt.s32.totalorder %v4779_v50, %v8682_v8 }
 0x1f6   :  { %1572 = vadd.xlane.f32.xlu1 %v1509_v57  ;;  %v2777_v57 = vrot.slane %v6033_v38, %v5600_v1  ;;  %v2769_v10 = vsel %vm1041_vm0, %v2768_v15, %v2764_v39  ;;  %v2791_v33 = vrot.slane %v2663_v27, %v5597_v49 }
 0x1f7   :  { %v2665_v53 = vpop.xlane.xlu1 %2664 }
 0x1f8   :  { %2698 = vadd.xlane.f32.xlu0 %v2636_v55  ;;  %v2786_v55 = vrot.slane %v2661_v43, %v5600_v1  ;;  %v2795_v4 = vrot.slane %v2665_v53, %v5600_v1  ;;  %v2880_v43 = vsel %vm1182_vm3, %v2769_v10, %v5887_v44 }
 0x1f9   :  { %v6176_v12 = vpop.xlane.xlu0 %962 }
 0x1fa   :  { %2700 = vadd.xlane.f32.xlu1 %v2637_v24  ;;  %v2773_v24 = vrot.slane %v6025_v17, %v5597_v49  ;;  %v2787_v34 = vsel %vm1041_vm0, %v2786_v55, %v2782_v18  ;;  %v2796_v17 = vsel %vm1041_vm0, %v2795_v4, %v2791_v33 }
 0x1fb   :  { %v6178_v2 = vpop.xlane.xlu1 %964 }
 0x1fc   :  { %v2778_v38 = vsel %vm1041_vm0, %v2777_v57, %v2773_v24 }
 0x1fd   :  { %v6180_v16 = vpop.xlane.xlu0 %2102  ;;  %v2881_v15 = vsel %vm1184_vm4, %v2778_v38, %v2880_v43 }
 0x1fe   :  { %v2882_v39 = vsel %vm1186_vm5, %v2787_v34, %v2881_v15 }
 0x1ff   :  { %v6182_v28 = vpop.xlane.xlu1 %2104  ;;  %v2883_v44 = vsel %vm1188_vm6, %v2796_v17, %v2882_v39 }
 0x201   :  { %v6188_v36 = vpop.xlane.xlu0 %1538 }
 0x203   :  { %v6196_v25 = vpop.xlane.xlu1 %1540 }
 0x205   :  { %v2667_v56 = vpop.xlane.xlu0 %2666 }
 0x206   :  { %v2800_v57 = vrot.slane %v2667_v56, %v5597_v49 }
 0x207   :  { %v2669_v53 = vpop.xlane.xlu1 %2668 }
 0x208   :  { %v2804_v27 = vrot.slane %v2669_v53, %v5600_v1 }
 0x209   :  { %v6214_v55 = vpop.xlane.xlu0 %966 }
 0x20a   :  { %v2805_v10 = vsel %vm1041_vm0, %v2804_v27, %v2800_v57 }
 0x20b   :  { %v2884_v56 = vsel %vm1190_vm7, %v2805_v10, %v2883_v44  ;;  %v6228_v4 = vpop.xlane.xlu1 %968 }
 0x20c   :  { %v6232_v24 = vsel %vm6223_vm8, %v2884_v56, -1e+30 }
 0x20d   :  { %8969 = vst [vmem:[#allocation137_spill] sm:$0xff] %v6232_v24  ;;  %v6234_v18 = vpop.xlane.xlu0 %2106 }
 0x20f   :  { %v6236_v38 = vpop.xlane.xlu1 %2108 }
 0x211   :  { %v6238_v34 = vpop.xlane.xlu0 %1542 }
 0x213   :  { %v6240_v43 = vpop.xlane.xlu1 %1544 }
 0x215   :  { %v6242_v17 = vpop.xlane.xlu0 %2670 }
 0x216   :  { %8970 = vst [vmem:[#allocation138_spill] sm:$0xff] %v6242_v17 }
 0x217   :  { %v6244_v53 = vpop.xlane.xlu1 %2672 }
 0x219   :  { %v6246_v15 = vpop.xlane.xlu0 %970 }
 0x21b   :  { %v6248_v57 = vpop.xlane.xlu1 %972 }
 0x21d   :  { %v6250_v27 = vpop.xlane.xlu0 %2110 }
 0x21f   :  { %v6252_v39 = vpop.xlane.xlu1 %2112 }
 0x221   :  { %v6254_v44 = vpop.xlane.xlu0 %1546 }
 0x223   :  { %v6256_v10 = vpop.xlane.xlu1 %1548 }
 0x225   :  { %v6258_v56 = vpop.xlane.xlu0 %2674 }
 0x227   :  { %v6260_v8 = vpop.xlane.xlu1 %2676 }
 0x229   :  { %v6262_v48 = vpop.xlane.xlu0 %974 }
 0x22b   :  { %v6264_v51 = vpop.xlane.xlu1 %976 }
 0x22d   :  { %v6266_v23 = vpop.xlane.xlu0 %2114 }
 0x22f   :  { %v6268_v42 = vpop.xlane.xlu1 %2116 }
 0x231   :  { %v6270_v60 = vpop.xlane.xlu0 %1550 }
 0x233   :  { %v6272_v9 = vpop.xlane.xlu1 %1552 }
 0x235   :  { %v6274_v29 = vpop.xlane.xlu0 %2678 }
 0x236   :  { %8971 = vst [vmem:[#allocation139_spill] sm:$0xff] %v6274_v29 }
 0x237   :  { %v6276_v5 = vpop.xlane.xlu1 %2680 }
 0x239   :  { %v6278_v20 = vpop.xlane.xlu0 %978 }
 0x23a   :  { %8972 = vst [vmem:[#allocation140_spill] sm:$0xff] %v6278_v20 }
 0x23b   :  { %v6280_v31 = vpop.xlane.xlu1 %980 }
 0x23c   :  { %8973 = vst [vmem:[#allocation141_spill] sm:$0xff] %v6280_v31 }
 0x23d   :  { %v6282_v13 = vpop.xlane.xlu0 %2118 }
 0x23e   :  { %8974 = vst [vmem:[#allocation142_spill] sm:$0xff] %v6282_v13 }
 0x23f   :  { %v6284_v54 = vpop.xlane.xlu1 %2120 }
 0x241   :  { %v6286_v0 = vpop.xlane.xlu0 %1554 }
 0x242   :  { %8975 = vst [vmem:[#allocation143_spill] sm:$0xff] %v6286_v0  ;;  %v1077_v0 = vrot.slane %v5970_v62, %v5600_v1  ;;  %v2209_v62 = vrot.slane %v5983_v35, %v5597_v49  ;;  %v1649_v35 = vrot.slane %v6011_v21, %v5600_v1 }
 0x243   :  { %v6288_v45 = vpop.xlane.xlu1 %1556 }
 0x244   :  { %8976 = vst [vmem:[#allocation144_spill] sm:$0xff] %v6288_v45 }
 0x245   :  { %v6290_v46 = vpop.xlane.xlu0 %2682 }
 0x246   :  { %8977 = vst [vmem:[#allocation145_spill] sm:$0xff] %v6290_v46  ;;  %v1073_v46 = vrot.slane %v5964_v30, %v5597_v49  ;;  %v2231_v30 = vrot.slane %v6151_v59, %v5600_v1 }
 0x247   :  { %v6292_v47 = vpop.xlane.xlu1 %2684 }
 0x249   :  { %v6294_v24 = vpop.xlane.xlu0 %982 }
 0x24a   :  { %8978 = vst [vmem:[#allocation146_spill] sm:$0xff] %v6294_v24  ;;  %v2213_v24 = vrot.slane %v5994_v11, %v5600_v1 }
 0x24b   :  { %v6296_v29 = vpop.xlane.xlu1 %984 }
 0x24c   :  { %8979 = vst [vmem:[#allocation147_spill] sm:$0xff] %v6296_v29 }
 0x24d   :  { %v6298_v17 = vpop.xlane.xlu0 %2122 }
 0x24e   :  { %8980 = vst [vmem:[#allocation148_spill] sm:$0xff] %v6298_v17  ;;  %v1086_v17 = vrot.slane %v6054_v3, %v5600_v1  ;;  %v2218_v3 = vrot.slane %v6063_v6, %v5597_v49 }
 0x24f   :  { %v6300_v20 = vpop.xlane.xlu1 %2124 }
 0x251   :  { %v6302_v31 = vpop.xlane.xlu0 %1558 }
 0x252   :  { %8981 = vst [vmem:[#allocation149_spill] sm:$0xff] %v6302_v31  ;;  %v2222_v31 = vrot.slane %v6071_v63, %v5600_v1  ;;  %v2240_v63 = vrot.slane %v6182_v28, %v5600_v1  ;;  %v1100_v28 = vrot.slane %v6176_v12, %v5597_v49 }
 0x253   :  { %v6304_v13 = vpop.xlane.xlu1 %1560 }
 0x254   :  { %8982 = vst [vmem:[#allocation150_spill] sm:$0xff] %v6304_v13  ;;  %v1078_v13 = vsel %vm1041_vm0, %v1077_v0, %v1073_v46  ;;  %v1104_v46 = vrot.slane %v6178_v2, %v5600_v1  ;;  %v2214_v0 = vsel %vm1041_vm0, %v2213_v24, %v2209_v62  ;;  %v2223_v2 = vsel %vm1041_vm0, %v2222_v31, %v2218_v3 }
 0x255   :  { %v6308_v45 = vpop.xlane.xlu0 %2686  ;;  %v2236_v24 = vrot.slane %v6180_v16, %v5597_v49  ;;  %v1185_v21 = vsel %vm1184_vm4, %v1078_v13, %v5907_v19  ;;  %v1658_v31 = vrot.slane %v6093_v37, %v5600_v1  ;;  %v1676_v3 = vrot.slane %v6196_v25, %v5600_v1 }
 0x256   :  { %8983 = vst [vmem:[#allocation151_spill] sm:$0xff] %v6308_v45  ;;  %v1095_v45 = vrot.slane %v6129_v7, %v5600_v1  ;;  %v1091_v7 = vrot.slane %v6122_v40, %v5597_v49  ;;  %v1645_v40 = vrot.slane %v6004_v52, %v5597_v49  ;;  %v1105_v12 = vsel %vm1041_vm0, %v1104_v46, %v1100_v28 }
 0x257   :  { %v6314_v29 = vpop.xlane.xlu1 %2688  ;;  %v2241_v16 = vsel %vm1041_vm0, %v2240_v63, %v2236_v24  ;;  %v1667_v52 = vrot.slane %v6164_v58, %v5600_v1  ;;  %v1663_v46 = vrot.slane %v6159_v32, %v5597_v49 }
 0x258   :  { %8984 = vst [vmem:[#allocation152_spill] sm:$0xff] %v6314_v29  ;;  %v1082_v29 = vrot.slane %v6044_v61, %v5597_v49  ;;  %v2227_v61 = vrot.slane %v6145_v26, %v5597_v49  ;;  %v1096_v26 = vsel %vm1041_vm0, %v1095_v45, %v1091_v7  ;;  %v1650_v13 = vsel %vm1041_vm0, %v1649_v35, %v1645_v40 }
 0x259   :  { %v6327_v11 = vpop.xlane.xlu0 %986  ;;  %v1753_v7 = vsel %vm1184_vm4, %v1650_v13, %v5951_v22  ;;  %v2245_v13 = vrot.slane %v6234_v18, %v5597_v49  ;;  %v1690_v18 = vrot.slane %v6254_v44, %v5597_v49 }
 0x25a   :  { %8985 = vst [vmem:[#allocation153_spill] sm:$0xff] %v6327_v11  ;;  %v1087_v6 = vsel %vm1041_vm0, %v1086_v17, %v1082_v29  ;;  %v2232_v62 = vsel %vm1041_vm0, %v2231_v30, %v2227_v61  ;;  %v2317_v29 = vsel %vm1184_vm4, %v2214_v0, %v5928_v41  ;;  %v1654_v41 = vrot.slane %v6084_v14, %v5597_v49 }
 0x25b   :  { %v6344_v59 = vpop.xlane.xlu1 %988  ;;  %v1187_v19 = vsel %vm1186_vm5, %v1087_v6, %v1185_v21  ;;  %v2318_v45 = vsel %vm1186_vm5, %v2223_v2, %v2317_v29  ;;  %v1672_v14 = vrot.slane %v6188_v36, %v5597_v49  ;;  %v1668_v61 = vsel %vm1041_vm0, %v1667_v52, %v1663_v46 }
 0x25c   :  { %v1189_v37 = vsel %vm1188_vm6, %v1096_v26, %v1187_v19  ;;  %v2319_v30 = vsel %vm1188_vm6, %v2232_v62, %v2318_v45  ;;  %v1659_v35 = vsel %vm1041_vm0, %v1658_v31, %v1654_v41  ;;  %v1113_v36 = vrot.slane %v6228_v4, %v5600_v1 }
 0x25d   :  { %v6358_v11 = vpop.xlane.xlu0 %2126  ;;  %v1191_v63 = vsel %vm1190_vm7, %v1105_v12, %v1189_v37  ;;  %v2320_v0 = vsel %vm1190_vm7, %v2241_v16, %v2319_v30  ;;  %v1677_v2 = vsel %vm1041_vm0, %v1676_v3, %v1672_v14  ;;  %v1754_v22 = vsel %vm1186_vm5, %v1659_v35, %v1753_v7  ;;  %v8987_v14 = vld [vmem:[#allocation139_spill] sm:$0xff] }
 0x25e   :  { %v6395_v32 = vsel %vm6223_vm8, %v1191_v63, -1e+30  ;;  %v6399_v6 = vsel %vm6223_vm8, %v2320_v0, -1e+30  ;;  %v1755_v24 = vsel %vm1188_vm6, %v1668_v61, %v1754_v22  ;;  %v1109_v21 = vrot.slane %v6214_v55, %v5597_v49 }
 0x25f   :  { %v6371_v17 = vpop.xlane.xlu1 %2128  ;;  %v6412_v40 = vsel %vm1203_vm9, %v6395_v32, -inf  ;;  %v6416_v26 = vsel %vm1203_vm9, %v6399_v6, -inf  ;;  %v6419_v62 = vsel %vm1190_vm7, %v1677_v2, %v1755_v24  ;;  %v6424_v29 = vadd.s32 8, %v4779_v50 }
 0x260   :  { %v1114_v31 = vsel %vm1041_vm0, %v1113_v36, %v1109_v21  ;;  %v1122_v55 = vrot.slane %v6248_v57, %v5600_v1  ;;  %v2258_v12 = vrot.slane %v6252_v39, %v5600_v1  ;;  %v1694_v16 = vrot.slane %v6256_v10, %v5600_v1 }
 0x261   :  { %v6383_v58 = vpop.xlane.xlu0 %1562  ;;  %v2249_v19 = vrot.slane %v6236_v38, %v5600_v1  ;;  %v1681_v45 = vrot.slane %v6238_v34, %v5597_v49  ;;  %v1685_v52 = vrot.slane %v6240_v43, %v5600_v1  ;;  %v1118_v57 = vrot.slane %v6246_v15, %v5597_v49 }
 0x262   :  { %v2254_v39 = vrot.slane %v6250_v27, %v5597_v49  ;;  %v2822_v38 = vrot.slane %v6260_v8, %v5600_v1  ;;  %v2813_v34 = vrot.slane %v6244_v53, %v5600_v1  ;;  %v1131_v43 = vrot.slane %v6264_v51, %v5600_v1 }
 0x263   :  { %v6391_v25 = vpop.xlane.xlu1 %1564  ;;  %v2267_v10 = vrot.slane %v6268_v42, %v5600_v1  ;;  %v1703_v15 = vrot.slane %v6272_v9, %v5600_v1  ;;  %v1123_v27 = vsel %vm1041_vm0, %v1122_v55, %v1118_v57  ;;  %v1695_v8 = vsel %vm1041_vm0, %v1694_v16, %v1690_v18  ;;  %v8988_v55 = vld [vmem:[#allocation141_spill] sm:$0xff] }
 0x264   :  { %v2259_v44 = vsel %vm1041_vm0, %v2258_v12, %v2254_v39  ;;  %v2818_v53 = vrot.slane %v6258_v56, %v5597_v49  ;;  %v1127_v51 = vrot.slane %v6262_v48, %v5597_v49  ;;  %v2263_v42 = vrot.slane %v6266_v23, %v5597_v49  ;;  %v8986_v56 = vld [vmem:[#allocation138_spill] sm:$0xff]  ;;  %v8990_v39 = vld [vmem:[#allocation140_spill] sm:$0xff] }
 0x265   :  { %v6405_v28 = vpop.xlane.xlu0 %2690  ;;  %v1699_v9 = vrot.slane %v6270_v60, %v5597_v49  ;;  %v2831_v30 = vrot.slane %v6276_v5, %v5600_v1  ;;  %v2250_v46 = vsel %vm1041_vm0, %v2249_v19, %v2245_v13  ;;  %v1686_v63 = vsel %vm1041_vm0, %v1685_v52, %v1681_v45  ;;  %v8989_v52 = vld [vmem:[#allocation144_spill] sm:$0xff] }
 0x266   :  { %v2809_v0 = vrot.slane %v8986_v56, %v5597_v49  ;;  %v2823_v48 = vsel %vm1041_vm0, %v2822_v38, %v2818_v53  ;;  %v1132_v35 = vsel %vm1041_vm0, %v1131_v43, %v1127_v51  ;;  %v2268_v23 = vsel %vm1041_vm0, %v2267_v10, %v2263_v42  ;;  %v8991_v38 = vld [vmem:[#allocation142_spill] sm:$0xff]  ;;  %v8992_v43 = vld [vmem:[#allocation147_spill] sm:$0xff] }
 0x267   :  { %v6421_v4 = vpop.xlane.xlu1 %2692  ;;  %v1704_v60 = vsel %vm1041_vm0, %v1703_v15, %v1699_v9  ;;  %v2827_v5 = vrot.slane %v8987_v14, %v5597_v49  ;;  %v1192_v2 = vsel %vm1178_vm1, %v1123_v27, %v1114_v31  ;;  %v2321_v36 = vsel %vm1178_vm1, %v2259_v44, %v2250_v46  ;;  %v8993_v44 = vld [vmem:[#allocation143_spill] sm:$0xff]  ;;  %v8994_v9 = vld [vmem:[#allocation145_spill] sm:$0xff]  ;;  %v8995_v46 = vld [vmem:[#allocation146_spill] sm:$0xff] }
 0x268   :  { %v2814_v61 = vsel %vm1041_vm0, %v2813_v34, %v2809_v0  ;;  %v1757_v22 = vsel %vm1178_vm1, %v1695_v8, %v1686_v63  ;;  %v1140_v12 = vrot.slane %v8988_v55, %v5600_v1  ;;  %v2276_v16 = vrot.slane %v6284_v54, %v5600_v1 }
 0x269   :  { %v6441_v41 = vpop.xlane.xlu0 %990  ;;  %v2885_v24 = vsel %vm1178_vm1, %v2823_v48, %v2814_v61  ;;  %v2832_v21 = vsel %vm1041_vm0, %v2831_v30, %v2827_v5  ;;  %v1193_v19 = vsel %vm1180_vm2, %v1132_v35, %v1192_v2  ;;  %v2322_v31 = vsel %vm1180_vm2, %v2268_v23, %v2321_v36  ;;  %v8999_v48 = vld [vmem:[#allocation148_spill] sm:$0xff]  ;;  %v9000_v23 = vld [vmem:[#allocation153_spill] sm:$0xff] }
 0x26a   :  { %v1758_v45 = vsel %vm1180_vm2, %v1704_v60, %v1757_v22  ;;  %v1712_v57 = vrot.slane %v8989_v52, %v5600_v1  ;;  %v1136_v18 = vrot.slane %v8990_v39, %v5597_v49  ;;  %v2272_v34 = vrot.slane %v8991_v38, %v5597_v49  ;;  %v9002_v52 = vld [vmem:[#allocation149_spill] sm:$0xff] }
 0x26b   :  { %v6459_v37 = vpop.xlane.xlu1 %992  ;;  %v2840_v54 = vrot.slane %v6292_v47, %v5600_v1  ;;  %v1149_v10 = vrot.slane %v8992_v43, %v5600_v1  ;;  %v2886_v27 = vsel %vm1180_vm2, %v2832_v21, %v2885_v24  ;;  %v1708_v8 = vrot.slane %v8993_v44, %v5597_v49 }
 0x26c   :  { %v2285_v53 = vrot.slane %v6300_v20, %v5600_v1  ;;  %v1158_v51 = vrot.slane %v6344_v59, %v5600_v1  ;;  %v1141_v42 = vsel %vm1041_vm0, %v1140_v12, %v1136_v18  ;;  %v2277_v47 = vsel %vm1041_vm0, %v2276_v16, %v2272_v34 }
 0x26d   :  { %v6474_v3 = vpop.xlane.xlu0 %2130  ;;  %v2836_v30 = vrot.slane %v8994_v9, %v5597_v49  ;;  %v1145_v63 = vrot.slane %v8995_v46, %v5597_v49  ;;  %v8996_v0 = vstv %s8514_s0  ;;  %v1713_v59 = vsel %vm1041_vm0, %v1712_v57, %v1708_v8 }
 0x26e   :  { %vm6535_vm10 = vcmp.lt.s32.totalorder %v6424_v29, %v8996_v0  ;;  %v2281_v35 = vrot.slane %v8999_v48, %v5597_v49  ;;  %v1154_v60 = vrot.slane %v9000_v23, %v5597_v49  ;;  %v1167_v14 = vrot.slane %v6459_v37, %v5600_v1  ;;  %v9001_v29 = vld [vmem:[#allocation150_spill] sm:$0xff] }
 0x26f   :  { %v6486_v7 = vpop.xlane.xlu1 %2132  ;;  %v2841_v5 = vsel %vm1041_vm0, %v2840_v54, %v2836_v30  ;;  %v1150_v61 = vsel %vm1041_vm0, %v1149_v10, %v1145_v63  ;;  %v1721_v2 = vrot.slane %v9001_v29, %v5600_v1  ;;  %v2294_v36 = vrot.slane %v6371_v17, %v5600_v1 }
 0x270   :  { %v1194_v24 = vsel %vm1182_vm3, %v1141_v42, %v1193_v19  ;;  %v2286_v21 = vsel %vm1041_vm0, %v2285_v53, %v2281_v35  ;;  %v1159_v55 = vsel %vm1041_vm0, %v1158_v51, %v1154_v60  ;;  %v1163_v37 = vrot.slane %v6441_v41, %v5597_v49  ;;  %v9004_v53 = vld [vmem:[#allocation152_spill] sm:$0xff] }
 0x271   :  { %v6498_v13 = vpop.xlane.xlu0 %1566  ;;  %v2323_v12 = vsel %vm1182_vm3, %v2277_v47, %v2322_v31  ;;  %v1759_v16 = vsel %vm1182_vm3, %v1713_v59, %v1758_v45  ;;  %v1717_v57 = vrot.slane %v9002_v52, %v5597_v49  ;;  %v2290_v17 = vrot.slane %v6358_v11, %v5597_v49 }
 0x272   :  { %v2887_v19 = vsel %vm1182_vm3, %v2841_v5, %v2886_v27  ;;  %v1195_v18 = vsel %vm1184_vm4, %v1150_v61, %v1194_v24  ;;  %v1168_v38 = vsel %vm1041_vm0, %v1167_v14, %v1163_v37  ;;  %v2303_v41 = vrot.slane %v6486_v7, %v5600_v1  ;;  %v9003_v7 = vld [vmem:[#allocation151_spill] sm:$0xff] }
 0x273   :  { %v6513_v15 = vpop.xlane.xlu1 %1568  ;;  %v2324_v31 = vsel %vm1184_vm4, %v2286_v21, %v2323_v12  ;;  %v1722_v45 = vsel %vm1041_vm0, %v1721_v2, %v1717_v57  ;;  %v1196_v34 = vsel %vm1186_vm5, %v1159_v55, %v1195_v18  ;;  %v2295_v54 = vsel %vm1041_vm0, %v2294_v36, %v2290_v17 }
 0x274   :  { %v1730_v11 = vrot.slane %v6391_v25, %v5600_v1  ;;  %v2299_v10 = vrot.slane %v6474_v3, %v5597_v49  ;;  %v2845_v8 = vrot.slane %v9003_v7, %v5597_v49  ;;  %v2849_v51 = vrot.slane %v9004_v53, %v5600_v1 }
 0x275   :  { %v6528_v56 = vpop.xlane.xlu0 %2694  ;;  %v1726_v42 = vrot.slane %v6383_v58, %v5597_v49  ;;  %v1197_v47 = vsel %vm1188_vm6, %v1168_v38, %v1196_v34  ;;  %v1739_v3 = vrot.slane %v6513_v15, %v5600_v1  ;;  %v1760_v63 = vsel %vm1184_vm4, %v1722_v45, %v1759_v16 }
 0x276   :  { %v2304_v25 = vsel %vm1041_vm0, %v2303_v41, %v2299_v10  ;;  %v2325_v0 = vsel %vm1186_vm5, %v2295_v54, %v2324_v31  ;;  %v2858_v59 = vrot.slane %v6421_v4, %v5600_v1  ;;  %v1735_v23 = vrot.slane %v6498_v13, %v5597_v49 }
 0x277   :  { %v6552_v22 = vpop.xlane.xlu1 %2696  ;;  %v1731_v35 = vsel %vm1041_vm0, %v1730_v11, %v1726_v42  ;;  %v2850_v14 = vsel %vm1041_vm0, %v2849_v51, %v2845_v8  ;;  %v2854_v5 = vrot.slane %v6405_v28, %v5597_v49  ;;  %v2326_v4 = vsel %vm1188_vm6, %v2304_v25, %v2325_v0 }
 0x278   :  { %v1740_v2 = vsel %vm1041_vm0, %v1739_v3, %v1735_v23  ;;  %v2867_v13 = vrot.slane %v6552_v22, %v5600_v1  ;;  %v1761_v21 = vsel %vm1186_vm5, %v1731_v35, %v1760_v63  ;;  %v2863_v28 = vrot.slane %v6528_v56, %v5597_v49 }
 0x279   :  { %v995_v39 = vpop.xlane.xlu0 %994  ;;  %v2859_v55 = vsel %vm1041_vm0, %v2858_v59, %v2854_v5  ;;  %v1766_v57 = vsel %vm6223_vm8, %v6419_v62, -1e+30  ;;  %v2888_v17 = vsel %vm1184_vm4, %v2850_v14, %v2887_v19 }
 0x27a   :  { %v1172_v27 = vrot.slane %v995_v39, %v5597_v49  ;;  %v1762_v39 = vsel %vm1188_vm6, %v1740_v2, %v1761_v21  ;;  %v2868_v38 = vsel %vm1041_vm0, %v2867_v13, %v2863_v28  ;;  %v2889_v34 = vsel %vm1186_vm5, %v2859_v55, %v2888_v17 }
 0x27b   :  { %v997_v43 = vpop.xlane.xlu1 %996 }
 0x27c   :  { %v1176_v44 = vrot.slane %v997_v43, %v5600_v1 }
 0x27d   :  { %v2135_v9 = vpop.xlane.xlu0 %2134 }
 0x27e   :  { %v1177_v30 = vsel %vm1041_vm0, %v1176_v44, %v1172_v27  ;;  %v2308_v46 = vrot.slane %v2135_v9, %v5597_v49  ;;  %v1768_v27 = vsel %vm1203_vm9, %v1766_v57, -inf }
 0x27f   :  { %v1198_v58 = vsel %vm1190_vm7, %v1177_v30, %v1197_v47  ;;  %v2137_v48 = vpop.xlane.xlu1 %2136 }
 0x280   :  { %v1202_v15 = vsel %vm6535_vm10, %v1198_v58, -1e+30  ;;  %v2312_v60 = vrot.slane %v2137_v48, %v5600_v1 }
 0x281   :  { %v1205_v61 = vsel %vm1203_vm9, %v1202_v15, -inf  ;;  %v1571_v29 = vpop.xlane.xlu0 %1570 }
 0x282   :  { %v1206_v36 = vmax.f32 %v6412_v40, %v1205_v61  ;;  %v2313_v24 = vsel %vm1041_vm0, %v2312_v60, %v2308_v46  ;;  %v1744_v22 = vrot.slane %v1571_v29, %v5597_v49 }
 0x283   :  { %v2327_v37 = vsel %vm1190_vm7, %v2313_v24, %v2326_v4  ;;  %v1573_v12 = vpop.xlane.xlu1 %1572 }
 0x284   :  { %v1207_v16 = vrot.slane %v1206_v36, 4  ;;  %v2331_v52 = vsel %vm6535_vm10, %v2327_v37, -1e+30  ;;  %v1748_v40 = vrot.slane %v1573_v12, %v5600_v1 }
 0x285   :  { %v2333_v56 = vsel %vm1203_vm9, %v2331_v52, -inf  ;;  %v2699_v18 = vpop.xlane.xlu0 %2698 }
 0x286   :  { %v1208_v41 = vmax.f32 %v1206_v36, %v1207_v16  ;;  %v2334_v31 = vmax.f32 %v6416_v26, %v2333_v56  ;;  %v1749_v45 = vsel %vm1041_vm0, %v1748_v40, %v1744_v22  ;;  %v2872_v33 = vrot.slane %v2699_v18, %v5597_v49 }
 0x287   :  { %v1763_v54 = vsel %vm1190_vm7, %v1749_v45, %v1762_v39  ;;  %v2701_v62 = vpop.xlane.xlu1 %2700  ;;  %v2890_v26 = vsel %vm1188_vm6, %v2868_v38, %v2889_v34 }
 0x288   :  { %v1209_v19 = vrot.slane %v1208_v41, 2  ;;  %v2335_v43 = vrot.slane %v2334_v31, 4  ;;  %v1767_v11 = vsel %vm6535_vm10, %v1763_v54, -1e+30  ;;  %v2876_v10 = vrot.slane %v2701_v62, %v5600_v1  ;;  %v9005_v1 = vld [vmem:[#allocation137_spill] sm:$0xff] }
 0x289   :  { %v1769_v44 = vsel %vm1203_vm9, %v1767_v11, -inf  ;;  %v2896_v3 = vsel %vm1203_vm9, %v9005_v1, -inf }
 0x28a   :  { %v1210_v7 = vmax.f32 %v1208_v41, %v1209_v19  ;;  %v2336_v8 = vmax.f32 %v2334_v31, %v2335_v43  ;;  %v1770_v53 = vmax.f32 %v1768_v27, %v1769_v44  ;;  %v2877_v51 = vsel %vm1041_vm0, %v2876_v10, %v2872_v33 }
 0x28b   :  { %v2891_v49 = vsel %vm1190_vm7, %v2877_v51, %v2890_v26 }
 0x28c   :  { %v1211_v42 = vrot.slane %v1210_v7, 1  ;;  %v2337_v47 = vrot.slane %v2336_v8, 2  ;;  %v1771_v9 = vrot.slane %v1770_v53, 4  ;;  %v2895_v25 = vsel %vm6535_vm10, %v2891_v49, -1e+30 }
 0x28d   :  { %v2897_v30 = vsel %vm1203_vm9, %v2895_v25, -inf }
 0x28e   :  { %v1212_v46 = vmax.f32 %v1210_v7, %v1211_v42  ;;  %v2338_v63 = vmax.f32 %v2336_v8, %v2337_v47  ;;  %v1772_v0 = vmax.f32 %v1770_v53, %v1771_v9  ;;  %v2898_v59 = vmax.f32 %v2896_v3, %v2897_v30 }
 0x290   :  { %v1213_v58 = vsub.f32 %v6395_v32, %v1212_v46  ;;  %v1214_v48 = vsub.f32 %v1202_v15, %v1212_v46  ;;  %v2339_v35 = vrot.slane %v2338_v63, 1  ;;  %v1773_v23 = vrot.slane %v1772_v0, 2 }
 0x291   :  { %v2899_v60 = vrot.slane %v2898_v59, 4 }
 0x292   :  { %v1215_v14 = vmul.f32 1.442695, %v1213_v58  ;;  %v1217_v5 = vmul.f32 1.442695, %v1214_v48  ;;  %v2340_v4 = vmax.f32 %v2338_v63, %v2339_v35  ;;  %v1774_v20 = vmax.f32 %v1772_v0, %v1773_v23 }
 0x293   :  { %v2900_v61 = vmax.f32 %v2898_v59, %v2899_v60 }
 0x294   :  { %4523 = vpow2.f32 %v1215_v14  ;;  %v2341_v29 = vsub.f32 %v6399_v6, %v2340_v4  ;;  %v2342_v2 = vsub.f32 %v2331_v52, %v2340_v4  ;;  %v1775_v13 = vrot.slane %v1774_v20, 1 }
 0x295   :  { %4525 = vpow2.f32 %v1217_v5  ;;  %v2901_v36 = vrot.slane %v2900_v61, 2 }
 0x296   :  { %v2343_v24 = vmul.f32 1.442695, %v2341_v29  ;;  %v2345_v21 = vmul.f32 1.442695, %v2342_v2  ;;  %v1776_v55 = vmax.f32 %v1774_v20, %v1775_v13  ;;  %v9006_v13 = vld [vmem:[#allocation5_spill] sm:$0xff] }
 0x297   :  { %v2902_v32 = vmax.f32 %v2900_v61, %v2901_v36 }
 0x298   :  { %4527 = vpow2.f32 %v2343_v24  ;;  %v1777_v15 = vsub.f32 %v1766_v57, %v1776_v55  ;;  %v1778_v28 = vsub.f32 %v1767_v11, %v1776_v55 }
 0x299   :  { %4529 = vpow2.f32 %v2345_v21  ;;  %v2903_v37 = vrot.slane %v2902_v32, 1 }
 0x29a   :  { %v1779_v12 = vmul.f32 1.442695, %v1777_v15  ;;  %v1781_v16 = vmul.f32 1.442695, %v1778_v28  ;;  %v9007_v15 = vld [vmem:[#allocation7_spill] sm:$0xff] }
 0x29b   :  { %v2904_v22 = vmax.f32 %v2902_v32, %v2903_v37  ;;  %v6673_v37 = vsub.s32 4, %v4779_v50 }
 0x29c   :  { %4531 = vpow2.f32 %v1779_v12 }
 0x29d   :  { %4533 = vpow2.f32 %v1781_v16  ;;  %v2905_v6 = vsub.f32 %v9005_v1, %v2904_v22  ;;  %v2906_v52 = vsub.f32 %v2895_v25, %v2904_v22 }
 0x29e   :  { %v4524_v40 = vpop.eup %4523 }
 0x29f   :  { %v4526_v17 = vpop.eup %4525  ;;  %v1219_v39 = vsel %vm1203_vm9, %v4524_v40, 0.0  ;;  %v2907_v56 = vmul.f32 1.442695, %v2905_v6  ;;  %v2909_v18 = vmul.f32 1.442695, %v2906_v52  ;;  %v9008_v52 = vld [vmem:[#allocation6_spill] sm:$0xff] }
 0x2a0   :  { %v1220_v38 = vsel %vm1203_vm9, %v4526_v17, 0.0 }
 0x2a1   :  { %v1221_v57 = vadd.f32 %v1220_v38, %v1219_v39  ;;  %4535 = vpow2.f32 %v2907_v56  ;;  %v6689_v39 = vsub.s32 6, %v4779_v50  ;;  %v6692_v56 = vsub.s32 7, %v4779_v50 }
 0x2a2   :  { %v4528_v41 = vpop.eup %4527  ;;  %4537 = vpow2.f32 %v2909_v18 }
 0x2a3   :  { %v4530_v31 = vpop.eup %4529  ;;  %v1222_v45 = vrot.slane %v1221_v57, 4  ;;  %v2347_v34 = vsel %vm1203_vm9, %v4528_v41, 0.0 }
 0x2a4   :  { %v2348_v54 = vsel %vm1203_vm9, %v4530_v31, 0.0 }
 0x2a5   :  { %v1223_v33 = vadd.f32 %v1222_v45, %v1221_v57  ;;  %v2349_v62 = vadd.f32 %v2348_v54, %v2347_v34  ;;  %v9009_v54 = vld [vmem:[#allocation8_spill] sm:$0xff] }
 0x2a6   :  { %v4532_v19 = vpop.eup %4531 }
 0x2a7   :  { %v4534_v43 = vpop.eup %4533  ;;  %v1224_v11 = vrot.slane %v1223_v33, 2  ;;  %v2350_v10 = vrot.slane %v2349_v62, 4  ;;  %v1783_v27 = vsel %vm1203_vm9, %v4532_v19, 0.0 }
 0x2a8   :  { %v1784_v26 = vsel %vm1203_vm9, %v4534_v43, 0.0 }
 0x2a9   :  { %v1225_v44 = vadd.f32 %v1224_v11, %v1223_v33  ;;  %v2351_v7 = vadd.f32 %v2350_v10, %v2349_v62  ;;  %v1785_v8 = vadd.f32 %v1784_v26, %v1783_v27 }
 0x2ab   :  { %v4536_v53 = vpop.eup %4535  ;;  %v1226_v51 = vrot.slane %v1225_v44, 1  ;;  %v2352_v49 = vrot.slane %v2351_v7, 2  ;;  %v1786_v42 = vrot.slane %v1785_v8, 4 }
 0x2ac   :  { %v4538_v47 = vpop.eup %4537  ;;  %v2911_v9 = vsel %vm1203_vm9, %v4536_v53, 0.0 }
 0x2ad   :  { %v1227_v25 = vadd.f32 %v1226_v51, %v1225_v44  ;;  %v2353_v1 = vadd.f32 %v2352_v49, %v2351_v7  ;;  %v1787_v3 = vadd.f32 %v1786_v42, %v1785_v8  ;;  %v2912_v30 = vsel %vm1203_vm9, %v4538_v47, 0.0 }
 0x2ae   :  { %v2913_v46 = vadd.f32 %v2912_v30, %v2911_v9 }
 0x2af   :  { %4539 = vrcp.f32 %v1227_v25  ;;  %v2354_v63 = vrot.slane %v2353_v1, 1  ;;  %v1788_v0 = vrot.slane %v1787_v3, 2 }
 0x2b0   :  { %v2914_v59 = vrot.slane %v2913_v46, 4 }
 0x2b1   :  { %v2355_v58 = vadd.f32 %v2354_v63, %v2353_v1  ;;  %v1789_v48 = vadd.f32 %v1788_v0, %v1787_v3 }
 0x2b2   :  { %v2915_v35 = vadd.f32 %v2914_v59, %v2913_v46 }
 0x2b3   :  { %4541 = vrcp.f32 %v2355_v58  ;;  %v1790_v23 = vrot.slane %v1789_v48, 1 }
 0x2b4   :  { %v2916_v60 = vrot.slane %v2915_v35, 2 }
 0x2b5   :  { %v1791_v14 = vadd.f32 %v1790_v23, %v1789_v48 }
 0x2b6   :  { %v2917_v5 = vadd.f32 %v2916_v60, %v2915_v35 }
 0x2b7   :  { %4543 = vrcp.f32 %v1791_v14 }
 0x2b8   :  { %v2918_v4 = vrot.slane %v2917_v5, 1 }
 0x2b9   :  { %v4540_v20 = vpop.eup %4539 }
 0x2ba   :  { %v1229_v61 = vmul.f32 %v4540_v20, %v4524_v40  ;;  %v6658_v29 = vmul.f32 %v4540_v20, %v4526_v17  ;;  %v2919_v2 = vadd.f32 %v2918_v4, %v2917_v5  ;;  %v6686_v17 = vsub.s32 5, %v4779_v50 }
 0x2bc   :  { %4545 = vrcp.f32 %v2919_v2  ;;  %v1234_v36 = vrot.slane %v1229_v61, %v9006_v13  ;;  %v6670_v28 = vrot.slane %v1229_v61, %v9007_v15  ;;  %v1278_v6 = vrot.slane %v1229_v61, %v6673_v37  ;;  %v3172_v2 = vld [vmem:[%s8515_s5 + $0x8] sm:$0xff] }
 0x2bd   :  { %v4542_v24 = vpop.eup %4541  ;;  %v6683_v40 = vrot.slane %v1229_v61, %v9008_v52  ;;  %v1289_v34 = vrot.slane %v1229_v61, %v6686_v17  ;;  %v6717_v33 = vrot.slane %v1229_v61, %v9009_v54  ;;  %v6791_v1 = vrot.slane %v1229_v61, %v6689_v39 }
 0x2be   :  { %v6661_v21 = vmul.f32 %v4542_v24, %v4528_v41  ;;  %v6663_v55 = vmul.f32 %v4542_v24, %v4530_v31  ;;  %1240 = vbcast.lane.b32.xlu0 %v1234_v36, 264  ;;  %1236 = vbcast.lane.b32.xlu1 %v1234_v36, 256  ;;  %v6800_v30 = vrot.slane %v1229_v61, %v6692_v56  ;;  %v3176_v36 = vld [vmem:[%s8515_s5 + $0x28] sm:$0xff]  ;;  %v3171_v24 = vld [vmem:[%s8515_s5] sm:$0xff] }
 0x2bf   :  { %v6810_v63 = vrot.slane %v6658_v29, %v9006_v13  ;;  %v6820_v59 = vrot.slane %v6658_v29, %v9007_v15  ;;  %v6830_v48 = vrot.slane %v6658_v29, %v9008_v52  ;;  %v6840_v23 = vrot.slane %v6658_v29, %v9009_v54 }
 0x2c0   :  { %v6667_v32 = vrot.slane %v6661_v21, %v9006_v13  ;;  %v6750_v44 = vrot.slane %v6663_v55, %v6689_v39  ;;  %v6754_v7 = vrot.slane %v6663_v55, %v6692_v56  ;;  %v6783_v9 = vrot.slane %v6661_v21, %v9008_v52 }
 0x2c1   :  { %v4544_v12 = vpop.eup %4543  ;;  %v6788_v25 = vrot.slane %v6661_v21, %v9009_v54  ;;  %v6797_v3 = vrot.slane %v6661_v21, %v6673_v37  ;;  %v6806_v46 = vrot.slane %v6661_v21, %v6686_v17  ;;  %v6816_v0 = vrot.slane %v6661_v21, %v6689_v39 }
 0x2c2   :  { %v6675_v16 = vmul.f32 %v4544_v12, %v4532_v19  ;;  %v6677_v22 = vmul.f32 %v4544_v12, %v4534_v43  ;;  %2364 = vbcast.lane.b32.xlu0 %v6667_v32, 256  ;;  %1247 = vbcast.lane.b32.xlu1 %v6670_v28, 256  ;;  %v6826_v58 = vrot.slane %v6661_v21, %v6692_v56  ;;  %v3175_v12 = vld [vmem:[%s8515_s5 + $0x20] sm:$0xff] }
 0x2c3   :  { %v6836_v35 = vrot.slane %v6663_v55, %v9006_v13  ;;  %v6846_v60 = vrot.slane %v6663_v55, %v9007_v15  ;;  %v6850_v14 = vrot.slane %v6658_v29, %v6673_v37  ;;  %v6856_v5 = vrot.slane %v6663_v55, %v9008_v52 }
 0x2c4   :  { %v6697_v38 = vrot.slane %v6675_v16, %v6673_v37  ;;  %v6701_v57 = vrot.slane %v6675_v16, %v6686_v17  ;;  %v6705_v41 = vrot.slane %v6675_v16, %v6689_v39  ;;  %v6713_v45 = vrot.slane %v6675_v16, %v6692_v56 }
 0x2c5   :  { %v6721_v62 = vrot.slane %v6677_v22, %v6673_v37  ;;  %v6725_v19 = vrot.slane %v6677_v22, %v6686_v17  ;;  %v6729_v43 = vrot.slane %v6677_v22, %v6689_v39  ;;  %v6733_v11 = vrot.slane %v6677_v22, %v6692_v56 }
 0x2c6   :  { %v4546_v18 = vpop.eup %4545  ;;  %1284 = vbcast.lane.b32.xlu0 %v1278_v6, 264  ;;  %1258 = vbcast.lane.b32.xlu1 %v6683_v40, 256  ;;  %v6860_v4 = vrot.slane %v6658_v29, %v6686_v17  ;;  %v6866_v20 = vrot.slane %v6675_v16, %v9006_v13  ;;  %v6870_v61 = vrot.slane %v6658_v29, %v6689_v39 }
 0x2c7   :  { %v6707_v31 = vmul.f32 %v4546_v18, %v4536_v53  ;;  %v6709_v50 = vmul.f32 %v4546_v18, %v4538_v47  ;;  %v6762_v53 = vrot.slane %v6661_v21, %v9007_v15  ;;  %v4122_v21 = vpack.c.bf16 %v3176_v36, %v3172_v2  ;;  %v3173_v2 = vld [vmem:[%s8515_s5 + $0x10] sm:$0xff] }
 0x2c8   :  { %v4124_v18 = vpack.c.bf16 %v3175_v12, %v3171_v24  ;;  %v3177_v36 = vld [vmem:[%s8515_s5 + $0x30] sm:$0xff]  ;;  %v6910_v24 = vrot.slane %v6663_v55, %v6673_v37  ;;  %v3182_v12 = vld [vmem:[%s8515_s5 + $0x58] sm:$0xff] }
 0x2c9   :  { %v6738_v10 = vrot.slane %v6707_v31, %v6673_v37  ;;  %v6742_v27 = vrot.slane %v6707_v31, %v6686_v17  ;;  %v6746_v26 = vrot.slane %v6707_v31, %v6689_v39  ;;  %v6758_v8 = vrot.slane %v6707_v31, %v6692_v56  ;;  %4123 = vmatprep.subr.bf16.mxu0 %v4122_v21  ;;  %v3180_v21 = vld [vmem:[%s8515_s5 + $0x48] sm:$0xff] }
 0x2ca   :  { %1295 = vbcast.lane.b32.xlu0 %v1289_v34, 264  ;;  %1269 = vbcast.lane.b32.xlu1 %v6717_v33, 256  ;;  %v6766_v51 = vrot.slane %v6709_v50, %v6673_v37  ;;  %v6771_v49 = vrot.slane %v6709_v50, %v6686_v17  ;;  %v6775_v42 = vrot.slane %v6709_v50, %v6689_v39  ;;  %v3178_v39 = vld [vmem:[%s8515_s5 + $0x38] sm:$0xff]  ;;  %v3183_v37 = vld [vmem:[%s8515_s5 + $0x60] sm:$0xff] }
 0x2cb   :  { %v6779_v47 = vrot.slane %v6709_v50, %v6692_v56  ;;  %4125 = vmatpush1.bf16.msra.mxu0 %v4124_v18 }
 0x2cc   :  { %9010 = vst [vmem:[#allocation138_spill] sm:$0xff] %v6771_v49  ;;  %9011 = vst [vmem:[#allocation139_spill] sm:$0xff] %v6775_v42  ;;  %v6900_v42 = vrot.slane %v6663_v55, %v9009_v54  ;;  %v6904_v49 = vrot.slane %v6658_v29, %v6692_v56  ;;  %v3184_v29 = vld [vmem:[%s8515_s5 + $0x68] sm:$0xff]  ;;  %v3179_v56 = vld [vmem:[%s8515_s5 + $0x40] sm:$0xff] }
 0x2cd   :  { %9012 = vst [vmem:[#allocation141_spill] sm:$0xff] %v6779_v47  ;;  %v4252_v47 = vpack.c.bf16 %v3177_v36, %v3173_v2  ;;  %v6940_v2 = vrot.slane %v6663_v55, %v6686_v17  ;;  %v3187_v55 = vld [vmem:[%s8515_s5 + $0x80] sm:$0xff]  ;;  %v6955_v17 = vrot.slane %v6675_v16, %v9008_v52 }
 0x2ce   :  { %2379 = vbcast.lane.b32.xlu0 %v6762_v53, 264  ;;  %1280 = vbcast.lane.b32.xlu1 %v1278_v6, 256  ;;  %v3174_v6 = vld [vmem:[%s8515_s5 + $0x18] sm:$0xff] }
 0x2d2   :  { %2390 = vbcast.lane.b32.xlu0 %v6783_v9, 264  ;;  %1291 = vbcast.lane.b32.xlu1 %v1289_v34, 256  ;;  %v4250_v34 = vpack.c.bf16 %v3178_v39, %v3174_v6  ;;  %v3186_v6 = vld [vmem:[%s8515_s5 + $0x78] sm:$0xff]  ;;  %v4128_v39 = vpack.c.bf16 %v3183_v37, %v3179_v56 }
 0x2d3   :  { %v4254_v18 = vpack.c.bf16 %v3186_v6, %v3182_v12  ;;  %v3194_v37 = vld [vmem:[%s8515_s5 + $0xb8] sm:$0xff] }
 0x2d4   :  { %4251 = vmatprep.subr.bf16.mxu1 %v4250_v34  ;;  %v3181_v34 = vld [vmem:[%s8515_s5 + $0x50] sm:$0xff] }
 0x2d5   :  { %4253 = vmatpush1.bf16.msra.mxu1 %v4252_v47  ;;  %v4126_v47 = vpack.c.bf16 %v3184_v29, %v3180_v21  ;;  %v3188_v21 = vld [vmem:[%s8515_s5 + $0x88] sm:$0xff] }
 0x2d6   :  { %2401 = vbcast.lane.b32.xlu0 %v6788_v25, 264  ;;  %1302 = vbcast.lane.b32.xlu1 %v6791_v1, 256  ;;  %v3192_v29 = vld [vmem:[%s8515_s5 + $0xa8] sm:$0xff] }
 0x2d7   :  { %4127 = vmatprep.subr.bf16.mxu0 %v4126_v47  ;;  %4255 = vmatprep.subr.bf16.mxu1 %v4254_v18  ;;  %v4130_v56 = vpack.c.bf16 %v3192_v29, %v3188_v21  ;;  %v3190_v47 = vld [vmem:[%s8515_s5 + $0x98] sm:$0xff]  ;;  %v3193_v18 = vld [vmem:[%s8515_s5 + $0xb0] sm:$0xff] }
 0x2d8   :  { %4129 = vmatpush1.bf16.msra.mxu0 %v4128_v39  ;;  %v4258_v6 = vpack.c.bf16 %v3194_v37, %v3190_v47  ;;  %v3189_v39 = vld [vmem:[%s8515_s5 + $0x90] sm:$0xff]  ;;  %v3202_v29 = vld [vmem:[%s8515_s5 + $0xf8] sm:$0xff]  ;;  %v3204_v37 = vld [vmem:[%s8515_s5 + $0x108] sm:$0xff] }
 0x2d9   :  { %4131 = vmatprep.subr.bf16.mxu0 %v4130_v56  ;;  %v3201_v47 = vld [vmem:[%s8515_s5 + $0xf0] sm:$0xff] }
 0x2da   :  { %2412 = vbcast.lane.b32.xlu0 %v6797_v3, 264  ;;  %1313 = vbcast.lane.b32.xlu1 %v6800_v30, 256 }
 0x2de   :  { %2423 = vbcast.lane.b32.xlu0 %v6806_v46, 264  ;;  %1324 = vbcast.lane.b32.xlu1 %v6810_v63, 256 }
 0x2e2   :  { %2434 = vbcast.lane.b32.xlu0 %v6816_v0, 264  ;;  %1335 = vbcast.lane.b32.xlu1 %v6820_v59, 256 }
 0x2e6   :  { %2445 = vbcast.lane.b32.xlu0 %v6826_v58, 264  ;;  %1346 = vbcast.lane.b32.xlu1 %v6830_v48, 256 }
 0x2ea   :  { %2456 = vbcast.lane.b32.xlu0 %v6836_v35, 264  ;;  %1357 = vbcast.lane.b32.xlu1 %v6840_v23, 256 }
 0x2ee   :  { %2467 = vbcast.lane.b32.xlu0 %v6846_v60, 264  ;;  %1368 = vbcast.lane.b32.xlu1 %v6850_v14, 256 }
 0x2f2   :  { %2478 = vbcast.lane.b32.xlu0 %v6856_v5, 264  ;;  %1379 = vbcast.lane.b32.xlu1 %v6860_v4, 256 }
 0x2f6   :  { %1800 = vbcast.lane.b32.xlu0 %v6866_v20, 256  ;;  %1390 = vbcast.lane.b32.xlu1 %v6870_v61, 256 }
 0x2fa   :  { %2489 = vbcast.lane.b32.xlu0 %v6900_v42, 264  ;;  %1401 = vbcast.lane.b32.xlu1 %v6904_v49, 256 }
 0x2fe   :  { %2500 = vbcast.lane.b32.xlu0 %v6910_v24, 264  ;;  %1251 = vbcast.lane.b32.xlu1 %v6670_v28, 264  ;;  %v3185_v28 = vld [vmem:[%s8515_s5 + $0x70] sm:$0xff] }
 0x2ff   :  { %v4256_v36 = vpack.c.bf16 %v3185_v28, %v3181_v34  ;;  %v4260_v34 = vpack.c.bf16 %v3193_v18, %v3189_v39  ;;  %v6976_v28 = vrot.slane %v6675_v16, %v9009_v54  ;;  %v3203_v39 = vld [vmem:[%s8515_s5 + $0x100] sm:$0xff] }
 0x300   :  { %v3207_v18 = vld [vmem:[%s8515_s5 + $0x120] sm:$0xff] }
 0x301   :  { %4257 = vmatpush1.bf16.msra.mxu1 %v4256_v36  ;;  %v3200_v36 = vld [vmem:[%s8515_s5 + $0xe8] sm:$0xff] }
 0x302   :  { %2511 = vbcast.lane.b32.xlu0 %v6940_v2, 264  ;;  %1262 = vbcast.lane.b32.xlu1 %v6683_v40, 264  ;;  %v3191_v40 = vld [vmem:[%s8515_s5 + $0xa0] sm:$0xff] }
 0x303   :  { %v4132_v12 = vpack.c.bf16 %v3191_v40, %v3187_v55  ;;  %4259 = vmatprep.subr.bf16.mxu1 %v4258_v6  ;;  %v3197_v40 = vld [vmem:[%s8515_s5 + $0xd0] sm:$0xff]  ;;  %v3208_v6 = vld [vmem:[%s8515_s5 + $0x128] sm:$0xff] }
 0x305   :  { %4133 = vmatpush1.bf16.msra.mxu0 %v4132_v12  ;;  %4261 = vmatpush1.bf16.msra.mxu1 %v4260_v34  ;;  %v4264_v12 = vpack.c.bf16 %v3201_v47, %v3197_v40  ;;  %v4138_v34 = vpack.c.bf16 %v3208_v6, %v3204_v37  ;;  %v7047_v40 = vrot.slane %v6677_v22, %v9006_v13  ;;  %v3215_v47 = vld [vmem:[%s8515_s5 + $0x160] sm:$0xff]  ;;  %v3214_v37 = vld [vmem:[%s8515_s5 + $0x158] sm:$0xff] }
 0x306   :  { %1822 = vbcast.lane.b32.xlu0 %v6955_v17, 256  ;;  %1273 = vbcast.lane.b32.xlu1 %v6717_v33, 264  ;;  %v3196_v33 = vld [vmem:[%s8515_s5 + $0xc8] sm:$0xff] }
 0x307   :  { %v4134_v21 = vpack.c.bf16 %v3200_v36, %v3196_v33  ;;  %v3210_v33 = vld [vmem:[%s8515_s5 + $0x138] sm:$0xff]  ;;  %v3205_v36 = vld [vmem:[%s8515_s5 + $0x110] sm:$0xff] }
 0x309   :  { %4135 = vmatprep.subr.bf16.mxu0 %v4134_v21  ;;  %v3209_v21 = vld [vmem:[%s8515_s5 + $0x130] sm:$0xff] }
 0x30a   :  { %1833 = vbcast.lane.b32.xlu0 %v6976_v28, 256  ;;  %2375 = vbcast.lane.b32.xlu1 %v6762_v53, 256  ;;  %v3195_v53 = vld [vmem:[%s8515_s5 + $0xc0] sm:$0xff] }
 0x30e   :  { %1844 = vbcast.lane.b32.xlu0 %v6697_v38, 256  ;;  %2386 = vbcast.lane.b32.xlu1 %v6783_v9, 256  ;;  %v3199_v9 = vld [vmem:[%s8515_s5 + $0xe0] sm:$0xff] }
 0x30f   :  { %v4136_v55 = vpack.c.bf16 %v3199_v9, %v3195_v53  ;;  %v4140_v53 = vpack.c.bf16 %v3207_v18, %v3203_v39  ;;  %v3213_v18 = vld [vmem:[%s8515_s5 + $0x150] sm:$0xff] }
 0x311   :  { %4137 = vmatpush1.bf16.msra.mxu0 %v4136_v55  ;;  %v3216_v55 = vld [vmem:[%s8515_s5 + $0x168] sm:$0xff] }
 0x312   :  { %1855 = vbcast.lane.b32.xlu0 %v6701_v57, 256  ;;  %2368 = vbcast.lane.b32.xlu1 %v6667_v32, 264  ;;  %v3198_v32 = vld [vmem:[%s8515_s5 + $0xd8] sm:$0xff] }
 0x313   :  { %v4262_v56 = vpack.c.bf16 %v3202_v29, %v3198_v32  ;;  %4139 = vmatprep.subr.bf16.mxu0 %v4138_v34  ;;  %v4268_v32 = vpack.c.bf16 %v3209_v21, %v3205_v36  ;;  %v3212_v29 = vld [vmem:[%s8515_s5 + $0x148] sm:$0xff]  ;;  %v3217_v34 = vld [vmem:[%s8515_s5 + $0x170] sm:$0xff] }
 0x314   :  { %v3220_v36 = vld [vmem:[%s8515_s5 + $0x188] sm:$0xff] }
 0x315   :  { %4263 = vmatprep.subr.bf16.mxu1 %v4262_v56  ;;  %v3211_v56 = vld [vmem:[%s8515_s5 + $0x140] sm:$0xff]  ;;  %4141 = vmatpush1.bf16.msra.mxu0 %v4140_v53 }
 0x316   :  { %1866 = vbcast.lane.b32.xlu0 %v6705_v41, 256  ;;  %2397 = vbcast.lane.b32.xlu1 %v6788_v25, 256  ;;  %v3206_v25 = vld [vmem:[%s8515_s5 + $0x118] sm:$0xff]  ;;  %v4144_v6 = vpack.c.bf16 %v3215_v47, %v3211_v56  ;;  %v3219_v53 = vld [vmem:[%s8515_s5 + $0x180] sm:$0xff]  ;;  %v3225_v47 = vld [vmem:[%s8515_s5 + $0x1b0] sm:$0xff] }
 0x317   :  { %4265 = vmatpush1.bf16.msra.mxu1 %v4264_v12  ;;  %v4266_v9 = vpack.c.bf16 %v3210_v33, %v3206_v25  ;;  %v3218_v12 = vld [vmem:[%s8515_s5 + $0x178] sm:$0xff]  ;;  %v4272_v25 = vpack.c.bf16 %v3217_v34, %v3213_v18  ;;  %v7068_v33 = vrot.slane %v6677_v22, %v9007_v15  ;;  %v3231_v18 = vld [vmem:[%s8515_s5 + $0x1e0] sm:$0xff] }
 0x318   :  { %v4270_v39 = vpack.c.bf16 %v3218_v12, %v3214_v37  ;;  %v7104_v12 = vrot.slane %v6677_v22, %v9009_v54  ;;  %v3234_v34 = vld [vmem:[%s8515_s5 + $0x1f8] sm:$0xff] }
 0x319   :  { %4267 = vmatprep.subr.bf16.mxu1 %v4266_v9  ;;  %v7083_v9 = vrot.slane %v6677_v22, %v9008_v52 }
 0x31a   :  { %1877 = vbcast.lane.b32.xlu0 %v6713_v45, 256  ;;  %1306 = vbcast.lane.b32.xlu1 %v6791_v1, 264  ;;  %v4142_v1 = vpack.c.bf16 %v3216_v55, %v3212_v29  ;;  %v3226_v29 = vld [vmem:[%s8515_s5 + $0x1b8] sm:$0xff] }
 0x31b   :  { %4269 = vmatpush1.bf16.msra.mxu1 %v4268_v32  ;;  %v3222_v32 = vld [vmem:[%s8515_s5 + $0x198] sm:$0xff] }
 0x31c   :  { %4143 = vmatprep.subr.bf16.mxu0 %v4142_v1  ;;  %4271 = vmatprep.subr.bf16.mxu1 %v4270_v39  ;;  %v4274_v56 = vpack.c.bf16 %v3226_v29, %v3222_v32  ;;  %v3221_v1 = vld [vmem:[%s8515_s5 + $0x190] sm:$0xff]  ;;  %v3227_v39 = vld [vmem:[%s8515_s5 + $0x1c0] sm:$0xff]  ;;  %v3236_v29 = vld [vmem:[%s8515_s5 + $0x208] sm:$0xff] }
 0x31d   :  { %4145 = vmatpush1.bf16.msra.mxu0 %v4144_v6  ;;  %v4276_v37 = vpack.c.bf16 %v3225_v47, %v3221_v1  ;;  %v3228_v6 = vld [vmem:[%s8515_s5 + $0x1c8] sm:$0xff] }
 0x31e   :  { %1888 = vbcast.lane.b32.xlu0 %v7047_v40, 256  ;;  %2408 = vbcast.lane.b32.xlu1 %v6797_v3, 256  ;;  %v3224_v3 = vld [vmem:[%s8515_s5 + $0x1a8] sm:$0xff] }
 0x31f   :  { %4273 = vmatpush1.bf16.msra.mxu1 %v4272_v25  ;;  %v4146_v21 = vpack.c.bf16 %v3224_v3, %v3220_v36  ;;  %v4152_v25 = vpack.c.bf16 %v3231_v18, %v3227_v39  ;;  %v3229_v3 = vld [vmem:[%s8515_s5 + $0x1d0] sm:$0xff] }
 0x320   :  { %4275 = vmatprep.subr.bf16.mxu1 %v4274_v56  ;;  %v3241_v18 = vld [vmem:[%s8515_s5 + $0x230] sm:$0xff] }
 0x321   :  { %4147 = vmatprep.subr.bf16.mxu0 %v4146_v21 }
 0x322   :  { %1899 = vbcast.lane.b32.xlu0 %v7068_v33, 256  ;;  %1317 = vbcast.lane.b32.xlu1 %v6800_v30, 264  ;;  %v3223_v30 = vld [vmem:[%s8515_s5 + $0x1a0] sm:$0xff] }
 0x323   :  { %v4148_v55 = vpack.c.bf16 %v3223_v30, %v3219_v53  ;;  %4277 = vmatpush1.bf16.msra.mxu1 %v4276_v37  ;;  %v3233_v53 = vld [vmem:[%s8515_s5 + $0x1f0] sm:$0xff]  ;;  %v3238_v37 = vld [vmem:[%s8515_s5 + $0x218] sm:$0xff] }
 0x324   :  { %v4280_v21 = vpack.c.bf16 %v3233_v53, %v3229_v3  ;;  %v3243_v3 = vld [vmem:[%s8515_s5 + $0x240] sm:$0xff] }
 0x325   :  { %4149 = vmatpush1.bf16.msra.mxu0 %v4148_v55  ;;  %v3235_v55 = vld [vmem:[%s8515_s5 + $0x200] sm:$0xff] }
 0x326   :  { %1910 = vbcast.lane.b32.xlu0 %v7083_v9, 256  ;;  %2419 = vbcast.lane.b32.xlu1 %v6806_v46, 256  ;;  %v3232_v46 = vld [vmem:[%s8515_s5 + $0x1e8] sm:$0xff] }
 0x327   :  { %v4150_v22 = vpack.c.bf16 %v3232_v46, %v3228_v6  ;;  %v3242_v6 = vld [vmem:[%s8515_s5 + $0x238] sm:$0xff] }
 0x328   :  { %v4282_v39 = vpack.c.bf16 %v3242_v6, %v3238_v37  ;;  %v3245_v37 = vld [vmem:[%s8515_s5 + $0x250] sm:$0xff] }
 0x329   :  { %4151 = vmatprep.subr.bf16.mxu0 %v4150_v22  ;;  %v3237_v22 = vld [vmem:[%s8515_s5 + $0x210] sm:$0xff] }
 0x32a   :  { %1921 = vbcast.lane.b32.xlu0 %v7104_v12, 256  ;;  %1328 = vbcast.lane.b32.xlu1 %v6810_v63, 264  ;;  %v3230_v63 = vld [vmem:[%s8515_s5 + $0x1d8] sm:$0xff]  ;;  %v3249_v6 = vld [vmem:[%s8515_s5 + $0x270] sm:$0xff] }
 0x32b   :  { %v4278_v36 = vpack.c.bf16 %v3234_v34, %v3230_v63  ;;  %4153 = vmatpush1.bf16.msra.mxu0 %v4152_v25  ;;  %v4284_v63 = vpack.c.bf16 %v3241_v18, %v3237_v22  ;;  %v3252_v18 = vld [vmem:[%s8515_s5 + $0x288] sm:$0xff] }
 0x32d   :  { %4279 = vmatprep.subr.bf16.mxu1 %v4278_v36  ;;  %v3244_v36 = vld [vmem:[%s8515_s5 + $0x248] sm:$0xff] }
 0x32e   :  { %1932 = vbcast.lane.b32.xlu0 %v6721_v62, 256  ;;  %2430 = vbcast.lane.b32.xlu1 %v6816_v0, 256  ;;  %v3240_v0 = vld [vmem:[%s8515_s5 + $0x228] sm:$0xff] }
 0x32f   :  { %4281 = vmatpush1.bf16.msra.mxu1 %v4280_v21  ;;  %v4154_v47 = vpack.c.bf16 %v3240_v0, %v3236_v29  ;;  %v3246_v0 = vld [vmem:[%s8515_s5 + $0x258] sm:$0xff] }
 0x330   :  { %v7134_v30 = vpop.permute.xlu0 %1240  ;;  %v7136_v32 = vpop.permute.xlu1 %1236  ;;  %4283 = vmatprep.subr.bf16.mxu1 %v4282_v39 }
 0x331   :  { %4155 = vmatprep.subr.bf16.mxu0 %v4154_v47 }
 0x332   :  { %1943 = vbcast.lane.b32.xlu0 %v6725_v19, 256  ;;  %1339 = vbcast.lane.b32.xlu1 %v6820_v59, 264  ;;  %v3239_v59 = vld [vmem:[%s8515_s5 + $0x220] sm:$0xff] }
 0x333   :  { %v4156_v46 = vpack.c.bf16 %v3239_v59, %v3235_v55  ;;  %4285 = vmatpush1.bf16.msra.mxu1 %v4284_v63  ;;  %v3250_v55 = vld [vmem:[%s8515_s5 + $0x278] sm:$0xff] }
 0x334   :  { %v7149_v56 = vpop.permute.xlu0 %2364  ;;  %v7151_v1 = vpop.permute.xlu1 %1247  ;;  %v4286_v59 = vpack.c.bf16 %v3250_v55, %v3246_v0  ;;  %v3253_v0 = vld [vmem:[%s8515_s5 + $0x290] sm:$0xff] }
 0x335   :  { %4157 = vmatpush1.bf16.msra.mxu0 %v4156_v46  ;;  %v4288_v46 = vpack.c.bf16 %v3249_v6, %v3245_v37  ;;  %v3257_v55 = vld [vmem:[%s8515_s5 + $0x2b0] sm:$0xff]  ;;  %v2937_v6 = vrot.slane %v6707_v31, %v9007_v15 }
 0x336   :  { %1954 = vbcast.lane.b32.xlu0 %v6729_v43, 256  ;;  %2441 = vbcast.lane.b32.xlu1 %v6826_v58, 256  ;;  %v3248_v58 = vld [vmem:[%s8515_s5 + $0x268] sm:$0xff] }
 0x337   :  { %v4158_v29 = vpack.c.bf16 %v3248_v58, %v3244_v36  ;;  %4287 = vmatprep.subr.bf16.mxu1 %v4286_v59 }
 0x338   :  { %v7170_v34 = vpop.permute.xlu0 %1284  ;;  %v7172_v25 = vpop.permute.xlu1 %1258  ;;  %4289 = vmatpush1.bf16.msra.mxu1 %v4288_v46  ;;  %v3259_v46 = vld [vmem:[%s8515_s5 + $0x2c0] sm:$0xff] }
 0x339   :  { %4159 = vmatprep.subr.bf16.mxu0 %v4158_v29 }
 0x33a   :  { %1965 = vbcast.lane.b32.xlu0 %v6733_v11, 256  ;;  %1350 = vbcast.lane.b32.xlu1 %v6830_v48, 264  ;;  %v3247_v48 = vld [vmem:[%s8515_s5 + $0x260] sm:$0xff] }
 0x33b   :  { %v4160_v47 = vpack.c.bf16 %v3247_v48, %v3243_v3  ;;  %v3258_v3 = vld [vmem:[%s8515_s5 + $0x2b8] sm:$0xff] }
 0x33c   :  { %v7185_v53 = vpop.permute.xlu0 %1295  ;;  %v7187_v21 = vpop.permute.xlu1 %1269 }
 0x33d   :  { %4161 = vmatpush1.bf16.msra.mxu0 %v4160_v47  ;;  %v4292_v47 = vpack.c.bf16 %v3257_v55, %v3253_v0 }
 0x33e   :  { %1804 = vbcast.lane.b32.xlu0 %v6866_v20, 264  ;;  %2452 = vbcast.lane.b32.xlu1 %v6836_v35, 256  ;;  %v3256_v35 = vld [vmem:[%s8515_s5 + $0x2a8] sm:$0xff]  ;;  %v3251_v20 = vld [vmem:[%s8515_s5 + $0x280] sm:$0xff] }
 0x33f   :  { %v4162_v58 = vpack.c.bf16 %v3256_v35, %v3252_v18 }
 0x340   :  { %v7206_v39 = vpop.permute.xlu0 %2379  ;;  %v7208_v22 = vpop.permute.xlu1 %1280 }
 0x341   :  { %4163 = vmatprep.subr.bf16.mxu0 %v4162_v58  ;;  %v3262_v58 = vld [vmem:[%s8515_s5 + $0x2d8] sm:$0xff] }
 0x342   :  { %1826 = vbcast.lane.b32.xlu0 %v6955_v17, 264  ;;  %1361 = vbcast.lane.b32.xlu1 %v6840_v23, 264  ;;  %v3255_v23 = vld [vmem:[%s8515_s5 + $0x2a0] sm:$0xff]  ;;  %v3254_v17 = vld [vmem:[%s8515_s5 + $0x298] sm:$0xff] }
 0x343   :  { %v4164_v29 = vpack.c.bf16 %v3255_v23, %v3251_v20  ;;  %v4290_v48 = vpack.c.bf16 %v3258_v3, %v3254_v17  ;;  %v3266_v23 = vld [vmem:[%s8515_s5 + $0x2f8] sm:$0xff] }
 0x344   :  { %v7221_v63 = vpop.permute.xlu0 %2390  ;;  %v7223_v36 = vpop.permute.xlu1 %1291  ;;  %v4294_v3 = vpack.c.bf16 %v3266_v23, %v3262_v58  ;;  %v3270_v58 = vld [vmem:[%s8515_s5 + $0x318] sm:$0xff] }
 0x345   :  { %4291 = vmatprep.subr.bf16.mxu1 %v4290_v48  ;;  %4165 = vmatpush1.bf16.msra.mxu0 %v4164_v29  ;;  %v3261_v29 = vld [vmem:[%s8515_s5 + $0x2d0] sm:$0xff]  ;;  %v3274_v23 = vld [vmem:[%s8515_s5 + $0x338] sm:$0xff] }
 0x346   :  { %1837 = vbcast.lane.b32.xlu0 %v6976_v28, 264  ;;  %2463 = vbcast.lane.b32.xlu1 %v6846_v60, 256  ;;  %v3260_v28 = vld [vmem:[%s8515_s5 + $0x2c8] sm:$0xff]  ;;  %v3265_v48 = vld [vmem:[%s8515_s5 + $0x2f0] sm:$0xff] }
 0x347   :  { %4293 = vmatpush1.bf16.msra.mxu1 %v4292_v47  ;;  %v3264_v60 = vld [vmem:[%s8515_s5 + $0x2e8] sm:$0xff]  ;;  %v4296_v0 = vpack.c.bf16 %v3265_v48, %v3261_v29 }
 0x348   :  { %v7242_v59 = vpop.permute.xlu0 %2401  ;;  %v7244_v37 = vpop.permute.xlu1 %1302  ;;  %v4166_v20 = vpack.c.bf16 %v3264_v60, %v3260_v28  ;;  %4295 = vmatprep.subr.bf16.mxu1 %v4294_v3  ;;  %v4298_v3 = vpack.c.bf16 %v3274_v23, %v3270_v58  ;;  %v3276_v29 = vld [vmem:[%s8515_s5 + $0x348] sm:$0xff]  ;;  %v3282_v23 = vld [vmem:[%s8515_s5 + $0x378] sm:$0xff] }
 0x349   :  { %9013 = vst [vmem:[#allocation144_spill] sm:$0xff] %v7244_v37 }
 0x34a   :  { %2939 = vbcast.lane.b32.xlu0 %v2937_v6, 256  ;;  %1372 = vbcast.lane.b32.xlu1 %v6850_v14, 264  ;;  %v3263_v14 = vld [vmem:[%s8515_s5 + $0x2e0] sm:$0xff] }
 0x34b   :  { %v4168_v17 = vpack.c.bf16 %v3263_v14, %v3259_v46  ;;  %4167 = vmatprep.subr.bf16.mxu0 %v4166_v20  ;;  %4297 = vmatpush1.bf16.msra.mxu1 %v4296_v0  ;;  %v3271_v14 = vld [vmem:[%s8515_s5 + $0x320] sm:$0xff] }
 0x34c   :  { %v7258_v18 = vpop.permute.xlu0 %2412  ;;  %v7260_v35 = vpop.permute.xlu1 %1313  ;;  %4299 = vmatprep.subr.bf16.mxu1 %v4298_v3  ;;  %v3281_v3 = vld [vmem:[%s8515_s5 + $0x370] sm:$0xff] }
 0x34d   :  { %9014 = vst [vmem:[#allocation140_spill] sm:$0xff] %v7260_v35  ;;  %4169 = vmatpush1.bf16.msra.mxu0 %v4168_v17 }
 0x34e   :  { %1848 = vbcast.lane.b32.xlu0 %v6697_v38, 264  ;;  %2474 = vbcast.lane.b32.xlu1 %v6856_v5, 256 }
 0x350   :  { %v7279_v55 = vpop.permute.xlu0 %2423  ;;  %v7281_v47 = vpop.permute.xlu1 %1324 }
 0x351   :  { %9015 = vst [vmem:[#allocation142_spill] sm:$0xff] %v7281_v47  ;;  %v9045_v47 = vld [vmem:[#allocation36_spill] sm:$0xff] }
 0x352   :  { %1859 = vbcast.lane.b32.xlu0 %v6701_v57, 264  ;;  %1383 = vbcast.lane.b32.xlu1 %v6860_v4, 264  ;;  %v7302_v4 = vrot.slane %v6675_v16, %v9007_v15  ;;  %v3267_v16 = vld [vmem:[%s8515_s5 + $0x300] sm:$0xff] }
 0x353   :  { %v4172_v17 = vpack.c.bf16 %v3271_v14, %v3267_v16  ;;  %v3275_v16 = vld [vmem:[%s8515_s5 + $0x340] sm:$0xff] }
 0x354   :  { %v7285_v28 = vpop.permute.xlu0 %2434  ;;  %v7287_v60 = vpop.permute.xlu1 %1335  ;;  %v3279_v14 = vld [vmem:[%s8515_s5 + $0x360] sm:$0xff] }
 0x355   :  { %9016 = vst [vmem:[#allocation147_spill] sm:$0xff] %v7287_v60 }
 0x356   :  { %2943 = vbcast.lane.b32.xlu0 %v2937_v6, 264  ;;  %2485 = vbcast.lane.b32.xlu1 %v6900_v42, 256 }
 0x358   :  { %v7290_v38 = vpop.permute.xlu0 %2445  ;;  %v7292_v5 = vpop.permute.xlu1 %1346 }
 0x359   :  { %9017 = vst [vmem:[#allocation143_spill] sm:$0xff] %v7292_v5 }
 0x35a   :  { %1870 = vbcast.lane.b32.xlu0 %v6705_v41, 264  ;;  %1394 = vbcast.lane.b32.xlu1 %v6870_v61, 264  ;;  %v3268_v41 = vld [vmem:[%s8515_s5 + $0x308] sm:$0xff] }
 0x35b   :  { %v3272_v61 = vld [vmem:[%s8515_s5 + $0x328] sm:$0xff] }
 0x35c   :  { %v7296_v46 = vpop.permute.xlu0 %2456  ;;  %v7298_v57 = vpop.permute.xlu1 %1357  ;;  %v4170_v20 = vpack.c.bf16 %v3272_v61, %v3268_v41  ;;  %v3280_v61 = vld [vmem:[%s8515_s5 + $0x368] sm:$0xff] }
 0x35d   :  { %9018 = vst [vmem:[#allocation145_spill] sm:$0xff] %v7298_v57  ;;  %v4174_v58 = vpack.c.bf16 %v3280_v61, %v3276_v29  ;;  %v3284_v29 = vld [vmem:[%s8515_s5 + $0x388] sm:$0xff] }
 0x35e   :  { %2972 = vbcast.lane.b32.xlu0 %v6738_v10, 256  ;;  %1811 = vbcast.lane.b32.xlu1 %v7302_v4, 256  ;;  %v3288_v61 = vld [vmem:[%s8515_s5 + $0x3a8] sm:$0xff] }
 0x35f   :  { %4171 = vmatprep.subr.bf16.mxu0 %v4170_v20  ;;  %v3278_v20 = vld [vmem:[%s8515_s5 + $0x358] sm:$0xff] }
 0x360   :  { %v7306_v42 = vpop.permute.xlu0 %2467  ;;  %v7308_v6 = vpop.permute.xlu1 %1368  ;;  %4173 = vmatpush1.bf16.msra.mxu0 %v4172_v17  ;;  %v4302_v17 = vpack.c.bf16 %v3282_v23, %v3278_v20 }
 0x361   :  { %9019 = vst [vmem:[#allocation146_spill] sm:$0xff] %v7308_v6  ;;  %4175 = vmatprep.subr.bf16.mxu0 %v4174_v58  ;;  %v4178_v6 = vpack.c.bf16 %v3288_v61, %v3284_v29  ;;  %v3285_v58 = vld [vmem:[%s8515_s5 + $0x390] sm:$0xff] }
 0x362   :  { %1881 = vbcast.lane.b32.xlu0 %v6713_v45, 264  ;;  %2496 = vbcast.lane.b32.xlu1 %v6910_v24, 256  ;;  %v3269_v45 = vld [vmem:[%s8515_s5 + $0x310] sm:$0xff] }
 0x363   :  { %v3273_v24 = vld [vmem:[%s8515_s5 + $0x330] sm:$0xff] }
 0x364   :  { %v7339_v48 = vpop.permute.xlu0 %2478  ;;  %v7341_v0 = vpop.permute.xlu1 %1379  ;;  %v4300_v41 = vpack.c.bf16 %v3273_v24, %v3269_v45  ;;  %v3277_v45 = vld [vmem:[%s8515_s5 + $0x350] sm:$0xff]  ;;  %v4176_v24 = vpack.c.bf16 %v3279_v14, %v3275_v16  ;;  %v3287_v16 = vld [vmem:[%s8515_s5 + $0x3a0] sm:$0xff]  ;;  %v3286_v14 = vld [vmem:[%s8515_s5 + $0x398] sm:$0xff] }
 0x365   :  { %9020 = vst [vmem:[#allocation148_spill] sm:$0xff] %v7341_v0  ;;  %v4304_v0 = vpack.c.bf16 %v3281_v3, %v3277_v45  ;;  %v3289_v45 = vld [vmem:[%s8515_s5 + $0x3b0] sm:$0xff] }
 0x366   :  { %2983 = vbcast.lane.b32.xlu0 %v6742_v27, 256  ;;  %1405 = vbcast.lane.b32.xlu1 %v6904_v49, 264  ;;  %v3283_v49 = vld [vmem:[%s8515_s5 + $0x380] sm:$0xff] }
 0x367   :  { %4301 = vmatpush1.bf16.msra.mxu1 %v4300_v41  ;;  %v3290_v41 = vld [vmem:[%s8515_s5 + $0x3b8] sm:$0xff]  ;;  %4177 = vmatpush1.bf16.msra.mxu0 %v4176_v24  ;;  %v4180_v3 = vpack.c.bf16 %v3287_v16, %v3283_v49 }
 0x368   :  { %v7381_v20 = vpop.permute.xlu0 %1800  ;;  %v7383_v23 = vpop.permute.xlu1 %1390  ;;  %4303 = vmatprep.subr.bf16.mxu1 %v4302_v17  ;;  %v4306_v29 = vpack.c.bf16 %v3290_v41, %v3286_v14  ;;  %4179 = vmatprep.subr.bf16.mxu0 %v4178_v6  ;;  %v4308_v17 = vpack.c.bf16 %v3289_v45, %v3285_v58  ;;  %v9025_v6 = vld [vmem:[#allocation11_spill] sm:$0xff]  ;;  %v3292_v41 = vld [vmem:[%s8515_s5 + $0x3c8] sm:$0xff]  ;;  %v3291_v45 = vld [vmem:[%s8515_s5 + $0x3c0] sm:$0xff] }
 0x369   :  { %9021 = vst [vmem:[#allocation153_spill] sm:$0xff] %v7383_v23  ;;  %v3296_v58 = vld [vmem:[%s8515_s5 + $0x3e8] sm:$0xff] }
 0x36a   :  { %1892 = vbcast.lane.b32.xlu0 %v7047_v40, 264  ;;  %2507 = vbcast.lane.b32.xlu1 %v6940_v2, 256  ;;  %v9023_v40 = vld [vmem:[#allocation18_spill] sm:$0xff] }
 0x36b   :  { %4305 = vmatpush1.bf16.msra.mxu1 %v4304_v0  ;;  %4181 = vmatpush1.bf16.msra.mxu0 %v4180_v3  ;;  %v9024_v16 = vmax.f32 %v9023_v40, 0.0  ;;  %v9026_v0 = vmax.f32 %v9025_v6, 0.0 }
 0x36c   :  { %v7396_v61 = vpop.permute.xlu0 %2489  ;;  %v7398_v23 = vpop.permute.xlu1 %1401  ;;  %4307 = vmatprep.subr.bf16.mxu1 %v4306_v29  ;;  %v4182_v29 = vpack.c.bf16 %v3296_v58, %v3292_v41  ;;  %v3293_v41 = vld [vmem:[%s8515_s5 + $0x3d0] sm:$0xff] }
 0x36d   :  { %9022 = vst [vmem:[#allocation150_spill] sm:$0xff] %v7398_v23  ;;  %v1408_v14 = vmul.f32 %v7134_v30, %v9026_v0  ;;  %v3295_v30 = vld [vmem:[%s8515_s5 + $0x3e0] sm:$0xff]  ;;  %v3297_v58 = vld [vmem:[%s8515_s5 + $0x3f0] sm:$0xff] }
 0x36e   :  { %2994 = vbcast.lane.b32.xlu0 %v6746_v26, 256  ;;  %2518 = vbcast.lane.b32.xlu1 %v6750_v44, 256  ;;  %v4184_v23 = vpack.c.bf16 %v3295_v30, %v3291_v45  ;;  %v4312_v5 = vpack.c.bf16 %v3297_v58, %v3293_v41  ;;  %v2926_v45 = vrot.slane %v6707_v31, %v9006_v13 }
 0x36f   :  { %4309 = vmatpush1.bf16.msra.mxu1 %v4308_v17  ;;  %v3294_v17 = vld [vmem:[%s8515_s5 + $0x3d8] sm:$0xff]  ;;  %4183 = vmatprep.subr.bf16.mxu0 %v4182_v29  ;;  %v2948_v41 = vrot.slane %v6707_v31, %v9008_v52 }
 0x370   :  { %v7402_v24 = vpop.permute.xlu0 %2500  ;;  %v1252_v49 = vpop.permute.xlu1 %1251  ;;  %4185 = vmatpush1.bf16.msra.mxu0 %v4184_v23 }
 0x371   :  { %v1410_v2 = vmul.f32 %v1252_v49, %v9024_v16  ;;  %v3298_v49 = vld [vmem:[%s8515_s5 + $0x3f8] sm:$0xff]  ;;  %v9027_v16 = vld [vmem:[#allocation26_spill] sm:$0xff] }
 0x372   :  { %1903 = vbcast.lane.b32.xlu0 %v7068_v33, 264  ;;  %2529 = vbcast.lane.b32.xlu1 %v6754_v7, 256  ;;  %v9028_v6 = vmax.f32 %v9027_v16, 0.0  ;;  %v4310_v57 = vpack.c.bf16 %v3298_v49, %v3294_v17  ;;  %v3300_v49 = vld [vmem:[%s8515_s5 + $0x408] sm:$0xff] }
 0x373   :  { %v1454_v40 = vadd.f32 %v1410_v2, %v1408_v14 }
 0x374   :  { %v7420_v3 = vpop.permute.xlu0 %2511  ;;  %v1263_v33 = vpop.permute.xlu1 %1262  ;;  %4311 = vmatprep.subr.bf16.mxu1 %v4310_v57  ;;  %v3302_v57 = vld [vmem:[%s8515_s5 + $0x418] sm:$0xff] }
 0x375   :  { %v1412_v0 = vmul.f32 %v1263_v33, %v9028_v6  ;;  %4313 = vmatpush1.bf16.msra.mxu1 %v4312_v5  ;;  %v9029_v33 = vld [vmem:[#allocation34_spill] sm:$0xff]  ;;  %v3306_v5 = vld [vmem:[%s8515_s5 + $0x438] sm:$0xff] }
 0x376   :  { %3005 = vbcast.lane.b32.xlu0 %v6758_v8, 256  ;;  %1815 = vbcast.lane.b32.xlu1 %v7302_v4, 264  ;;  %v9030_v30 = vmax.f32 %v9029_v33, 0.0  ;;  %v3304_v4 = vld [vmem:[%s8515_s5 + $0x428] sm:$0xff] }
 0x377   :  { %v1455_v60 = vadd.f32 %v1454_v40, %v1412_v0  ;;  %v4186_v23 = vpack.c.bf16 %v3304_v4, %v3300_v49  ;;  %v4314_v40 = vpack.c.bf16 %v3306_v5, %v3302_v57  ;;  %v7464_v0 = vrot.slane %v6709_v50, %v9006_v13  ;;  %v9035_v57 = vld [vmem:[#allocation27_spill] sm:$0xff] }
 0x378   :  { %v7441_v2 = vpop.permute.xlu0 %1822  ;;  %v1274_v14 = vpop.permute.xlu1 %1273  ;;  %v9036_v5 = vmax.f32 %v9035_v57, 0.0 }
 0x379   :  { %v1414_v17 = vmul.f32 %v1274_v14, %v9030_v30  ;;  %4187 = vmatprep.subr.bf16.mxu0 %v4186_v23  ;;  %4315 = vmatprep.subr.bf16.mxu1 %v4314_v40 }
 0x37a   :  { %1914 = vbcast.lane.b32.xlu0 %v7083_v9, 264  ;;  %2928 = vbcast.lane.b32.xlu1 %v2926_v45, 256  ;;  %v9031_v9 = vld [vmem:[#allocation21_spill] sm:$0xff] }
 0x37b   :  { %v1456_v29 = vadd.f32 %v1455_v60, %v1414_v17  ;;  %v9032_v58 = vmax.f32 %v9031_v9, 0.0  ;;  %v9033_v60 = vld [vmem:[#allocation10_spill] sm:$0xff]  ;;  %v7483_v9 = vrot.slane %v6709_v50, %v9007_v15 }
 0x37c   :  { %v7460_v16 = vpop.permute.xlu0 %1833  ;;  %v2376_v6 = vpop.permute.xlu1 %2375  ;;  %v9034_v33 = vmax.f32 %v9033_v60, 0.0 }
 0x37d   :  { %v2537_v14 = vmul.f32 %v2376_v6, %v9032_v58  ;;  %v9037_v58 = vld [vmem:[#allocation20_spill] sm:$0xff] }
 0x37e   :  { %3016 = vbcast.lane.b32.xlu0 %v7464_v0, 256  ;;  %2950 = vbcast.lane.b32.xlu1 %v2948_v41, 256  ;;  %v2535_v30 = vmul.f32 %v7149_v56, %v9034_v33  ;;  %v2959_v56 = vrot.slane %v6707_v31, %v9009_v54  ;;  %v9038_v60 = vmax.f32 %v9037_v58, 0.0  ;;  %v9039_v33 = vld [vmem:[#allocation13_spill] sm:$0xff] }
 0x380   :  { %v7474_v17 = vpop.permute.xlu0 %1844  ;;  %v2387_v49 = vpop.permute.xlu1 %2386  ;;  %v2567_v4 = vadd.f32 %v2537_v14, %v2535_v30  ;;  %v2538_v14 = vmul.f32 %v7206_v39, %v9038_v60  ;;  %v9040_v30 = vmax.f32 %v9039_v33, 0.0  ;;  %v9046_v39 = vmax.f32 %v9045_v47, 0.0 }
 0x381   :  { %v2539_v13 = vmul.f32 %v2387_v49, %v9036_v5 }
 0x382   :  { %1925 = vbcast.lane.b32.xlu0 %v7104_v12, 264  ;;  %2932 = vbcast.lane.b32.xlu1 %v2926_v45, 264  ;;  %v2542_v60 = vmul.f32 %v7242_v59, %v9046_v39 }
 0x383   :  { %v2568_v23 = vadd.f32 %v2567_v4, %v2539_v13  ;;  %v9041_v13 = vld [vmem:[#allocation42_spill] sm:$0xff]  ;;  %v9043_v4 = vld [vmem:[#allocation28_spill] sm:$0xff] }
 0x384   :  { %v7479_v6 = vpop.permute.xlu0 %1855  ;;  %v2369_v40 = vpop.permute.xlu1 %2368  ;;  %v9042_v12 = vmax.f32 %v9041_v13, 0.0  ;;  %v9044_v57 = vmax.f32 %v9043_v4, 0.0 }
 0x385   :  { %v2536_v49 = vmul.f32 %v2369_v40, %v9040_v30  ;;  %v9047_v30 = vld [vmem:[#allocation35_spill] sm:$0xff] }
 0x386   :  { %3027 = vbcast.lane.b32.xlu0 %v7483_v9, 256  ;;  %2961 = vbcast.lane.b32.xlu1 %v2959_v56, 256  ;;  %v1416_v45 = vmul.f32 %v7170_v34, %v9042_v12  ;;  %v2540_v5 = vmul.f32 %v7221_v63, %v9044_v57  ;;  %v9048_v35 = vmax.f32 %v9047_v30, 0.0  ;;  %v9049_v34 = vld [vmem:[#allocation50_spill] sm:$0xff] }
 0x387   :  { %v2582_v15 = vadd.f32 %v2538_v14, %v2536_v49  ;;  %v9050_v13 = vmax.f32 %v9049_v34, 0.0  ;;  %v9051_v14 = vld [vmem:[#allocation44_spill] sm:$0xff]  ;;  %v9059_v34 = vld [vmem:[#allocation83_spill] sm:$0xff] }
 0x388   :  { %v7499_v31 = vpop.permute.xlu0 %1866  ;;  %v2398_v58 = vpop.permute.xlu1 %2397  ;;  %v1457_v40 = vadd.f32 %v1456_v29, %v1416_v45  ;;  %v9052_v49 = vmax.f32 %v9051_v14, 0.0 }
 0x389   :  { %v2583_v33 = vadd.f32 %v2582_v15, %v2540_v5  ;;  %v2541_v37 = vmul.f32 %v2398_v58, %v9048_v35  ;;  %v1418_v63 = vmul.f32 %v7185_v53, %v9050_v13  ;;  %v7517_v15 = vrot.slane %v6709_v50, %v9008_v52  ;;  %v9053_v35 = vld [vmem:[#allocation52_spill] sm:$0xff] }
 0x38a   :  { %1936 = vbcast.lane.b32.xlu0 %v6721_v62, 264  ;;  %2954 = vbcast.lane.b32.xlu1 %v2948_v41, 264  ;;  %v2544_v12 = vmul.f32 %v7258_v18, %v9052_v49  ;;  %v9054_v62 = vmax.f32 %v9053_v35, 0.0  ;;  %v9055_v53 = vld [vmem:[#allocation64_spill] sm:$0xff]  ;;  %v9060_v13 = vmax.f32 %v9059_v34, 0.0 }
 0x38b   :  { %v2584_v4 = vadd.f32 %v2583_v33, %v2542_v60  ;;  %v2569_v47 = vadd.f32 %v2568_v23, %v2541_v37  ;;  %v1458_v45 = vadd.f32 %v1457_v40, %v1418_v63  ;;  %v9056_v5 = vmax.f32 %v9055_v53, 0.0  ;;  %v9057_v37 = vld [vmem:[#allocation67_spill] sm:$0xff]  ;;  %v9067_v53 = vld [vmem:[#allocation105_spill] sm:$0xff] }
 0x38c   :  { %v7513_v57 = vpop.permute.xlu0 %1877  ;;  %v1307_v59 = vpop.permute.xlu1 %1306  ;;  %v2546_v29 = vmul.f32 %v7279_v55, %v9054_v62  ;;  %v9058_v18 = vmax.f32 %v9057_v37, 0.0  ;;  %v2550_v55 = vmul.f32 %v7290_v38, %v9060_v13  ;;  %v9061_v63 = vld [vmem:[#allocation43_spill] sm:$0xff]  ;;  %v3047_v38 = vrot.slane %v6709_v50, %v9009_v54  ;;  %v9073_v13 = vld [vmem:[#allocation118_spill] sm:$0xff] }
 0x38d   :  { %v2585_v41 = vadd.f32 %v2584_v4, %v2544_v12  ;;  %v1420_v58 = vmul.f32 %v1307_v59, %v9056_v5  ;;  %v9062_v14 = vmax.f32 %v9061_v63, 0.0  ;;  %v9068_v5 = vmax.f32 %v9067_v53, 0.0 }
 0x38e   :  { %3038 = vbcast.lane.b32.xlu0 %v7517_v15, 256  ;;  %2965 = vbcast.lane.b32.xlu1 %v2959_v56, 264  ;;  %v2548_v23 = vmul.f32 %v7285_v28, %v9058_v18  ;;  %v9063_v28 = vld [vmem:[#allocation97_spill] sm:$0xff] }
 0x38f   :  { %v2586_v39 = vadd.f32 %v2585_v41, %v2546_v29  ;;  %v1459_v60 = vadd.f32 %v1458_v45, %v1420_v58  ;;  %v9064_v4 = vmax.f32 %v9063_v28, 0.0  ;;  %v9065_v29 = vld [vmem:[#allocation80_spill] sm:$0xff]  ;;  %v9069_v58 = vld [vmem:[#allocation113_spill] sm:$0xff]  ;;  %v9077_v28 = vld [vmem:[#allocation95_spill] sm:$0xff] }
 0x390   :  { %v7528_v33 = vpop.permute.xlu0 %1888  ;;  %v2409_v30 = vpop.permute.xlu1 %2408  ;;  %v9066_v41 = vmax.f32 %v9065_v29, 0.0 }
 0x391   :  { %v2587_v40 = vadd.f32 %v2586_v39, %v2548_v23  ;;  %v2543_v49 = vmul.f32 %v2409_v30, %v9062_v14  ;;  %v2552_v59 = vmul.f32 %v7296_v46, %v9064_v4  ;;  %v9070_v46 = vmax.f32 %v9069_v58, 0.0  ;;  %v9071_v39 = vld [vmem:[#allocation51_spill] sm:$0xff] }
 0x392   :  { %1947 = vbcast.lane.b32.xlu0 %v6725_v19, 264  ;;  %2976 = vbcast.lane.b32.xlu1 %v6738_v10, 264  ;;  %v2554_v19 = vmul.f32 %v7306_v42, %v9068_v5  ;;  %v9072_v30 = vmax.f32 %v9071_v39, 0.0  ;;  %v9078_v4 = vmax.f32 %v9077_v28, 0.0  ;;  %v9083_v58 = vld [vmem:[#allocation103_spill] sm:$0xff]  ;;  %v9086_v39 = vld [vmem:[#allocation81_spill] sm:$0xff] }
 0x393   :  { %v2588_v56 = vadd.f32 %v2587_v40, %v2550_v55  ;;  %v2570_v12 = vadd.f32 %v2569_v47, %v2543_v49  ;;  %v2556_v37 = vmul.f32 %v7339_v48, %v9070_v46  ;;  %v9074_v55 = vmax.f32 %v9073_v13, 0.0  ;;  %v9075_v40 = vld [vmem:[#allocation123_spill] sm:$0xff] }
 0x394   :  { %v7540_v35 = vpop.permute.xlu0 %1899  ;;  %v1318_v62 = vpop.permute.xlu1 %1317  ;;  %v9076_v63 = vmax.f32 %v9075_v40, 0.0 }
 0x395   :  { %v1422_v45 = vmul.f32 %v1318_v62, %v9066_v41  ;;  %v2589_v10 = vadd.f32 %v2588_v56, %v2552_v59  ;;  %v2558_v42 = vmul.f32 %v7396_v61, %v9074_v55  ;;  %v9079_v62 = vld [vmem:[#allocation126_spill] sm:$0xff]  ;;  %v9088_v55 = vld [vmem:[#allocation111_spill] sm:$0xff] }
 0x396   :  { %3049 = vbcast.lane.b32.xlu0 %v3047_v38, 256  ;;  %2987 = vbcast.lane.b32.xlu1 %v6742_v27, 264  ;;  %v2560_v48 = vmul.f32 %v7402_v24, %v9076_v63  ;;  %v9080_v29 = vmax.f32 %v9079_v62, 0.0  ;;  %v9090_v63 = vld [vmem:[#allocation96_spill] sm:$0xff] }
 0x397   :  { %v1460_v47 = vadd.f32 %v1459_v60, %v1422_v45  ;;  %v2590_v50 = vadd.f32 %v2589_v10, %v2554_v19  ;;  %v9081_v45 = vld [vmem:[#allocation65_spill] sm:$0xff] }
 0x398   :  { %v7553_v18 = vpop.permute.xlu0 %1910  ;;  %v2420_v23 = vpop.permute.xlu1 %2419  ;;  %v2562_v61 = vmul.f32 %v7420_v3, %v9080_v29  ;;  %v9082_v53 = vmax.f32 %v9081_v45, 0.0  ;;  %v9095_v29 = vld [vmem:[#allocation141_spill] sm:$0xff] }
 0x399   :  { %v2545_v34 = vmul.f32 %v2420_v23, %v9072_v30  ;;  %v2591_v27 = vadd.f32 %v2590_v50, %v2556_v37  ;;  %v9087_v30 = vmax.f32 %v9086_v39, 0.0 }
 0x39a   :  { %1958 = vbcast.lane.b32.xlu0 %v6729_v43, 264  ;;  %2998 = vbcast.lane.b32.xlu1 %v6746_v26, 264 }
 0x39b   :  { %v2571_v60 = vadd.f32 %v2570_v12, %v2545_v34  ;;  %v2592_v56 = vadd.f32 %v2591_v27, %v2558_v42  ;;  %v9089_v42 = vmax.f32 %v9088_v55, 0.0 }
 0x39c   :  { %v7565_v14 = vpop.permute.xlu0 %1921  ;;  %v1329_v49 = vpop.permute.xlu1 %1328 }
 0x39d   :  { %v1424_v59 = vmul.f32 %v1329_v49, %v9078_v4  ;;  %v2593_v43 = vadd.f32 %v2592_v56, %v2560_v48  ;;  %v9091_v48 = vmax.f32 %v9090_v63, 0.0  ;;  %v9093_v4 = vld [vmem:[#allocation117_spill] sm:$0xff]  ;;  %v9104_v63 = vld [vmem:[#allocation60_spill] sm:$0xff] }
 0x39e   :  { %3060 = vbcast.lane.b32.xlu0 %v6766_v51, 256  ;;  %3009 = vbcast.lane.b32.xlu1 %v6758_v8, 264  ;;  %v9084_v8 = vmax.f32 %v9083_v58, 0.0 }
 0x39f   :  { %v1461_v26 = vadd.f32 %v1460_v47, %v1424_v59  ;;  %v7576_v41 = vadd.f32 %v2593_v43, %v2562_v61  ;;  %v9085_v47 = vld [vmem:[#allocation138_spill] sm:$0xff]  ;;  %v9094_v59 = vmax.f32 %v9093_v4, 0.0 }
 0x3a0   :  { %v7574_v12 = vpop.permute.xlu0 %1932  ;;  %v2431_v24 = vpop.permute.xlu1 %2430 }
 0x3a1   :  { %v2547_v5 = vmul.f32 %v2431_v24, %v9082_v53 }
 0x3a2   :  { %1969 = vbcast.lane.b32.xlu0 %v6733_v11, 264  ;;  %3020 = vbcast.lane.b32.xlu1 %v7464_v0, 264 }
 0x3a3   :  { %v2572_v19 = vadd.f32 %v2571_v60, %v2547_v5 }
 0x3a4   :  { %v7582_v3 = vpop.permute.xlu0 %1943  ;;  %v1340_v10 = vpop.permute.xlu1 %1339 }
 0x3a5   :  { %v1426_v46 = vmul.f32 %v1340_v10, %v9084_v8  ;;  %v9098_v10 = vld [vmem:[#allocation121_spill] sm:$0xff] }
 0x3a6   :  { %3071 = vbcast.lane.b32.xlu0 %v9085_v47, 256  ;;  %3031 = vbcast.lane.b32.xlu1 %v7483_v9, 264  ;;  %v9099_v58 = vmax.f32 %v9098_v10, 0.0  ;;  %v9112_v10 = vld [vmem:[#allocation16_spill] sm:$0xff] }
 0x3a7   :  { %v1462_v37 = vadd.f32 %v1461_v26, %v1426_v46  ;;  %v9096_v26 = vld [vmem:[#allocation104_spill] sm:$0xff] }
 0x3a8   :  { %v7588_v23 = vpop.permute.xlu0 %1954  ;;  %v2442_v50 = vpop.permute.xlu1 %2441  ;;  %v9097_v24 = vmax.f32 %v9096_v26, 0.0 }
 0x3a9   :  { %v2549_v11 = vmul.f32 %v2442_v50, %v9087_v30  ;;  %v9100_v50 = vld [vmem:[#allocation112_spill] sm:$0xff] }
 0x3aa   :  { %3064 = vbcast.lane.b32.xlu0 %v6766_v51, 264  ;;  %3042 = vbcast.lane.b32.xlu1 %v7517_v15, 264  ;;  %v9092_v51 = vld [vmem:[#allocation139_spill] sm:$0xff]  ;;  %v9101_v39 = vmax.f32 %v9100_v50, 0.0 }
 0x3ab   :  { %v2573_v0 = vadd.f32 %v2572_v19, %v2549_v11 }
 0x3ac   :  { %v7594_v34 = vpop.permute.xlu0 %1965  ;;  %v1351_v13 = vpop.permute.xlu1 %1350 }
 0x3ad   :  { %v1428_v27 = vmul.f32 %v1351_v13, %v9089_v42  ;;  %v9102_v13 = vld [vmem:[#allocation125_spill] sm:$0xff] }
 0x3ae   :  { %3075 = vbcast.lane.b32.xlu0 %v9085_v47, 264  ;;  %3053 = vbcast.lane.b32.xlu1 %v3047_v38, 264  ;;  %v9103_v55 = vmax.f32 %v9102_v13, 0.0 }
 0x3af   :  { %v1463_v9 = vadd.f32 %v1462_v37, %v1428_v27 }
 0x3b0   :  { %v7599_v60 = vpop.permute.xlu0 %1804  ;;  %v2453_v40 = vpop.permute.xlu1 %2452 }
 0x3b1   :  { %v2551_v49 = vmul.f32 %v2453_v40, %v9091_v48 }
 0x3b2   :  { %3086 = vbcast.lane.b32.xlu0 %v9092_v51, 264  ;;  %3082 = vbcast.lane.b32.xlu1 %v9092_v51, 256 }
 0x3b3   :  { %v2574_v15 = vadd.f32 %v2573_v0, %v2551_v49 }
 0x3b4   :  { %v7605_v56 = vpop.permute.xlu0 %1826  ;;  %v1362_v28 = vpop.permute.xlu1 %1361 }
 0x3b5   :  { %v1430_v62 = vmul.f32 %v1362_v28, %v9094_v59  ;;  %v9106_v28 = vld [vmem:[#allocation129_spill] sm:$0xff] }
 0x3b6   :  { %3097 = vbcast.lane.b32.xlu0 %v9095_v29, 264  ;;  %3093 = vbcast.lane.b32.xlu1 %v9095_v29, 256  ;;  %v9107_v4 = vmax.f32 %v9106_v28, 0.0  ;;  %v9108_v29 = vld [vmem:[#allocation19_spill] sm:$0xff] }
 0x3b7   :  { %v1464_v38 = vadd.f32 %v1463_v9, %v1430_v62 }
 0x3b8   :  { %v7611_v61 = vpop.permute.xlu0 %1837  ;;  %v2464_v43 = vpop.permute.xlu1 %2463 }
 0x3b9   :  { %v2553_v45 = vmul.f32 %v2464_v43, %v9097_v24 }
 0x3ba   :  { %2522 = vbcast.lane.b32.xlu1 %v6750_v44, 264 }
 0x3bb   :  { %v2575_v53 = vadd.f32 %v2574_v15, %v2553_v45  ;;  %v9110_v45 = vld [vmem:[#allocation12_spill] sm:$0xff] }
 0x3bc   :  { %v7616_v5 = vpop.permute.xlu0 %2939  ;;  %v1373_v19 = vpop.permute.xlu1 %1372 }
 0x3bd   :  { %v1432_v8 = vmul.f32 %v1373_v19, %v9099_v58  ;;  %v9113_v58 = vmax.f32 %v9112_v10, 0.0 }
 0x3be   :  { %2533 = vbcast.lane.b32.xlu1 %v6754_v7, 264  ;;  %v9105_v7 = vmax.f32 %v9104_v63, 0.0 }
 0x3bf   :  { %v1465_v46 = vadd.f32 %v1464_v38, %v1432_v8  ;;  %v9109_v38 = vmax.f32 %v9108_v29, 0.0 }
 0x3c0   :  { %v7621_v47 = vpop.permute.xlu0 %1848  ;;  %v2475_v37 = vpop.permute.xlu1 %2474 }
 0x3c1   :  { %v2555_v30 = vmul.f32 %v2475_v37, %v9101_v39  ;;  %v1409_v43 = vmul.f32 %v7151_v1, %v9109_v38  ;;  %v9116_v39 = vld [vmem:[#allocation25_spill] sm:$0xff] }
 0x3c2   :  { %v9126_v38 = vld [vmem:[#allocation41_spill] sm:$0xff] }
 0x3c3   :  { %v2576_v11 = vadd.f32 %v2575_v53, %v2555_v30  ;;  %v9111_v53 = vmax.f32 %v9110_v45, 0.0  ;;  %v9117_v30 = vmax.f32 %v9116_v39, 0.0 }
 0x3c4   :  { %v7625_v0 = vpop.permute.xlu0 %1859  ;;  %v1384_v44 = vpop.permute.xlu1 %1383 }
 0x3c5   :  { %v1434_v42 = vmul.f32 %v1384_v44, %v9103_v55  ;;  %v1971_v19 = vmul.f32 %v7381_v20, %v9111_v53  ;;  %v9118_v44 = vld [vmem:[#allocation29_spill] sm:$0xff] }
 0x3c6   :  { %v9119_v1 = vmax.f32 %v9118_v44, 0.0  ;;  %v9134_v44 = vld [vmem:[#allocation61_spill] sm:$0xff] }
 0x3c7   :  { %v1466_v27 = vadd.f32 %v1465_v46, %v1434_v42  ;;  %v9114_v46 = vld [vmem:[#allocation9_spill] sm:$0xff] }
 0x3c8   :  { %v7629_v9 = vpop.permute.xlu0 %2943  ;;  %v2486_v40 = vpop.permute.xlu1 %2485  ;;  %v9115_v37 = vmax.f32 %v9114_v46, 0.0  ;;  %v1975_v13 = vmul.f32 %v7441_v2, %v9119_v1  ;;  %v9127_v2 = vmax.f32 %v9126_v38, 0.0  ;;  %v9135_v1 = vmax.f32 %v9134_v44, 0.0  ;;  %v9154_v44 = vld [vmem:[#allocation106_spill] sm:$0xff] }
 0x3c9   :  { %v2557_v48 = vmul.f32 %v2486_v40, %v9105_v7 }
 0x3ca   :  { %v1407_v50 = vmul.f32 %v7136_v32, %v9115_v37 }
 0x3cb   :  { %v2577_v49 = vadd.f32 %v2576_v11, %v2557_v48  ;;  %v1411_v11 = vmul.f32 %v7172_v25, %v9117_v30  ;;  %v9122_v48 = vld [vmem:[#allocation37_spill] sm:$0xff] }
 0x3cc   :  { %v7633_v51 = vpop.permute.xlu0 %1870  ;;  %v1395_v15 = vpop.permute.xlu1 %1394  ;;  %v1439_v42 = vadd.f32 %v1409_v43, %v1407_v50  ;;  %v1415_v43 = vmul.f32 %v7208_v22, %v9127_v2  ;;  %v9132_v50 = vld [vmem:[#allocation54_spill] sm:$0xff] }
 0x3cd   :  { %v1436_v59 = vmul.f32 %v1395_v15, %v9107_v4  ;;  %v9123_v15 = vmax.f32 %v9122_v48, 0.0  ;;  %v9124_v4 = vld [vmem:[#allocation122_spill] sm:$0xff]  ;;  %v9133_v39 = vmax.f32 %v9132_v50, 0.0 }
 0x3ce   :  { %v9125_v25 = vmax.f32 %v9124_v4, 0.0  ;;  %v1440_v29 = vadd.f32 %v1439_v42, %v1411_v11  ;;  %v9151_v50 = vld [vmem:[#allocation102_spill] sm:$0xff] }
 0x3cf   :  { %v7637_v62 = vadd.f32 %v1466_v27, %v1436_v59  ;;  %v9120_v27 = vld [vmem:[#allocation33_spill] sm:$0xff]  ;;  %v1977_v32 = vmul.f32 %v7460_v16, %v9123_v15  ;;  %v1981_v30 = vmul.f32 %v7479_v6, %v9133_v39  ;;  %v9142_v6 = vld [vmem:[#allocation86_spill] sm:$0xff]  ;;  %v9152_v39 = vmax.f32 %v9151_v50, 0.0 }
 0x3d0   :  { %v7642_v26 = vpop.permute.xlu0 %2972  ;;  %v1812_v24 = vpop.permute.xlu1 %1811  ;;  %v9121_v40 = vmax.f32 %v9120_v27, 0.0  ;;  %v9173_v50 = vld [vmem:[#allocation66_spill] sm:$0xff] }
 0x3d1   :  { %v1973_v8 = vmul.f32 %v1812_v24, %v9113_v58  ;;  %v9128_v24 = vld [vmem:[#allocation45_spill] sm:$0xff] }
 0x3d2   :  { %v1413_v20 = vmul.f32 %v7187_v21, %v9121_v40  ;;  %v9129_v45 = vmax.f32 %v9128_v24, 0.0  ;;  %v9130_v58 = vld [vmem:[#allocation49_spill] sm:$0xff]  ;;  %v9148_v24 = vld [vmem:[#allocation142_spill] sm:$0xff] }
 0x3d3   :  { %v2003_v55 = vadd.f32 %v1973_v8, %v1971_v19  ;;  %v9131_v8 = vmax.f32 %v9130_v58, 0.0  ;;  %v9139_v40 = vld [vmem:[#allocation77_spill] sm:$0xff] }
 0x3d4   :  { %v7661_v63 = vpop.permute.xlu0 %1881  ;;  %v2497_v7 = vpop.permute.xlu1 %2496  ;;  %v1979_v21 = vmul.f32 %v7474_v17, %v9129_v45  ;;  %v1441_v10 = vadd.f32 %v1440_v29, %v1413_v20  ;;  %v9136_v17 = vld [vmem:[#allocation144_spill] sm:$0xff]  ;;  %v9140_v20 = vmax.f32 %v9139_v40, 0.0 }
 0x3d5   :  { %v2004_v28 = vadd.f32 %v2003_v55, %v1975_v13  ;;  %v2559_v59 = vmul.f32 %v2497_v7, %v9125_v25  ;;  %v1417_v16 = vmul.f32 %v7223_v36, %v9131_v8  ;;  %v1419_v13 = vmul.f32 %v9136_v17, %v9135_v1  ;;  %v9141_v7 = vld [vmem:[#allocation140_spill] sm:$0xff] }
 0x3d6   :  { %v1442_v11 = vadd.f32 %v1441_v10, %v1415_v43  ;;  %v1421_v48 = vmul.f32 %v9141_v7, %v9140_v20  ;;  %v9146_v43 = vld [vmem:[#allocation93_spill] sm:$0xff]  ;;  %v9155_v1 = vmax.f32 %v9154_v44, 0.0  ;;  %v9161_v20 = vld [vmem:[#allocation114_spill] sm:$0xff] }
 0x3d7   :  { %v2005_v53 = vadd.f32 %v2004_v28, %v1977_v32  ;;  %v2578_v19 = vadd.f32 %v2577_v49, %v2559_v59  ;;  %v9137_v49 = vld [vmem:[#allocation70_spill] sm:$0xff]  ;;  %v9143_v28 = vmax.f32 %v9142_v6, 0.0  ;;  %v9144_v59 = vld [vmem:[#allocation76_spill] sm:$0xff]  ;;  %v9162_v7 = vmax.f32 %v9161_v20, 0.0 }
 0x3d8   :  { %v7677_v46 = vpop.permute.xlu0 %2983  ;;  %v7679_v37 = vpop.permute.xlu1 %1405  ;;  %v9138_v55 = vmax.f32 %v9137_v49, 0.0  ;;  %v1443_v36 = vadd.f32 %v1442_v11, %v1417_v16  ;;  %v9145_v29 = vmax.f32 %v9144_v59, 0.0  ;;  %v1989_v17 = vmul.f32 %v7540_v35, %v9155_v1  ;;  %v9156_v49 = vld [vmem:[#allocation130_spill] sm:$0xff]  ;;  %v9165_v59 = vld [vmem:[#allocation145_spill] sm:$0xff]  ;;  %v9175_v1 = vld [vmem:[#allocation124_spill] sm:$0xff] }
 0x3d9   :  { %v2006_v22 = vadd.f32 %v2005_v53, %v1979_v21  ;;  %v1985_v4 = vmul.f32 %v7513_v57, %v9143_v28  ;;  %v9149_v21 = vld [vmem:[#allocation98_spill] sm:$0xff] }
 0x3da   :  { %v1983_v42 = vmul.f32 %v7499_v31, %v9138_v55  ;;  %v1444_v2 = vadd.f32 %v1443_v36, %v1419_v13  ;;  %v9147_v31 = vmax.f32 %v9146_v43, 0.0  ;;  %v9150_v53 = vmax.f32 %v9149_v21, 0.0 }
 0x3db   :  { %v2007_v27 = vadd.f32 %v2006_v22, %v1981_v30  ;;  %v9153_v30 = vld [vmem:[#allocation147_spill] sm:$0xff]  ;;  %v9157_v55 = vmax.f32 %v9156_v49, 0.0 }
 0x3dc   :  { %v7693_v15 = vpop.permute.xlu0 %1892  ;;  %v2508_v32 = vpop.permute.xlu1 %2507  ;;  %v1423_v45 = vmul.f32 %v9148_v24, %v9147_v31  ;;  %v1987_v10 = vmul.f32 %v7528_v33, %v9150_v53  ;;  %v1445_v16 = vadd.f32 %v1444_v2, %v1421_v48  ;;  %v1425_v57 = vmul.f32 %v9153_v30, %v9152_v39  ;;  %v9158_v33 = vld [vmem:[#allocation110_spill] sm:$0xff]  ;;  %v9168_v24 = vld [vmem:[#allocation92_spill] sm:$0xff] }
 0x3dd   :  { %v2008_v25 = vadd.f32 %v2007_v27, %v1983_v42  ;;  %v2561_v38 = vmul.f32 %v2508_v32, %v9145_v29  ;;  %v9159_v36 = vmax.f32 %v9158_v33, 0.0  ;;  %v1991_v48 = vmul.f32 %v7553_v18, %v9162_v7  ;;  %v9166_v2 = vld [vmem:[#allocation58_spill] sm:$0xff]  ;;  %v9170_v18 = vld [vmem:[#allocation120_spill] sm:$0xff] }
 0x3de   :  { %v1446_v27 = vadd.f32 %v1445_v16, %v1423_v45  ;;  %v9167_v43 = vmax.f32 %v9166_v2, 0.0  ;;  %v9169_v45 = vmax.f32 %v9168_v24, 0.0  ;;  %v9174_v39 = vmax.f32 %v9173_v50, 0.0  ;;  %v9189_v2 = vld [vmem:[#allocation30_spill] sm:$0xff] }
 0x3df   :  { %v2009_v58 = vadd.f32 %v2008_v25, %v1985_v4  ;;  %v2579_v8 = vadd.f32 %v2578_v19, %v2561_v38  ;;  %v9160_v19 = vld [vmem:[#allocation143_spill] sm:$0xff]  ;;  %v9163_v4 = vld [vmem:[#allocation116_spill] sm:$0xff]  ;;  %v3308_v50 = vld [vmem:[%s8515_s5 + $0x448] sm:$0xff] }
 0x3e0   :  { %v7709_v22 = vpop.permute.xlu0 %2994  ;;  %v2519_v11 = vpop.permute.xlu1 %2518  ;;  %v1427_v40 = vmul.f32 %v9160_v19, %v9159_v36  ;;  %v1447_v28 = vadd.f32 %v1446_v27, %v1425_v57  ;;  %v9164_v25 = vmax.f32 %v9163_v4, 0.0  ;;  %v1993_v31 = vmul.f32 %v7565_v14, %v9167_v43  ;;  %v9177_v14 = vld [vmem:[#allocation148_spill] sm:$0xff]  ;;  %v9180_v36 = vld [vmem:[#allocation17_spill] sm:$0xff] }
 0x3e1   :  { %v2010_v13 = vadd.f32 %v2009_v58, %v1987_v10  ;;  %v2563_v42 = vmul.f32 %v2519_v11, %v9157_v55  ;;  %v9171_v58 = vmax.f32 %v9170_v18, 0.0  ;;  %v1995_v30 = vmul.f32 %v7574_v12, %v9174_v39  ;;  %v9182_v12 = vld [vmem:[#allocation22_spill] sm:$0xff]  ;;  %v9186_v4 = vld [vmem:[#allocation153_spill] sm:$0xff] }
 0x3e2   :  { %v1429_v35 = vmul.f32 %v9165_v59, %v9164_v25  ;;  %v1448_v10 = vadd.f32 %v1447_v28, %v1427_v40  ;;  %v9181_v19 = vmax.f32 %v9180_v36, 0.0  ;;  %v9183_v20 = vmax.f32 %v9182_v12, 0.0  ;;  %v9187_v59 = vld [vmem:[#allocation82_spill] sm:$0xff] }
 0x3e3   :  { %v2580_v32 = vadd.f32 %v2579_v8, %v2563_v42  ;;  %v2011_v6 = vadd.f32 %v2010_v13, %v1989_v17  ;;  %v9172_v8 = vld [vmem:[#allocation146_spill] sm:$0xff]  ;;  %v9176_v17 = vmax.f32 %v9175_v1, 0.0  ;;  %v9190_v43 = vmax.f32 %v9189_v2, 0.0 }
 0x3e4   :  { %v7725_v29 = vpop.permute.xlu0 %1903  ;;  %v2530_v38 = vpop.permute.xlu1 %2529  ;;  %v1431_v16 = vmul.f32 %v9172_v8, %v9171_v58  ;;  %v1449_v44 = vadd.f32 %v1448_v10, %v1429_v35  ;;  %v9178_v42 = vld [vmem:[#allocation74_spill] sm:$0xff]  ;;  %v1972_v40 = vmul.f32 %v7599_v60, %v9181_v19  ;;  %v9188_v35 = vmax.f32 %v9187_v59, 0.0  ;;  %v3299_v60 = vld [vmem:[%s8515_s5 + $0x400] sm:$0xff]  ;;  %v3313_v59 = vld [vmem:[%s8515_s5 + $0x470] sm:$0xff] }
 0x3e5   :  { %v2565_v21 = vmul.f32 %v2530_v38, %v9169_v45  ;;  %v2012_v53 = vadd.f32 %v2011_v6, %v1991_v48  ;;  %v1433_v13 = vmul.f32 %v9177_v14, %v9176_v17  ;;  %v9179_v27 = vmax.f32 %v9178_v42, 0.0  ;;  %v9184_v6 = vld [vmem:[#allocation128_spill] sm:$0xff]  ;;  %v3303_v45 = vld [vmem:[%s8515_s5 + $0x420] sm:$0xff]  ;;  %v9193_v18 = vld [vmem:[#allocation150_spill] sm:$0xff] }
 0x3e6   :  { %v9185_v28 = vmax.f32 %v9184_v6, 0.0  ;;  %v1999_v38 = vmul.f32 %v7588_v23, %v9188_v35  ;;  %v9194_v39 = vld [vmem:[#allocation90_spill] sm:$0xff]  ;;  %v3310_v42 = vld [vmem:[%s8515_s5 + $0x458] sm:$0xff] }
 0x3e7   :  { %v7738_v57 = vadd.f32 %v2580_v32, %v2565_v21  ;;  %v2013_v11 = vadd.f32 %v2012_v53, %v1993_v31  ;;  %v1997_v33 = vmul.f32 %v7582_v3, %v9179_v27  ;;  %v1450_v32 = vadd.f32 %v1449_v44, %v1431_v16  ;;  %v9191_v53 = vld [vmem:[#allocation132_spill] sm:$0xff]  ;;  %v3305_v16 = vld [vmem:[%s8515_s5 + $0x430] sm:$0xff]  ;;  %v9196_v44 = vld [vmem:[#allocation38_spill] sm:$0xff] }
 0x3e8   :  { %v7743_v49 = vpop.permute.xlu0 %3005  ;;  %v1816_v55 = vpop.permute.xlu1 %1815  ;;  %v1435_v25 = vmul.f32 %v9186_v4, %v9185_v28  ;;  %v1976_v3 = vmul.f32 %v7605_v56, %v9190_v43  ;;  %v9192_v10 = vmax.f32 %v9191_v53, 0.0  ;;  %v3301_v56 = vld [vmem:[%s8515_s5 + $0x410] sm:$0xff]  ;;  %v9197_v1 = vmax.f32 %v9196_v44, 0.0  ;;  %v3314_v27 = vld [vmem:[%s8515_s5 + $0x478] sm:$0xff]  ;;  %v9198_v36 = vld [vmem:[#allocation46_spill] sm:$0xff] }
 0x3e9   :  { %v1974_v7 = vmul.f32 %v1816_v55, %v9183_v20  ;;  %v2014_v48 = vadd.f32 %v2013_v11, %v1995_v30  ;;  %v1451_v21 = vadd.f32 %v1450_v32, %v1433_v13  ;;  %v9195_v30 = vmax.f32 %v9194_v39, 0.0  ;;  %v3312_v55 = vld [vmem:[%s8515_s5 + $0x468] sm:$0xff]  ;;  %v3318_v43 = vld [vmem:[%s8515_s5 + $0x498] sm:$0xff]  ;;  %v9204_v44 = vld [vmem:[#allocation23_spill] sm:$0xff] }
 0x3ea   :  { %v1437_v58 = vmul.f32 %v9193_v18, %v9192_v10  ;;  %v1978_v17 = vmul.f32 %v7611_v61, %v9197_v1  ;;  %v9199_v19 = vmax.f32 %v9198_v36, 0.0  ;;  %v4316_v20 = vpack.c.bf16 %v3305_v16, %v3301_v56  ;;  %v3316_v35 = vld [vmem:[%s8515_s5 + $0x488] sm:$0xff]  ;;  %v3319_v56 = vld [vmem:[%s8515_s5 + $0x4a0] sm:$0xff] }
 0x3eb   :  { %v2018_v31 = vadd.f32 %v1974_v7, %v1972_v40  ;;  %v2015_v24 = vadd.f32 %v2014_v48, %v1997_v33  ;;  %v2001_v11 = vmul.f32 %v7594_v34, %v9195_v30  ;;  %v1452_v33 = vadd.f32 %v1451_v21, %v1435_v25  ;;  %v3307_v7 = vld [vmem:[%s8515_s5 + $0x440] sm:$0xff]  ;;  %v3320_v2 = vld [vmem:[%s8515_s5 + $0x4a8] sm:$0xff]  ;;  %v9202_v21 = vld [vmem:[#allocation15_spill] sm:$0xff] }
 0x3ec   :  { %v7771_v23 = vpop.permute.xlu0 %1914  ;;  %v2929_v8 = vpop.permute.xlu1 %2928  ;;  %v4188_v34 = vpack.c.bf16 %v3303_v45, %v3299_v60  ;;  %v1980_v61 = vmul.f32 %v7621_v47, %v9199_v19  ;;  %v3311_v48 = vld [vmem:[%s8515_s5 + $0x460] sm:$0xff]  ;;  %v4190_v4 = vpack.c.bf16 %v3312_v55, %v3308_v50  ;;  %v4318_v25 = vpack.c.bf16 %v3314_v27, %v3310_v42  ;;  %v3309_v47 = vld [vmem:[%s8515_s5 + $0x450] sm:$0xff]  ;;  %v3328_v27 = vld [vmem:[%s8515_s5 + $0x4e8] sm:$0xff] }
 0x3ed   :  { %v2019_v14 = vadd.f32 %v2018_v31, %v1976_v3  ;;  %v2016_v13 = vadd.f32 %v2015_v24, %v1999_v38  ;;  %v1453_v32 = vadd.f32 %v1452_v33, %v1437_v58  ;;  %v3322_v3 = vld [vmem:[%s8515_s5 + $0x4b8] sm:$0xff]  ;;  %v4192_v31 = vpack.c.bf16 %v3311_v48, %v3307_v7  ;;  %v3315_v58 = vld [vmem:[%s8515_s5 + $0x480] sm:$0xff]  ;;  %v3321_v30 = vld [vmem:[%s8515_s5 + $0x4b0] sm:$0xff] }
 0x3ee   :  { %v9200_v24 = vld [vmem:[#allocation56_spill] sm:$0xff]  ;;  %v9203_v53 = vmax.f32 %v9202_v21, 0.0  ;;  %v4320_v18 = vpack.c.bf16 %v3313_v59, %v3309_v47  ;;  %v4322_v39 = vpack.c.bf16 %v3322_v3, %v3318_v43  ;;  %v9205_v1 = vmax.f32 %v9204_v44, 0.0  ;;  %v3327_v7 = vld [vmem:[%s8515_s5 + $0x4e0] sm:$0xff]  ;;  %v3325_v48 = vld [vmem:[%s8515_s5 + $0x4d0] sm:$0xff] }
 0x3ef   :  { %v2020_v40 = vadd.f32 %v2019_v14, %v1978_v17  ;;  %v2017_v12 = vadd.f32 %v2016_v13, %v2001_v11  ;;  %v9201_v60 = vmax.f32 %v9200_v24, 0.0  ;;  %v3324_v11 = vld [vmem:[%s8515_s5 + $0x4c8] sm:$0xff]  ;;  %v9206_v13 = vld [vmem:[#allocation31_spill] sm:$0xff]  ;;  %v3326_v33 = vld [vmem:[%s8515_s5 + $0x4d8] sm:$0xff]  ;;  %v4196_v36 = vpack.c.bf16 %v3319_v56, %v3315_v58 }
 0x3f0   :  { %v7806_v6 = vpop.permute.xlu0 %3016  ;;  %v2951_v28 = vpop.permute.xlu1 %2950  ;;  %v3099_v10 = vmul.f32 %v2929_v8, %v9203_v53  ;;  %v3317_v8 = vld [vmem:[%s8515_s5 + $0x490] sm:$0xff]  ;;  %v3101_v17 = vmul.f32 %v7616_v5, %v9205_v1  ;;  %v9207_v55 = vmax.f32 %v9206_v13, 0.0  ;;  %v3323_v5 = vld [vmem:[%s8515_s5 + $0x4c0] sm:$0xff]  ;;  %v9208_v19 = vld [vmem:[#allocation72_spill] sm:$0xff] }
 0x3f1   :  { %v2021_v38 = vadd.f32 %v2020_v40, %v1980_v61  ;;  %3513 = vmatprep.mubr.f32.mxu0 %v2017_v12  ;;  %3667 = vmatprep.mubr.f32.mxu1 %v2017_v12  ;;  %v1982_v45 = vmul.f32 %v7625_v0, %v9201_v60  ;;  %v4194_v0 = vpack.c.bf16 %v3320_v2, %v3316_v35  ;;  %v9209_v61 = vmax.f32 %v9208_v19, 0.0  ;;  %v3332_v47 = vld [vmem:[%s8515_s5 + $0x508] sm:$0xff]  ;;  %v3338_v24 = vld [vmem:[%s8515_s5 + $0x538] sm:$0xff]  ;;  %v9212_v21 = vld [vmem:[#allocation47_spill] sm:$0xff] }
 0x3f2   :  { %3514 = vmatmul.mubr.f32.vlgmr.msra.gmra.mrb[64].mxu0 %v1453_v32  ;;  %3668 = vmatmul.mubr.f32.vlgmr.msra.gmra.mrb[64].mxu1 %v1453_v32  ;;  %v3103_v42 = vmul.f32 %v2951_v28, %v9207_v55  ;;  %v3131_v12 = vadd.f32 %v3101_v17, %v3099_v10  ;;  %v3329_v32 = vld [vmem:[%s8515_s5 + $0x4f0] sm:$0xff]  ;;  %v3336_v3 = vld [vmem:[%s8515_s5 + $0x528] sm:$0xff]  ;;  %v4200_v60 = vpack.c.bf16 %v3327_v7, %v3323_v5  ;;  %v9213_v53 = vmax.f32 %v9212_v21, 0.0 }
 0x3f3   :  { %4189 = vmatpush1.bf16.msra.mxu0 %v4188_v34  ;;  %4317 = vmatpush1.bf16.msra.mxu1 %v4316_v20  ;;  %v2022_v14 = vadd.f32 %v2021_v38, %v1982_v45  ;;  %v3330_v34 = vld [vmem:[%s8515_s5 + $0x4f8] sm:$0xff]  ;;  %v1984_v40 = vmul.f32 %v7633_v51, %v9209_v61  ;;  %v4324_v20 = vpack.c.bf16 %v3321_v30, %v3317_v8  ;;  %v9210_v38 = vld [vmem:[#allocation39_spill] sm:$0xff]  ;;  %v3335_v8 = vld [vmem:[%s8515_s5 + $0x520] sm:$0xff] }
 0x3f4   :  { %v7837_v16 = vpop.permute.xlu0 %1925  ;;  %v7839_v50 = vpop.permute.xlu1 %2932  ;;  %4191 = vmatprep.subr.bf16.mxu0 %v4190_v4  ;;  %4319 = vmatprep.subr.bf16.mxu1 %v4318_v25  ;;  %v4198_v51 = vpack.c.bf16 %v3328_v27, %v3324_v11  ;;  %v4326_v25 = vpack.c.bf16 %v3330_v34, %v3326_v33  ;;  %v3132_v35 = vadd.f32 %v3131_v12, %v3103_v42  ;;  %v9211_v2 = vmax.f32 %v9210_v38, 0.0  ;;  %v3337_v1 = vld [vmem:[%s8515_s5 + $0x530] sm:$0xff]  ;;  %v3340_v17 = vld [vmem:[%s8515_s5 + $0x548] sm:$0xff]  ;;  %v3342_v42 = vld [vmem:[%s8515_s5 + $0x558] sm:$0xff] }
 0x3f5   :  { %v2023_v59 = vadd.f32 %v2022_v14, %v1984_v40  ;;  %v4328_v45 = vpack.c.bf16 %v3329_v32, %v3325_v48  ;;  %v3107_v10 = vmul.f32 %v7642_v26, %v9213_v53  ;;  %v4202_v26 = vpack.c.bf16 %v3336_v3, %v3332_v47  ;;  %v3344_v55 = vld [vmem:[%s8515_s5 + $0x568] sm:$0xff]  ;;  %v3346_v27 = vld [vmem:[%s8515_s5 + $0x578] sm:$0xff]  ;;  %v9216_v33 = vld [vmem:[#allocation99_spill] sm:$0xff] }
 0x3f6   :  { %v9217_v34 = vmax.f32 %v9216_v33, 0.0  ;;  %v3339_v61 = vld [vmem:[%s8515_s5 + $0x540] sm:$0xff]  ;;  %v4206_v7 = vpack.c.bf16 %v3344_v55, %v3340_v17  ;;  %v3341_v48 = vld [vmem:[%s8515_s5 + $0x550] sm:$0xff]  ;;  %v3350_v47 = vld [vmem:[%s8515_s5 + $0x598] sm:$0xff] }
 0x3f7   :  { %4193 = vmatpush1.bf16.msra.mxu0 %v4192_v31  ;;  %4321 = vmatpush1.bf16.msra.mxu1 %v4320_v18  ;;  %v3334_v31 = vld [vmem:[%s8515_s5 + $0x518] sm:$0xff]  ;;  %v3343_v40 = vld [vmem:[%s8515_s5 + $0x560] sm:$0xff]  ;;  %v3345_v32 = vld [vmem:[%s8515_s5 + $0x570] sm:$0xff] }
 0x3f8   :  { %v7879_v28 = vpop.permute.xlu0 %3027  ;;  %v2962_v4 = vpop.permute.xlu1 %2961  ;;  %4195 = vmatprep.subr.bf16.mxu0 %v4194_v0  ;;  %4323 = vmatprep.subr.bf16.mxu1 %v4322_v39  ;;  %v9214_v18 = vld [vmem:[#allocation88_spill] sm:$0xff]  ;;  %v3331_v39 = vld [vmem:[%s8515_s5 + $0x500] sm:$0xff]  ;;  %v4330_v44 = vpack.c.bf16 %v3338_v24, %v3334_v31  ;;  %v4336_v3 = vpack.c.bf16 %v3345_v32, %v3341_v48  ;;  %v3349_v53 = vld [vmem:[%s8515_s5 + $0x590] sm:$0xff] }
 0x3f9   :  { %v3105_v43 = vmul.f32 %v2962_v4, %v9211_v2  ;;  %v9215_v58 = vmax.f32 %v9214_v18, 0.0  ;;  %v4204_v5 = vpack.c.bf16 %v3335_v8, %v3331_v39  ;;  %v3348_v4 = vld [vmem:[%s8515_s5 + $0x588] sm:$0xff]  ;;  %v3347_v31 = vld [vmem:[%s8515_s5 + $0x580] sm:$0xff]  ;;  %v3362_v39 = vld [vmem:[%s8515_s5 + $0x5f8] sm:$0xff] }
 0x3fa   :  { %v3351_v24 = vld [vmem:[%s8515_s5 + $0x5a0] sm:$0xff]  ;;  %v3356_v18 = vld [vmem:[%s8515_s5 + $0x5c8] sm:$0xff]  ;;  %v9220_v8 = vld [vmem:[#allocation115_spill] sm:$0xff] }
 0x3fb   :  { %v1986_v56 = vmul.f32 %v7661_v63, %v9215_v58  ;;  %v3133_v0 = vadd.f32 %v3132_v35, %v3105_v43  ;;  %4197 = vmatpush1.bf16.msra.mxu0 %v4196_v36  ;;  %4325 = vmatpush1.bf16.msra.mxu1 %v4324_v20  ;;  %v3333_v63 = vld [vmem:[%s8515_s5 + $0x510] sm:$0xff]  ;;  %v1988_v36 = vmul.f32 %v7693_v15, %v9217_v34  ;;  %v3355_v17 = vld [vmem:[%s8515_s5 + $0x5c0] sm:$0xff]  ;;  %v9224_v48 = vld [vmem:[#allocation14_spill] sm:$0xff] }
 0x3fc   :  { %v7907_v30 = vpop.permute.xlu0 %1936  ;;  %v7909_v11 = vpop.permute.xlu1 %2954  ;;  %4199 = vmatprep.subr.bf16.mxu0 %v4198_v51  ;;  %4327 = vmatprep.subr.bf16.mxu1 %v4326_v25  ;;  %v4332_v19 = vpack.c.bf16 %v3337_v1, %v3333_v63  ;;  %v4334_v15 = vpack.c.bf16 %v3346_v27, %v3342_v42  ;;  %v3352_v25 = vld [vmem:[%s8515_s5 + $0x5a8] sm:$0xff]  ;;  %v9218_v35 = vld [vmem:[#allocation107_spill] sm:$0xff]  ;;  %v4208_v43 = vpack.c.bf16 %v3343_v40, %v3339_v61  ;;  %v9222_v42 = vld [vmem:[#allocation57_spill] sm:$0xff]  ;;  %v9225_v32 = vmax.f32 %v9224_v48, 0.0 }
 0x3fd   :  { %v2024_v14 = vadd.f32 %v2023_v59, %v1986_v56  ;;  %v7920_v13 = vadd.f32 %v3133_v0, %v3107_v10  ;;  %v3354_v59 = vld [vmem:[%s8515_s5 + $0x5b8] sm:$0xff]  ;;  %v9219_v38 = vmax.f32 %v9218_v35, 0.0  ;;  %v4210_v21 = vpack.c.bf16 %v3352_v25, %v3348_v4  ;;  %v3353_v10 = vld [vmem:[%s8515_s5 + $0x5b0] sm:$0xff]  ;;  %v3360_v56 = vld [vmem:[%s8515_s5 + $0x5e8] sm:$0xff] }
 0x3fe   :  { %v3358_v0 = vld [vmem:[%s8515_s5 + $0x5d8] sm:$0xff]  ;;  %v4212_v63 = vpack.c.bf16 %v3351_v24, %v3347_v31  ;;  %v4340_v1 = vpack.c.bf16 %v3353_v10, %v3349_v53  ;;  %v3357_v55 = vld [vmem:[%s8515_s5 + $0x5d0] sm:$0xff]  ;;  %v9223_v27 = vmax.f32 %v9222_v42, 0.0  ;;  %v3364_v61 = vld [vmem:[%s8515_s5 + $0x608] sm:$0xff]  ;;  %v3100_v4 = vmul.f32 %v7839_v50, %v9225_v32 }
 0x3ff   :  { %4201 = vmatpush1.bf16.msra.mxu0 %v4200_v60  ;;  %4329 = vmatpush1.bf16.msra.mxu1 %v4328_v45  ;;  %v2025_v51 = vadd.f32 %v2024_v14, %v1988_v36  ;;  %v1990_v2 = vmul.f32 %v7725_v29, %v9219_v38  ;;  %v4338_v29 = vpack.c.bf16 %v3354_v59, %v3350_v47  ;;  %v3359_v14 = vld [vmem:[%s8515_s5 + $0x5e0] sm:$0xff]  ;;  %v9226_v59 = vld [vmem:[#allocation119_spill] sm:$0xff]  ;;  %v9228_v31 = vld [vmem:[#allocation24_spill] sm:$0xff] }
 0x400   :  { %v7940_v12 = vpop.permute.xlu0 %3038  ;;  %v7942_v20 = vpop.permute.xlu1 %2965  ;;  %4203 = vmatprep.subr.bf16.mxu0 %v4202_v26  ;;  %4331 = vmatprep.subr.bf16.mxu1 %v4330_v44  ;;  %v9221_v26 = vmax.f32 %v9220_v8, 0.0  ;;  %v4214_v36 = vpack.c.bf16 %v3360_v56, %v3356_v18  ;;  %v4216_v25 = vpack.c.bf16 %v3359_v14, %v3355_v17  ;;  %v3363_v47 = vld [vmem:[%s8515_s5 + $0x600] sm:$0xff]  ;;  %v9227_v35 = vmax.f32 %v9226_v59, 0.0  ;;  %v3365_v50 = vld [vmem:[%s8515_s5 + $0x610] sm:$0xff]  ;;  %v3372_v56 = vld [vmem:[%s8515_s5 + $0x648] sm:$0xff] }
 0x401   :  { %v2026_v58 = vadd.f32 %v2025_v51, %v1990_v2  ;;  %v9229_v24 = vmax.f32 %v9228_v31, 0.0  ;;  %v3373_v42 = vld [vmem:[%s8515_s5 + $0x650] sm:$0xff]  ;;  %v3380_v48 = vld [vmem:[%s8515_s5 + $0x688] sm:$0xff]  ;;  %v9240_v32 = vld [vmem:[#allocation89_spill] sm:$0xff] }
 0x402   :  { %v1992_v44 = vmul.f32 %v7771_v23, %v9221_v26  ;;  %v3109_v23 = vmul.f32 %v7677_v46, %v9223_v27  ;;  %v3368_v46 = vld [vmem:[%s8515_s5 + $0x628] sm:$0xff]  ;;  %v1994_v38 = vmul.f32 %v7837_v16, %v9227_v35  ;;  %v9234_v27 = vld [vmem:[#allocation68_spill] sm:$0xff] }
 0x403   :  { %4205 = vmatpush1.bf16.msra.mxu0 %v4204_v5  ;;  %4333 = vmatpush1.bf16.msra.mxu1 %v4332_v19  ;;  %v4342_v5 = vpack.c.bf16 %v3362_v39, %v3358_v0  ;;  %v3361_v19 = vld [vmem:[%s8515_s5 + $0x5f0] sm:$0xff]  ;;  %v3102_v16 = vmul.f32 %v7629_v9, %v9229_v24  ;;  %v9232_v39 = vld [vmem:[#allocation32_spill] sm:$0xff]  ;;  %v3376_v9 = vld [vmem:[%s8515_s5 + $0x668] sm:$0xff] }
 0x404   :  { %v7971_v60 = vpop.permute.xlu0 %1947  ;;  %v7973_v45 = vpop.permute.xlu1 %2976  ;;  %4207 = vmatprep.subr.bf16.mxu0 %v4206_v7  ;;  %4335 = vmatprep.subr.bf16.mxu1 %v4334_v15  ;;  %v2027_v40 = vadd.f32 %v2026_v58, %v1992_v44  ;;  %v3366_v7 = vld [vmem:[%s8515_s5 + $0x618] sm:$0xff]  ;;  %v3135_v51 = vadd.f32 %v7920_v13, %v3109_v23  ;;  %v4344_v2 = vpack.c.bf16 %v3361_v19, %v3357_v55  ;;  %v3369_v13 = vld [vmem:[%s8515_s5 + $0x630] sm:$0xff]  ;;  %v9233_v8 = vmax.f32 %v9232_v39, 0.0  ;;  %v3375_v55 = vld [vmem:[%s8515_s5 + $0x660] sm:$0xff] }
 0x405   :  { %v3370_v15 = vld [vmem:[%s8515_s5 + $0x638] sm:$0xff]  ;;  %v4348_v14 = vpack.c.bf16 %v3369_v13, %v3365_v50  ;;  %v9235_v23 = vmax.f32 %v9234_v27, 0.0 }
 0x406   :  { %v4346_v58 = vpack.c.bf16 %v3370_v15, %v3366_v7  ;;  %v2028_v0 = vadd.f32 %v2027_v40, %v1994_v38  ;;  %v3104_v26 = vmul.f32 %v7909_v11, %v9233_v8  ;;  %v3378_v44 = vld [vmem:[%s8515_s5 + $0x678] sm:$0xff]  ;;  %v3371_v11 = vld [vmem:[%s8515_s5 + $0x640] sm:$0xff]  ;;  %v3377_v15 = vld [vmem:[%s8515_s5 + $0x670] sm:$0xff] }
 0x407   :  { %4209 = vmatpush1.bf16.msra.mxu0 %v4208_v43  ;;  %4337 = vmatpush1.bf16.msra.mxu1 %v4336_v3  ;;  %v4218_v43 = vpack.c.bf16 %v3368_v46, %v3364_v61  ;;  %v3367_v3 = vld [vmem:[%s8515_s5 + $0x620] sm:$0xff]  ;;  %v9238_v46 = vld [vmem:[#allocation127_spill] sm:$0xff]  ;;  %v9242_v38 = vld [vmem:[#allocation48_spill] sm:$0xff] }
 0x408   :  { %v8008_v33 = vpop.permute.xlu0 %3049  ;;  %v8010_v34 = vpop.permute.xlu1 %2987  ;;  %4211 = vmatprep.subr.bf16.mxu0 %v4210_v21  ;;  %4339 = vmatprep.subr.bf16.mxu1 %v4338_v29  ;;  %v9230_v21 = vld [vmem:[#allocation73_spill] sm:$0xff]  ;;  %v4220_v17 = vpack.c.bf16 %v3367_v3, %v3363_v47  ;;  %v9239_v40 = vmax.f32 %v9238_v46, 0.0  ;;  %v9244_v50 = vld [vmem:[#allocation84_spill] sm:$0xff] }
 0x409   :  { %v9231_v29 = vmax.f32 %v9230_v21, 0.0  ;;  %v9245_v13 = vmax.f32 %v9244_v50, 0.0  ;;  %v4352_v21 = vpack.c.bf16 %v3377_v15, %v3373_v42 }
 0x40a   :  { %v1998_v7 = vmul.f32 %v7971_v60, %v9239_v40 }
 0x40b   :  { %4213 = vmatpush1.bf16.msra.mxu0 %v4212_v63  ;;  %4341 = vmatpush1.bf16.msra.mxu1 %v4340_v1  ;;  %v3111_v53 = vmul.f32 %v7709_v22, %v9231_v29  ;;  %v3374_v22 = vld [vmem:[%s8515_s5 + $0x658] sm:$0xff]  ;;  %v3146_v63 = vadd.f32 %v3102_v16, %v3100_v4  ;;  %v4224_v16 = vpack.c.bf16 %v3375_v55, %v3371_v11 }
 0x40c   :  { %v1959_v10 = vpop.permute.xlu0 %1958  ;;  %v2999_v18 = vpop.permute.xlu1 %2998  ;;  %4215 = vmatprep.subr.bf16.mxu0 %v4214_v36  ;;  %4343 = vmatprep.subr.bf16.mxu1 %v4342_v5  ;;  %v1996_v36 = vmul.f32 %v7907_v30, %v9235_v23  ;;  %v9236_v5 = vld [vmem:[#allocation40_spill] sm:$0xff]  ;;  %v3384_v30 = vld [vmem:[%s8515_s5 + $0x6a8] sm:$0xff]  ;;  %v4350_v47 = vpack.c.bf16 %v3378_v44, %v3374_v22  ;;  %v9248_v44 = vld [vmem:[#allocation133_spill] sm:$0xff] }
 0x40d   :  { %v3136_v1 = vadd.f32 %v3135_v51, %v3111_v53  ;;  %v9237_v19 = vmax.f32 %v9236_v5, 0.0  ;;  %v3147_v35 = vadd.f32 %v3146_v63, %v3104_v26  ;;  %v2000_v31 = vmul.f32 %v1959_v10, %v9245_v13  ;;  %v3379_v53 = vld [vmem:[%s8515_s5 + $0x680] sm:$0xff]  ;;  %v3381_v10 = vld [vmem:[%s8515_s5 + $0x690] sm:$0xff]  ;;  %v3392_v22 = vld [vmem:[%s8515_s5 + $0x6e8] sm:$0xff] }
 0x40e   :  { %v2029_v59 = vadd.f32 %v2028_v0, %v1996_v36  ;;  %v4226_v29 = vpack.c.bf16 %v3384_v30, %v3380_v48  ;;  %v9246_v0 = vld [vmem:[#allocation59_spill] sm:$0xff]  ;;  %v9249_v63 = vmax.f32 %v9248_v44, 0.0  ;;  %v9250_v11 = vld [vmem:[#allocation100_spill] sm:$0xff] }
 0x40f   :  { %v3106_v61 = vmul.f32 %v7942_v20, %v9237_v19  ;;  %4217 = vmatpush1.bf16.msra.mxu0 %v4216_v25  ;;  %4345 = vmatpush1.bf16.msra.mxu1 %v4344_v2  ;;  %v9241_v20 = vmax.f32 %v9240_v32, 0.0  ;;  %v4222_v25 = vpack.c.bf16 %v3376_v9, %v3372_v56  ;;  %v9243_v2 = vmax.f32 %v9242_v38, 0.0  ;;  %v3385_v26 = vld [vmem:[%s8515_s5 + $0x6b0] sm:$0xff]  ;;  %v3388_v9 = vld [vmem:[%s8515_s5 + $0x6c8] sm:$0xff]  ;;  %v9258_v38 = vld [vmem:[#allocation108_spill] sm:$0xff] }
 0x410   :  { %v8097_v51 = vpop.permute.xlu0 %3060  ;;  %v3010_v60 = vpop.permute.xlu1 %3009  ;;  %4219 = vmatprep.subr.bf16.mxu0 %v4218_v43  ;;  %4347 = vmatprep.subr.bf16.mxu1 %v4346_v58  ;;  %v3386_v43 = vld [vmem:[%s8515_s5 + $0x6b8] sm:$0xff]  ;;  %v2030_v56 = vadd.f32 %v2029_v59, %v1998_v7  ;;  %v9247_v39 = vmax.f32 %v9246_v0, 0.0  ;;  %v9252_v36 = vld [vmem:[#allocation75_spill] sm:$0xff]  ;;  %v4356_v48 = vpack.c.bf16 %v3385_v26, %v3381_v10  ;;  %v4230_v30 = vpack.c.bf16 %v3392_v22, %v3388_v9  ;;  %v3391_v59 = vld [vmem:[%s8515_s5 + $0x6e0] sm:$0xff] }
 0x411   :  { %v3113_v4 = vmul.f32 %v7743_v49, %v9241_v20  ;;  %v3108_v3 = vmul.f32 %v7973_v45, %v9243_v2  ;;  %v3382_v49 = vld [vmem:[%s8515_s5 + $0x698] sm:$0xff]  ;;  %v3383_v45 = vld [vmem:[%s8515_s5 + $0x6a0] sm:$0xff]  ;;  %v3148_v58 = vadd.f32 %v3147_v35, %v3106_v61  ;;  %v9253_v5 = vmax.f32 %v9252_v36, 0.0  ;;  %v9254_v61 = vld [vmem:[#allocation135_spill] sm:$0xff] }
 0x412   :  { %v3110_v8 = vmul.f32 %v8010_v34, %v9247_v39  ;;  %v9251_v34 = vmax.f32 %v9250_v11, 0.0  ;;  %v4354_v42 = vpack.c.bf16 %v3386_v43, %v3382_v49  ;;  %v2031_v23 = vadd.f32 %v2030_v56, %v2000_v31  ;;  %v9256_v20 = vld [vmem:[#allocation91_spill] sm:$0xff]  ;;  %v9262_v56 = vld [vmem:[#allocation109_spill] sm:$0xff] }
 0x413   :  { %v3137_v24 = vadd.f32 %v3136_v1, %v3113_v4  ;;  %4221 = vmatpush1.bf16.msra.mxu0 %v4220_v17  ;;  %4349 = vmatpush1.bf16.msra.mxu1 %v4348_v14  ;;  %v1438_v1 = vmul.f32 %v7679_v37, %v9249_v63  ;;  %v3149_v27 = vadd.f32 %v3148_v58, %v3108_v3  ;;  %v9255_v46 = vmax.f32 %v9254_v61, 0.0  ;;  %v3390_v37 = vld [vmem:[%s8515_s5 + $0x6d8] sm:$0xff]  ;;  %v3389_v31 = vld [vmem:[%s8515_s5 + $0x6d0] sm:$0xff]  ;;  %v3395_v26 = vld [vmem:[%s8515_s5 + $0x700] sm:$0xff] }
 0x414   :  { %v3115_v17 = vmul.f32 %v7806_v6, %v9251_v34  ;;  %v1970_v14 = vpop.permute.xlu0 %1969  ;;  %v3021_v55 = vpop.permute.xlu1 %3020  ;;  %4223 = vmatprep.subr.bf16.mxu0 %v4222_v25  ;;  %4351 = vmatprep.subr.bf16.mxu1 %v4350_v47  ;;  %v3112_v19 = vmul.f32 %v2999_v18, %v9253_v5  ;;  %v3394_v6 = vld [vmem:[%s8515_s5 + $0x6f8] sm:$0xff]  ;;  %v4228_v15 = vpack.c.bf16 %v3383_v45, %v3379_v53  ;;  %v9257_v4 = vmax.f32 %v9256_v20, 0.0  ;;  %v3387_v47 = vld [vmem:[%s8515_s5 + $0x6c0] sm:$0xff]  ;;  %v3393_v49 = vld [vmem:[%s8515_s5 + $0x6f0] sm:$0xff] }
 0x415   :  { %v2002_v40 = vmul.f32 %v1970_v14, %v9255_v46  ;;  %v3150_v32 = vadd.f32 %v3149_v27, %v3110_v8  ;;  %v1468_v35 = vadd.f32 %v7637_v62, %v1438_v1  ;;  %v9259_v2 = vmax.f32 %v9258_v38, 0.0  ;;  %v3396_v62 = vld [vmem:[%s8515_s5 + $0x708] sm:$0xff]  ;;  %v3402_v53 = vld [vmem:[%s8515_s5 + $0x738] sm:$0xff]  ;;  %v3399_v9 = vld [vmem:[%s8515_s5 + $0x720] sm:$0xff] }
 0x416   :  { %v3138_v7 = vadd.f32 %v3137_v24, %v3115_v17  ;;  %v3114_v25 = vmul.f32 %v3010_v60, %v9257_v4  ;;  %v4358_v13 = vpack.c.bf16 %v3394_v6, %v3390_v37  ;;  %v4232_v10 = vpack.c.bf16 %v3391_v59, %v3387_v47  ;;  %v9264_v22 = vld [vmem:[#allocation53_spill] sm:$0xff]  ;;  %v3397_v14 = vld [vmem:[%s8515_s5 + $0x710] sm:$0xff]  ;;  %v3408_v5 = vld [vmem:[%s8515_s5 + $0x768] sm:$0xff] }
 0x417   :  { %v2032_v18 = vadd.f32 %v2031_v23, %v2002_v40  ;;  %4225 = vmatpush1.bf16.msra.mxu0 %v4224_v16  ;;  %4353 = vmatpush1.bf16.msra.mxu1 %v4352_v21  ;;  %v3117_v3 = vmul.f32 %v7879_v28, %v9259_v2  ;;  %v3151_v43 = vadd.f32 %v3150_v32, %v3112_v19  ;;  %v9260_v28 = vld [vmem:[#allocation101_spill] sm:$0xff]  ;;  %v3400_v21 = vld [vmem:[%s8515_s5 + $0x728] sm:$0xff]  ;;  %v9263_v0 = vmax.f32 %v9262_v56, 0.0  ;;  %v3406_v19 = vld [vmem:[%s8515_s5 + $0x758] sm:$0xff] }
 0x418   :  { %v8159_v50 = vpop.permute.xlu0 %3071  ;;  %v3032_v60 = vpop.permute.xlu1 %3031  ;;  %4227 = vmatprep.subr.bf16.mxu0 %v4226_v29  ;;  %4355 = vmatprep.subr.bf16.mxu1 %v4354_v42  ;;  %v9261_v24 = vmax.f32 %v9260_v28, 0.0  ;;  %v3398_v29 = vld [vmem:[%s8515_s5 + $0x718] sm:$0xff]  ;;  %v4360_v8 = vpack.c.bf16 %v3393_v49, %v3389_v31  ;;  %v9265_v44 = vmax.f32 %v9264_v22, 0.0  ;;  %v4234_v34 = vpack.c.bf16 %v3400_v21, %v3396_v62  ;;  %v3404_v42 = vld [vmem:[%s8515_s5 + $0x748] sm:$0xff]  ;;  %v3407_v32 = vld [vmem:[%s8515_s5 + $0x760] sm:$0xff] }
 0x419   :  { %3519 = vmatprep.mubr.f32.mxu0 %v2032_v18  ;;  %3673 = vmatprep.mubr.f32.mxu1 %v2032_v18  ;;  %v3139_v45 = vadd.f32 %v3138_v7, %v3117_v3  ;;  %v3152_v58 = vadd.f32 %v3151_v43, %v3114_v25  ;;  %v3118_v39 = vmul.f32 %v3032_v60, %v9263_v0  ;;  %v3410_v61 = vld [vmem:[%s8515_s5 + $0x778] sm:$0xff]  ;;  %v9268_v40 = vld [vmem:[#allocation62_spill] sm:$0xff]  ;;  %v3403_v7 = vld [vmem:[%s8515_s5 + $0x740] sm:$0xff] }
 0x41a   :  { %v3116_v16 = vmul.f32 %v3021_v55, %v9261_v24  ;;  %3520 = vmatmul.mubr.f32.gmra.mrb[66].mxu0 %v1468_v35  ;;  %3674 = vmatmul.mubr.f32.gmra.mrb[66].mxu1 %v1468_v35  ;;  %v3119_v63 = vmul.f32 %v7940_v12, %v9265_v44  ;;  %v4362_v17 = vpack.c.bf16 %v3402_v53, %v3398_v29  ;;  %v3401_v55 = vld [vmem:[%s8515_s5 + $0x730] sm:$0xff]  ;;  %v9269_v37 = vmax.f32 %v9268_v40, 0.0  ;;  %v3412_v59 = vld [vmem:[%s8515_s5 + $0x788] sm:$0xff]  ;;  %v9270_v35 = vld [vmem:[#allocation69_spill] sm:$0xff] }
 0x41b   :  { %4229 = vmatpush1.bf16.msra.mxu0 %v4228_v15  ;;  %4357 = vmatpush1.bf16.msra.mxu1 %v4356_v48  ;;  %v9266_v12 = vld [vmem:[#allocation55_spill] sm:$0xff]  ;;  %v4236_v48 = vpack.c.bf16 %v3399_v9, %v3395_v26  ;;  %v4238_v18 = vpack.c.bf16 %v3408_v5, %v3404_v42  ;;  %v4366_v47 = vpack.c.bf16 %v3410_v61, %v3406_v19  ;;  %v9271_v38 = vmax.f32 %v9270_v35, 0.0  ;;  %v3416_v49 = vld [vmem:[%s8515_s5 + $0x7a8] sm:$0xff]  ;;  %v3414_v62 = vld [vmem:[%s8515_s5 + $0x798] sm:$0xff] }
 0x41c   :  { %v3065_v1 = vpop.permute.xlu0 %3064  ;;  %v3043_v11 = vpop.permute.xlu1 %3042  ;;  %4231 = vmatprep.subr.bf16.mxu0 %v4230_v30  ;;  %4359 = vmatprep.subr.bf16.mxu1 %v4358_v13  ;;  %v3153_v27 = vadd.f32 %v3152_v58, %v3116_v16  ;;  %v9267_v23 = vmax.f32 %v9266_v12, 0.0  ;;  %v3140_v46 = vadd.f32 %v3139_v45, %v3119_v63  ;;  %v3121_v6 = vmul.f32 %v8008_v33, %v9269_v37  ;;  %v3405_v20 = vld [vmem:[%s8515_s5 + $0x750] sm:$0xff]  ;;  %v3418_v43 = vld [vmem:[%s8515_s5 + $0x7b8] sm:$0xff]  ;;  %v3411_v56 = vld [vmem:[%s8515_s5 + $0x780] sm:$0xff] }
 0x41d   :  { %v4364_v30 = vpack.c.bf16 %v3401_v55, %v3397_v14  ;;  %v3409_v33 = vld [vmem:[%s8515_s5 + $0x770] sm:$0xff]  ;;  %v3123_v2 = vmul.f32 %v8097_v51, %v9271_v38  ;;  %v4240_v24 = vpack.c.bf16 %v3407_v32, %v3403_v7  ;;  %v9274_v51 = vld [vmem:[#allocation78_spill] sm:$0xff]  ;;  %v3415_v0 = vld [vmem:[%s8515_s5 + $0x7a0] sm:$0xff]  ;;  %v4242_v26 = vpack.c.bf16 %v3416_v49, %v3412_v59 }
 0x41e   :  { %v3120_v36 = vmul.f32 %v3043_v11, %v9267_v23  ;;  %v3154_v15 = vadd.f32 %v3153_v27, %v3118_v39  ;;  %v9272_v60 = vld [vmem:[#allocation63_spill] sm:$0xff]  ;;  %v3141_v28 = vadd.f32 %v3140_v46, %v3121_v6  ;;  %v4368_v16 = vpack.c.bf16 %v3409_v33, %v3405_v20  ;;  %v3420_v44 = vld [vmem:[%s8515_s5 + $0x7c8] sm:$0xff]  ;;  %v9278_v11 = vld [vmem:[#allocation85_spill] sm:$0xff] }
 0x41f   :  { %4233 = vmatpush1.bf16.msra.mxu0 %v4232_v10  ;;  %4361 = vmatpush1.bf16.msra.mxu1 %v4360_v8  ;;  %v9273_v13 = vmax.f32 %v9272_v60, 0.0  ;;  %v9275_v21 = vmax.f32 %v9274_v51, 0.0  ;;  %v9276_v53 = vld [vmem:[#allocation71_spill] sm:$0xff]  ;;  %v3424_v14 = vld [vmem:[%s8515_s5 + $0x7e8] sm:$0xff]  ;;  %v3422_v55 = vld [vmem:[%s8515_s5 + $0x7d8] sm:$0xff]  ;;  %v4244_v27 = vpack.c.bf16 %v3415_v0, %v3411_v56 }
 0x420   :  { %v3076_v4 = vpop.permute.xlu0 %3075  ;;  %v3054_v25 = vpop.permute.xlu1 %3053  ;;  %4235 = vmatprep.subr.bf16.mxu0 %v4234_v34  ;;  %4363 = vmatprep.subr.bf16.mxu1 %v4362_v17  ;;  %v3155_v3 = vadd.f32 %v3154_v15, %v3120_v36  ;;  %v9277_v45 = vmax.f32 %v9276_v53, 0.0  ;;  %v3413_v9 = vld [vmem:[%s8515_s5 + $0x790] sm:$0xff]  ;;  %v3142_v63 = vadd.f32 %v3141_v28, %v3123_v2  ;;  %v9279_v34 = vmax.f32 %v9278_v11, 0.0  ;;  %v3426_v42 = vld [vmem:[%s8515_s5 + $0x7f8] sm:$0xff]  ;;  %v3419_v61 = vld [vmem:[%s8515_s5 + $0x7c0] sm:$0xff] }
 0x421   :  { %v3122_v31 = vmul.f32 %v3054_v25, %v9273_v13  ;;  %v3125_v29 = vmul.f32 %v8159_v50, %v9275_v21  ;;  %v4370_v50 = vpack.c.bf16 %v3418_v43, %v3414_v62  ;;  %v3417_v22 = vld [vmem:[%s8515_s5 + $0x7b0] sm:$0xff]  ;;  %v3423_v46 = vld [vmem:[%s8515_s5 + $0x7e0] sm:$0xff]  ;;  %v4246_v37 = vpack.c.bf16 %v3424_v14, %v3420_v44  ;;  %v9282_v20 = vld [vmem:[#allocation94_spill] sm:$0xff] }
 0x422   :  { %v3124_v10 = vmul.f32 %v3065_v1, %v9277_v45  ;;  %v9280_v23 = vld [vmem:[#allocation79_spill] sm:$0xff]  ;;  %v4372_v19 = vpack.c.bf16 %v3417_v22, %v3413_v9  ;;  %v4374_v6 = vpack.c.bf16 %v3426_v42, %v3422_v55  ;;  %v9283_v33 = vmax.f32 %v9282_v20, 0.0  ;;  %v3782_v25 = vld [vmem:[%s8516_s7 + $0x88] sm:$0xff]  ;;  %v3765_v43 = vld [vmem:[%s8516_s7] sm:$0xff] }
 0x423   :  { %v3156_v58 = vadd.f32 %v3155_v3, %v3122_v31  ;;  %4237 = vmatpush1.bf16.msra.mxu0 %v4236_v48  ;;  %4365 = vmatpush1.bf16.msra.mxu1 %v4364_v30  ;;  %v3143_v12 = vadd.f32 %v3142_v63, %v3125_v29  ;;  %v9281_v36 = vmax.f32 %v9280_v23, 0.0  ;;  %v3421_v7 = vld [vmem:[%s8515_s5 + $0x7d0] sm:$0xff]  ;;  %v3781_v48 = vld [vmem:[%s8516_s7 + $0x80] sm:$0xff]  ;;  %v4248_v35 = vpack.c.bf16 %v3423_v46, %v3419_v61  ;;  %v3766_v28 = vld [vmem:[%s8516_s7 + $0x8] sm:$0xff] }
 0x424   :  { %v3087_v39 = vpop.permute.xlu0 %3086  ;;  %v3083_v8 = vpop.permute.xlu1 %3082  ;;  %4239 = vmatprep.subr.bf16.mxu0 %v4238_v18  ;;  %4367 = vmatprep.subr.bf16.mxu1 %v4366_v47  ;;  %v3425_v15 = vld [vmem:[%s8515_s5 + $0x7f0] sm:$0xff]  ;;  %v3813_v18 = vld [vmem:[%s8516_s7 + $0x180] sm:$0xff]  ;;  %v3814_v47 = vld [vmem:[%s8516_s7 + $0x188] sm:$0xff]  ;;  %v4378_v49 = vpack.c.bf16 %v3782_v25, %v3781_v48 }
 0x425   :  { %v3157_v1 = vadd.f32 %v3156_v58, %v3124_v10  ;;  %v3127_v17 = vmul.f32 %v3083_v8, %v9279_v34  ;;  %v3126_v5 = vmul.f32 %v3076_v4, %v9281_v36  ;;  %v9284_v38 = vld [vmem:[#allocation87_spill] sm:$0xff]  ;;  %v4376_v13 = vpack.c.bf16 %v3425_v15, %v3421_v7  ;;  %v9286_v51 = vld [vmem:[#allocation136_spill] sm:$0xff]  ;;  %v3798_v58 = vld [vmem:[%s8516_s7 + $0x108] sm:$0xff] }
 0x426   :  { %v9285_v2 = vmax.f32 %v9284_v38, 0.0  ;;  %v4410_v62 = vpack.c.bf16 %v3814_v47, %v3813_v18  ;;  %v9287_v21 = vmax.f32 %v9286_v51, 0.0  ;;  %v9288_v53 = vld [vmem:[#allocation131_spill] sm:$0xff]  ;;  %v3784_v0 = vld [vmem:[%s8516_s7 + $0x98] sm:$0xff]  ;;  %v9290_v34 = vld [vmem:[#allocation134_spill] sm:$0xff] }
 0x427   :  { %4241 = vmatpush1.bf16.msra.mxu0 %v4240_v24  ;;  %4369 = vmatpush1.bf16.msra.mxu1 %v4368_v16  ;;  %v3158_v30 = vadd.f32 %v3157_v1, %v3126_v5  ;;  %v3144_v32 = vadd.f32 %v3143_v12, %v3127_v17  ;;  %v3797_v24 = vld [vmem:[%s8516_s7 + $0x100] sm:$0xff]  ;;  %v9289_v45 = vmax.f32 %v9288_v53, 0.0  ;;  %v3783_v56 = vld [vmem:[%s8516_s7 + $0x90] sm:$0xff]  ;;  %v3816_v8 = vld [vmem:[%s8516_s7 + $0x198] sm:$0xff]  ;;  %v9291_v17 = vmax.f32 %v9290_v34, 0.0 }
 0x428   :  { %v3094_v40 = vpop.permute.xlu1 %3093  ;;  %4243 = vmatprep.subr.bf16.mxu0 %v4242_v26  ;;  %4371 = vmatprep.subr.bf16.mxu1 %v4370_v50  ;;  %v3098_v59 = vpop.permute.xlu0 %3097  ;;  %v3128_v3 = vmul.f32 %v3087_v39, %v9285_v2  ;;  %v3815_v39 = vld [vmem:[%s8516_s7 + $0x190] sm:$0xff]  ;;  %v4380_v50 = vpack.c.bf16 %v3766_v28, %v3765_v43  ;;  %v4412_v9 = vpack.c.bf16 %v3798_v58, %v3797_v24  ;;  %v3768_v63 = vld [vmem:[%s8516_s7 + $0x18] sm:$0xff]  ;;  %v3785_v12 = vld [vmem:[%s8516_s7 + $0xa0] sm:$0xff] }
 0x429   :  { %v3129_v4 = vmul.f32 %v3094_v40, %v9283_v33  ;;  %v3130_v29 = vmul.f32 %v3098_v59, %v9287_v21  ;;  %v4382_v22 = vpack.c.bf16 %v3784_v0, %v3783_v56  ;;  %v3767_v44 = vld [vmem:[%s8516_s7 + $0x10] sm:$0xff]  ;;  %v4414_v55 = vpack.c.bf16 %v3816_v8, %v3815_v39  ;;  %v3817_v23 = vld [vmem:[%s8516_s7 + $0x1a0] sm:$0xff]  ;;  %v3818_v36 = vld [vmem:[%s8516_s7 + $0x1a8] sm:$0xff] }
 0x42a   :  { %v3159_v16 = vadd.f32 %v3158_v30, %v3128_v3  ;;  %v3799_v42 = vld [vmem:[%s8516_s7 + $0x110] sm:$0xff]  ;;  %v3770_v46 = vld [vmem:[%s8516_s7 + $0x28] sm:$0xff]  ;;  %v3788_v48 = vld [vmem:[%s8516_s7 + $0xb8] sm:$0xff] }
 0x42b   :  { %v3145_v60 = vadd.f32 %v3144_v32, %v3129_v4  ;;  %4245 = vmatpush1.bf16.msra.mxu0 %v4244_v27  ;;  %4373 = vmatpush1.bf16.msra.mxu1 %v4372_v19  ;;  %v3800_v27 = vld [vmem:[%s8516_s7 + $0x118] sm:$0xff]  ;;  %v4384_v19 = vpack.c.bf16 %v3768_v63, %v3767_v44  ;;  %v3802_v7 = vld [vmem:[%s8516_s7 + $0x128] sm:$0xff]  ;;  %v3787_v15 = vld [vmem:[%s8516_s7 + $0xb0] sm:$0xff] }
 0x42c   :  { %v2523_v31 = vpop.permute.xlu1 %2522  ;;  %4247 = vmatprep.subr.bf16.mxu0 %v4246_v37  ;;  %4375 = vmatprep.subr.bf16.mxu1 %v4374_v6  ;;  %v3160_v1 = vadd.f32 %v3159_v16, %v3130_v29  ;;  %v4416_v61 = vpack.c.bf16 %v3800_v27, %v3799_v42  ;;  %v4418_v37 = vpack.c.bf16 %v3818_v36, %v3817_v23  ;;  %v3801_v6 = vld [vmem:[%s8516_s7 + $0x120] sm:$0xff]  ;;  %v3819_v30 = vld [vmem:[%s8516_s7 + $0x1b0] sm:$0xff]  ;;  %v3820_v32 = vld [vmem:[%s8516_s7 + $0x1b8] sm:$0xff] }
 0x42d   :  { %v2564_v10 = vmul.f32 %v2523_v31, %v9289_v45  ;;  %3590 = vmatprep.mubr.f32.mxu0 %v3145_v60  ;;  %3744 = vmatprep.mubr.f32.mxu1 %v3145_v60  ;;  %v4420_v33 = vpack.c.bf16 %v3802_v7, %v3801_v6  ;;  %v3771_v4 = vld [vmem:[%s8516_s7 + $0x30] sm:$0xff]  ;;  %v3772_v25 = vld [vmem:[%s8516_s7 + $0x38] sm:$0xff]  ;;  %v4390_v18 = vpack.c.bf16 %v3788_v48, %v3787_v15  ;;  %v3789_v38 = vld [vmem:[%s8516_s7 + $0xc0] sm:$0xff] }
 0x42e   :  { %v4422_v47 = vpack.c.bf16 %v3820_v32, %v3819_v30  ;;  %v3803_v59 = vld [vmem:[%s8516_s7 + $0x130] sm:$0xff]  ;;  %v3790_v2 = vld [vmem:[%s8516_s7 + $0xc8] sm:$0xff]  ;;  %v3821_v3 = vld [vmem:[%s8516_s7 + $0x1c0] sm:$0xff] }
 0x42f   :  { %4249 = vmatpush1.bf16.msra.mxu0 %v4248_v35  ;;  %4377 = vmatpush1.bf16.msra.mxu1 %v4376_v13  ;;  %v2595_v11 = vadd.f32 %v7576_v41, %v2564_v10  ;;  %v3786_v41 = vld [vmem:[%s8516_s7 + $0xa8] sm:$0xff]  ;;  %v3804_v35 = vld [vmem:[%s8516_s7 + $0x138] sm:$0xff]  ;;  %v4392_v13 = vpack.c.bf16 %v3772_v25, %v3771_v4  ;;  %v4394_v43 = vpack.c.bf16 %v3790_v2, %v3789_v38  ;;  %v3805_v24 = vld [vmem:[%s8516_s7 + $0x140] sm:$0xff] }
 0x430   :  { %v2534_v26 = vpop.permute.xlu1 %2533  ;;  %4379 = vmatprep.subr.bf16.mxu0 %v4378_v49  ;;  %4411 = vmatprep.subr.bf16.mxu1 %v4410_v62  ;;  %v4386_v40 = vpack.c.bf16 %v3786_v41, %v3785_v12  ;;  %v3822_v60 = vld [vmem:[%s8516_s7 + $0x1c8] sm:$0xff]  ;;  %v4424_v31 = vpack.c.bf16 %v3804_v35, %v3803_v59  ;;  %v3773_v49 = vld [vmem:[%s8516_s7 + $0x40] sm:$0xff]  ;;  %v3791_v51 = vld [vmem:[%s8516_s7 + $0xd0] sm:$0xff] }
 0x431   :  { %v2566_v14 = vmul.f32 %v2534_v26, %v9291_v17  ;;  %v3774_v62 = vld [vmem:[%s8516_s7 + $0x48] sm:$0xff]  ;;  %v4426_v28 = vpack.c.bf16 %v3822_v60, %v3821_v3  ;;  %v3792_v21 = vld [vmem:[%s8516_s7 + $0xd8] sm:$0xff]  ;;  %v3823_v29 = vld [vmem:[%s8516_s7 + $0x1d0] sm:$0xff] }
 0x432   :  { %3591 = vmatmul.mubr.f32.vlgmr.msra.gmra.mrb[64].mxu0 %v7738_v57  ;;  %3745 = vmatmul.mubr.f32.vlgmr.msra.gmra.mrb[64].mxu1 %v7738_v57  ;;  %v3769_v57 = vld [vmem:[%s8516_s7 + $0x20] sm:$0xff]  ;;  %v3806_v16 = vld [vmem:[%s8516_s7 + $0x148] sm:$0xff]  ;;  %v3824_v53 = vld [vmem:[%s8516_s7 + $0x1d8] sm:$0xff]  ;;  %v4396_v45 = vpack.c.bf16 %v3774_v62, %v3773_v49  ;;  %v4398_v0 = vpack.c.bf16 %v3792_v21, %v3791_v51 }
 0x433   :  { %v2596_v5 = vadd.f32 %v2595_v11, %v2566_v14  ;;  %3596 = vmatprep.mubr.f32.mxu0 %v3160_v1  ;;  %3750 = vmatprep.mubr.f32.mxu1 %v3160_v1  ;;  %v4388_v20 = vpack.c.bf16 %v3770_v46, %v3769_v57  ;;  %v4428_v10 = vpack.c.bf16 %v3806_v16, %v3805_v24  ;;  %v3775_v58 = vld [vmem:[%s8516_s7 + $0x50] sm:$0xff]  ;;  %v3776_v56 = vld [vmem:[%s8516_s7 + $0x58] sm:$0xff]  ;;  %v3826_v44 = vld [vmem:[%s8516_s7 + $0x1e8] sm:$0xff] }
 0x434   :  { %4381 = vmatpush3.bf16.msra.mxu0 %v4380_v50  ;;  %4413 = vmatpush3.bf16.msra.mxu1 %v4412_v9  ;;  %v4430_v39 = vpack.c.bf16 %v3824_v53, %v3823_v29  ;;  %v3807_v8 = vld [vmem:[%s8516_s7 + $0x150] sm:$0xff]  ;;  %v3808_v26 = vld [vmem:[%s8516_s7 + $0x158] sm:$0xff]  ;;  %v3793_v50 = vld [vmem:[%s8516_s7 + $0xe0] sm:$0xff]  ;;  %v4400_v63 = vpack.c.bf16 %v3776_v56, %v3775_v58 }
 0x435   :  { %4383 = vmatprep.subr.bf16.mxu0 %v4382_v22  ;;  %4415 = vmatprep.subr.bf16.mxu1 %v4414_v55  ;;  %v3794_v9 = vld [vmem:[%s8516_s7 + $0xe8] sm:$0xff]  ;;  %v3825_v22 = vld [vmem:[%s8516_s7 + $0x1e0] sm:$0xff]  ;;  %v4432_v1 = vpack.c.bf16 %v3808_v26, %v3807_v8  ;;  %v3795_v12 = vld [vmem:[%s8516_s7 + $0xf0] sm:$0xff] }
 0x436   :  { %3597 = vmatmul.mubr.f32.gmra.mrb[66].mxu0 %v2596_v5  ;;  %3751 = vmatmul.mubr.f32.gmra.mrb[66].mxu1 %v2596_v5  ;;  %v4402_v11 = vpack.c.bf16 %v3794_v9, %v3793_v50  ;;  %v4434_v34 = vpack.c.bf16 %v3826_v44, %v3825_v22  ;;  %v3777_v17 = vld [vmem:[%s8516_s7 + $0x60] sm:$0xff]  ;;  %v3778_v14 = vld [vmem:[%s8516_s7 + $0x68] sm:$0xff]  ;;  %v3796_v41 = vld [vmem:[%s8516_s7 + $0xf8] sm:$0xff] }
 0x437   :  { %v3809_v55 = vld [vmem:[%s8516_s7 + $0x160] sm:$0xff]  ;;  %v4404_v42 = vpack.c.bf16 %v3778_v14, %v3777_v17  ;;  %v3810_v27 = vld [vmem:[%s8516_s7 + $0x168] sm:$0xff]  ;;  %v4406_v36 = vpack.c.bf16 %v3796_v41, %v3795_v12  ;;  %v3827_v5 = vld [vmem:[%s8516_s7 + $0x1f0] sm:$0xff] }
 0x438   :  { %4385 = vmatpush3.bf16.msra.mxu0 %v4384_v19  ;;  %4417 = vmatpush3.bf16.msra.mxu1 %v4416_v61  ;;  %v4436_v23 = vpack.c.bf16 %v3810_v27, %v3809_v55  ;;  %v3828_v19 = vld [vmem:[%s8516_s7 + $0x1f8] sm:$0xff]  ;;  %v3779_v57 = vld [vmem:[%s8516_s7 + $0x70] sm:$0xff]  ;;  %v3427_v15 = vld [vmem:[%s8517_s6] sm:$0xf] }
 0x439   :  { %4387 = vmatprep.subr.bf16.mxu0 %v4386_v40  ;;  %4419 = vmatprep.subr.bf16.mxu1 %v4418_v37  ;;  %v4438_v61 = vpack.c.bf16 %v3828_v19, %v3827_v5  ;;  %v3780_v46 = vld [vmem:[%s8516_s7 + $0x78] sm:$0xff]  ;;  %v3811_v40 = vld [vmem:[%s8516_s7 + $0x170] sm:$0xff]  ;;  %v9292_v48 = vld [vmem:[#allocation5_spill] sm:$0xff]  ;;  %v3440_v32 = vrot.slane %v3427_v15, %v9008_v52  ;;  %v3444_v4 = vrot.slane %v3427_v15, %v9009_v54 }
 0x43a   :  { %v4408_v37 = vpack.c.bf16 %v3780_v46, %v3779_v57  ;;  %v3812_v6 = vld [vmem:[%s8516_s7 + $0x178] sm:$0xff]  ;;  %v3432_v30 = vrot.slane %v3427_v15, %v9292_v48  ;;  %v4045_v56 = vld [vmem:[%s8518_s8] ss:$0 sm:$0xff] }
 0x43b   :  { %v4440_v7 = vpack.c.bf16 %v3812_v6, %v3811_v40 }
 0x43c   :  { %4389 = vmatpush3.bf16.msra.mxu0 %v4388_v20  ;;  %4421 = vmatpush3.bf16.msra.mxu1 %v4420_v33  ;;  %v9293_v20 = vld [vmem:[#allocation7_spill] sm:$0xff] }
 0x43d   :  { %4391 = vmatprep.subr.bf16.mxu0 %v4390_v18  ;;  %4423 = vmatprep.subr.bf16.mxu1 %v4422_v47  ;;  %v3436_v33 = vrot.slane %v3427_v15, %v9293_v20 }
 0x440   :  { %4393 = vmatpush3.bf16.msra.mxu0 %v4392_v13  ;;  %4425 = vmatpush3.bf16.msra.mxu1 %v4424_v31 }
 0x441   :  { %4395 = vmatprep.subr.bf16.mxu0 %v4394_v43  ;;  %4427 = vmatprep.subr.bf16.mxu1 %v4426_v28 }
 0x444   :  { %4397 = vmatpush3.bf16.msra.mxu0 %v4396_v45  ;;  %4429 = vmatpush3.bf16.msra.mxu1 %v4428_v10 }
 0x445   :  { %4399 = vmatprep.subr.bf16.mxu0 %v4398_v0  ;;  %4431 = vmatprep.subr.bf16.mxu1 %v4430_v39 }
 0x448   :  { %4401 = vmatpush3.bf16.msra.mxu0 %v4400_v63  ;;  %4433 = vmatpush3.bf16.msra.mxu1 %v4432_v1 }
 0x449   :  { %4403 = vmatprep.subr.bf16.mxu0 %v4402_v11  ;;  %4435 = vmatprep.subr.bf16.mxu1 %v4434_v34 }
 0x44c   :  { %4405 = vmatpush3.bf16.msra.mxu0 %v4404_v42  ;;  %4437 = vmatpush3.bf16.msra.mxu1 %v4436_v23 }
 0x44d   :  { %4407 = vmatprep.subr.bf16.mxu0 %v4406_v36  ;;  %4439 = vmatprep.subr.bf16.mxu1 %v4438_v61 }
 0x450   :  { %4409 = vmatpush3.bf16.msra.mxu0 %v4408_v37  ;;  %4441 = vmatpush3.bf16.msra.mxu1 %v4440_v7 }
 0x505   :  { %v3592_v25 = vpop.f32.mrb[64].mxu0  ;;  %v3746_v18 = vpop.f32.mrb[64].mxu1 }
 0x506   :  { %v4442_v47 = vadd.f32 %v3592_v25, %v3432_v30  ;;  %v4446_v59 = vadd.f32 %v3746_v18, %v3440_v32  ;;  %v3594_v35 = vpop.f32.mrb[65].mxu0  ;;  %v3748_v38 = vpop.f32.mrb[65].mxu1 }
 0x507   :  { %v4443_v2 = vadd.f32 %v3594_v35, %v3436_v33  ;;  %v4447_v3 = vadd.f32 %v3748_v38, %v3444_v4 }
 0x508   :  { %v3757_v62 = vmax.f32 %v4442_v47, 0.0  ;;  %v3759_v43 = vmax.f32 %v4446_v59, 0.0 }
 0x509   :  { %v3758_v60 = vmax.f32 %v4443_v2, 0.0  ;;  %v3760_v13 = vmax.f32 %v4447_v3, 0.0  ;;  %v3598_v31 = vpop.f32.mrb[66].mxu0  ;;  %v3752_v49 = vpop.f32.mrb[66].mxu1 }
 0x50a   :  { %v4444_v28 = vadd.f32 %v3598_v31, %v3432_v30  ;;  %v4448_v52 = vadd.f32 %v3752_v49, %v3440_v32  ;;  %v3600_v24 = vpop.f32.mrb[67].mxu0  ;;  %v3754_v16 = vpop.f32.mrb[67].mxu1 }
 0x50b   :  { %v4445_v51 = vadd.f32 %v3600_v24, %v3436_v33  ;;  %v4449_v54 = vadd.f32 %v3754_v16, %v3444_v4  ;;  %3900 = vmatprep.mubr.f32.mxu0 %v3758_v60  ;;  %3975 = vmatprep.mubr.f32.mxu1 %v3760_v13 }
 0x50c   :  { %3901 = vmatmul.mubr.f32.vlgmr.msra.gmra.mrb[68].mxu0 %v3757_v62  ;;  %3976 = vmatmul.mubr.f32.vlgmr.msra.gmra.mrb[68].mxu1 %v3759_v43  ;;  %v3761_v53 = vmax.f32 %v4444_v28, 0.0  ;;  %v3763_v45 = vmax.f32 %v4448_v52, 0.0 }
 0x50d   :  { %v3762_v21 = vmax.f32 %v4445_v51, 0.0  ;;  %v3764_v29 = vmax.f32 %v4449_v54, 0.0 }
 0x50f   :  { %3905 = vmatprep.mubr.f32.mxu0 %v3762_v21  ;;  %3980 = vmatprep.mubr.f32.mxu1 %v3764_v29 }
 0x510   :  { %3906 = vmatmul.mubr.f32.gmra.mrb[70].mxu0 %v3761_v53  ;;  %3981 = vmatmul.mubr.f32.gmra.mrb[70].mxu1 %v3763_v45 }
 0x5df   :  { %v4078_v10 = vpop.f32.mrb[68].mxu0  ;;  %v4116_v58 = vpop.f32.mrb[68].mxu1 }
 0x5e0   :  { %v4079_v0 = vpop.f32.mrb[69].mxu0  ;;  %v4117_v39 = vpop.f32.mrb[69].mxu1 }
 0x5e1   :  { %v4080_v8 = vadd.f32 %v4079_v0, %v4078_v10  ;;  %v4118_v26 = vadd.f32 %v4117_v39, %v4116_v58 }
 0x5e3   :  { %v3903_v50 = vadd.f32 %v4080_v8, %v4045_v56  ;;  %v4081_v9 = vpop.f32.mrb[70].mxu0  ;;  %v4119_v22 = vpop.f32.mrb[70].mxu1 }
 0x5e4   :  { %v4082_v44 = vpop.f32.mrb[71].mxu0  ;;  %v4120_v63 = vpop.f32.mrb[71].mxu1 }
 0x5e5   :  { %v3978_v1 = vadd.f32 %v4118_v26, %v3903_v50  ;;  %v4083_v11 = vadd.f32 %v4082_v44, %v4081_v9  ;;  %v4121_v34 = vadd.f32 %v4120_v63, %v4119_v22 }
 0x5e7   :  { %3987 = vst.msk [vmem:[%s8519_s9] sm:$0xff] %vm3986_vm11, %v3978_v1  ;;  %v3908_v17 = vadd.f32 %v4083_v11, %v4045_v56 }
 0x5e9   :  { %v3983_v14 = vadd.f32 %v4121_v34, %v3908_v17 }
 0x5eb   :  { %3988 = vst.msk [vmem:[%s8519_s9 + $0x8] sm:$0xff] %vm3986_vm11, %v3983_v14 }

</bundles_post_ra>
